<compile_context>
chip_gen: v6e
topology: v6e:2x2x1
jax: 0.10.0
libtpu: 0.0.40
codegen_flags: <defaults>
</compile_context>

<pallas_src>
import functools

import jax
import jax.numpy as jnp
from jax import lax
from jax.experimental import pallas as pl
from jax.experimental.pallas import tpu as pltpu

C_PAD = 128              # channel / hidden / class axes padded to a full lane tile
TILE_M = 128             # pooled output positions per conv grid step
TILE_B = 16              # batch rows per fc grid step
VMEM_LIMIT = 32 * 1024 * 1024


# ----------------------------- Pallas kernels ------------------------------

def _conv_if_pool_kernel(p_ref, w_ref, o_ref, *, v_threshold, use_mxu):
    """Fused 3x3 conv + IF spike + 2x2 max-pool.

    p_ref: [4, TM, K]   im2col patches, one slab per pooling phase
    w_ref: [K, 128]     conv weights, Cout zero-padded to 128 lanes
    o_ref: [TM, 128]    pooled spikes (exact 0/1), lane-dense store
    """
    w = w_ref[...]
    pooled = None
    for ph in range(4):                                     # static: 4 pool phases
        pat = p_ref[ph]                                     # [TM, K]
        if use_mxu:
            acc = jnp.dot(pat, w, preferred_element_type=jnp.float32)
        else:
            # K is tiny (9): outer-product FMAs on the VPU, dense on both the
            # sublane (TM) and lane (128) axes; avoids a degenerate MXU matmul.
            acc = None
            for t in range(pat.shape[-1]):
                term = (pat[:, t:t + 1].astype(jnp.float32)
                        * w[t:t + 1, :].astype(jnp.float32))
                acc = term if acc is None else acc + term
        spikes = (acc >= v_threshold).astype(jnp.float32)   # IF, single step, v0=0
        pooled = spikes if pooled is None else jnp.maximum(pooled, spikes)
    o_ref[...] = pooled.astype(o_ref.dtype)


def _fc_lif_softmax_kernel(x_ref, w1_ref, w2_ref, o_ref, *,
                           T, tau, v_threshold, v_reset, n_classes):
    """T-step Linear->LIF->Linear->LIF with spike counting + masked softmax.

    x_ref:  [TB, F]     conv spikes (bf16, exact 0/1), F = 49*128
    w1_ref: [F, 128]    fc1 weights (hidden padded 100->128), bf16
    w2_ref: [128, 128]  fc2 weights (classes padded 10->128), bf16
    o_ref:  [TB, 128]   softmax probabilities in the first `n_classes` lanes
    """
    inv_tau = 1.0 / tau
    leak = 1.0 - inv_tau
    bias = v_reset * inv_tau

    def _reset(v, spk):
        if v_reset == 0.0:
            return v * (1.0 - spk)
        return spk * v_reset + (1.0 - spk) * v

    x = x_ref[...]
    w2 = w2_ref[...]
    # Linear1(x) is identical every timestep -> hoist it, and fold the LIF
    # charge constants (no divide / subtract in the hot loop).
    h1 = jnp.dot(x, w1_ref[...], preferred_element_type=jnp.float32)
    drive1 = h1 * inv_tau + bias

    tb = x.shape[0]
    hdim = w1_ref.shape[1]
    cdim = w2_ref.shape[1]
    v1 = jnp.zeros((tb, hdim), jnp.float32)
    v2 = jnp.zeros((tb, cdim), jnp.float32)
    counter = jnp.zeros((tb, cdim), jnp.float32)

    for _ in range(T):                                      # T is a small static int
        v1 = v1 * leak + drive1
        spk1 = (v1 >= v_threshold).astype(jnp.float32)
        v1 = _reset(v1, spk1)

        h2 = jnp.dot(spk1.astype(w2.dtype), w2, preferred_element_type=jnp.float32)
        v2 = v2 * leak + h2 * inv_tau + bias
        spk2 = (v2 >= v_threshold).astype(jnp.float32)
        v2 = _reset(v2, spk2)

        counter = counter + spk2

    # F.softmax(counter / T) over the real class lanes only (rest are padding).
    z = counter * (1.0 / T)
    lane = lax.broadcasted_iota(jnp.int32, z.shape, 1)
    valid = lane < n_classes
    z = jnp.where(valid, z, -1e30)
    z = z - jnp.max(z, axis=-1, keepdims=True)
    e = jnp.where(valid, jnp.exp(z), 0.0)
    o_ref[...] = e / jnp.sum(e, axis=-1, keepdims=True)


# --------------------------- pallas_call plumbing ---------------------------

def _conv_if_pool(patches, wmat, *, v_threshold, use_mxu, tile_m=TILE_M):
    _, m_pad, k = patches.shape
    n = wmat.shape[1]
    kern = functools.partial(_conv_if_pool_kernel,
                             v_threshold=v_threshold, use_mxu=use_mxu)
    return pl.pallas_call(
        kern,
        out_shape=jax.ShapeDtypeStruct((m_pad, n), jnp.bfloat16),
        grid=(m_pad // tile_m,),
        in_specs=[
            pl.BlockSpec((4, tile_m, k), lambda m: (0, m, 0)),
            pl.BlockSpec((k, n), lambda m: (0, 0)),
        ],
        out_specs=pl.BlockSpec((tile_m, n), lambda m: (m, 0)),
        compiler_params=pltpu.CompilerParams(
            dimension_semantics=("parallel",),   # shards M-tiles across TCs (v7x)
            vmem_limit_bytes=VMEM_LIMIT,
        ),
    )(patches, wmat)


def _fc_lif_softmax(x, w1, w2, *, T, tau, v_threshold, v_reset, n_classes,
                    tile_b=TILE_B):
    b_pad, f = x.shape
    h = w1.shape[1]
    c = w2.shape[1]
    kern = functools.partial(_fc_lif_softmax_kernel, T=T, tau=tau,
                             v_threshold=v_threshold, v_reset=v_reset,
                             n_classes=n_classes)
    return pl.pallas_call(
        kern,
        out_shape=jax.ShapeDtypeStruct((b_pad, c), jnp.float32),
        grid=(b_pad // tile_b,),
        in_specs=[
            pl.BlockSpec((tile_b, f), lambda b: (b, 0)),
            pl.BlockSpec((f, h), lambda b: (0, 0)),
            pl.BlockSpec((h, c), lambda b: (0, 0)),
        ],
        out_specs=pl.BlockSpec((tile_b, c), lambda b: (b, 0)),
        compiler_params=pltpu.CompilerParams(
            dimension_semantics=("parallel",),
            vmem_limit_bytes=VMEM_LIMIT,
        ),
    )(x, w1, w2)


# ------------------------------- glue (JAX) --------------------------------

def _pad_axis_to(x, axis, multiple):
    n = x.shape[axis]
    target = -(-n // multiple) * multiple
    if target == n:
        return x
    pads = [(0, 0)] * x.ndim
    pads[axis] = (0, target - n)
    return jnp.pad(x, pads)


def _pool_phase_patches(x_nhwc):
    """im2col for a 3x3/pad-1 conv, output rows grouped by 2x2 pooling phase.

    x_nhwc: [B, H, W, C] (H, W even) ->
    [4, B*(H//2)*(W//2), 9*C] with
      out[p, b*Ho*Wo + i*Wo + j, (kh*3+kw)*C + c] = xpad[b, 2i+dh+kh, 2j+dw+kw, c]
    so the 2x2 max-pool is just a max over axis 0 downstream.
    """
    # TODO(synk): patch construction still runs in XLA; an in-kernel halo DMA
    # would remove the ~9x im2col HBM expansion flagged for v5e.
    B, H, W, C = x_nhwc.shape
    Ho, Wo = H // 2, W // 2
    xpad = jnp.pad(x_nhwc, ((0, 0), (1, 1), (1, 1), (0, 0)))
    phases = []
    for dh in range(2):
        for dw in range(2):
            taps = []
            for kh in range(3):
                for kw in range(3):
                    h0, w0 = dh + kh, dw + kw
                    taps.append(
                        xpad[:, h0:h0 + 2 * Ho - 1:2, w0:w0 + 2 * Wo - 1:2, :])
            phases.append(
                jnp.concatenate(taps, axis=-1).reshape(B * Ho * Wo, 9 * C))
    return jnp.stack(phases, axis=0)


def _conv_weight_matrix(w, dtype):
    # w: [Cout, Cin, 3, 3] -> [9*Cin, 128], row = (kh*3+kw)*Cin + cin,
    # output channels zero-padded to a full 128-lane tile.
    cout, cin, kh, kw = w.shape
    m = jnp.transpose(w, (2, 3, 1, 0)).reshape(kh * kw * cin, cout)
    return jnp.pad(m, ((0, 0), (0, C_PAD - cout))).astype(dtype)


def _fc1_weight_matrix(wf1, cin, hw):
    # wf1: [hidden, cin*hw] with PyTorch NCHW-flatten feature order c*hw + p.
    # Kernel features are ordered p*128 + c (channel-last, channels padded).
    hidden = wf1.shape[0]
    w = wf1.reshape(hidden, cin, hw)                 # [hid, c, p]
    w = jnp.transpose(w, (2, 1, 0))                  # [p, c, hid]
    w = jnp.pad(w, ((0, 0), (0, C_PAD - cin), (0, C_PAD - hidden)))
    return w.reshape(hw * C_PAD, C_PAD).astype(jnp.bfloat16)


def _fc2_weight_matrix(wf2):
    # wf2: [classes, hidden] -> [128, 128] (hidden rows / class cols zero-padded)
    n_cls, hidden = wf2.shape
    w = jnp.transpose(wf2)
    return jnp.pad(w, ((0, C_PAD - hidden), (0, C_PAD - n_cls))).astype(jnp.bfloat16)


def snn_forward(x, W1, W2, Wf1, Wf2, *, T, tau, v_threshold=1.0, v_reset=0.0):
    """Matches the reference forward: conv block runs once (IF sees a single
    step), fc block runs T times with persistent LIF state, spike counts are
    averaged and softmaxed over the class axis."""
    B = x.shape[0]
    cout1, cout2 = W1.shape[0], W2.shape[0]
    n_classes = Wf2.shape[0]

    # ---- conv1 (1->10) + IF + maxpool2x2, fused (VPU FMAs) ----------------
    x_nhwc = jnp.transpose(x, (0, 2, 3, 1))                      # [B,28,28,1]
    p1 = _pad_axis_to(_pool_phase_patches(x_nhwc), 1, TILE_M)    # [4, M1p, 9]
    s1 = _conv_if_pool(p1, _conv_weight_matrix(W1, jnp.float32),
                       v_threshold=v_threshold, use_mxu=False)   # [M1p,128] bf16
    h1, w1o = x.shape[2] // 2, x.shape[3] // 2                   # 14, 14
    s1 = s1[:B * h1 * w1o].reshape(B, h1, w1o, C_PAD)[..., :cout1]

    # ---- conv2 (10->20) + IF + maxpool2x2, fused (bf16 MXU matmul) --------
    p2 = _pad_axis_to(_pool_phase_patches(s1), 1, TILE_M)        # [4, M2p, 90]
    s2 = _conv_if_pool(p2, _conv_weight_matrix(W2, jnp.bfloat16),
                       v_threshold=v_threshold, use_mxu=True)    # [M2p,128] bf16
    h2, w2o = h1 // 2, w1o // 2                                  # 7, 7
    feat = s2[:B * h2 * w2o].reshape(B, h2 * w2o * C_PAD)        # [B, 6272] bf16

    # ---- fc: (Linear -> LIF -> Linear -> LIF) x T, count, softmax ---------
    w1f = _fc1_weight_matrix(Wf1, cout2, h2 * w2o)               # [6272, 128]
    w2f = _fc2_weight_matrix(Wf2)                                # [128, 128]
    featp = _pad_axis_to(feat, 0, TILE_B)
    out = _fc_lif_softmax(featp, w1f, w2f, T=T, tau=tau,
                          v_threshold=v_threshold, v_reset=v_reset,
                          n_classes=n_classes)
    return out[:B, :n_classes]


# ---------------------------------- main ------------------------------------

if __name__ == "__main__":
    T = 4
    tau = 2.0

    key = jax.random.PRNGKey(0)
    k1, k2, k3, k4, kx = jax.random.split(key, 5)

    # Deterministic synthetic parameters (shapes follow the module __init__,
    # all layers bias-free as in the spec).
    W1 = jax.random.normal(k1, (10, 1, 3, 3), jnp.float32) * (1.0 / 3.0)
    W2 = jax.random.normal(k2, (20, 10, 3, 3), jnp.float32) * (1.0 / jnp.sqrt(90.0))
    Wf1 = jax.random.normal(k3, (100, 20 * 7 * 7), jnp.float32) * (1.0 / jnp.sqrt(980.0))
    Wf2 = jax.random.normal(k4, (10, 100), jnp.float32) * 0.1

    # fc1 expects 20*7*7 features -> the forward implies 1x28x28 inputs (MNIST).
    x = jax.random.normal(kx, (2, 1, 28, 28), jnp.float32)

    fwd = jax.jit(functools.partial(snn_forward, T=T, tau=tau,
                                    v_threshold=1.0, v_reset=0.0))
    out = jax.block_until_ready(fwd(x, W1, W2, Wf1, Wf2))

    assert out.shape == (2, 10)
    assert bool(jnp.all(jnp.isfinite(out)))
    # rows of the class softmax sum to 1
    assert bool(jnp.all(jnp.abs(jnp.sum(out, axis=-1) - 1.0) < 1e-4))
    print("KERNEL_OK")
</pallas_src>

<mosaic_0001>
module attributes {stable_mosaic.version = 11 : i64} {
  func.func @_conv_if_pool_kernel(%arg0: i32, %arg1: memref<4x128x9xf32, #tpu.memory_space<vmem>>, %arg2: memref<9x128xf32, #tpu.memory_space<vmem>>, %arg3: memref<128x128xbf16, #tpu.memory_space<vmem>>) attributes {dimension_semantics = [#tpu.dimension_semantics<parallel>], iteration_bounds = array<i64: 4>, scalar_prefetch = 0 : i64, scratch_operands = 0 : i64, tpu.core_type = #tpu.core_type<tc>, window_params = [{transform_indices = @transform_0, window_bounds = array<i64: 4, 128, 9>}, {pipeline_mode = #tpu.pipeline_mode<synchronous>, transform_indices = @transform_1, window_bounds = array<i64: 9, 128>}, {transform_indices = @transform_2, window_bounds = array<i64: 128, 128>}]} {
    %c0 = arith.constant 0 : index
    %c0_0 = arith.constant 0 : index
    %0 = vector.load %arg2[%c0, %c0_0] : memref<9x128xf32, #tpu.memory_space<vmem>>, vector<9x128xf32>
    %c0_1 = arith.constant 0 : index
    %c0_2 = arith.constant 0 : index
    %c0_3 = arith.constant 0 : index
    %1 = vector.load %arg1[%c0_1, %c0_2, %c0_3] : memref<4x128x9xf32, #tpu.memory_space<vmem>>, vector<1x128x9xf32>
    %2 = vector.shape_cast %1 : vector<1x128x9xf32> to vector<128x9xf32>
    %3 = vector.extract_strided_slice %2 {offsets = [0, 0], sizes = [128, 1], strides = [1, 1]} : vector<128x9xf32> to vector<128x1xf32>
    %4 = vector.extract_strided_slice %0 {offsets = [0, 0], sizes = [1, 128], strides = [1, 1]} : vector<9x128xf32> to vector<1x128xf32>
    %5 = vector.broadcast %3 : vector<128x1xf32> to vector<128x128xf32>
    %6 = vector.broadcast %4 : vector<1x128xf32> to vector<128x128xf32>
    %7 = arith.mulf %5, %6 : vector<128x128xf32>
    %8 = vector.extract_strided_slice %2 {offsets = [0, 1], sizes = [128, 1], strides = [1, 1]} : vector<128x9xf32> to vector<128x1xf32>
    %9 = vector.extract_strided_slice %0 {offsets = [1, 0], sizes = [1, 128], strides = [1, 1]} : vector<9x128xf32> to vector<1x128xf32>
    %10 = vector.broadcast %8 : vector<128x1xf32> to vector<128x128xf32>
    %11 = vector.broadcast %9 : vector<1x128xf32> to vector<128x128xf32>
    %12 = arith.mulf %10, %11 : vector<128x128xf32>
    %13 = arith.addf %7, %12 : vector<128x128xf32>
    %14 = vector.extract_strided_slice %2 {offsets = [0, 2], sizes = [128, 1], strides = [1, 1]} : vector<128x9xf32> to vector<128x1xf32>
    %15 = vector.extract_strided_slice %0 {offsets = [2, 0], sizes = [1, 128], strides = [1, 1]} : vector<9x128xf32> to vector<1x128xf32>
    %16 = vector.broadcast %14 : vector<128x1xf32> to vector<128x128xf32>
    %17 = vector.broadcast %15 : vector<1x128xf32> to vector<128x128xf32>
    %18 = arith.mulf %16, %17 : vector<128x128xf32>
    %19 = arith.addf %13, %18 : vector<128x128xf32>
    %20 = vector.extract_strided_slice %2 {offsets = [0, 3], sizes = [128, 1], strides = [1, 1]} : vector<128x9xf32> to vector<128x1xf32>
    %21 = vector.extract_strided_slice %0 {offsets = [3, 0], sizes = [1, 128], strides = [1, 1]} : vector<9x128xf32> to vector<1x128xf32>
    %22 = vector.broadcast %20 : vector<128x1xf32> to vector<128x128xf32>
    %23 = vector.broadcast %21 : vector<1x128xf32> to vector<128x128xf32>
    %24 = arith.mulf %22, %23 : vector<128x128xf32>
    %25 = arith.addf %19, %24 : vector<128x128xf32>
    %26 = vector.extract_strided_slice %2 {offsets = [0, 4], sizes = [128, 1], strides = [1, 1]} : vector<128x9xf32> to vector<128x1xf32>
    %27 = vector.extract_strided_slice %0 {offsets = [4, 0], sizes = [1, 128], strides = [1, 1]} : vector<9x128xf32> to vector<1x128xf32>
    %28 = vector.broadcast %26 : vector<128x1xf32> to vector<128x128xf32>
    %29 = vector.broadcast %27 : vector<1x128xf32> to vector<128x128xf32>
    %30 = arith.mulf %28, %29 : vector<128x128xf32>
    %31 = arith.addf %25, %30 : vector<128x128xf32>
    %32 = vector.extract_strided_slice %2 {offsets = [0, 5], sizes = [128, 1], strides = [1, 1]} : vector<128x9xf32> to vector<128x1xf32>
    %33 = vector.extract_strided_slice %0 {offsets = [5, 0], sizes = [1, 128], strides = [1, 1]} : vector<9x128xf32> to vector<1x128xf32>
    %34 = vector.broadcast %32 : vector<128x1xf32> to vector<128x128xf32>
    %35 = vector.broadcast %33 : vector<1x128xf32> to vector<128x128xf32>
    %36 = arith.mulf %34, %35 : vector<128x128xf32>
    %37 = arith.addf %31, %36 : vector<128x128xf32>
    %38 = vector.extract_strided_slice %2 {offsets = [0, 6], sizes = [128, 1], strides = [1, 1]} : vector<128x9xf32> to vector<128x1xf32>
    %39 = vector.extract_strided_slice %0 {offsets = [6, 0], sizes = [1, 128], strides = [1, 1]} : vector<9x128xf32> to vector<1x128xf32>
    %40 = vector.broadcast %38 : vector<128x1xf32> to vector<128x128xf32>
    %41 = vector.broadcast %39 : vector<1x128xf32> to vector<128x128xf32>
    %42 = arith.mulf %40, %41 : vector<128x128xf32>
    %43 = arith.addf %37, %42 : vector<128x128xf32>
    %44 = vector.extract_strided_slice %2 {offsets = [0, 7], sizes = [128, 1], strides = [1, 1]} : vector<128x9xf32> to vector<128x1xf32>
    %45 = vector.extract_strided_slice %0 {offsets = [7, 0], sizes = [1, 128], strides = [1, 1]} : vector<9x128xf32> to vector<1x128xf32>
    %46 = vector.broadcast %44 : vector<128x1xf32> to vector<128x128xf32>
    %47 = vector.broadcast %45 : vector<1x128xf32> to vector<128x128xf32>
    %48 = arith.mulf %46, %47 : vector<128x128xf32>
    %49 = arith.addf %43, %48 : vector<128x128xf32>
    %50 = vector.extract_strided_slice %2 {offsets = [0, 8], sizes = [128, 1], strides = [1, 1]} : vector<128x9xf32> to vector<128x1xf32>
    %51 = vector.extract_strided_slice %0 {offsets = [8, 0], sizes = [1, 128], strides = [1, 1]} : vector<9x128xf32> to vector<1x128xf32>
    %52 = vector.broadcast %50 : vector<128x1xf32> to vector<128x128xf32>
    %53 = vector.broadcast %51 : vector<1x128xf32> to vector<128x128xf32>
    %54 = arith.mulf %52, %53 : vector<128x128xf32>
    %55 = arith.addf %49, %54 : vector<128x128xf32>
    %cst = arith.constant 1.000000e+00 : f32
    %56 = vector.broadcast %cst : f32 to vector<128x128xf32>
    %57 = arith.cmpf oge, %55, %56 : vector<128x128xf32>
    %58 = arith.extui %57 : vector<128x128xi1> to vector<128x128xi32>
    %59 = arith.sitofp %58 : vector<128x128xi32> to vector<128x128xf32>
    %c1 = arith.constant 1 : index
    %c0_4 = arith.constant 0 : index
    %c0_5 = arith.constant 0 : index
    %60 = vector.load %arg1[%c1, %c0_4, %c0_5] : memref<4x128x9xf32, #tpu.memory_space<vmem>>, vector<1x128x9xf32>
    %61 = vector.shape_cast %60 : vector<1x128x9xf32> to vector<128x9xf32>
    %62 = vector.extract_strided_slice %61 {offsets = [0, 0], sizes = [128, 1], strides = [1, 1]} : vector<128x9xf32> to vector<128x1xf32>
    %63 = vector.extract_strided_slice %0 {offsets = [0, 0], sizes = [1, 128], strides = [1, 1]} : vector<9x128xf32> to vector<1x128xf32>
    %64 = vector.broadcast %62 : vector<128x1xf32> to vector<128x128xf32>
    %65 = vector.broadcast %63 : vector<1x128xf32> to vector<128x128xf32>
    %66 = arith.mulf %64, %65 : vector<128x128xf32>
    %67 = vector.extract_strided_slice %61 {offsets = [0, 1], sizes = [128, 1], strides = [1, 1]} : vector<128x9xf32> to vector<128x1xf32>
    %68 = vector.extract_strided_slice %0 {offsets = [1, 0], sizes = [1, 128], strides = [1, 1]} : vector<9x128xf32> to vector<1x128xf32>
    %69 = vector.broadcast %67 : vector<128x1xf32> to vector<128x128xf32>
    %70 = vector.broadcast %68 : vector<1x128xf32> to vector<128x128xf32>
    %71 = arith.mulf %69, %70 : vector<128x128xf32>
    %72 = arith.addf %66, %71 : vector<128x128xf32>
    %73 = vector.extract_strided_slice %61 {offsets = [0, 2], sizes = [128, 1], strides = [1, 1]} : vector<128x9xf32> to vector<128x1xf32>
    %74 = vector.extract_strided_slice %0 {offsets = [2, 0], sizes = [1, 128], strides = [1, 1]} : vector<9x128xf32> to vector<1x128xf32>
    %75 = vector.broadcast %73 : vector<128x1xf32> to vector<128x128xf32>
    %76 = vector.broadcast %74 : vector<1x128xf32> to vector<128x128xf32>
    %77 = arith.mulf %75, %76 : vector<128x128xf32>
    %78 = arith.addf %72, %77 : vector<128x128xf32>
    %79 = vector.extract_strided_slice %61 {offsets = [0, 3], sizes = [128, 1], strides = [1, 1]} : vector<128x9xf32> to vector<128x1xf32>
    %80 = vector.extract_strided_slice %0 {offsets = [3, 0], sizes = [1, 128], strides = [1, 1]} : vector<9x128xf32> to vector<1x128xf32>
    %81 = vector.broadcast %79 : vector<128x1xf32> to vector<128x128xf32>
    %82 = vector.broadcast %80 : vector<1x128xf32> to vector<128x128xf32>
    %83 = arith.mulf %81, %82 : vector<128x128xf32>
    %84 = arith.addf %78, %83 : vector<128x128xf32>
    %85 = vector.extract_strided_slice %61 {offsets = [0, 4], sizes = [128, 1], strides = [1, 1]} : vector<128x9xf32> to vector<128x1xf32>
    %86 = vector.extract_strided_slice %0 {offsets = [4, 0], sizes = [1, 128], strides = [1, 1]} : vector<9x128xf32> to vector<1x128xf32>
    %87 = vector.broadcast %85 : vector<128x1xf32> to vector<128x128xf32>
    %88 = vector.broadcast %86 : vector<1x128xf32> to vector<128x128xf32>
    %89 = arith.mulf %87, %88 : vector<128x128xf32>
    %90 = arith.addf %84, %89 : vector<128x128xf32>
    %91 = vector.extract_strided_slice %61 {offsets = [0, 5], sizes = [128, 1], strides = [1, 1]} : vector<128x9xf32> to vector<128x1xf32>
    %92 = vector.extract_strided_slice %0 {offsets = [5, 0], sizes = [1, 128], strides = [1, 1]} : vector<9x128xf32> to vector<1x128xf32>
    %93 = vector.broadcast %91 : vector<128x1xf32> to vector<128x128xf32>
    %94 = vector.broadcast %92 : vector<1x128xf32> to vector<128x128xf32>
    %95 = arith.mulf %93, %94 : vector<128x128xf32>
    %96 = arith.addf %90, %95 : vector<128x128xf32>
    %97 = vector.extract_strided_slice %61 {offsets = [0, 6], sizes = [128, 1], strides = [1, 1]} : vector<128x9xf32> to vector<128x1xf32>
    %98 = vector.extract_strided_slice %0 {offsets = [6, 0], sizes = [1, 128], strides = [1, 1]} : vector<9x128xf32> to vector<1x128xf32>
    %99 = vector.broadcast %97 : vector<128x1xf32> to vector<128x128xf32>
    %100 = vector.broadcast %98 : vector<1x128xf32> to vector<128x128xf32>
    %101 = arith.mulf %99, %100 : vector<128x128xf32>
    %102 = arith.addf %96, %101 : vector<128x128xf32>
    %103 = vector.extract_strided_slice %61 {offsets = [0, 7], sizes = [128, 1], strides = [1, 1]} : vector<128x9xf32> to vector<128x1xf32>
    %104 = vector.extract_strided_slice %0 {offsets = [7, 0], sizes = [1, 128], strides = [1, 1]} : vector<9x128xf32> to vector<1x128xf32>
    %105 = vector.broadcast %103 : vector<128x1xf32> to vector<128x128xf32>
    %106 = vector.broadcast %104 : vector<1x128xf32> to vector<128x128xf32>
    %107 = arith.mulf %105, %106 : vector<128x128xf32>
    %108 = arith.addf %102, %107 : vector<128x128xf32>
    %109 = vector.extract_strided_slice %61 {offsets = [0, 8], sizes = [128, 1], strides = [1, 1]} : vector<128x9xf32> to vector<128x1xf32>
    %110 = vector.extract_strided_slice %0 {offsets = [8, 0], sizes = [1, 128], strides = [1, 1]} : vector<9x128xf32> to vector<1x128xf32>
    %111 = vector.broadcast %109 : vector<128x1xf32> to vector<128x128xf32>
    %112 = vector.broadcast %110 : vector<1x128xf32> to vector<128x128xf32>
    %113 = arith.mulf %111, %112 : vector<128x128xf32>
    %114 = arith.addf %108, %113 : vector<128x128xf32>
    %cst_6 = arith.constant 1.000000e+00 : f32
    %115 = vector.broadcast %cst_6 : f32 to vector<128x128xf32>
    %116 = arith.cmpf oge, %114, %115 : vector<128x128xf32>
    %117 = arith.extui %116 : vector<128x128xi1> to vector<128x128xi32>
    %118 = arith.sitofp %117 : vector<128x128xi32> to vector<128x128xf32>
    %119 = arith.maximumf %59, %118 : vector<128x128xf32>
    %c2 = arith.constant 2 : index
    %c0_7 = arith.constant 0 : index
    %c0_8 = arith.constant 0 : index
    %120 = vector.load %arg1[%c2, %c0_7, %c0_8] : memref<4x128x9xf32, #tpu.memory_space<vmem>>, vector<1x128x9xf32>
    %121 = vector.shape_cast %120 : vector<1x128x9xf32> to vector<128x9xf32>
    %122 = vector.extract_strided_slice %121 {offsets = [0, 0], sizes = [128, 1], strides = [1, 1]} : vector<128x9xf32> to vector<128x1xf32>
    %123 = vector.extract_strided_slice %0 {offsets = [0, 0], sizes = [1, 128], strides = [1, 1]} : vector<9x128xf32> to vector<1x128xf32>
    %124 = vector.broadcast %122 : vector<128x1xf32> to vector<128x128xf32>
    %125 = vector.broadcast %123 : vector<1x128xf32> to vector<128x128xf32>
    %126 = arith.mulf %124, %125 : vector<128x128xf32>
    %127 = vector.extract_strided_slice %121 {offsets = [0, 1], sizes = [128, 1], strides = [1, 1]} : vector<128x9xf32> to vector<128x1xf32>
    %128 = vector.extract_strided_slice %0 {offsets = [1, 0], sizes = [1, 128], strides = [1, 1]} : vector<9x128xf32> to vector<1x128xf32>
    %129 = vector.broadcast %127 : vector<128x1xf32> to vector<128x128xf32>
    %130 = vector.broadcast %128 : vector<1x128xf32> to vector<128x128xf32>
    %131 = arith.mulf %129, %130 : vector<128x128xf32>
    %132 = arith.addf %126, %131 : vector<128x128xf32>
    %133 = vector.extract_strided_slice %121 {offsets = [0, 2], sizes = [128, 1], strides = [1, 1]} : vector<128x9xf32> to vector<128x1xf32>
    %134 = vector.extract_strided_slice %0 {offsets = [2, 0], sizes = [1, 128], strides = [1, 1]} : vector<9x128xf32> to vector<1x128xf32>
    %135 = vector.broadcast %133 : vector<128x1xf32> to vector<128x128xf32>
    %136 = vector.broadcast %134 : vector<1x128xf32> to vector<128x128xf32>
    %137 = arith.mulf %135, %136 : vector<128x128xf32>
    %138 = arith.addf %132, %137 : vector<128x128xf32>
    %139 = vector.extract_strided_slice %121 {offsets = [0, 3], sizes = [128, 1], strides = [1, 1]} : vector<128x9xf32> to vector<128x1xf32>
    %140 = vector.extract_strided_slice %0 {offsets = [3, 0], sizes = [1, 128], strides = [1, 1]} : vector<9x128xf32> to vector<1x128xf32>
    %141 = vector.broadcast %139 : vector<128x1xf32> to vector<128x128xf32>
    %142 = vector.broadcast %140 : vector<1x128xf32> to vector<128x128xf32>
    %143 = arith.mulf %141, %142 : vector<128x128xf32>
    %144 = arith.addf %138, %143 : vector<128x128xf32>
    %145 = vector.extract_strided_slice %121 {offsets = [0, 4], sizes = [128, 1], strides = [1, 1]} : vector<128x9xf32> to vector<128x1xf32>
    %146 = vector.extract_strided_slice %0 {offsets = [4, 0], sizes = [1, 128], strides = [1, 1]} : vector<9x128xf32> to vector<1x128xf32>
    %147 = vector.broadcast %145 : vector<128x1xf32> to vector<128x128xf32>
    %148 = vector.broadcast %146 : vector<1x128xf32> to vector<128x128xf32>
    %149 = arith.mulf %147, %148 : vector<128x128xf32>
    %150 = arith.addf %144, %149 : vector<128x128xf32>
    %151 = vector.extract_strided_slice %121 {offsets = [0, 5], sizes = [128, 1], strides = [1, 1]} : vector<128x9xf32> to vector<128x1xf32>
    %152 = vector.extract_strided_slice %0 {offsets = [5, 0], sizes = [1, 128], strides = [1, 1]} : vector<9x128xf32> to vector<1x128xf32>
    %153 = vector.broadcast %151 : vector<128x1xf32> to vector<128x128xf32>
    %154 = vector.broadcast %152 : vector<1x128xf32> to vector<128x128xf32>
    %155 = arith.mulf %153, %154 : vector<128x128xf32>
    %156 = arith.addf %150, %155 : vector<128x128xf32>
    %157 = vector.extract_strided_slice %121 {offsets = [0, 6], sizes = [128, 1], strides = [1, 1]} : vector<128x9xf32> to vector<128x1xf32>
    %158 = vector.extract_strided_slice %0 {offsets = [6, 0], sizes = [1, 128], strides = [1, 1]} : vector<9x128xf32> to vector<1x128xf32>
    %159 = vector.broadcast %157 : vector<128x1xf32> to vector<128x128xf32>
    %160 = vector.broadcast %158 : vector<1x128xf32> to vector<128x128xf32>
    %161 = arith.mulf %159, %160 : vector<128x128xf32>
    %162 = arith.addf %156, %161 : vector<128x128xf32>
    %163 = vector.extract_strided_slice %121 {offsets = [0, 7], sizes = [128, 1], strides = [1, 1]} : vector<128x9xf32> to vector<128x1xf32>
    %164 = vector.extract_strided_slice %0 {offsets = [7, 0], sizes = [1, 128], strides = [1, 1]} : vector<9x128xf32> to vector<1x128xf32>
    %165 = vector.broadcast %163 : vector<128x1xf32> to vector<128x128xf32>
    %166 = vector.broadcast %164 : vector<1x128xf32> to vector<128x128xf32>
    %167 = arith.mulf %165, %166 : vector<128x128xf32>
    %168 = arith.addf %162, %167 : vector<128x128xf32>
    %169 = vector.extract_strided_slice %121 {offsets = [0, 8], sizes = [128, 1], strides = [1, 1]} : vector<128x9xf32> to vector<128x1xf32>
    %170 = vector.extract_strided_slice %0 {offsets = [8, 0], sizes = [1, 128], strides = [1, 1]} : vector<9x128xf32> to vector<1x128xf32>
    %171 = vector.broadcast %169 : vector<128x1xf32> to vector<128x128xf32>
    %172 = vector.broadcast %170 : vector<1x128xf32> to vector<128x128xf32>
    %173 = arith.mulf %171, %172 : vector<128x128xf32>
    %174 = arith.addf %168, %173 : vector<128x128xf32>
    %cst_9 = arith.constant 1.000000e+00 : f32
    %175 = vector.broadcast %cst_9 : f32 to vector<128x128xf32>
    %176 = arith.cmpf oge, %174, %175 : vector<128x128xf32>
    %177 = arith.extui %176 : vector<128x128xi1> to vector<128x128xi32>
    %178 = arith.sitofp %177 : vector<128x128xi32> to vector<128x128xf32>
    %179 = arith.maximumf %119, %178 : vector<128x128xf32>
    %c3 = arith.constant 3 : index
    %c0_10 = arith.constant 0 : index
    %c0_11 = arith.constant 0 : index
    %180 = vector.load %arg1[%c3, %c0_10, %c0_11] : memref<4x128x9xf32, #tpu.memory_space<vmem>>, vector<1x128x9xf32>
    %181 = vector.shape_cast %180 : vector<1x128x9xf32> to vector<128x9xf32>
    %182 = vector.extract_strided_slice %181 {offsets = [0, 0], sizes = [128, 1], strides = [1, 1]} : vector<128x9xf32> to vector<128x1xf32>
    %183 = vector.extract_strided_slice %0 {offsets = [0, 0], sizes = [1, 128], strides = [1, 1]} : vector<9x128xf32> to vector<1x128xf32>
    %184 = vector.broadcast %182 : vector<128x1xf32> to vector<128x128xf32>
    %185 = vector.broadcast %183 : vector<1x128xf32> to vector<128x128xf32>
    %186 = arith.mulf %184, %185 : vector<128x128xf32>
    %187 = vector.extract_strided_slice %181 {offsets = [0, 1], sizes = [128, 1], strides = [1, 1]} : vector<128x9xf32> to vector<128x1xf32>
    %188 = vector.extract_strided_slice %0 {offsets = [1, 0], sizes = [1, 128], strides = [1, 1]} : vector<9x128xf32> to vector<1x128xf32>
    %189 = vector.broadcast %187 : vector<128x1xf32> to vector<128x128xf32>
    %190 = vector.broadcast %188 : vector<1x128xf32> to vector<128x128xf32>
    %191 = arith.mulf %189, %190 : vector<128x128xf32>
    %192 = arith.addf %186, %191 : vector<128x128xf32>
    %193 = vector.extract_strided_slice %181 {offsets = [0, 2], sizes = [128, 1], strides = [1, 1]} : vector<128x9xf32> to vector<128x1xf32>
    %194 = vector.extract_strided_slice %0 {offsets = [2, 0], sizes = [1, 128], strides = [1, 1]} : vector<9x128xf32> to vector<1x128xf32>
    %195 = vector.broadcast %193 : vector<128x1xf32> to vector<128x128xf32>
    %196 = vector.broadcast %194 : vector<1x128xf32> to vector<128x128xf32>
    %197 = arith.mulf %195, %196 : vector<128x128xf32>
    %198 = arith.addf %192, %197 : vector<128x128xf32>
    %199 = vector.extract_strided_slice %181 {offsets = [0, 3], sizes = [128, 1], strides = [1, 1]} : vector<128x9xf32> to vector<128x1xf32>
    %200 = vector.extract_strided_slice %0 {offsets = [3, 0], sizes = [1, 128], strides = [1, 1]} : vector<9x128xf32> to vector<1x128xf32>
    %201 = vector.broadcast %199 : vector<128x1xf32> to vector<128x128xf32>
    %202 = vector.broadcast %200 : vector<1x128xf32> to vector<128x128xf32>
    %203 = arith.mulf %201, %202 : vector<128x128xf32>
    %204 = arith.addf %198, %203 : vector<128x128xf32>
    %205 = vector.extract_strided_slice %181 {offsets = [0, 4], sizes = [128, 1], strides = [1, 1]} : vector<128x9xf32> to vector<128x1xf32>
    %206 = vector.extract_strided_slice %0 {offsets = [4, 0], sizes = [1, 128], strides = [1, 1]} : vector<9x128xf32> to vector<1x128xf32>
    %207 = vector.broadcast %205 : vector<128x1xf32> to vector<128x128xf32>
    %208 = vector.broadcast %206 : vector<1x128xf32> to vector<128x128xf32>
    %209 = arith.mulf %207, %208 : vector<128x128xf32>
    %210 = arith.addf %204, %209 : vector<128x128xf32>
    %211 = vector.extract_strided_slice %181 {offsets = [0, 5], sizes = [128, 1], strides = [1, 1]} : vector<128x9xf32> to vector<128x1xf32>
    %212 = vector.extract_strided_slice %0 {offsets = [5, 0], sizes = [1, 128], strides = [1, 1]} : vector<9x128xf32> to vector<1x128xf32>
    %213 = vector.broadcast %211 : vector<128x1xf32> to vector<128x128xf32>
    %214 = vector.broadcast %212 : vector<1x128xf32> to vector<128x128xf32>
    %215 = arith.mulf %213, %214 : vector<128x128xf32>
    %216 = arith.addf %210, %215 : vector<128x128xf32>
    %217 = vector.extract_strided_slice %181 {offsets = [0, 6], sizes = [128, 1], strides = [1, 1]} : vector<128x9xf32> to vector<128x1xf32>
    %218 = vector.extract_strided_slice %0 {offsets = [6, 0], sizes = [1, 128], strides = [1, 1]} : vector<9x128xf32> to vector<1x128xf32>
    %219 = vector.broadcast %217 : vector<128x1xf32> to vector<128x128xf32>
    %220 = vector.broadcast %218 : vector<1x128xf32> to vector<128x128xf32>
    %221 = arith.mulf %219, %220 : vector<128x128xf32>
    %222 = arith.addf %216, %221 : vector<128x128xf32>
    %223 = vector.extract_strided_slice %181 {offsets = [0, 7], sizes = [128, 1], strides = [1, 1]} : vector<128x9xf32> to vector<128x1xf32>
    %224 = vector.extract_strided_slice %0 {offsets = [7, 0], sizes = [1, 128], strides = [1, 1]} : vector<9x128xf32> to vector<1x128xf32>
    %225 = vector.broadcast %223 : vector<128x1xf32> to vector<128x128xf32>
    %226 = vector.broadcast %224 : vector<1x128xf32> to vector<128x128xf32>
    %227 = arith.mulf %225, %226 : vector<128x128xf32>
    %228 = arith.addf %222, %227 : vector<128x128xf32>
    %229 = vector.extract_strided_slice %181 {offsets = [0, 8], sizes = [128, 1], strides = [1, 1]} : vector<128x9xf32> to vector<128x1xf32>
    %230 = vector.extract_strided_slice %0 {offsets = [8, 0], sizes = [1, 128], strides = [1, 1]} : vector<9x128xf32> to vector<1x128xf32>
    %231 = vector.broadcast %229 : vector<128x1xf32> to vector<128x128xf32>
    %232 = vector.broadcast %230 : vector<1x128xf32> to vector<128x128xf32>
    %233 = arith.mulf %231, %232 : vector<128x128xf32>
    %234 = arith.addf %228, %233 : vector<128x128xf32>
    %cst_12 = arith.constant 1.000000e+00 : f32
    %235 = vector.broadcast %cst_12 : f32 to vector<128x128xf32>
    %236 = arith.cmpf oge, %234, %235 : vector<128x128xf32>
    %237 = arith.extui %236 : vector<128x128xi1> to vector<128x128xi32>
    %238 = arith.sitofp %237 : vector<128x128xi32> to vector<128x128xf32>
    %239 = arith.maximumf %179, %238 : vector<128x128xf32>
    %240 = arith.truncf %239 : vector<128x128xf32> to vector<128x128xbf16>
    %c0_13 = arith.constant 0 : index
    %c0_14 = arith.constant 0 : index
    %241 = vector.load %arg3[%c0_13, %c0_14] : memref<128x128xbf16, #tpu.memory_space<vmem>>, vector<128x128xbf16>
    tpu.vector_store %arg3[%c0_13, %c0_14], %240 {strides = array<i32>} : memref<128x128xbf16, #tpu.memory_space<vmem>>, vector<128x128xbf16>,
    return
  }
  func.func @transform_0(%arg0: i32) -> (i32, i32, i32) {
    %c0_i32 = arith.constant 0 : i32
    %c0_i32_0 = arith.constant 0 : i32
    %c0_i32_1 = arith.constant 0 : i32
    return %c0_i32, %arg0, %c0_i32_0 : i32, i32, i32
  }
  func.func @transform_1(%arg0: i32) -> (i32, i32) {
    %c0_i32 = arith.constant 0 : i32
    %c0_i32_0 = arith.constant 0 : i32
    %c0_i32_1 = arith.constant 0 : i32
    return %c0_i32, %c0_i32_0 : i32, i32
  }
  func.func @transform_2(%arg0: i32) -> (i32, i32) {
    %c0_i32 = arith.constant 0 : i32
    %c0_i32_0 = arith.constant 0 : i32
    return %arg0, %c0_i32 : i32, i32
  }
}

module attributes {stable_mosaic.version = 11 : i64} {
  func.func @_conv_if_pool_kernel(%arg0: i32, %arg1: memref<4x128x90xbf16, #tpu.memory_space<vmem>>, %arg2: memref<90x128xbf16, #tpu.memory_space<vmem>>, %arg3: memref<128x128xbf16, #tpu.memory_space<vmem>>) attributes {dimension_semantics = [#tpu.dimension_semantics<parallel>], iteration_bounds = array<i64: 1>, scalar_prefetch = 0 : i64, scratch_operands = 0 : i64, tpu.core_type = #tpu.core_type<tc>, window_params = [{transform_indices = @transform_0, window_bounds = array<i64: 4, 128, 90>}, {pipeline_mode = #tpu.pipeline_mode<synchronous>, transform_indices = @transform_1, window_bounds = array<i64: 90, 128>}, {transform_indices = @transform_2, window_bounds = array<i64: 128, 128>}]} {
    %c0 = arith.constant 0 : index
    %c0_0 = arith.constant 0 : index
    %0 = vector.load %arg2[%c0, %c0_0] : memref<90x128xbf16, #tpu.memory_space<vmem>>, vector<90x128xbf16>
    %c0_1 = arith.constant 0 : index
    %c0_2 = arith.constant 0 : index
    %c0_3 = arith.constant 0 : index
    %1 = vector.load %arg1[%c0_1, %c0_2, %c0_3] : memref<4x128x90xbf16, #tpu.memory_space<vmem>>, vector<1x128x90xbf16>
    %2 = vector.shape_cast %1 : vector<1x128x90xbf16> to vector<128x90xbf16>
    %cst = arith.constant dense<0.000000e+00> : vector<128x128xf32>
    %3 = tpu.matmul %2, %0, %cst {dimension_numbers = #tpu.dot_dimension_numbers<[1], [0], [0], [1], [0, 0, 1, 1], [], []>} : vector<128x90xbf16>, vector<90x128xbf16>, vector<128x128xf32> -> vector<128x128xf32>
    %cst_4 = arith.constant 1.000000e+00 : f32
    %4 = vector.broadcast %cst_4 : f32 to vector<128x128xf32>
    %5 = arith.cmpf oge, %3, %4 : vector<128x128xf32>
    %6 = arith.extui %5 : vector<128x128xi1> to vector<128x128xi32>
    %7 = arith.sitofp %6 : vector<128x128xi32> to vector<128x128xf32>
    %c1 = arith.constant 1 : index
    %c0_5 = arith.constant 0 : index
    %c0_6 = arith.constant 0 : index
    %8 = vector.load %arg1[%c1, %c0_5, %c0_6] : memref<4x128x90xbf16, #tpu.memory_space<vmem>>, vector<1x128x90xbf16>
    %9 = vector.shape_cast %8 : vector<1x128x90xbf16> to vector<128x90xbf16>
    %cst_7 = arith.constant dense<0.000000e+00> : vector<128x128xf32>
    %10 = tpu.matmul %9, %0, %cst_7 {dimension_numbers = #tpu.dot_dimension_numbers<[1], [0], [0], [1], [0, 0, 1, 1], [], []>} : vector<128x90xbf16>, vector<90x128xbf16>, vector<128x128xf32> -> vector<128x128xf32>
    %cst_8 = arith.constant 1.000000e+00 : f32
    %11 = vector.broadcast %cst_8 : f32 to vector<128x128xf32>
    %12 = arith.cmpf oge, %10, %11 : vector<128x128xf32>
    %13 = arith.extui %12 : vector<128x128xi1> to vector<128x128xi32>
    %14 = arith.sitofp %13 : vector<128x128xi32> to vector<128x128xf32>
    %15 = arith.maximumf %7, %14 : vector<128x128xf32>
    %c2 = arith.constant 2 : index
    %c0_9 = arith.constant 0 : index
    %c0_10 = arith.constant 0 : index
    %16 = vector.load %arg1[%c2, %c0_9, %c0_10] : memref<4x128x90xbf16, #tpu.memory_space<vmem>>, vector<1x128x90xbf16>
    %17 = vector.shape_cast %16 : vector<1x128x90xbf16> to vector<128x90xbf16>
    %cst_11 = arith.constant dense<0.000000e+00> : vector<128x128xf32>
    %18 = tpu.matmul %17, %0, %cst_11 {dimension_numbers = #tpu.dot_dimension_numbers<[1], [0], [0], [1], [0, 0, 1, 1], [], []>} : vector<128x90xbf16>, vector<90x128xbf16>, vector<128x128xf32> -> vector<128x128xf32>
    %cst_12 = arith.constant 1.000000e+00 : f32
    %19 = vector.broadcast %cst_12 : f32 to vector<128x128xf32>
    %20 = arith.cmpf oge, %18, %19 : vector<128x128xf32>
    %21 = arith.extui %20 : vector<128x128xi1> to vector<128x128xi32>
    %22 = arith.sitofp %21 : vector<128x128xi32> to vector<128x128xf32>
    %23 = arith.maximumf %15, %22 : vector<128x128xf32>
    %c3 = arith.constant 3 : index
    %c0_13 = arith.constant 0 : index
    %c0_14 = arith.constant 0 : index
    %24 = vector.load %arg1[%c3, %c0_13, %c0_14] : memref<4x128x90xbf16, #tpu.memory_space<vmem>>, vector<1x128x90xbf16>
    %25 = vector.shape_cast %24 : vector<1x128x90xbf16> to vector<128x90xbf16>
    %cst_15 = arith.constant dense<0.000000e+00> : vector<128x128xf32>
    %26 = tpu.matmul %25, %0, %cst_15 {dimension_numbers = #tpu.dot_dimension_numbers<[1], [0], [0], [1], [0, 0, 1, 1], [], []>} : vector<128x90xbf16>, vector<90x128xbf16>, vector<128x128xf32> -> vector<128x128xf32>
    %cst_16 = arith.constant 1.000000e+00 : f32
    %27 = vector.broadcast %cst_16 : f32 to vector<128x128xf32>
    %28 = arith.cmpf oge, %26, %27 : vector<128x128xf32>
    %29 = arith.extui %28 : vector<128x128xi1> to vector<128x128xi32>
    %30 = arith.sitofp %29 : vector<128x128xi32> to vector<128x128xf32>
    %31 = arith.maximumf %23, %30 : vector<128x128xf32>
    %32 = arith.truncf %31 : vector<128x128xf32> to vector<128x128xbf16>
    %c0_17 = arith.constant 0 : index
    %c0_18 = arith.constant 0 : index
    %33 = vector.load %arg3[%c0_17, %c0_18] : memref<128x128xbf16, #tpu.memory_space<vmem>>, vector<128x128xbf16>
    tpu.vector_store %arg3[%c0_17, %c0_18], %32 {strides = array<i32>} : memref<128x128xbf16, #tpu.memory_space<vmem>>, vector<128x128xbf16>,
    return
  }
  func.func @transform_0(%arg0: i32) -> (i32, i32, i32) {
    %c0_i32 = arith.constant 0 : i32
    %c0_i32_0 = arith.constant 0 : i32
    %c0_i32_1 = arith.constant 0 : i32
    return %c0_i32, %arg0, %c0_i32_0 : i32, i32, i32
  }
  func.func @transform_1(%arg0: i32) -> (i32, i32) {
    %c0_i32 = arith.constant 0 : i32
    %c0_i32_0 = arith.constant 0 : i32
    %c0_i32_1 = arith.constant 0 : i32
    return %c0_i32, %c0_i32_0 : i32, i32
  }
  func.func @transform_2(%arg0: i32) -> (i32, i32) {
    %c0_i32 = arith.constant 0 : i32
    %c0_i32_0 = arith.constant 0 : i32
    return %arg0, %c0_i32 : i32, i32
  }
}

module attributes {stable_mosaic.version = 11 : i64} {
  func.func @_fc_lif_softmax_kernel(%arg0: i32, %arg1: memref<16x6272xbf16, #tpu.memory_space<vmem>>, %arg2: memref<6272x128xbf16, #tpu.memory_space<vmem>>, %arg3: memref<128x128xbf16, #tpu.memory_space<vmem>>, %arg4: memref<16x128xf32, #tpu.memory_space<vmem>>) attributes {dimension_semantics = [#tpu.dimension_semantics<parallel>], iteration_bounds = array<i64: 1>, scalar_prefetch = 0 : i64, scratch_operands = 0 : i64, tpu.core_type = #tpu.core_type<tc>, window_params = [{transform_indices = @transform_0, window_bounds = array<i64: 16, 6272>}, {pipeline_mode = #tpu.pipeline_mode<synchronous>, transform_indices = @transform_1, window_bounds = array<i64: 6272, 128>}, {pipeline_mode = #tpu.pipeline_mode<synchronous>, transform_indices = @transform_2, window_bounds = array<i64: 128, 128>}, {transform_indices = @transform_3, window_bounds = array<i64: 16, 128>}]} {
    %c0 = arith.constant 0 : index
    %c0_0 = arith.constant 0 : index
    %0 = vector.load %arg1[%c0, %c0_0] : memref<16x6272xbf16, #tpu.memory_space<vmem>>, vector<16x6272xbf16>
    %c0_1 = arith.constant 0 : index
    %c0_2 = arith.constant 0 : index
    %1 = vector.load %arg3[%c0_1, %c0_2] : memref<128x128xbf16, #tpu.memory_space<vmem>>, vector<128x128xbf16>
    %c0_3 = arith.constant 0 : index
    %c0_4 = arith.constant 0 : index
    %2 = vector.load %arg2[%c0_3, %c0_4] : memref<6272x128xbf16, #tpu.memory_space<vmem>>, vector<6272x128xbf16>
    %cst = arith.constant dense<0.000000e+00> : vector<16x128xf32>
    %3 = tpu.matmul %0, %2, %cst {dimension_numbers = #tpu.dot_dimension_numbers<[1], [0], [0], [1], [0, 0, 1, 1], [], []>} : vector<16x6272xbf16>, vector<6272x128xbf16>, vector<16x128xf32> -> vector<16x128xf32>
    %cst_5 = arith.constant 5.000000e-01 : f32
    %4 = vector.broadcast %cst_5 : f32 to vector<16x128xf32>
    %5 = arith.mulf %3, %4 : vector<16x128xf32>
    %cst_6 = arith.constant 0.000000e+00 : f32
    %6 = vector.broadcast %cst_6 : f32 to vector<16x128xf32>
    %7 = arith.addf %5, %6 : vector<16x128xf32>
    %cst_7 = arith.constant 0.000000e+00 : f32
    %8 = vector.broadcast %cst_7 : f32 to vector<16x128xf32>
    %cst_8 = arith.constant 0.000000e+00 : f32
    %9 = vector.broadcast %cst_8 : f32 to vector<16x128xf32>
    %cst_9 = arith.constant 0.000000e+00 : f32
    %10 = vector.broadcast %cst_9 : f32 to vector<16x128xf32>
    %cst_10 = arith.constant 5.000000e-01 : f32
    %11 = vector.broadcast %cst_10 : f32 to vector<16x128xf32>
    %12 = arith.mulf %8, %11 : vector<16x128xf32>
    %13 = arith.addf %12, %7 : vector<16x128xf32>
    %cst_11 = arith.constant 1.000000e+00 : f32
    %14 = vector.broadcast %cst_11 : f32 to vector<16x128xf32>
    %15 = arith.cmpf oge, %13, %14 : vector<16x128xf32>
    %16 = arith.extui %15 : vector<16x128xi1> to vector<16x128xi32>
    %17 = arith.sitofp %16 : vector<16x128xi32> to vector<16x128xf32>
    %cst_12 = arith.constant 1.000000e+00 : f32
    %18 = vector.broadcast %cst_12 : f32 to vector<16x128xf32>
    %19 = arith.subf %18, %17 : vector<16x128xf32>
    %20 = arith.mulf %13, %19 : vector<16x128xf32>
    %21 = arith.truncf %17 : vector<16x128xf32> to vector<16x128xbf16>
    %cst_13 = arith.constant dense<0.000000e+00> : vector<16x128xf32>
    %22 = tpu.matmul %21, %1, %cst_13 {dimension_numbers = #tpu.dot_dimension_numbers<[1], [0], [0], [1], [0, 0, 1, 1], [], []>} : vector<16x128xbf16>, vector<128x128xbf16>, vector<16x128xf32> -> vector<16x128xf32>
    %cst_14 = arith.constant 5.000000e-01 : f32
    %23 = vector.broadcast %cst_14 : f32 to vector<16x128xf32>
    %24 = arith.mulf %9, %23 : vector<16x128xf32>
    %cst_15 = arith.constant 5.000000e-01 : f32
    %25 = vector.broadcast %cst_15 : f32 to vector<16x128xf32>
    %26 = arith.mulf %22, %25 : vector<16x128xf32>
    %27 = arith.addf %24, %26 : vector<16x128xf32>
    %cst_16 = arith.constant 0.000000e+00 : f32
    %28 = vector.broadcast %cst_16 : f32 to vector<16x128xf32>
    %29 = arith.addf %27, %28 : vector<16x128xf32>
    %cst_17 = arith.constant 1.000000e+00 : f32
    %30 = vector.broadcast %cst_17 : f32 to vector<16x128xf32>
    %31 = arith.cmpf oge, %29, %30 : vector<16x128xf32>
    %32 = arith.extui %31 : vector<16x128xi1> to vector<16x128xi32>
    %33 = arith.sitofp %32 : vector<16x128xi32> to vector<16x128xf32>
    %cst_18 = arith.constant 1.000000e+00 : f32
    %34 = vector.broadcast %cst_18 : f32 to vector<16x128xf32>
    %35 = arith.subf %34, %33 : vector<16x128xf32>
    %36 = arith.mulf %29, %35 : vector<16x128xf32>
    %37 = arith.addf %10, %33 : vector<16x128xf32>
    %cst_19 = arith.constant 5.000000e-01 : f32
    %38 = vector.broadcast %cst_19 : f32 to vector<16x128xf32>
    %39 = arith.mulf %20, %38 : vector<16x128xf32>
    %40 = arith.addf %39, %7 : vector<16x128xf32>
    %cst_20 = arith.constant 1.000000e+00 : f32
    %41 = vector.broadcast %cst_20 : f32 to vector<16x128xf32>
    %42 = arith.cmpf oge, %40, %41 : vector<16x128xf32>
    %43 = arith.extui %42 : vector<16x128xi1> to vector<16x128xi32>
    %44 = arith.sitofp %43 : vector<16x128xi32> to vector<16x128xf32>
    %cst_21 = arith.constant 1.000000e+00 : f32
    %45 = vector.broadcast %cst_21 : f32 to vector<16x128xf32>
    %46 = arith.subf %45, %44 : vector<16x128xf32>
    %47 = arith.mulf %40, %46 : vector<16x128xf32>
    %48 = arith.truncf %44 : vector<16x128xf32> to vector<16x128xbf16>
    %cst_22 = arith.constant dense<0.000000e+00> : vector<16x128xf32>
    %49 = tpu.matmul %48, %1, %cst_22 {dimension_numbers = #tpu.dot_dimension_numbers<[1], [0], [0], [1], [0, 0, 1, 1], [], []>} : vector<16x128xbf16>, vector<128x128xbf16>, vector<16x128xf32> -> vector<16x128xf32>
    %cst_23 = arith.constant 5.000000e-01 : f32
    %50 = vector.broadcast %cst_23 : f32 to vector<16x128xf32>
    %51 = arith.mulf %36, %50 : vector<16x128xf32>
    %cst_24 = arith.constant 5.000000e-01 : f32
    %52 = vector.broadcast %cst_24 : f32 to vector<16x128xf32>
    %53 = arith.mulf %49, %52 : vector<16x128xf32>
    %54 = arith.addf %51, %53 : vector<16x128xf32>
    %cst_25 = arith.constant 0.000000e+00 : f32
    %55 = vector.broadcast %cst_25 : f32 to vector<16x128xf32>
    %56 = arith.addf %54, %55 : vector<16x128xf32>
    %cst_26 = arith.constant 1.000000e+00 : f32
    %57 = vector.broadcast %cst_26 : f32 to vector<16x128xf32>
    %58 = arith.cmpf oge, %56, %57 : vector<16x128xf32>
    %59 = arith.extui %58 : vector<16x128xi1> to vector<16x128xi32>
    %60 = arith.sitofp %59 : vector<16x128xi32> to vector<16x128xf32>
    %cst_27 = arith.constant 1.000000e+00 : f32
    %61 = vector.broadcast %cst_27 : f32 to vector<16x128xf32>
    %62 = arith.subf %61, %60 : vector<16x128xf32>
    %63 = arith.mulf %56, %62 : vector<16x128xf32>
    %64 = arith.addf %37, %60 : vector<16x128xf32>
    %cst_28 = arith.constant 5.000000e-01 : f32
    %65 = vector.broadcast %cst_28 : f32 to vector<16x128xf32>
    %66 = arith.mulf %47, %65 : vector<16x128xf32>
    %67 = arith.addf %66, %7 : vector<16x128xf32>
    %cst_29 = arith.constant 1.000000e+00 : f32
    %68 = vector.broadcast %cst_29 : f32 to vector<16x128xf32>
    %69 = arith.cmpf oge, %67, %68 : vector<16x128xf32>
    %70 = arith.extui %69 : vector<16x128xi1> to vector<16x128xi32>
    %71 = arith.sitofp %70 : vector<16x128xi32> to vector<16x128xf32>
    %cst_30 = arith.constant 1.000000e+00 : f32
    %72 = vector.broadcast %cst_30 : f32 to vector<16x128xf32>
    %73 = arith.subf %72, %71 : vector<16x128xf32>
    %74 = arith.mulf %67, %73 : vector<16x128xf32>
    %75 = arith.truncf %71 : vector<16x128xf32> to vector<16x128xbf16>
    %cst_31 = arith.constant dense<0.000000e+00> : vector<16x128xf32>
    %76 = tpu.matmul %75, %1, %cst_31 {dimension_numbers = #tpu.dot_dimension_numbers<[1], [0], [0], [1], [0, 0, 1, 1], [], []>} : vector<16x128xbf16>, vector<128x128xbf16>, vector<16x128xf32> -> vector<16x128xf32>
    %cst_32 = arith.constant 5.000000e-01 : f32
    %77 = vector.broadcast %cst_32 : f32 to vector<16x128xf32>
    %78 = arith.mulf %63, %77 : vector<16x128xf32>
    %cst_33 = arith.constant 5.000000e-01 : f32
    %79 = vector.broadcast %cst_33 : f32 to vector<16x128xf32>
    %80 = arith.mulf %76, %79 : vector<16x128xf32>
    %81 = arith.addf %78, %80 : vector<16x128xf32>
    %cst_34 = arith.constant 0.000000e+00 : f32
    %82 = vector.broadcast %cst_34 : f32 to vector<16x128xf32>
    %83 = arith.addf %81, %82 : vector<16x128xf32>
    %cst_35 = arith.constant 1.000000e+00 : f32
    %84 = vector.broadcast %cst_35 : f32 to vector<16x128xf32>
    %85 = arith.cmpf oge, %83, %84 : vector<16x128xf32>
    %86 = arith.extui %85 : vector<16x128xi1> to vector<16x128xi32>
    %87 = arith.sitofp %86 : vector<16x128xi32> to vector<16x128xf32>
    %cst_36 = arith.constant 1.000000e+00 : f32
    %88 = vector.broadcast %cst_36 : f32 to vector<16x128xf32>
    %89 = arith.subf %88, %87 : vector<16x128xf32>
    %90 = arith.mulf %83, %89 : vector<16x128xf32>
    %91 = arith.addf %64, %87 : vector<16x128xf32>
    %cst_37 = arith.constant 5.000000e-01 : f32
    %92 = vector.broadcast %cst_37 : f32 to vector<16x128xf32>
    %93 = arith.mulf %74, %92 : vector<16x128xf32>
    %94 = arith.addf %93, %7 : vector<16x128xf32>
    %cst_38 = arith.constant 1.000000e+00 : f32
    %95 = vector.broadcast %cst_38 : f32 to vector<16x128xf32>
    %96 = arith.cmpf oge, %94, %95 : vector<16x128xf32>
    %97 = arith.extui %96 : vector<16x128xi1> to vector<16x128xi32>
    %98 = arith.sitofp %97 : vector<16x128xi32> to vector<16x128xf32>
    %99 = arith.truncf %98 : vector<16x128xf32> to vector<16x128xbf16>
    %cst_39 = arith.constant dense<0.000000e+00> : vector<16x128xf32>
    %100 = tpu.matmul %99, %1, %cst_39 {dimension_numbers = #tpu.dot_dimension_numbers<[1], [0], [0], [1], [0, 0, 1, 1], [], []>} : vector<16x128xbf16>, vector<128x128xbf16>, vector<16x128xf32> -> vector<16x128xf32>
    %cst_40 = arith.constant 5.000000e-01 : f32
    %101 = vector.broadcast %cst_40 : f32 to vector<16x128xf32>
    %102 = arith.mulf %90, %101 : vector<16x128xf32>
    %cst_41 = arith.constant 5.000000e-01 : f32
    %103 = vector.broadcast %cst_41 : f32 to vector<16x128xf32>
    %104 = arith.mulf %100, %103 : vector<16x128xf32>
    %105 = arith.addf %102, %104 : vector<16x128xf32>
    %cst_42 = arith.constant 0.000000e+00 : f32
    %106 = vector.broadcast %cst_42 : f32 to vector<16x128xf32>
    %107 = arith.addf %105, %106 : vector<16x128xf32>
    %cst_43 = arith.constant 1.000000e+00 : f32
    %108 = vector.broadcast %cst_43 : f32 to vector<16x128xf32>
    %109 = arith.cmpf oge, %107, %108 : vector<16x128xf32>
    %110 = arith.extui %109 : vector<16x128xi1> to vector<16x128xi32>
    %111 = arith.sitofp %110 : vector<16x128xi32> to vector<16x128xf32>
    %112 = arith.addf %91, %111 : vector<16x128xf32>
    %cst_44 = arith.constant 2.500000e-01 : f32
    %113 = vector.broadcast %cst_44 : f32 to vector<16x128xf32>
    %114 = arith.mulf %112, %113 : vector<16x128xf32>
    %115 = tpu.iota {dimensions = array<i32: 1>} : vector<16x128xi32>
    %c10_i32 = arith.constant 10 : i32
    %116 = vector.broadcast %c10_i32 : i32 to vector<16x128xi32>
    %117 = arith.cmpi slt, %115, %116 : vector<16x128xi32>
    %cst_45 = arith.constant -1.000000e+30 : f32
    %118 = vector.broadcast %cst_45 : f32 to vector<16x128xf32>
    %119 = arith.select %117, %114, %118 : vector<16x128xi1>, vector<16x128xf32>
    %cst_46 = arith.constant dense<0xFF800000> : vector<16xf32>
    %120 = vector.multi_reduction <maximumf>, %119, %cst_46 [1] : vector<16x128xf32> to vector<16xf32>
    %121 = vector.shape_cast %120 : vector<16xf32> to vector<16x1xf32>
    %122 = vector.broadcast %121 : vector<16x1xf32> to vector<16x128xf32>
    %123 = arith.subf %119, %122 : vector<16x128xf32>
    %124 = math.exp %123 : vector<16x128xf32>
    %cst_47 = arith.constant 0.000000e+00 : f32
    %125 = vector.broadcast %cst_47 : f32 to vector<16x128xf32>
    %126 = arith.select %117, %124, %125 : vector<16x128xi1>, vector<16x128xf32>
    %cst_48 = arith.constant dense<0.000000e+00> : vector<16xf32>
    %127 = vector.multi_reduction <add>, %126, %cst_48 [1] : vector<16x128xf32> to vector<16xf32>
    %128 = vector.shape_cast %127 : vector<16xf32> to vector<16x1xf32>
    %129 = vector.broadcast %128 : vector<16x1xf32> to vector<16x128xf32>
    %130 = arith.divf %126, %129 : vector<16x128xf32>
    %c0_49 = arith.constant 0 : index
    %c0_50 = arith.constant 0 : index
    %131 = vector.load %arg4[%c0_49, %c0_50] : memref<16x128xf32, #tpu.memory_space<vmem>>, vector<16x128xf32>
    tpu.vector_store %arg4[%c0_49, %c0_50], %130 {strides = array<i32>} : memref<16x128xf32, #tpu.memory_space<vmem>>, vector<16x128xf32>,
    return
  }
  func.func @transform_0(%arg0: i32) -> (i32, i32) {
    %c0_i32 = arith.constant 0 : i32
    %c0_i32_0 = arith.constant 0 : i32
    return %arg0, %c0_i32 : i32, i32
  }
  func.func @transform_1(%arg0: i32) -> (i32, i32) {
    %c0_i32 = arith.constant 0 : i32
    %c0_i32_0 = arith.constant 0 : i32
    %c0_i32_1 = arith.constant 0 : i32
    return %c0_i32, %c0_i32_0 : i32, i32
  }
  func.func @transform_2(%arg0: i32) -> (i32, i32) {
    %c0_i32 = arith.constant 0 : i32
    %c0_i32_0 = arith.constant 0 : i32
    %c0_i32_1 = arith.constant 0 : i32
    return %c0_i32, %c0_i32_0 : i32, i32
  }
  func.func @transform_3(%arg0: i32) -> (i32, i32) {
    %c0_i32 = arith.constant 0 : i32
    %c0_i32_0 = arith.constant 0 : i32
    return %arg0, %c0_i32 : i32, i32
  }
}

</mosaic_0001>

<bundles_post_ra>
// kernel: snn_forward.3
= control target key start
LH: loop header
LB: loop body
LE: loop exit
PB: predicated region body
PF: predicated region fallthrough
CT: control target
= control target key end

     0   :  { %s4797_s9 = smov 0   ;;  %s4799_s10 = smov 0   ;;  %s9505_s0 = inlined_call_operand.vmem [shape: f32[4,512,9], index: 0, kind: input, shape index: {}]   ;;  %s9506_s1 = inlined_call_operand.vmem [shape: f32[9,128], index: 1, kind: input, shape index: {}]   ;;  %s9507_s2 = inlined_call_operand.vmem [shape: bf16[512,128], index: 2, kind: output, shape index: {}]  }
   0x1   :  { %s4801_s11 = smov 0  }
   0x2 LB: > { %s4377_s12 = sadd.s32 4294967295, %s4770_s11   ;;  %s4814_s13 = sadd.s32 1, %s4770_s11   ;;  %s4770_s11 = sphi %s4801_s11, %s11069_s11   ;;  %s4766_s10 = sphi %s4799_s10, %s11068_s10   ;;  %s4762_s9 = sphi %s4797_s9, %s11067_s9  }
   0x3   : > { %s16_s14 = ssub.s32 %s4770_s11, %s4814_s13  ;;  %s19_s15 = sadd.s32 1, %s4766_s10 }
   0x4   : > { %p17_p0 = scmp.eq.s32.totalorder %s16_s14, 0  ;;  %p26_p1 = scmp.ne.s32.totalorder %s4766_s10, %s4762_s9 }
   0x5   : > { %p27_p2 = scmp.eq.s32.totalorder %s4770_s11, 0  ;;  %p4380_p4 = scmp.ge.s32.totalorder %s4770_s11, 4 }
   0x6   : > { %s4823_s16 = scalar_select %p17_p0, %s4766_s10, %s19_s15  }
   0x7   : > { %p28_p3 = por %p27_p2, %p26_p1  ;;  %102 = sbr.rel (%p4380_p4) target bundleno = 48 (0x30), region = 20 }
   0xc   : > { %105 = sbr.rel (!%p28_p3) target bundleno = 48 (0x30), region = 24  ;;  %s107_s17 = sand.u32 (%p28_p3), 1, %s4766_s10  }
   0xd   : > { %s4519_s18 = sshll.u32 (%p28_p3), %s4770_s11, 7  ;;  %s4381_s19 = sshll.u32 (%p28_p3), %s107_s17, 9 }
   0xe   : > { %s4831_s22 = scalar_lea.vmem (%p28_p3), %s9505_s0, %s4519_s18  ;;  %s4836_s23 = scalar_lea.vmem (%p28_p3), [#allocation2], %s4381_s19 }
   0xf   : > { %v267_v0 = vld [vmem:[%s4831_s22] sm:$0xff] (%p28_p3)  ;;  %v269_v1 = vld [vmem:[%s4831_s22 + $0x8] sm:$0xff] (%p28_p3)  ;;  %v271_v2 = vld [vmem:[%s4831_s22 + $0x10] sm:$0xff] (%p28_p3) }
  0x10   : > { %268 = vst [vmem:[%s4836_s23] sm:$0xff] (%p28_p3), %v267_v0  ;;  %270 = vst [vmem:[%s4836_s23 + $0x8] sm:$0xff] (%p28_p3), %v269_v1  ;;  %v273_v3 = vld [vmem:[%s4831_s22 + $0x18] sm:$0xff] (%p28_p3)  ;;  %v275_v4 = vld [vmem:[%s4831_s22 + $0x20] sm:$0xff] (%p28_p3) }
  0x11   : > { %272 = vst [vmem:[%s4836_s23 + $0x10] sm:$0xff] %v271_v2  ;;  %v277_v5 = vld [vmem:[%s4831_s22 + $0x28] sm:$0xff]  ;;  %274 = vst [vmem:[%s4836_s23 + $0x18] sm:$0xff] %v273_v3  ;;  %v279_v6 = vld [vmem:[%s4831_s22 + $0x30] sm:$0xff] }
  0x12   : > { %276 = vst [vmem:[%s4836_s23 + $0x20] sm:$0xff] %v275_v4  ;;  %278 = vst [vmem:[%s4836_s23 + $0x28] sm:$0xff] %v277_v5  ;;  %v281_v7 = vld [vmem:[%s4831_s22 + $0x38] sm:$0xff]  ;;  %v283_v8 = vld [vmem:[%s4831_s22 + $0x40] sm:$0xff] }
  0x13   : > { %280 = vst [vmem:[%s4836_s23 + $0x30] sm:$0xff] %v279_v6  ;;  %282 = vst [vmem:[%s4836_s23 + $0x38] sm:$0xff] %v281_v7  ;;  %v285_v9 = vld [vmem:[%s4831_s22 + $0x48] sm:$0xff]  ;;  %v287_v10 = vld [vmem:[%s4831_s22 + $0x50] sm:$0xff] }
  0x14   : > { %284 = vst [vmem:[%s4836_s23 + $0x40] sm:$0xff] %v283_v8  ;;  %v289_v11 = vld [vmem:[%s4831_s22 + $0x58] sm:$0xff]  ;;  %286 = vst [vmem:[%s4836_s23 + $0x48] sm:$0xff] %v285_v9  ;;  %v291_v12 = vld [vmem:[%s4831_s22 + $0x60] sm:$0xff] }
  0x15   : > { %288 = vst [vmem:[%s4836_s23 + $0x50] sm:$0xff] %v287_v10  ;;  %290 = vst [vmem:[%s4836_s23 + $0x58] sm:$0xff] %v289_v11  ;;  %v293_v13 = vld [vmem:[%s4831_s22 + $0x68] sm:$0xff]  ;;  %v295_v14 = vld [vmem:[%s4831_s22 + $0x70] sm:$0xff] }
  0x16   : > { %292 = vst [vmem:[%s4836_s23 + $0x60] sm:$0xff] %v291_v12  ;;  %294 = vst [vmem:[%s4836_s23 + $0x68] sm:$0xff] %v293_v13  ;;  %v297_v15 = vld [vmem:[%s4831_s22 + $0x78] sm:$0xff]  ;;  %v299_v16 = vld [vmem:[%s4831_s22 + $0x200] sm:$0xff] }
  0x17   : > { %296 = vst [vmem:[%s4836_s23 + $0x70] sm:$0xff] %v295_v14  ;;  %v301_v17 = vld [vmem:[%s4831_s22 + $0x208] sm:$0xff]  ;;  %298 = vst [vmem:[%s4836_s23 + $0x78] sm:$0xff] %v297_v15  ;;  %v303_v18 = vld [vmem:[%s4831_s22 + $0x210] sm:$0xff] }
  0x18   : > { %300 = vst [vmem:[%s4836_s23 + $0x80] sm:$0xff] %v299_v16  ;;  %302 = vst [vmem:[%s4836_s23 + $0x88] sm:$0xff] %v301_v17  ;;  %v305_v19 = vld [vmem:[%s4831_s22 + $0x218] sm:$0xff]  ;;  %v307_v20 = vld [vmem:[%s4831_s22 + $0x220] sm:$0xff] }
  0x19   : > { %304 = vst [vmem:[%s4836_s23 + $0x90] sm:$0xff] %v303_v18  ;;  %306 = vst [vmem:[%s4836_s23 + $0x98] sm:$0xff] %v305_v19  ;;  %v309_v21 = vld [vmem:[%s4831_s22 + $0x228] sm:$0xff]  ;;  %v311_v22 = vld [vmem:[%s4831_s22 + $0x230] sm:$0xff] }
  0x1a   : > { %308 = vst [vmem:[%s4836_s23 + $0xa0] sm:$0xff] %v307_v20  ;;  %v313_v23 = vld [vmem:[%s4831_s22 + $0x238] sm:$0xff]  ;;  %310 = vst [vmem:[%s4836_s23 + $0xa8] sm:$0xff] %v309_v21  ;;  %v315_v24 = vld [vmem:[%s4831_s22 + $0x240] sm:$0xff] }
  0x1b   : > { %312 = vst [vmem:[%s4836_s23 + $0xb0] sm:$0xff] %v311_v22  ;;  %314 = vst [vmem:[%s4836_s23 + $0xb8] sm:$0xff] %v313_v23  ;;  %v317_v25 = vld [vmem:[%s4831_s22 + $0x248] sm:$0xff]  ;;  %v319_v26 = vld [vmem:[%s4831_s22 + $0x250] sm:$0xff] }
  0x1c   : > { %316 = vst [vmem:[%s4836_s23 + $0xc0] sm:$0xff] %v315_v24  ;;  %318 = vst [vmem:[%s4836_s23 + $0xc8] sm:$0xff] %v317_v25  ;;  %v321_v27 = vld [vmem:[%s4831_s22 + $0x258] sm:$0xff]  ;;  %v323_v28 = vld [vmem:[%s4831_s22 + $0x260] sm:$0xff] }
  0x1d   : > { %320 = vst [vmem:[%s4836_s23 + $0xd0] sm:$0xff] %v319_v26  ;;  %v325_v29 = vld [vmem:[%s4831_s22 + $0x268] sm:$0xff]  ;;  %322 = vst [vmem:[%s4836_s23 + $0xd8] sm:$0xff] %v321_v27  ;;  %v327_v30 = vld [vmem:[%s4831_s22 + $0x270] sm:$0xff] }
  0x1e   : > { %324 = vst [vmem:[%s4836_s23 + $0xe0] sm:$0xff] %v323_v28  ;;  %326 = vst [vmem:[%s4836_s23 + $0xe8] sm:$0xff] %v325_v29  ;;  %v329_v31 = vld [vmem:[%s4831_s22 + $0x278] sm:$0xff]  ;;  %v331_v32 = vld [vmem:[%s4831_s22 + $0x400] sm:$0xff] }
  0x1f   : > { %328 = vst [vmem:[%s4836_s23 + $0xf0] sm:$0xff] %v327_v30  ;;  %330 = vst [vmem:[%s4836_s23 + $0xf8] sm:$0xff] %v329_v31  ;;  %v333_v33 = vld [vmem:[%s4831_s22 + $0x408] sm:$0xff]  ;;  %v335_v34 = vld [vmem:[%s4831_s22 + $0x410] sm:$0xff] }
  0x20   : > { %332 = vst [vmem:[%s4836_s23 + $0x100] sm:$0xff] %v331_v32  ;;  %v337_v35 = vld [vmem:[%s4831_s22 + $0x418] sm:$0xff]  ;;  %334 = vst [vmem:[%s4836_s23 + $0x108] sm:$0xff] %v333_v33  ;;  %v339_v36 = vld [vmem:[%s4831_s22 + $0x420] sm:$0xff] }
  0x21   : > { %336 = vst [vmem:[%s4836_s23 + $0x110] sm:$0xff] %v335_v34  ;;  %338 = vst [vmem:[%s4836_s23 + $0x118] sm:$0xff] %v337_v35  ;;  %v341_v37 = vld [vmem:[%s4831_s22 + $0x428] sm:$0xff]  ;;  %v343_v38 = vld [vmem:[%s4831_s22 + $0x430] sm:$0xff] }
  0x22   : > { %340 = vst [vmem:[%s4836_s23 + $0x120] sm:$0xff] %v339_v36  ;;  %342 = vst [vmem:[%s4836_s23 + $0x128] sm:$0xff] %v341_v37  ;;  %v345_v39 = vld [vmem:[%s4831_s22 + $0x438] sm:$0xff]  ;;  %v347_v40 = vld [vmem:[%s4831_s22 + $0x440] sm:$0xff] }
  0x23   : > { %344 = vst [vmem:[%s4836_s23 + $0x130] sm:$0xff] %v343_v38  ;;  %v349_v41 = vld [vmem:[%s4831_s22 + $0x448] sm:$0xff]  ;;  %346 = vst [vmem:[%s4836_s23 + $0x138] sm:$0xff] %v345_v39  ;;  %v351_v42 = vld [vmem:[%s4831_s22 + $0x450] sm:$0xff] }
  0x24   : > { %348 = vst [vmem:[%s4836_s23 + $0x140] sm:$0xff] %v347_v40  ;;  %350 = vst [vmem:[%s4836_s23 + $0x148] sm:$0xff] %v349_v41  ;;  %v353_v43 = vld [vmem:[%s4831_s22 + $0x458] sm:$0xff]  ;;  %v355_v44 = vld [vmem:[%s4831_s22 + $0x460] sm:$0xff] }
  0x25   : > { %352 = vst [vmem:[%s4836_s23 + $0x150] sm:$0xff] %v351_v42  ;;  %354 = vst [vmem:[%s4836_s23 + $0x158] sm:$0xff] %v353_v43  ;;  %v357_v45 = vld [vmem:[%s4831_s22 + $0x468] sm:$0xff]  ;;  %v359_v46 = vld [vmem:[%s4831_s22 + $0x470] sm:$0xff] }
  0x26   : > { %356 = vst [vmem:[%s4836_s23 + $0x160] sm:$0xff] %v355_v44  ;;  %v361_v47 = vld [vmem:[%s4831_s22 + $0x478] sm:$0xff]  ;;  %358 = vst [vmem:[%s4836_s23 + $0x168] sm:$0xff] %v357_v45  ;;  %v363_v48 = vld [vmem:[%s4831_s22 + $0x600] sm:$0xff] }
  0x27   : > { %360 = vst [vmem:[%s4836_s23 + $0x170] sm:$0xff] %v359_v46  ;;  %362 = vst [vmem:[%s4836_s23 + $0x178] sm:$0xff] %v361_v47  ;;  %v365_v49 = vld [vmem:[%s4831_s22 + $0x608] sm:$0xff]  ;;  %v367_v50 = vld [vmem:[%s4831_s22 + $0x610] sm:$0xff] }
  0x28   : > { %364 = vst [vmem:[%s4836_s23 + $0x180] sm:$0xff] %v363_v48  ;;  %366 = vst [vmem:[%s4836_s23 + $0x188] sm:$0xff] %v365_v49  ;;  %v369_v51 = vld [vmem:[%s4831_s22 + $0x618] sm:$0xff]  ;;  %v371_v52 = vld [vmem:[%s4831_s22 + $0x620] sm:$0xff] }
  0x29   : > { %368 = vst [vmem:[%s4836_s23 + $0x190] sm:$0xff] %v367_v50  ;;  %v373_v53 = vld [vmem:[%s4831_s22 + $0x628] sm:$0xff]  ;;  %370 = vst [vmem:[%s4836_s23 + $0x198] sm:$0xff] %v369_v51  ;;  %v375_v54 = vld [vmem:[%s4831_s22 + $0x630] sm:$0xff] }
  0x2a   : > { %372 = vst [vmem:[%s4836_s23 + $0x1a0] sm:$0xff] %v371_v52  ;;  %374 = vst [vmem:[%s4836_s23 + $0x1a8] sm:$0xff] %v373_v53  ;;  %v377_v55 = vld [vmem:[%s4831_s22 + $0x638] sm:$0xff]  ;;  %v379_v56 = vld [vmem:[%s4831_s22 + $0x640] sm:$0xff] }
  0x2b   : > { %376 = vst [vmem:[%s4836_s23 + $0x1b0] sm:$0xff] %v375_v54  ;;  %378 = vst [vmem:[%s4836_s23 + $0x1b8] sm:$0xff] %v377_v55  ;;  %v381_v57 = vld [vmem:[%s4831_s22 + $0x648] sm:$0xff]  ;;  %v383_v58 = vld [vmem:[%s4831_s22 + $0x650] sm:$0xff] }
  0x2c   : > { %380 = vst [vmem:[%s4836_s23 + $0x1c0] sm:$0xff] %v379_v56  ;;  %v385_v59 = vld [vmem:[%s4831_s22 + $0x658] sm:$0xff]  ;;  %382 = vst [vmem:[%s4836_s23 + $0x1c8] sm:$0xff] %v381_v57  ;;  %v387_v60 = vld [vmem:[%s4831_s22 + $0x660] sm:$0xff] }
  0x2d   : > { %384 = vst [vmem:[%s4836_s23 + $0x1d0] sm:$0xff] %v383_v58  ;;  %386 = vst [vmem:[%s4836_s23 + $0x1d8] sm:$0xff] %v385_v59  ;;  %v389_v61 = vld [vmem:[%s4831_s22 + $0x668] sm:$0xff]  ;;  %v391_v62 = vld [vmem:[%s4831_s22 + $0x670] sm:$0xff] }
  0x2e   : > { %388 = vst [vmem:[%s4836_s23 + $0x1e0] sm:$0xff] %v387_v60  ;;  %390 = vst [vmem:[%s4836_s23 + $0x1e8] sm:$0xff] %v389_v61  ;;  %v393_v63 = vld [vmem:[%s4831_s22 + $0x678] sm:$0xff] }
  0x2f   : > { %392 = vst [vmem:[%s4836_s23 + $0x1f0] sm:$0xff] %v391_v62  ;;  %394 = vst [vmem:[%s4836_s23 + $0x1f8] sm:$0xff] %v393_v63 }
  0x30 PF: > { %p4384_p5 = scmp.ge.s32.totalorder %s4770_s11, 1  ;;  %p399_p6 = scmp.lt.s32.totalorder %s4770_s11, 5 }
  0x32   : > { %p400_p7 = pnand %p4384_p5, %p399_p6 }
  0x34   : > { %403 = sbr.rel (%p400_p7) target bundleno = 1477 (0x5c5), region = 62 }
  0x39   : > { %s406_s24 = sand.u32 1, %s4762_s9   ;;  %v9514_v0 = vmov 0   ;;  %v9512_v18 = vmov 1   ;;  %v9516_v27 = vmov 2   ;;  %v9510_v38 = vmov 3   ;;  %s9322_s5 = sshll.u32 %s4377_s12, 4 }
  0x3a   : > { %4618 = vset.pattern.permute.xlu1 %v9514_v0  ;;  %4617 = vset.pattern.permute.xlu0 %v9514_v0  ;;  %s4385_s25 = sshll.u32 %s406_s24, 9  ;;  %v9508_v50 = vmov 4   ;;  %p429_p8 = scmp.lt.s32.totalorder %s9322_s5, 63 }
  0x3b   : > { %s4968_s26 = scalar_lea.vmem [#allocation2], %s4385_s25 }
  0x3c   : > { %v4971_v1 = vld [vmem:[%s4968_s26 + $0x10] sm:$0xff]  ;;  %v4974_v2 = vld [vmem:[%s4968_s26] sm:$0xff]  ;;  %v4979_v3 = vld [vmem:[%s4968_s26 + $0x18] sm:$0xff]  ;;  %s11071_s5 = smov (!%p429_p8, %s9322_s5), 63 }
  0x3d   : > { %464 = vperm.xlu1 %4618, %v4971_v1   ;;  %454 = vperm.xlu0 %4617, %v4974_v2   ;;  %v4982_v4 = vld [vmem:[%s4968_s26 + $0x8] sm:$0xff]  ;;  %v4990_v6 = vld [vmem:[%s4968_s26 + $0x20] sm:$0xff]  ;;  %v4995_v7 = vld [vmem:[%s4968_s26 + $0x38] sm:$0xff]  ;;  %s4387_s6 = sshll.u32 %s11071_s5, 2 }
  0x3e   : > { %v4987_v5 = vld [vmem:[%s4968_s26 + $0x28] sm:$0xff]  ;;  %v4998_v8 = vld [vmem:[%s4968_s26 + $0x30] sm:$0xff]  ;;  %v5006_v10 = vld [vmem:[%s4968_s26 + $0x40] sm:$0xff]  ;;  %s9403_s9 = scalar_lea.vmem %s9507_s2, %s4387_s6 }
  0x3f   : > { %v5003_v9 = vld [vmem:[%s4968_s26 + $0x48] sm:$0xff]  ;;  %v5011_v11 = vld [vmem:[%s4968_s26 + $0x58] sm:$0xff]  ;;  %v5014_v12 = vld [vmem:[%s4968_s26 + $0x50] sm:$0xff] }
  0x40   : > { %v5019_v13 = vld [vmem:[%s4968_s26 + $0x68] sm:$0xff]  ;;  %v5022_v14 = vld [vmem:[%s4968_s26 + $0x60] sm:$0xff]  ;;  %v5027_v15 = vld [vmem:[%s4968_s26 + $0x78] sm:$0xff] }
  0x41   : > { %469 = vperm.xlu1 %4618, %v4979_v3   ;;  %459 = vperm.xlu0 %4617, %v4982_v4   ;;  %v5030_v16 = vld [vmem:[%s4968_s26 + $0x70] sm:$0xff]  ;;  %v5035_v17 = vld [vmem:[%s4968_s26 + $0x80] sm:$0xff]  ;;  %v5041_v19 = vld [vmem:[%s4968_s26 + $0x98] sm:$0xff] }
  0x42   : > { %v5046_v20 = vld [vmem:[%s4968_s26 + $0xa8] sm:$0xff]  ;;  %v5051_v21 = vld [vmem:[%s4968_s26 + $0xb8] sm:$0xff]  ;;  %v5081_v28 = vld [vmem:[%s4968_s26 + $0x120] sm:$0xff] }
  0x43   : > { %v5056_v22 = vld [vmem:[%s4968_s26 + $0xc8] sm:$0xff]  ;;  %v5061_v23 = vld [vmem:[%s4968_s26 + $0xd8] sm:$0xff]  ;;  %v5086_v29 = vld [vmem:[%s4968_s26 + $0x130] sm:$0xff] }
  0x44   : > { %v5066_v24 = vld [vmem:[%s4968_s26 + $0xe8] sm:$0xff]  ;;  %v5071_v25 = vld [vmem:[%s4968_s26 + $0xf8] sm:$0xff]  ;;  %v5091_v30 = vld [vmem:[%s4968_s26 + $0x140] sm:$0xff] }
  0x45   : > { %479 = vperm.xlu1 %4618, %v4987_v5   ;;  %474 = vperm.xlu0 %4617, %v4990_v6   ;;  %v5076_v26 = vld [vmem:[%s4968_s26 + $0x108] sm:$0xff]  ;;  %v5096_v31 = vld [vmem:[%s4968_s26 + $0x150] sm:$0xff]  ;;  %v5101_v32 = vld [vmem:[%s4968_s26 + $0x160] sm:$0xff] }
  0x46   : > { %9581 = vst [vmem:[#allocation3_spill] sm:$0xff] %v5076_v26  ;;  %v5106_v33 = vld [vmem:[%s4968_s26 + $0x170] sm:$0xff]  ;;  %v5111_v34 = vld [vmem:[%s4968_s26 + $0x180] sm:$0xff]  ;;  %v5116_v35 = vld [vmem:[%s4968_s26 + $0x198] sm:$0xff] }
  0x47   : > { %v5121_v36 = vld [vmem:[%s4968_s26 + $0x1a8] sm:$0xff]  ;;  %v5126_v37 = vld [vmem:[%s4968_s26 + $0x1b8] sm:$0xff]  ;;  %v5211_v63 = vld [vmem:[%s4968_s26 + $0xa0] sm:$0xff] }
  0x48   : > { %v5132_v39 = vld [vmem:[%s4968_s26 + $0x1c8] sm:$0xff]  ;;  %v5137_v40 = vld [vmem:[%s4968_s26 + $0x1d8] sm:$0xff] }
  0x49   : > { %489 = vperm.xlu1 %4618, %v4995_v7   ;;  %484 = vperm.xlu0 %4617, %v4998_v8   ;;  %v5142_v41 = vld [vmem:[%s4968_s26 + $0x1e8] sm:$0xff]  ;;  %v5147_v42 = vld [vmem:[%s4968_s26 + $0x1f8] sm:$0xff] }
  0x4a   : > { %v5202_v60 = vld [vmem:[%s4968_s26 + $0x88] sm:$0xff] }
  0x4d   : > { %499 = vperm.xlu1 %4618, %v5003_v9   ;;  %494 = vperm.xlu0 %4617, %v5006_v10  }
  0x51   : > { %509 = vperm.xlu1 %4618, %v5011_v11   ;;  %504 = vperm.xlu0 %4617, %v5014_v12  }
  0x55   : > { %519 = vperm.xlu1 %4618, %v5019_v13   ;;  %514 = vperm.xlu0 %4617, %v5022_v14  }
  0x59   : > { %529 = vperm.xlu1 %4618, %v5027_v15   ;;  %524 = vperm.xlu0 %4617, %v5030_v16  }
  0x5d   : > { %4619 = vset.pattern.permute.xlu1 %v9512_v18  ;;  %1419 = vperm.xlu0 %4617, %v5035_v17  }
  0x5e   : > { %557 = vperm.xlu1 %4619, %v4982_v4  }
  0x61   : > { %1434 = vperm.xlu0 %4617, %v5041_v19  }
  0x62   : > { %561 = vperm.xlu1 %4619, %v4971_v1  }
  0x65   : > { %1444 = vperm.xlu0 %4617, %v5046_v20  }
  0x66   : > { %569 = vperm.xlu1 %4619, %v4990_v6  }
  0x69   : > { %1454 = vperm.xlu0 %4617, %v5051_v21  }
  0x6a   : > { %577 = vperm.xlu1 %4619, %v4998_v8  }
  0x6d   : > { %1464 = vperm.xlu0 %4617, %v5056_v22  }
  0x6e   : > { %585 = vperm.xlu1 %4619, %v5006_v10  }
  0x71   : > { %1474 = vperm.xlu0 %4617, %v5061_v23  }
  0x72   : > { %593 = vperm.xlu1 %4619, %v5014_v12  }
  0x75   : > { %1484 = vperm.xlu0 %4617, %v5066_v24  }
  0x76   : > { %601 = vperm.xlu1 %4619, %v5022_v14  }
  0x79   : > { %1494 = vperm.xlu0 %4617, %v5071_v25  }
  0x7a   : > { %609 = vperm.xlu1 %4619, %v5030_v16  }
  0x7d   : > { %2369 = vperm.xlu0 %4617, %v5076_v26  }
  0x7e   : > { %4620 = vset.pattern.permute.xlu1 %v9516_v27 }
  0x7f   : > { %653 = vperm.xlu1 %4620, %v4974_v2  }
  0x81   : > { %2384 = vperm.xlu0 %4617, %v5081_v28  }
  0x83   : > { %661 = vperm.xlu1 %4620, %v4971_v1  }
  0x85   : > { %2394 = vperm.xlu0 %4617, %v5086_v29  }
  0x87   : > { %665 = vperm.xlu1 %4620, %v4979_v3  }
  0x89   : > { %2404 = vperm.xlu0 %4617, %v5091_v30  }
  0x8b   : > { %673 = vperm.xlu1 %4620, %v4987_v5  }
  0x8d   : > { %2414 = vperm.xlu0 %4617, %v5096_v31  }
  0x8f   : > { %681 = vperm.xlu1 %4620, %v4995_v7  }
  0x91   : > { %2424 = vperm.xlu0 %4617, %v5101_v32  }
  0x93   : > { %689 = vperm.xlu1 %4620, %v5003_v9  }
  0x95   : > { %2434 = vperm.xlu0 %4617, %v5106_v33  }
  0x97   : > { %697 = vperm.xlu1 %4620, %v5011_v11  }
  0x99   : > { %3309 = vperm.xlu0 %4617, %v5111_v34  }
  0x9b   : > { %705 = vperm.xlu1 %4620, %v5019_v13  }
  0x9d   : > { %3324 = vperm.xlu0 %4617, %v5116_v35  }
  0x9f   : > { %713 = vperm.xlu1 %4620, %v5027_v15  }
  0xa1   : > { %3334 = vperm.xlu0 %4617, %v5121_v36  }
  0xa3   : > { %4621 = vset.pattern.permute.xlu1 %v9510_v38 }
  0xa4   : > { %757 = vperm.xlu1 %4621, %v4982_v4  }
  0xa5   : > { %3344 = vperm.xlu0 %4617, %v5126_v37  }
  0xa8   : > { %761 = vperm.xlu1 %4621, %v4971_v1  }
  0xa9   : > { %3354 = vperm.xlu0 %4617, %v5132_v39  }
  0xac   : > { %769 = vperm.xlu1 %4621, %v4990_v6  }
  0xad   : > { %3364 = vperm.xlu0 %4617, %v5137_v40  }
  0xb0   : > { %777 = vperm.xlu1 %4621, %v4998_v8  }
  0xb1   : > { %3374 = vperm.xlu0 %4617, %v5142_v41  }
  0xb4   : > { %785 = vperm.xlu1 %4621, %v5006_v10  }
  0xb5   : > { %3384 = vperm.xlu0 %4617, %v5147_v42  }
  0xb8   : > { %v5151_v43 = vpop.permute.xlu1 %464  ;;  %793 = vperm.xlu1 %4621, %v5014_v12   ;;  %v5154_v44 = vpop.permute.xlu0 %454 }
  0xb9   : > { %9582 = vst [vmem:[#allocation4_spill] sm:$0xff] %v5151_v43  ;;  %9583 = vst [vmem:[#allocation5_spill] sm:$0xff] %v5154_v44  ;;  %4646 = vset.pattern.permute.xlu0 %v9512_v18  ;;  %v5220_v18 = vld [vmem:[%s4968_s26 + $0xb0] sm:$0xff]  ;;  %v5384_v43 = vld [vmem:[%s4968_s26 + $0x1e0] sm:$0xff] }
  0xba   : > { %553 = vperm.xlu0 %4646, %v4974_v2   ;;  %v5375_v44 = vld [vmem:[%s4968_s26 + $0x1d0] sm:$0xff]  ;;  %9641 = vst [vmem:[#allocation63_spill] sm:$0xff] %v5384_v43 }
  0xbb   : > { %9638 = vst [vmem:[#allocation60_spill] sm:$0xff] %v5375_v44 }
  0xbc   : > { %v5158_v45 = vpop.permute.xlu1 %469  ;;  %801 = vperm.xlu1 %4621, %v5022_v14   ;;  %v5161_v46 = vpop.permute.xlu0 %459 }
  0xbd   : > { %9584 = vst [vmem:[#allocation6_spill] sm:$0xff] %v5158_v45  ;;  %9585 = vst [vmem:[#allocation7_spill] sm:$0xff] %v5161_v46  ;;  %v5357_v46 = vld [vmem:[%s4968_s26 + $0x1b0] sm:$0xff]  ;;  %v5366_v45 = vld [vmem:[%s4968_s26 + $0x1c0] sm:$0xff] }
  0xbe   : > { %565 = vperm.xlu0 %4646, %v4979_v3   ;;  %9632 = vst [vmem:[#allocation54_spill] sm:$0xff] %v5357_v46  ;;  %9635 = vst [vmem:[#allocation57_spill] sm:$0xff] %v5366_v45 }
  0xc0   : > { %v5164_v47 = vpop.permute.xlu1 %479  ;;  %809 = vperm.xlu1 %4621, %v5030_v16   ;;  %v5167_v48 = vpop.permute.xlu0 %474 }
  0xc1   : > { %9586 = vst [vmem:[#allocation8_spill] sm:$0xff] %v5164_v47  ;;  %9587 = vst [vmem:[#allocation9_spill] sm:$0xff] %v5167_v48  ;;  %v5339_v48 = vld [vmem:[%s4968_s26 + $0x188] sm:$0xff]  ;;  %v5348_v47 = vld [vmem:[%s4968_s26 + $0x1a0] sm:$0xff] }
  0xc2   : > { %573 = vperm.xlu0 %4646, %v4987_v5  }
  0xc4   : > { %v5170_v49 = vpop.permute.xlu1 %489  ;;  %4622 = vset.pattern.permute.xlu1 %v9508_v50  ;;  %v5173_v51 = vpop.permute.xlu0 %484 }
  0xc5   : > { %9588 = vst [vmem:[#allocation10_spill] sm:$0xff] %v5170_v49  ;;  %9589 = vst [vmem:[#allocation11_spill] sm:$0xff] %v5173_v51  ;;  %853 = vperm.xlu1 %4622, %v4974_v2   ;;  %v9520_v51 = vmov 6  }
  0xc6   : > { %581 = vperm.xlu0 %4646, %v4995_v7  }
  0xc8   : > { %v5177_v52 = vpop.permute.xlu1 %499  ;;  %v5179_v53 = vpop.permute.xlu0 %494 }
  0xc9   : > { %9590 = vst [vmem:[#allocation12_spill] sm:$0xff] %v5177_v52  ;;  %9591 = vst [vmem:[#allocation13_spill] sm:$0xff] %v5179_v53  ;;  %861 = vperm.xlu1 %4622, %v4971_v1   ;;  %v5302_v53 = vld [vmem:[%s4968_s26 + $0x148] sm:$0xff]  ;;  %v5311_v52 = vld [vmem:[%s4968_s26 + $0x158] sm:$0xff] }
  0xca   : > { %589 = vperm.xlu0 %4646, %v5003_v9  }
  0xcc   : > { %v5183_v54 = vpop.permute.xlu1 %509  ;;  %v5185_v55 = vpop.permute.xlu0 %504 }
  0xcd   : > { %9592 = vst [vmem:[#allocation14_spill] sm:$0xff] %v5183_v54  ;;  %9593 = vst [vmem:[#allocation15_spill] sm:$0xff] %v5185_v55  ;;  %865 = vperm.xlu1 %4622, %v4979_v3   ;;  %v5275_v55 = vld [vmem:[%s4968_s26 + $0x118] sm:$0xff]  ;;  %v5284_v54 = vld [vmem:[%s4968_s26 + $0x128] sm:$0xff] }
  0xce   : > { %597 = vperm.xlu0 %4646, %v5011_v11  }
  0xd0   : > { %v5189_v56 = vpop.permute.xlu1 %519  ;;  %v5191_v57 = vpop.permute.xlu0 %514 }
  0xd1   : > { %9594 = vst [vmem:[#allocation16_spill] sm:$0xff] %v5189_v56  ;;  %9595 = vst [vmem:[#allocation17_spill] sm:$0xff] %v5191_v57  ;;  %873 = vperm.xlu1 %4622, %v4987_v5   ;;  %v9518_v56 = vmov 5  }
  0xd2   : > { %605 = vperm.xlu0 %4646, %v5019_v13  }
  0xd4   : > { %v5195_v58 = vpop.permute.xlu1 %529  ;;  %v5197_v59 = vpop.permute.xlu0 %524 }
  0xd5   : > { %9596 = vst [vmem:[#allocation18_spill] sm:$0xff] %v5195_v58  ;;  %9597 = vst [vmem:[#allocation19_spill] sm:$0xff] %v5197_v59  ;;  %881 = vperm.xlu1 %4622, %v4995_v7   ;;  %v5238_v58 = vld [vmem:[%s4968_s26 + $0xd0] sm:$0xff] }
  0xd6   : > { %613 = vperm.xlu0 %4646, %v5027_v15  }
  0xd8   : > { %v5204_v61 = vpop.permute.xlu0 %1419 }
  0xd9   : > { %9598 = vst [vmem:[#allocation20_spill] sm:$0xff] %v5204_v61  ;;  %v5206_v62 = vpop.permute.xlu1 %557  ;;  %889 = vperm.xlu1 %4622, %v5003_v9   ;;  %v5229_v61 = vld [vmem:[%s4968_s26 + $0xc0] sm:$0xff] }
  0xda   : > { %9599 = vst [vmem:[#allocation21_spill] sm:$0xff] %v5206_v62  ;;  %1518 = vperm.xlu0 %4646, %v5202_v60   ;;  %v5293_v62 = vld [vmem:[%s4968_s26 + $0x138] sm:$0xff] }
  0xdc   : > { %v5213_v50 = vpop.permute.xlu0 %1434 }
  0xdd   : > { %9600 = vst [vmem:[#allocation22_spill] sm:$0xff] %v5213_v50  ;;  %v5215_v38 = vpop.permute.xlu1 %561  ;;  %897 = vperm.xlu1 %4622, %v5011_v11  }
  0xde   : > { %9601 = vst [vmem:[#allocation23_spill] sm:$0xff] %v5215_v38  ;;  %1530 = vperm.xlu0 %4646, %v5211_v63   ;;  %v5266_v38 = vld [vmem:[%s4968_s26 + $0x100] sm:$0xff] }
  0xe0   : > { %v5222_v0 = vpop.permute.xlu0 %1444 }
  0xe1   : > { %9602 = vst [vmem:[#allocation24_spill] sm:$0xff] %v5222_v0  ;;  %v5224_v27 = vpop.permute.xlu1 %569  ;;  %905 = vperm.xlu1 %4622, %v5019_v13  }
  0xe2   : > { %9603 = vst [vmem:[#allocation25_spill] sm:$0xff] %v5224_v27  ;;  %1538 = vperm.xlu0 %4646, %v5220_v18  }
  0xe4   : > { %v5231_v50 = vpop.permute.xlu0 %1454 }
  0xe5   : > { %9604 = vst [vmem:[#allocation26_spill] sm:$0xff] %v5231_v50  ;;  %v5233_v59 = vpop.permute.xlu1 %577  ;;  %913 = vperm.xlu1 %4622, %v5027_v15   ;;  %v5248_v50 = vld [vmem:[%s4968_s26 + $0xe0] sm:$0xff] }
  0xe6   : > { %9605 = vst [vmem:[#allocation27_spill] sm:$0xff] %v5233_v59  ;;  %1546 = vperm.xlu0 %4646, %v5229_v61  }
  0xe8   : > { %v5240_v0 = vpop.permute.xlu0 %1464 }
  0xe9   : > { %9606 = vst [vmem:[#allocation28_spill] sm:$0xff] %v5240_v0  ;;  %v5242_v57 = vpop.permute.xlu1 %585  ;;  %4623 = vset.pattern.permute.xlu1 %v9518_v56  ;;  %v5257_v0 = vld [vmem:[%s4968_s26 + $0xf0] sm:$0xff] }
  0xea   : > { %9607 = vst [vmem:[#allocation29_spill] sm:$0xff] %v5242_v57  ;;  %957 = vperm.xlu1 %4623, %v4982_v4   ;;  %1554 = vperm.xlu0 %4646, %v5238_v58  }
  0xec   : > { %v5250_v59 = vpop.permute.xlu0 %1474 }
  0xed   : > { %9608 = vst [vmem:[#allocation30_spill] sm:$0xff] %v5250_v59  ;;  %v5252_v27 = vpop.permute.xlu1 %593 }
  0xee   : > { %9609 = vst [vmem:[#allocation31_spill] sm:$0xff] %v5252_v27  ;;  %961 = vperm.xlu1 %4623, %v4971_v1   ;;  %1562 = vperm.xlu0 %4646, %v5248_v50  }
  0xf0   : > { %v5259_v57 = vpop.permute.xlu0 %1484 }
  0xf1   : > { %9610 = vst [vmem:[#allocation32_spill] sm:$0xff] %v5259_v57  ;;  %v5261_v56 = vpop.permute.xlu1 %601 }
  0xf2   : > { %9611 = vst [vmem:[#allocation33_spill] sm:$0xff] %v5261_v56  ;;  %969 = vperm.xlu1 %4623, %v4990_v6   ;;  %1570 = vperm.xlu0 %4646, %v5257_v0  }
  0xf4   : > { %v5268_v59 = vpop.permute.xlu0 %1494 }
  0xf5   : > { %9612 = vst [vmem:[#allocation34_spill] sm:$0xff] %v5268_v59  ;;  %v5270_v27 = vpop.permute.xlu1 %609 }
  0xf6   : > { %9613 = vst [vmem:[#allocation35_spill] sm:$0xff] %v5270_v27  ;;  %977 = vperm.xlu1 %4623, %v4998_v8   ;;  %2459 = vperm.xlu0 %4646, %v5266_v38  }
  0xf8   : > { %v5277_v57 = vpop.permute.xlu0 %2369 }
  0xf9   : > { %9614 = vst [vmem:[#allocation36_spill] sm:$0xff] %v5277_v57 }
  0xfa   : > { %985 = vperm.xlu1 %4623, %v5006_v10   ;;  %v5280_v56 = vpop.permute.xlu1 %653  ;;  %2471 = vperm.xlu0 %4646, %v5275_v55  }
  0xfb   : > { %9615 = vst [vmem:[#allocation37_spill] sm:$0xff] %v5280_v56 }
  0xfc   : > { %v5286_v59 = vpop.permute.xlu0 %2384 }
  0xfd   : > { %9616 = vst [vmem:[#allocation38_spill] sm:$0xff] %v5286_v59 }
  0xfe   : > { %993 = vperm.xlu1 %4623, %v5014_v12   ;;  %v5289_v27 = vpop.permute.xlu1 %661  ;;  %2479 = vperm.xlu0 %4646, %v5284_v54  }
  0xff   : > { %9617 = vst [vmem:[#allocation39_spill] sm:$0xff] %v5289_v27 }
 0x100   : > { %v5295_v57 = vpop.permute.xlu0 %2394 }
 0x101   : > { %9618 = vst [vmem:[#allocation40_spill] sm:$0xff] %v5295_v57 }
 0x102   : > { %1001 = vperm.xlu1 %4623, %v5022_v14   ;;  %v5298_v56 = vpop.permute.xlu1 %665  ;;  %2487 = vperm.xlu0 %4646, %v5293_v62  }
 0x103   : > { %9619 = vst [vmem:[#allocation41_spill] sm:$0xff] %v5298_v56 }
 0x104   : > { %v5304_v59 = vpop.permute.xlu0 %2404 }
 0x105   : > { %9620 = vst [vmem:[#allocation42_spill] sm:$0xff] %v5304_v59  ;;  %v5321_v59 = vld [vmem:[%s4968_s26 + $0x168] sm:$0xff] }
 0x106   : > { %1009 = vperm.xlu1 %4623, %v5030_v16   ;;  %v5307_v27 = vpop.permute.xlu1 %673  ;;  %2495 = vperm.xlu0 %4646, %v5302_v53  }
 0x107   : > { %9621 = vst [vmem:[#allocation43_spill] sm:$0xff] %v5307_v27 }
 0x108   : > { %v5313_v57 = vpop.permute.xlu0 %2414 }
 0x109   : > { %9622 = vst [vmem:[#allocation44_spill] sm:$0xff] %v5313_v57  ;;  %v5330_v57 = vld [vmem:[%s4968_s26 + $0x178] sm:$0xff] }
 0x10a   : > { %4624 = vset.pattern.permute.xlu1 %v9520_v51  ;;  %v5316_v56 = vpop.permute.xlu1 %681  ;;  %2503 = vperm.xlu0 %4646, %v5311_v52  }
 0x10b   : > { %9623 = vst [vmem:[#allocation45_spill] sm:$0xff] %v5316_v56  ;;  %1053 = vperm.xlu1 %4624, %v4974_v2  }
 0x10c   : > { %v5323_v27 = vpop.permute.xlu0 %2424 }
 0x10d   : > { %9624 = vst [vmem:[#allocation46_spill] sm:$0xff] %v5323_v27 }
 0x10e   : > { %v5325_v49 = vpop.permute.xlu1 %689  ;;  %2511 = vperm.xlu0 %4646, %v5321_v59  }
 0x10f   : > { %9625 = vst [vmem:[#allocation47_spill] sm:$0xff] %v5325_v49  ;;  %1061 = vperm.xlu1 %4624, %v4971_v1  }
 0x110   : > { %v5332_v51 = vpop.permute.xlu0 %2434 }
 0x111   : > { %9626 = vst [vmem:[#allocation48_spill] sm:$0xff] %v5332_v51 }
 0x112   : > { %v5334_v56 = vpop.permute.xlu1 %697  ;;  %2519 = vperm.xlu0 %4646, %v5330_v57  }
 0x113   : > { %9627 = vst [vmem:[#allocation49_spill] sm:$0xff] %v5334_v56  ;;  %1065 = vperm.xlu1 %4624, %v4979_v3  }
 0x114   : > { %v5341_v27 = vpop.permute.xlu0 %3309 }
 0x115   : > { %9628 = vst [vmem:[#allocation50_spill] sm:$0xff] %v5341_v27 }
 0x116   : > { %v5343_v49 = vpop.permute.xlu1 %705  ;;  %3408 = vperm.xlu0 %4646, %v5339_v48  }
 0x117   : > { %9629 = vst [vmem:[#allocation51_spill] sm:$0xff] %v5343_v49  ;;  %1073 = vperm.xlu1 %4624, %v4987_v5  }
 0x118   : > { %v5350_v51 = vpop.permute.xlu0 %3324 }
 0x119   : > { %9630 = vst [vmem:[#allocation52_spill] sm:$0xff] %v5350_v51 }
 0x11a   : > { %v5352_v56 = vpop.permute.xlu1 %713  ;;  %3420 = vperm.xlu0 %4646, %v5348_v47  }
 0x11b   : > { %9631 = vst [vmem:[#allocation53_spill] sm:$0xff] %v5352_v56  ;;  %1081 = vperm.xlu1 %4624, %v4995_v7  }
 0x11c   : > { %v5359_v27 = vpop.permute.xlu0 %3334 }
 0x11d   : > { %9633 = vst [vmem:[#allocation55_spill] sm:$0xff] %v5359_v27 }
 0x11e   : > { %3428 = vperm.xlu0 %4646, %v5357_v46  }
 0x11f   : > { %1089 = vperm.xlu1 %4624, %v5003_v9   ;;  %v5363_v49 = vpop.permute.xlu1 %757 }
 0x120   : > { %9634 = vst [vmem:[#allocation56_spill] sm:$0xff] %v5363_v49  ;;  %v5368_v51 = vpop.permute.xlu0 %3344 }
 0x121   : > { %9636 = vst [vmem:[#allocation58_spill] sm:$0xff] %v5368_v51 }
 0x122   : > { %3436 = vperm.xlu0 %4646, %v5366_v45  }
 0x123   : > { %1097 = vperm.xlu1 %4624, %v5011_v11   ;;  %v5372_v56 = vpop.permute.xlu1 %761 }
 0x124   : > { %9637 = vst [vmem:[#allocation59_spill] sm:$0xff] %v5372_v56  ;;  %v5377_v27 = vpop.permute.xlu0 %3354  ;;  %v5393_v56 = vld [vmem:[%s4968_s26 + $0x1f0] sm:$0xff] }
 0x125   : > { %9639 = vst [vmem:[#allocation61_spill] sm:$0xff] %v5377_v27  ;;  %v9530_v27 = vmov 7  }
 0x126   : > { %3444 = vperm.xlu0 %4646, %v5375_v44  }
 0x127   : > { %1105 = vperm.xlu1 %4624, %v5019_v13   ;;  %v5381_v49 = vpop.permute.xlu1 %769 }
 0x128   : > { %9640 = vst [vmem:[#allocation62_spill] sm:$0xff] %v5381_v49  ;;  %v5386_v46 = vpop.permute.xlu0 %3364 }
 0x129   : > { %9642 = vst [vmem:[#allocation64_spill] sm:$0xff] %v5386_v46 }
 0x12a   : > { %3452 = vperm.xlu0 %4646, %v5384_v43   ;;  %v9647_v43 = vmov 2  }
 0x12b   : > { %1113 = vperm.xlu1 %4624, %v5027_v15   ;;  %v5390_v51 = vpop.permute.xlu1 %777 }
 0x12c   : > { %9643 = vst [vmem:[#allocation65_spill] sm:$0xff] %v5390_v51  ;;  %v5395_v45 = vpop.permute.xlu0 %3374 }
 0x12d   : > { %9644 = vst [vmem:[#allocation66_spill] sm:$0xff] %v5395_v45 }
 0x12e   : > { %3460 = vperm.xlu0 %4646, %v5393_v56  }
 0x12f   : > { %4625 = vset.pattern.permute.xlu1 %v9530_v27  ;;  %v5399_v49 = vpop.permute.xlu1 %785 }
 0x130   : > { %9645 = vst [vmem:[#allocation67_spill] sm:$0xff] %v5399_v49  ;;  %1157 = vperm.xlu1 %4625, %v4982_v4   ;;  %v5402_v46 = vpop.permute.xlu0 %3384 }
 0x131   : > { %9646 = vst [vmem:[#allocation68_spill] sm:$0xff] %v5402_v46 }
 0x132   : > { %4648 = vset.pattern.permute.xlu0 %v9647_v43 }
 0x133   : > { %v5405_v44 = vpop.permute.xlu1 %793  ;;  %657 = vperm.xlu0 %4648, %v4982_v4  }
 0x134   : > { %9648 = vst [vmem:[#allocation69_spill] sm:$0xff] %v5405_v44  ;;  %1161 = vperm.xlu1 %4625, %v4971_v1  }
 0x135   : > { %v5409_v45 = vpop.permute.xlu0 %553 }
 0x136   : > { %9649 = vst [vmem:[#allocation70_spill] sm:$0xff] %v5409_v45 }
 0x137   : > { %v5411_v51 = vpop.permute.xlu1 %801  ;;  %669 = vperm.xlu0 %4648, %v4990_v6  }
 0x138   : > { %9650 = vst [vmem:[#allocation71_spill] sm:$0xff] %v5411_v51  ;;  %1169 = vperm.xlu1 %4625, %v4990_v6  }
 0x139   : > { %v5415_v27 = vpop.permute.xlu0 %565 }
 0x13a   : > { %9651 = vst [vmem:[#allocation72_spill] sm:$0xff] %v5415_v27 }
 0x13b   : > { %v5417_v49 = vpop.permute.xlu1 %809  ;;  %677 = vperm.xlu0 %4648, %v4998_v8  }
 0x13c   : > { %9652 = vst [vmem:[#allocation73_spill] sm:$0xff] %v5417_v49  ;;  %1177 = vperm.xlu1 %4625, %v4998_v8  }
 0x13d   : > { %v5421_v44 = vpop.permute.xlu0 %573 }
 0x13e   : > { %9653 = vst [vmem:[#allocation74_spill] sm:$0xff] %v5421_v44 }
 0x13f   : > { %685 = vperm.xlu0 %4648, %v5006_v10  }
 0x140   : > { %1185 = vperm.xlu1 %4625, %v5006_v10   ;;  %v5425_v46 = vpop.permute.xlu1 %853 }
 0x141   : > { %9654 = vst [vmem:[#allocation75_spill] sm:$0xff] %v5425_v46  ;;  %v5427_v51 = vpop.permute.xlu0 %581 }
 0x142   : > { %9655 = vst [vmem:[#allocation76_spill] sm:$0xff] %v5427_v51 }
 0x143   : > { %693 = vperm.xlu0 %4648, %v5014_v12  }
 0x144   : > { %1193 = vperm.xlu1 %4625, %v5014_v12   ;;  %v5431_v27 = vpop.permute.xlu1 %861 }
 0x145   : > { %9656 = vst [vmem:[#allocation77_spill] sm:$0xff] %v5431_v27  ;;  %v5433_v49 = vpop.permute.xlu0 %589  ;;  %v9532_v27 = vmov 8  }
 0x146   : > { %9657 = vst [vmem:[#allocation78_spill] sm:$0xff] %v5433_v49 }
 0x147   : > { %701 = vperm.xlu0 %4648, %v5022_v14  }
 0x148   : > { %1201 = vperm.xlu1 %4625, %v5022_v14   ;;  %v5437_v44 = vpop.permute.xlu1 %865 }
 0x149   : > { %9658 = vst [vmem:[#allocation79_spill] sm:$0xff] %v5437_v44  ;;  %v5439_v45 = vpop.permute.xlu0 %597 }
 0x14a   : > { %9659 = vst [vmem:[#allocation80_spill] sm:$0xff] %v5439_v45 }
 0x14b   : > { %709 = vperm.xlu0 %4648, %v5030_v16  }
 0x14c   : > { %1209 = vperm.xlu1 %4625, %v5030_v16   ;;  %v5443_v46 = vpop.permute.xlu1 %873 }
 0x14d   : > { %9660 = vst [vmem:[#allocation81_spill] sm:$0xff] %v5443_v46  ;;  %v5445_v51 = vpop.permute.xlu0 %605 }
 0x14e   : > { %9661 = vst [vmem:[#allocation82_spill] sm:$0xff] %v5445_v51 }
 0x14f   : > { %1610 = vperm.xlu0 %4648, %v5035_v17  }
 0x150   : > { %4626 = vset.pattern.permute.xlu1 %v9532_v27  ;;  %v5449_v49 = vpop.permute.xlu1 %881 }
 0x151   : > { %9662 = vst [vmem:[#allocation83_spill] sm:$0xff] %v5449_v49  ;;  %1253 = vperm.xlu1 %4626, %v4974_v2   ;;  %v5452_v44 = vpop.permute.xlu0 %613 }
 0x152   : > { %9663 = vst [vmem:[#allocation84_spill] sm:$0xff] %v5452_v44 }
 0x153   : > { %1622 = vperm.xlu0 %4648, %v5041_v19  }
 0x154   : > { %v5455_v45 = vpop.permute.xlu1 %889 }
 0x155   : > { %9664 = vst [vmem:[#allocation85_spill] sm:$0xff] %v5455_v45  ;;  %1261 = vperm.xlu1 %4626, %v4971_v1   ;;  %v5458_v46 = vpop.permute.xlu0 %1518  ;;  %v9680_v45 = vmov 0  }
 0x156   : > { %9665 = vst [vmem:[#allocation86_spill] sm:$0xff] %v5458_v46 }
 0x157   : > { %1630 = vperm.xlu0 %4648, %v5046_v20  }
 0x158   : > { %v5461_v51 = vpop.permute.xlu1 %897 }
 0x159   : > { %9666 = vst [vmem:[#allocation87_spill] sm:$0xff] %v5461_v51  ;;  %1265 = vperm.xlu1 %4626, %v4979_v3   ;;  %v5464_v27 = vpop.permute.xlu0 %1530 }
 0x15a   : > { %9667 = vst [vmem:[#allocation88_spill] sm:$0xff] %v5464_v27 }
 0x15b   : > { %1638 = vperm.xlu0 %4648, %v5051_v21  }
 0x15c   : > { %v5467_v49 = vpop.permute.xlu1 %905 }
 0x15d   : > { %9668 = vst [vmem:[#allocation89_spill] sm:$0xff] %v5467_v49  ;;  %1273 = vperm.xlu1 %4626, %v4987_v5   ;;  %v5470_v44 = vpop.permute.xlu0 %1538 }
 0x15e   : > { %9669 = vst [vmem:[#allocation90_spill] sm:$0xff] %v5470_v44 }
 0x15f   : > { %1646 = vperm.xlu0 %4648, %v5056_v22  }
 0x160   : > { %v5473_v1 = vpop.permute.xlu1 %913 }
 0x161   : > { %9670 = vst [vmem:[#allocation91_spill] sm:$0xff] %v5473_v1  ;;  %1281 = vperm.xlu1 %4626, %v4995_v7   ;;  %v5476_v46 = vpop.permute.xlu0 %1546 }
 0x162   : > { %9671 = vst [vmem:[#allocation92_spill] sm:$0xff] %v5476_v46 }
 0x163   : > { %1654 = vperm.xlu0 %4648, %v5061_v23  }
 0x165   : > { %1289 = vperm.xlu1 %4626, %v5003_v9   ;;  %v5480_v27 = vpop.permute.xlu1 %957  ;;  %v5482_v51 = vpop.permute.xlu0 %1554 }
 0x166   : > { %9672 = vst [vmem:[#allocation93_spill] sm:$0xff] %v5480_v27  ;;  %9673 = vst [vmem:[#allocation94_spill] sm:$0xff] %v5482_v51 }
 0x167   : > { %1662 = vperm.xlu0 %4648, %v5066_v24  }
 0x169   : > { %1297 = vperm.xlu1 %4626, %v5011_v11   ;;  %v5486_v44 = vpop.permute.xlu1 %961  ;;  %v5488_v1 = vpop.permute.xlu0 %1562 }
 0x16a   : > { %9674 = vst [vmem:[#allocation95_spill] sm:$0xff] %v5486_v44  ;;  %9675 = vst [vmem:[#allocation96_spill] sm:$0xff] %v5488_v1 }
 0x16b   : > { %1670 = vperm.xlu0 %4648, %v5071_v25  }
 0x16d   : > { %1305 = vperm.xlu1 %4626, %v5019_v13   ;;  %v5492_v46 = vpop.permute.xlu1 %969  ;;  %v5494_v49 = vpop.permute.xlu0 %1570 }
 0x16e   : > { %9676 = vst [vmem:[#allocation97_spill] sm:$0xff] %v5492_v46  ;;  %9677 = vst [vmem:[#allocation98_spill] sm:$0xff] %v5494_v49  ;;  %v5511_v49 = vld [vmem:[%s4968_s26 + $0x90] sm:$0xff] }
 0x16f   : > { %2559 = vperm.xlu0 %4648, %v5076_v26  }
 0x171   : > { %1313 = vperm.xlu1 %4626, %v5027_v15   ;;  %v5498_v51 = vpop.permute.xlu1 %977  ;;  %v5500_v27 = vpop.permute.xlu0 %2459 }
 0x172   : > { %9678 = vst [vmem:[#allocation99_spill] sm:$0xff] %v5498_v51  ;;  %9679 = vst [vmem:[#allocation100_spill] sm:$0xff] %v5500_v27 }
 0x173   : > { %2571 = vperm.xlu0 %4648, %v5081_v28  }
 0x175   : > { %4627 = vset.pattern.permute.xlu1 %v9680_v45  ;;  %v5504_v1 = vpop.permute.xlu1 %985  ;;  %v5506_v44 = vpop.permute.xlu0 %2471 }
 0x176   : > { %9681 = vst [vmem:[#allocation101_spill] sm:$0xff] %v5504_v1  ;;  %9682 = vst [vmem:[#allocation102_spill] sm:$0xff] %v5506_v44  ;;  %1424 = vperm.xlu1 %4627, %v5202_v60  }
 0x177   : > { %2579 = vperm.xlu0 %4648, %v5086_v29  }
 0x179   : > { %v5513_v46 = vpop.permute.xlu1 %993  ;;  %v5515_v26 = vpop.permute.xlu0 %2479 }
 0x17a   : > { %9683 = vst [vmem:[#allocation103_spill] sm:$0xff] %v5513_v46  ;;  %9684 = vst [vmem:[#allocation104_spill] sm:$0xff] %v5515_v26  ;;  %1429 = vperm.xlu1 %4627, %v5511_v49   ;;  %v6140_v46 = vld [vmem:[%s4968_s26 + $0xe0] sm:$0xff] }
 0x17b   : > { %2587 = vperm.xlu0 %4648, %v5091_v30   ;;  %9865 = vst [vmem:[#allocation268_spill] sm:$0xff] %v6140_v46 }
 0x17d   : > { %v5519_v27 = vpop.permute.xlu1 %1001  ;;  %v5521_v51 = vpop.permute.xlu0 %2487 }
 0x17e   : > { %9685 = vst [vmem:[#allocation105_spill] sm:$0xff] %v5519_v27  ;;  %9686 = vst [vmem:[#allocation106_spill] sm:$0xff] %v5521_v51  ;;  %1439 = vperm.xlu1 %4627, %v5211_v63   ;;  %v6002_v27 = vld [vmem:[%s4968_s26 + $0x1e8] sm:$0xff] }
 0x17f   : > { %2595 = vperm.xlu0 %4648, %v5096_v31  }
 0x181   : > { %v5525_v44 = vpop.permute.xlu1 %1009  ;;  %v5527_v29 = vpop.permute.xlu0 %2495 }
 0x182   : > { %9687 = vst [vmem:[#allocation107_spill] sm:$0xff] %v5525_v44  ;;  %9688 = vst [vmem:[#allocation108_spill] sm:$0xff] %v5527_v29  ;;  %1449 = vperm.xlu1 %4627, %v5220_v18  }
 0x183   : > { %2603 = vperm.xlu0 %4648, %v5101_v32  }
 0x185   : > { %v5531_v26 = vpop.permute.xlu0 %2503 }
 0x186   : > { %9689 = vst [vmem:[#allocation109_spill] sm:$0xff] %v5531_v26  ;;  %1459 = vperm.xlu1 %4627, %v5229_v61   ;;  %v5534_v30 = vpop.permute.xlu1 %1053 }
 0x187   : > { %9690 = vst [vmem:[#allocation110_spill] sm:$0xff] %v5534_v30  ;;  %2611 = vperm.xlu0 %4648, %v5106_v33   ;;  %v9698_v30 = vmov 1  }
 0x189   : > { %v5537_v51 = vpop.permute.xlu0 %2511 }
 0x18a   : > { %9691 = vst [vmem:[#allocation111_spill] sm:$0xff] %v5537_v51  ;;  %1469 = vperm.xlu1 %4627, %v5238_v58   ;;  %v5540_v31 = vpop.permute.xlu1 %1061 }
 0x18b   : > { %9692 = vst [vmem:[#allocation112_spill] sm:$0xff] %v5540_v31  ;;  %3500 = vperm.xlu0 %4648, %v5111_v34  }
 0x18d   : > { %v5543_v29 = vpop.permute.xlu0 %2519 }
 0x18e   : > { %9693 = vst [vmem:[#allocation113_spill] sm:$0xff] %v5543_v29  ;;  %1479 = vperm.xlu1 %4627, %v5248_v50   ;;  %v5546_v32 = vpop.permute.xlu1 %1065 }
 0x18f   : > { %9694 = vst [vmem:[#allocation114_spill] sm:$0xff] %v5546_v32  ;;  %3512 = vperm.xlu0 %4648, %v5116_v35  }
 0x191   : > { %v5549_v26 = vpop.permute.xlu0 %3408 }
 0x192   : > { %9695 = vst [vmem:[#allocation115_spill] sm:$0xff] %v5549_v26  ;;  %1489 = vperm.xlu1 %4627, %v5257_v0   ;;  %v5552_v33 = vpop.permute.xlu1 %1073 }
 0x193   : > { %9696 = vst [vmem:[#allocation116_spill] sm:$0xff] %v5552_v33  ;;  %3520 = vperm.xlu0 %4648, %v5121_v36  }
 0x195   : > { %v5555_v51 = vpop.permute.xlu0 %3420 }
 0x196   : > { %9697 = vst [vmem:[#allocation117_spill] sm:$0xff] %v5555_v51  ;;  %4628 = vset.pattern.permute.xlu1 %v9698_v30  ;;  %v5558_v34 = vpop.permute.xlu1 %1081 }
 0x197   : > { %9699 = vst [vmem:[#allocation118_spill] sm:$0xff] %v5558_v34  ;;  %1514 = vperm.xlu1 %4628, %v5035_v17   ;;  %3528 = vperm.xlu0 %4648, %v5126_v37  }
 0x199   : > { %v5562_v29 = vpop.permute.xlu0 %3428 }
 0x19a   : > { %9700 = vst [vmem:[#allocation119_spill] sm:$0xff] %v5562_v29  ;;  %v5564_v35 = vpop.permute.xlu1 %1089 }
 0x19b   : > { %9701 = vst [vmem:[#allocation120_spill] sm:$0xff] %v5564_v35  ;;  %1522 = vperm.xlu1 %4628, %v5511_v49   ;;  %3536 = vperm.xlu0 %4648, %v5132_v39  }
 0x19d   : > { %v5568_v26 = vpop.permute.xlu0 %3436 }
 0x19e   : > { %9702 = vst [vmem:[#allocation121_spill] sm:$0xff] %v5568_v26  ;;  %v5570_v36 = vpop.permute.xlu1 %1097 }
 0x19f   : > { %9703 = vst [vmem:[#allocation122_spill] sm:$0xff] %v5570_v36  ;;  %1526 = vperm.xlu1 %4628, %v5041_v19   ;;  %3544 = vperm.xlu0 %4648, %v5137_v40  }
 0x1a1   : > { %v5574_v51 = vpop.permute.xlu0 %3444 }
 0x1a2   : > { %9704 = vst [vmem:[#allocation123_spill] sm:$0xff] %v5574_v51  ;;  %v5576_v34 = vpop.permute.xlu1 %1105  ;;  %v9710_v51 = vmov 3  }
 0x1a3   : > { %9705 = vst [vmem:[#allocation124_spill] sm:$0xff] %v5576_v34  ;;  %1534 = vperm.xlu1 %4628, %v5046_v20   ;;  %3552 = vperm.xlu0 %4648, %v5142_v41  }
 0x1a5   : > { %v5580_v37 = vpop.permute.xlu0 %3452 }
 0x1a6   : > { %9706 = vst [vmem:[#allocation125_spill] sm:$0xff] %v5580_v37  ;;  %v5582_v29 = vpop.permute.xlu1 %1113 }
 0x1a7   : > { %9707 = vst [vmem:[#allocation126_spill] sm:$0xff] %v5582_v29  ;;  %1542 = vperm.xlu1 %4628, %v5051_v21   ;;  %3560 = vperm.xlu0 %4648, %v5147_v42  }
 0x1a9   : > { %v5586_v39 = vpop.permute.xlu0 %3460 }
 0x1aa   : > { %9708 = vst [vmem:[#allocation127_spill] sm:$0xff] %v5586_v39 }
 0x1ab   : > { %1550 = vperm.xlu1 %4628, %v5056_v22   ;;  %v5589_v40 = vpop.permute.xlu1 %1157  ;;  %4650 = vset.pattern.permute.xlu0 %v9710_v51 }
 0x1ac   : > { %9709 = vst [vmem:[#allocation128_spill] sm:$0xff] %v5589_v40  ;;  %753 = vperm.xlu0 %4650, %v4974_v2  }
 0x1ae   : > { %v5593_v34 = vpop.permute.xlu0 %657 }
 0x1af   : > { %9711 = vst [vmem:[#allocation129_spill] sm:$0xff] %v5593_v34  ;;  %1558 = vperm.xlu1 %4628, %v5061_v23   ;;  %v5596_v41 = vpop.permute.xlu1 %1161  ;;  %v9764_v34 = vld [vmem:[#allocation57_spill] sm:$0xff] }
 0x1b0   : > { %9712 = vst [vmem:[#allocation130_spill] sm:$0xff] %v5596_v41  ;;  %765 = vperm.xlu0 %4650, %v4979_v3   ;;  %v9767_v41 = vld [vmem:[#allocation60_spill] sm:$0xff] }
 0x1b2   : > { %v5599_v37 = vpop.permute.xlu0 %669 }
 0x1b3   : > { %9713 = vst [vmem:[#allocation131_spill] sm:$0xff] %v5599_v37  ;;  %1566 = vperm.xlu1 %4628, %v5066_v24   ;;  %v5602_v42 = vpop.permute.xlu1 %1169  ;;  %v9761_v37 = vld [vmem:[#allocation54_spill] sm:$0xff] }
 0x1b4   : > { %9714 = vst [vmem:[#allocation132_spill] sm:$0xff] %v5602_v42  ;;  %773 = vperm.xlu0 %4650, %v4987_v5  }
 0x1b6   : > { %v5605_v40 = vpop.permute.xlu0 %677 }
 0x1b7   : > { %9715 = vst [vmem:[#allocation133_spill] sm:$0xff] %v5605_v40  ;;  %1574 = vperm.xlu1 %4628, %v5071_v25   ;;  %v5608_v2 = vpop.permute.xlu1 %1177 }
 0x1b8   : > { %9716 = vst [vmem:[#allocation134_spill] sm:$0xff] %v5608_v2  ;;  %781 = vperm.xlu0 %4650, %v4995_v7  }
 0x1ba   : > { %v5611_v39 = vpop.permute.xlu0 %685 }
 0x1bb   : > { %9717 = vst [vmem:[#allocation135_spill] sm:$0xff] %v5611_v39  ;;  %4629 = vset.pattern.permute.xlu1 %v9647_v43  ;;  %v5614_v3 = vpop.permute.xlu1 %1185  ;;  %v6162_v39 = vld [vmem:[%s4968_s26 + $0x100] sm:$0xff] }
 0x1bc   : > { %9718 = vst [vmem:[#allocation136_spill] sm:$0xff] %v5614_v3  ;;  %1614 = vperm.xlu1 %4629, %v5202_v60   ;;  %789 = vperm.xlu0 %4650, %v5003_v9  }
 0x1be   : > { %v5618_v42 = vpop.permute.xlu0 %693 }
 0x1bf   : > { %9719 = vst [vmem:[#allocation137_spill] sm:$0xff] %v5618_v42  ;;  %v5620_v5 = vpop.permute.xlu1 %1193  ;;  %v6097_v42 = vld [vmem:[%s4968_s26 + $0x88] sm:$0xff] }
 0x1c0   : > { %9720 = vst [vmem:[#allocation138_spill] sm:$0xff] %v5620_v5  ;;  %1618 = vperm.xlu1 %4629, %v5511_v49   ;;  %797 = vperm.xlu0 %4650, %v5011_v11  }
 0x1c2   : > { %v5624_v2 = vpop.permute.xlu0 %701 }
 0x1c3   : > { %9721 = vst [vmem:[#allocation139_spill] sm:$0xff] %v5624_v2  ;;  %v5626_v7 = vpop.permute.xlu1 %1201  ;;  %v5984_v2 = vld [vmem:[%s4968_s26 + $0x1c8] sm:$0xff] }
 0x1c4   : > { %9722 = vst [vmem:[#allocation140_spill] sm:$0xff] %v5626_v7  ;;  %1626 = vperm.xlu1 %4629, %v5211_v63   ;;  %805 = vperm.xlu0 %4650, %v5019_v13   ;;  %v9770_v7 = vld [vmem:[#allocation63_spill] sm:$0xff] }
 0x1c6   : > { %v5630_v29 = vpop.permute.xlu0 %709 }
 0x1c7   : > { %9723 = vst [vmem:[#allocation141_spill] sm:$0xff] %v5630_v29  ;;  %v5632_v26 = vpop.permute.xlu1 %1209 }
 0x1c8   : > { %9724 = vst [vmem:[#allocation142_spill] sm:$0xff] %v5632_v26  ;;  %1634 = vperm.xlu1 %4629, %v5220_v18   ;;  %813 = vperm.xlu0 %4650, %v5027_v15  }
 0x1ca   : > { %v5636_v9 = vpop.permute.xlu0 %1610 }
 0x1cb   : > { %9725 = vst [vmem:[#allocation143_spill] sm:$0xff] %v5636_v9 }
 0x1cc   : > { %1642 = vperm.xlu1 %4629, %v5229_v61   ;;  %v5639_v11 = vpop.permute.xlu1 %1253  ;;  %1710 = vperm.xlu0 %4650, %v5202_v60  }
 0x1cd   : > { %9726 = vst [vmem:[#allocation144_spill] sm:$0xff] %v5639_v11 }
 0x1ce   : > { %v5642_v36 = vpop.permute.xlu0 %1622 }
 0x1cf   : > { %9727 = vst [vmem:[#allocation145_spill] sm:$0xff] %v5642_v36 }
 0x1d0   : > { %1650 = vperm.xlu1 %4629, %v5238_v58   ;;  %v5645_v13 = vpop.permute.xlu1 %1261  ;;  %1722 = vperm.xlu0 %4650, %v5211_v63  }
 0x1d1   : > { %9728 = vst [vmem:[#allocation146_spill] sm:$0xff] %v5645_v13 }
 0x1d2   : > { %v5648_v35 = vpop.permute.xlu0 %1630 }
 0x1d3   : > { %9729 = vst [vmem:[#allocation147_spill] sm:$0xff] %v5648_v35 }
 0x1d4   : > { %1658 = vperm.xlu1 %4629, %v5248_v50   ;;  %v5651_v15 = vpop.permute.xlu1 %1265  ;;  %1730 = vperm.xlu0 %4650, %v5220_v18  }
 0x1d5   : > { %9730 = vst [vmem:[#allocation148_spill] sm:$0xff] %v5651_v15 }
 0x1d6   : > { %v5654_v9 = vpop.permute.xlu0 %1638 }
 0x1d7   : > { %9731 = vst [vmem:[#allocation149_spill] sm:$0xff] %v5654_v9 }
 0x1d8   : > { %1666 = vperm.xlu1 %4629, %v5257_v0   ;;  %v5657_v11 = vpop.permute.xlu1 %1273  ;;  %1738 = vperm.xlu0 %4650, %v5229_v61  }
 0x1d9   : > { %9732 = vst [vmem:[#allocation150_spill] sm:$0xff] %v5657_v11 }
 0x1da   : > { %v5660_v36 = vpop.permute.xlu0 %1646 }
 0x1db   : > { %9733 = vst [vmem:[#allocation151_spill] sm:$0xff] %v5660_v36 }
 0x1dc   : > { %4630 = vset.pattern.permute.xlu1 %v9710_v51  ;;  %v5663_v33 = vpop.permute.xlu1 %1281  ;;  %1746 = vperm.xlu0 %4650, %v5238_v58  }
 0x1dd   : > { %9734 = vst [vmem:[#allocation152_spill] sm:$0xff] %v5663_v33  ;;  %1706 = vperm.xlu1 %4630, %v5035_v17  }
 0x1de   : > { %v5667_v15 = vpop.permute.xlu0 %1654 }
 0x1df   : > { %9735 = vst [vmem:[#allocation153_spill] sm:$0xff] %v5667_v15 }
 0x1e0   : > { %v5669_v35 = vpop.permute.xlu1 %1289  ;;  %1754 = vperm.xlu0 %4650, %v5248_v50  }
 0x1e1   : > { %9736 = vst [vmem:[#allocation154_spill] sm:$0xff] %v5669_v35  ;;  %1714 = vperm.xlu1 %4630, %v5511_v49  }
 0x1e2   : > { %v5673_v11 = vpop.permute.xlu0 %1662 }
 0x1e3   : > { %9737 = vst [vmem:[#allocation155_spill] sm:$0xff] %v5673_v11 }
 0x1e4   : > { %v5675_v9 = vpop.permute.xlu1 %1297  ;;  %1762 = vperm.xlu0 %4650, %v5257_v0  }
 0x1e5   : > { %9738 = vst [vmem:[#allocation156_spill] sm:$0xff] %v5675_v9  ;;  %1718 = vperm.xlu1 %4630, %v5041_v19  }
 0x1e6   : > { %v5679_v33 = vpop.permute.xlu0 %1670 }
 0x1e7   : > { %9739 = vst [vmem:[#allocation157_spill] sm:$0xff] %v5679_v33 }
 0x1e8   : > { %v5681_v36 = vpop.permute.xlu1 %1305  ;;  %2651 = vperm.xlu0 %4650, %v5266_v38  }
 0x1e9   : > { %9740 = vst [vmem:[#allocation158_spill] sm:$0xff] %v5681_v36  ;;  %1726 = vperm.xlu1 %4630, %v5046_v20  }
 0x1ea   : > { %v5685_v35 = vpop.permute.xlu0 %2559 }
 0x1eb   : > { %9741 = vst [vmem:[#allocation159_spill] sm:$0xff] %v5685_v35 }
 0x1ec   : > { %v5687_v15 = vpop.permute.xlu1 %1313  ;;  %2663 = vperm.xlu0 %4650, %v5275_v55  }
 0x1ed   : > { %9742 = vst [vmem:[#allocation160_spill] sm:$0xff] %v5687_v15  ;;  %1734 = vperm.xlu1 %4630, %v5051_v21  }
 0x1ee   : > { %v5691_v9 = vpop.permute.xlu0 %2571 }
 0x1ef   : > { %9743 = vst [vmem:[#allocation161_spill] sm:$0xff] %v5691_v9 }
 0x1f0   : > { %2671 = vperm.xlu0 %4650, %v5284_v54  }
 0x1f1   : > { %1742 = vperm.xlu1 %4630, %v5056_v22   ;;  %v5695_v33 = vpop.permute.xlu1 %1424 }
 0x1f2   : > { %9744 = vst [vmem:[#allocation162_spill] sm:$0xff] %v5695_v33  ;;  %v5697_v36 = vpop.permute.xlu0 %2579 }
 0x1f3   : > { %9745 = vst [vmem:[#allocation163_spill] sm:$0xff] %v5697_v36 }
 0x1f4   : > { %2679 = vperm.xlu0 %4650, %v5293_v62  }
 0x1f5   : > { %1750 = vperm.xlu1 %4630, %v5061_v23   ;;  %v5701_v35 = vpop.permute.xlu1 %1429 }
 0x1f6   : > { %9746 = vst [vmem:[#allocation164_spill] sm:$0xff] %v5701_v35  ;;  %v5703_v15 = vpop.permute.xlu0 %2587  ;;  %v9752_v35 = vmov 4  }
 0x1f7   : > { %9747 = vst [vmem:[#allocation165_spill] sm:$0xff] %v5703_v15 }
 0x1f8   : > { %2687 = vperm.xlu0 %4650, %v5302_v53  }
 0x1f9   : > { %1758 = vperm.xlu1 %4630, %v5066_v24   ;;  %v5707_v9 = vpop.permute.xlu1 %1439 }
 0x1fa   : > { %9748 = vst [vmem:[#allocation166_spill] sm:$0xff] %v5707_v9  ;;  %v5709_v11 = vpop.permute.xlu0 %2595 }
 0x1fb   : > { %9749 = vst [vmem:[#allocation167_spill] sm:$0xff] %v5709_v11 }
 0x1fc   : > { %2695 = vperm.xlu0 %4650, %v5311_v52  }
 0x1fd   : > { %1766 = vperm.xlu1 %4630, %v5071_v25   ;;  %v5713_v36 = vpop.permute.xlu1 %1449 }
 0x1fe   : > { %9750 = vst [vmem:[#allocation168_spill] sm:$0xff] %v5713_v36  ;;  %v5715_v33 = vpop.permute.xlu0 %2603 }
 0x1ff   : > { %9751 = vst [vmem:[#allocation169_spill] sm:$0xff] %v5715_v33 }
 0x200   : > { %2703 = vperm.xlu0 %4650, %v5321_v59  }
 0x201   : > { %4631 = vset.pattern.permute.xlu1 %v9752_v35  ;;  %v5719_v15 = vpop.permute.xlu1 %1459 }
 0x202   : > { %9753 = vst [vmem:[#allocation170_spill] sm:$0xff] %v5719_v15  ;;  %1806 = vperm.xlu1 %4631, %v5202_v60   ;;  %v5722_v32 = vpop.permute.xlu0 %2611  ;;  %v6168_v15 = vld [vmem:[%s4968_s26 + $0x120] sm:$0xff] }
 0x203   : > { %9754 = vst [vmem:[#allocation171_spill] sm:$0xff] %v5722_v32 }
 0x204   : > { %2711 = vperm.xlu0 %4650, %v5330_v57  }
 0x205   : > { %v5725_v11 = vpop.permute.xlu1 %1469 }
 0x206   : > { %9755 = vst [vmem:[#allocation172_spill] sm:$0xff] %v5725_v11  ;;  %1810 = vperm.xlu1 %4631, %v5511_v49   ;;  %v5728_v9 = vpop.permute.xlu0 %3500  ;;  %v6131_v11 = vld [vmem:[%s4968_s26 + $0xd0] sm:$0xff] }
 0x207   : > { %9756 = vst [vmem:[#allocation173_spill] sm:$0xff] %v5728_v9 }
 0x208   : > { %3600 = vperm.xlu0 %4650, %v5339_v48  }
 0x209   : > { %v5731_v33 = vpop.permute.xlu1 %1479 }
 0x20a   : > { %9757 = vst [vmem:[#allocation174_spill] sm:$0xff] %v5731_v33  ;;  %1818 = vperm.xlu1 %4631, %v5211_v63   ;;  %v5734_v36 = vpop.permute.xlu0 %3512 }
 0x20b   : > { %9758 = vst [vmem:[#allocation175_spill] sm:$0xff] %v5734_v36 }
 0x20c   : > { %3612 = vperm.xlu0 %4650, %v5348_v47  }
 0x20d   : > { %v5737_v40 = vpop.permute.xlu1 %1489 }
 0x20e   : > { %9759 = vst [vmem:[#allocation176_spill] sm:$0xff] %v5737_v40  ;;  %1826 = vperm.xlu1 %4631, %v5220_v18   ;;  %v5740_v32 = vpop.permute.xlu0 %3520 }
 0x20f   : > { %9760 = vst [vmem:[#allocation177_spill] sm:$0xff] %v5740_v32 }
 0x210   : > { %3620 = vperm.xlu0 %4650, %v9761_v37  }
 0x212   : > { %1834 = vperm.xlu1 %4631, %v5229_v61   ;;  %v5744_v9 = vpop.permute.xlu1 %1514  ;;  %v5746_v13 = vpop.permute.xlu0 %3528 }
 0x213   : > { %9762 = vst [vmem:[#allocation54_spill] sm:$0xff] %v5744_v9  ;;  %9763 = vst [vmem:[#allocation178_spill] sm:$0xff] %v5746_v13 }
 0x214   : > { %3628 = vperm.xlu0 %4650, %v9764_v34  }
 0x216   : > { %1842 = vperm.xlu1 %4631, %v5238_v58   ;;  %v5750_v36 = vpop.permute.xlu1 %1522  ;;  %v5752_v26 = vpop.permute.xlu0 %3536 }
 0x217   : > { %9765 = vst [vmem:[#allocation57_spill] sm:$0xff] %v5750_v36  ;;  %9766 = vst [vmem:[#allocation179_spill] sm:$0xff] %v5752_v26  ;;  %v9773_v36 = vmov 5  }
 0x218   : > { %3636 = vperm.xlu0 %4650, %v9767_v41  }
 0x21a   : > { %1850 = vperm.xlu1 %4631, %v5248_v50   ;;  %v5756_v32 = vpop.permute.xlu1 %1526  ;;  %v5758_v31 = vpop.permute.xlu0 %3544 }
 0x21b   : > { %9768 = vst [vmem:[#allocation60_spill] sm:$0xff] %v5756_v32  ;;  %9769 = vst [vmem:[#allocation180_spill] sm:$0xff] %v5758_v31  ;;  %v5923_v32 = vld [vmem:[%s4968_s26 + $0xb8] sm:$0xff] }
 0x21c   : > { %3644 = vperm.xlu0 %4650, %v9770_v7  }
 0x21e   : > { %1858 = vperm.xlu1 %4631, %v5257_v0   ;;  %v5762_v13 = vpop.permute.xlu1 %1534  ;;  %v5764_v9 = vpop.permute.xlu0 %3552 }
 0x21f   : > { %9771 = vst [vmem:[#allocation63_spill] sm:$0xff] %v5762_v13  ;;  %9772 = vst [vmem:[#allocation181_spill] sm:$0xff] %v5764_v9 }
 0x220   : > { %3652 = vperm.xlu0 %4650, %v5393_v56  }
 0x222   : > { %4632 = vset.pattern.permute.xlu1 %v9773_v36  ;;  %v5768_v26 = vpop.permute.xlu1 %1542  ;;  %v5770_v5 = vpop.permute.xlu0 %3560 }
 0x223   : > { %9774 = vst [vmem:[#allocation182_spill] sm:$0xff] %v5768_v26  ;;  %9775 = vst [vmem:[#allocation183_spill] sm:$0xff] %v5770_v5  ;;  %1898 = vperm.xlu1 %4632, %v5035_v17  }
 0x224   : > { %4652 = vset.pattern.permute.xlu0 %v9752_v35 }
 0x225   : > { %857 = vperm.xlu0 %4652, %v4982_v4  }
 0x226   : > { %v5775_v31 = vpop.permute.xlu1 %1550 }
 0x227   : > { %9776 = vst [vmem:[#allocation184_spill] sm:$0xff] %v5775_v31  ;;  %1906 = vperm.xlu1 %4632, %v5511_v49   ;;  %v5778_v13 = vpop.permute.xlu0 %753 }
 0x228   : > { %9777 = vst [vmem:[#allocation185_spill] sm:$0xff] %v5778_v13 }
 0x229   : > { %869 = vperm.xlu0 %4652, %v4990_v6  }
 0x22a   : > { %v5781_v9 = vpop.permute.xlu1 %1558 }
 0x22b   : > { %9778 = vst [vmem:[#allocation186_spill] sm:$0xff] %v5781_v9  ;;  %1910 = vperm.xlu1 %4632, %v5041_v19   ;;  %v5784_v26 = vpop.permute.xlu0 %765  ;;  %v5911_v9 = vld [vmem:[%s4968_s26 + $0xa8] sm:$0xff] }
 0x22c   : > { %9779 = vst [vmem:[#allocation187_spill] sm:$0xff] %v5784_v26 }
 0x22d   : > { %877 = vperm.xlu0 %4652, %v4998_v8  }
 0x22e   : > { %v5787_v5 = vpop.permute.xlu1 %1566 }
 0x22f   : > { %9780 = vst [vmem:[#allocation188_spill] sm:$0xff] %v5787_v5  ;;  %1918 = vperm.xlu1 %4632, %v5046_v20   ;;  %v5790_v4 = vpop.permute.xlu0 %773 }
 0x230   : > { %9781 = vst [vmem:[#allocation189_spill] sm:$0xff] %v5790_v4 }
 0x231   : > { %885 = vperm.xlu0 %4652, %v5006_v10  }
 0x232   : > { %v5793_v31 = vpop.permute.xlu1 %1574 }
 0x233   : > { %9782 = vst [vmem:[#allocation190_spill] sm:$0xff] %v5793_v31  ;;  %1926 = vperm.xlu1 %4632, %v5051_v21   ;;  %v5796_v6 = vpop.permute.xlu0 %781  ;;  %v5899_v31 = vld [vmem:[%s4968_s26 + $0x98] sm:$0xff] }
 0x234   : > { %9783 = vst [vmem:[#allocation191_spill] sm:$0xff] %v5796_v6 }
 0x235   : > { %893 = vperm.xlu0 %4652, %v5014_v12  }
 0x237   : > { %1934 = vperm.xlu1 %4632, %v5056_v22   ;;  %v5800_v26 = vpop.permute.xlu1 %1614  ;;  %v5802_v8 = vpop.permute.xlu0 %789 }
 0x238   : > { %9784 = vst [vmem:[#allocation192_spill] sm:$0xff] %v5800_v26  ;;  %9785 = vst [vmem:[#allocation193_spill] sm:$0xff] %v5802_v8 }
 0x239   : > { %901 = vperm.xlu0 %4652, %v5022_v14  }
 0x23b   : > { %1942 = vperm.xlu1 %4632, %v5061_v23   ;;  %v5806_v4 = vpop.permute.xlu1 %1618  ;;  %v5808_v10 = vpop.permute.xlu0 %797 }
 0x23c   : > { %9786 = vst [vmem:[#allocation194_spill] sm:$0xff] %v5806_v4  ;;  %9787 = vst [vmem:[#allocation195_spill] sm:$0xff] %v5808_v10  ;;  %v9792_v4 = vmov 6  }
 0x23d   : > { %909 = vperm.xlu0 %4652, %v5030_v16  }
 0x23f   : > { %1950 = vperm.xlu1 %4632, %v5066_v24   ;;  %v5812_v6 = vpop.permute.xlu1 %1626  ;;  %v5814_v12 = vpop.permute.xlu0 %805 }
 0x240   : > { %9788 = vst [vmem:[#allocation196_spill] sm:$0xff] %v5812_v6  ;;  %9789 = vst [vmem:[#allocation197_spill] sm:$0xff] %v5814_v12  ;;  %v9807_v12 = vld [vmem:[#allocation3_spill] sm:$0xff] }
 0x241   : > { %1802 = vperm.xlu0 %4652, %v5035_v17  }
 0x243   : > { %1958 = vperm.xlu1 %4632, %v5071_v25   ;;  %v5818_v26 = vpop.permute.xlu1 %1634  ;;  %v5820_v14 = vpop.permute.xlu0 %813 }
 0x244   : > { %9790 = vst [vmem:[#allocation198_spill] sm:$0xff] %v5818_v26  ;;  %9791 = vst [vmem:[#allocation199_spill] sm:$0xff] %v5820_v14 }
 0x245   : > { %1814 = vperm.xlu0 %4652, %v5041_v19  }
 0x247   : > { %4633 = vset.pattern.permute.xlu1 %v9792_v4  ;;  %v5824_v10 = vpop.permute.xlu1 %1642  ;;  %v5826_v16 = vpop.permute.xlu0 %1710 }
 0x248   : > { %9793 = vst [vmem:[#allocation200_spill] sm:$0xff] %v5824_v10  ;;  %9794 = vst [vmem:[#allocation201_spill] sm:$0xff] %v5826_v16  ;;  %1998 = vperm.xlu1 %4633, %v5202_v60   ;;  %v6153_v10 = vld [vmem:[%s4968_s26 + $0xf0] sm:$0xff] }
 0x249   : > { %1822 = vperm.xlu0 %4652, %v5046_v20   ;;  %9868 = vst [vmem:[#allocation271_spill] sm:$0xff] %v6153_v10 }
 0x24b   : > { %v5830_v6 = vpop.permute.xlu1 %1650  ;;  %v5832_v17 = vpop.permute.xlu0 %1722 }
 0x24c   : > { %9795 = vst [vmem:[#allocation202_spill] sm:$0xff] %v5830_v6  ;;  %9796 = vst [vmem:[#allocation203_spill] sm:$0xff] %v5832_v17  ;;  %2002 = vperm.xlu1 %4633, %v5511_v49   ;;  %v5993_v6 = vld [vmem:[%s4968_s26 + $0x1d8] sm:$0xff] }
 0x24d   : > { %1830 = vperm.xlu0 %4652, %v5051_v21  }
 0x24f   : > { %v5836_v26 = vpop.permute.xlu1 %1658  ;;  %v5838_v19 = vpop.permute.xlu0 %1730 }
 0x250   : > { %9797 = vst [vmem:[#allocation204_spill] sm:$0xff] %v5836_v26  ;;  %9798 = vst [vmem:[#allocation205_spill] sm:$0xff] %v5838_v19  ;;  %2010 = vperm.xlu1 %4633, %v5211_v63   ;;  %v5957_v26 = vld [vmem:[%s4968_s26 + $0xe8] sm:$0xff] }
 0x251   : > { %1838 = vperm.xlu0 %4652, %v5056_v22  }
 0x253   : > { %v5842_v16 = vpop.permute.xlu1 %1666  ;;  %v5844_v14 = vpop.permute.xlu0 %1738 }
 0x254   : > { %9799 = vst [vmem:[#allocation206_spill] sm:$0xff] %v5842_v16  ;;  %9800 = vst [vmem:[#allocation207_spill] sm:$0xff] %v5844_v14  ;;  %2018 = vperm.xlu1 %4633, %v5220_v18   ;;  %v5951_v16 = vld [vmem:[%s4968_s26 + $0x198] sm:$0xff]  ;;  %v6079_v14 = vld [vmem:[%s4968_s26 + $0x68] sm:$0xff] }
 0x255   : > { %1846 = vperm.xlu0 %4652, %v5061_v23  }
 0x257   : > { %v5848_v20 = vpop.permute.xlu0 %1746 }
 0x258   : > { %9801 = vst [vmem:[#allocation208_spill] sm:$0xff] %v5848_v20  ;;  %2026 = vperm.xlu1 %4633, %v5229_v61   ;;  %v5851_v21 = vpop.permute.xlu1 %1706 }
 0x259   : > { %9802 = vst [vmem:[#allocation209_spill] sm:$0xff] %v5851_v21  ;;  %1854 = vperm.xlu0 %4652, %v5066_v24  }
 0x25b   : > { %v5854_v19 = vpop.permute.xlu0 %1754 }
 0x25c   : > { %9803 = vst [vmem:[#allocation210_spill] sm:$0xff] %v5854_v19  ;;  %2034 = vperm.xlu1 %4633, %v5238_v58   ;;  %v5857_v22 = vpop.permute.xlu1 %1714  ;;  %v5945_v19 = vld [vmem:[%s4968_s26 + $0xd8] sm:$0xff] }
 0x25d   : > { %9804 = vst [vmem:[#allocation211_spill] sm:$0xff] %v5857_v22  ;;  %1862 = vperm.xlu0 %4652, %v5071_v25   ;;  %v9811_v25 = vmov 7  }
 0x25f   : > { %v5860_v17 = vpop.permute.xlu0 %1762 }
 0x260   : > { %9805 = vst [vmem:[#allocation212_spill] sm:$0xff] %v5860_v17  ;;  %2042 = vperm.xlu1 %4633, %v5248_v50   ;;  %v5863_v23 = vpop.permute.xlu1 %1718  ;;  %v5933_v17 = vld [vmem:[%s4968_s26 + $0xc8] sm:$0xff] }
 0x261   : > { %9806 = vst [vmem:[#allocation213_spill] sm:$0xff] %v5863_v23  ;;  %2751 = vperm.xlu0 %4652, %v9807_v12   ;;  %v5878_v23 = vld [vmem:[%s4968_s26 + $0x80] sm:$0xff]  ;;  %v5882_v12 = vld [vmem:[%s4968_s26 + $0x130] sm:$0xff] }
 0x263   : > { %v5866_v24 = vpop.permute.xlu0 %2651 }
 0x264   : > { %9808 = vst [vmem:[#allocation3_spill] sm:$0xff] %v5866_v24  ;;  %2050 = vperm.xlu1 %4633, %v5257_v0   ;;  %v5869_v21 = vpop.permute.xlu1 %1726 }
 0x265   : > { %9809 = vst [vmem:[#allocation214_spill] sm:$0xff] %v5869_v21  ;;  %2763 = vperm.xlu0 %4652, %v5081_v28  }
 0x267   : > { %v5872_v22 = vpop.permute.xlu0 %2663 }
 0x268   : > { %9810 = vst [vmem:[#allocation215_spill] sm:$0xff] %v5872_v22  ;;  %4634 = vset.pattern.permute.xlu1 %v9811_v25  ;;  %v5875_v8 = vpop.permute.xlu1 %1734  ;;  %v5891_v22 = vld [vmem:[%s4968_s26 + $0x140] sm:$0xff] }
 0x269   : > { %9812 = vst [vmem:[#allocation216_spill] sm:$0xff] %v5875_v8  ;;  %2090 = vperm.xlu1 %4634, %v5878_v23   ;;  %2771 = vperm.xlu0 %4652, %v5882_v12  }
 0x26b   : > { %v5885_v24 = vpop.permute.xlu0 %2671 }
 0x26c   : > { %9813 = vst [vmem:[#allocation217_spill] sm:$0xff] %v5885_v24  ;;  %v5887_v28 = vpop.permute.xlu1 %1742  ;;  %v5903_v24 = vld [vmem:[%s4968_s26 + $0x150] sm:$0xff] }
 0x26d   : > { %9814 = vst [vmem:[#allocation218_spill] sm:$0xff] %v5887_v28  ;;  %2098 = vperm.xlu1 %4634, %v5511_v49   ;;  %2779 = vperm.xlu0 %4652, %v5891_v22  }
 0x26f   : > { %v5894_v8 = vpop.permute.xlu0 %2679 }
 0x270   : > { %9815 = vst [vmem:[#allocation219_spill] sm:$0xff] %v5894_v8  ;;  %v5896_v21 = vpop.permute.xlu1 %1750  ;;  %v5915_v8 = vld [vmem:[%s4968_s26 + $0x160] sm:$0xff] }
 0x271   : > { %9816 = vst [vmem:[#allocation220_spill] sm:$0xff] %v5896_v21  ;;  %2102 = vperm.xlu1 %4634, %v5899_v31   ;;  %2787 = vperm.xlu0 %4652, %v5903_v24  }
 0x273   : > { %v5906_v28 = vpop.permute.xlu0 %2687 }
 0x274   : > { %9817 = vst [vmem:[#allocation221_spill] sm:$0xff] %v5906_v28  ;;  %v5908_v5 = vpop.permute.xlu1 %1758  ;;  %v5927_v28 = vld [vmem:[%s4968_s26 + $0x170] sm:$0xff] }
 0x275   : > { %9818 = vst [vmem:[#allocation222_spill] sm:$0xff] %v5908_v5  ;;  %2110 = vperm.xlu1 %4634, %v5911_v9   ;;  %2795 = vperm.xlu0 %4652, %v5915_v8  }
 0x277   : > { %v5918_v21 = vpop.permute.xlu0 %2695 }
 0x278   : > { %9819 = vst [vmem:[#allocation223_spill] sm:$0xff] %v5918_v21  ;;  %v5920_v13 = vpop.permute.xlu1 %1766 }
 0x279   : > { %9820 = vst [vmem:[#allocation224_spill] sm:$0xff] %v5920_v13  ;;  %2118 = vperm.xlu1 %4634, %v5923_v32   ;;  %2803 = vperm.xlu0 %4652, %v5927_v28   ;;  %v5939_v13 = vld [vmem:[%s4968_s26 + $0x180] sm:$0xff] }
 0x27b   : > { %v5930_v5 = vpop.permute.xlu0 %2703 }
 0x27c   : > { %9821 = vst [vmem:[#allocation225_spill] sm:$0xff] %v5930_v5 }
 0x27d   : > { %2126 = vperm.xlu1 %4634, %v5933_v17   ;;  %v5936_v21 = vpop.permute.xlu1 %1806  ;;  %3692 = vperm.xlu0 %4652, %v5939_v13  }
 0x27e   : > { %9822 = vst [vmem:[#allocation226_spill] sm:$0xff] %v5936_v21 }
 0x27f   : > { %v5942_v29 = vpop.permute.xlu0 %2711 }
 0x280   : > { %9823 = vst [vmem:[#allocation227_spill] sm:$0xff] %v5942_v29  ;;  %v5963_v29 = vld [vmem:[%s4968_s26 + $0x1a8] sm:$0xff] }
 0x281   : > { %2134 = vperm.xlu1 %4634, %v5945_v19   ;;  %v5948_v5 = vpop.permute.xlu1 %1810  ;;  %3704 = vperm.xlu0 %4652, %v5951_v16  }
 0x282   : > { %9824 = vst [vmem:[#allocation228_spill] sm:$0xff] %v5948_v5  ;;  %v5969_v5 = vld [vmem:[%s4968_s26 + $0xf8] sm:$0xff] }
 0x283   : > { %v5954_v21 = vpop.permute.xlu0 %3600 }
 0x284   : > { %9825 = vst [vmem:[#allocation229_spill] sm:$0xff] %v5954_v21  ;;  %v5975_v21 = vld [vmem:[%s4968_s26 + $0x1b8] sm:$0xff] }
 0x285   : > { %2142 = vperm.xlu1 %4634, %v5957_v26   ;;  %v5960_v40 = vpop.permute.xlu1 %1818  ;;  %3712 = vperm.xlu0 %4652, %v5963_v29  }
 0x286   : > { %9826 = vst [vmem:[#allocation230_spill] sm:$0xff] %v5960_v40  ;;  %v9830_v40 = vmov 8  }
 0x287   : > { %v5966_v20 = vpop.permute.xlu0 %3612 }
 0x288   : > { %9827 = vst [vmem:[#allocation231_spill] sm:$0xff] %v5966_v20 }
 0x289   : > { %2150 = vperm.xlu1 %4634, %v5969_v5   ;;  %v5972_v3 = vpop.permute.xlu1 %1826  ;;  %3720 = vperm.xlu0 %4652, %v5975_v21  }
 0x28a   : > { %9828 = vst [vmem:[#allocation232_spill] sm:$0xff] %v5972_v3 }
 0x28b   : > { %v5978_v44 = vpop.permute.xlu0 %3620 }
 0x28c   : > { %9829 = vst [vmem:[#allocation233_spill] sm:$0xff] %v5978_v44 }
 0x28d   : > { %4635 = vset.pattern.permute.xlu1 %v9830_v40  ;;  %v5981_v33 = vpop.permute.xlu1 %1834  ;;  %3728 = vperm.xlu0 %4652, %v5984_v2  }
 0x28e   : > { %9831 = vst [vmem:[#allocation234_spill] sm:$0xff] %v5981_v33  ;;  %2190 = vperm.xlu1 %4635, %v5202_v60  }
 0x28f   : > { %v5988_v20 = vpop.permute.xlu0 %3628 }
 0x290   : > { %9832 = vst [vmem:[#allocation235_spill] sm:$0xff] %v5988_v20 }
 0x291   : > { %v5990_v3 = vpop.permute.xlu1 %1842  ;;  %3736 = vperm.xlu0 %4652, %v5993_v6  }
 0x292   : > { %9833 = vst [vmem:[#allocation236_spill] sm:$0xff] %v5990_v3  ;;  %2194 = vperm.xlu1 %4635, %v5511_v49   ;;  %v6011_v3 = vld [vmem:[%s4968_s26 + $0x1f8] sm:$0xff] }
 0x293   : > { %v5997_v44 = vpop.permute.xlu0 %3636 }
 0x294   : > { %9834 = vst [vmem:[#allocation237_spill] sm:$0xff] %v5997_v44 }
 0x295   : > { %v5999_v33 = vpop.permute.xlu1 %1850  ;;  %3744 = vperm.xlu0 %4652, %v6002_v27  }
 0x296   : > { %9835 = vst [vmem:[#allocation238_spill] sm:$0xff] %v5999_v33  ;;  %2202 = vperm.xlu1 %4635, %v5211_v63   ;;  %v6022_v63 = vld [vmem:[%s4968_s26] sm:$0xff]  ;;  %v6070_v33 = vld [vmem:[%s4968_s26 + $0x58] sm:$0xff] }
 0x297   : > { %v6006_v60 = vpop.permute.xlu0 %3644 }
 0x298   : > { %9836 = vst [vmem:[#allocation239_spill] sm:$0xff] %v6006_v60 }
 0x299   : > { %v6008_v20 = vpop.permute.xlu1 %1858  ;;  %3752 = vperm.xlu0 %4652, %v6011_v3  }
 0x29a   : > { %9837 = vst [vmem:[#allocation240_spill] sm:$0xff] %v6008_v20  ;;  %2210 = vperm.xlu1 %4635, %v5220_v18   ;;  %v6031_v18 = vld [vmem:[%s4968_s26 + $0x18] sm:$0xff] }
 0x29b   : > { %v6015_v49 = vpop.permute.xlu0 %3652 }
 0x29c   : > { %9838 = vst [vmem:[#allocation241_spill] sm:$0xff] %v6015_v49 }
 0x29d   : > { %4654 = vset.pattern.permute.xlu0 %v9773_v36 }
 0x29e   : > { %2218 = vperm.xlu1 %4635, %v5229_v61   ;;  %v6019_v44 = vpop.permute.xlu1 %1898  ;;  %953 = vperm.xlu0 %4654, %v6022_v63  }
 0x29f   : > { %9839 = vst [vmem:[#allocation242_spill] sm:$0xff] %v6019_v44  ;;  %v6040_v44 = vld [vmem:[%s4968_s26 + $0x28] sm:$0xff] }
 0x2a0   : > { %v6025_v60 = vpop.permute.xlu0 %857 }
 0x2a1   : > { %9840 = vst [vmem:[#allocation243_spill] sm:$0xff] %v6025_v60  ;;  %v6049_v60 = vld [vmem:[%s4968_s26 + $0x38] sm:$0xff] }
 0x2a2   : > { %2226 = vperm.xlu1 %4635, %v5238_v58   ;;  %v6028_v20 = vpop.permute.xlu1 %1906  ;;  %965 = vperm.xlu0 %4654, %v6031_v18  }
 0x2a3   : > { %9841 = vst [vmem:[#allocation244_spill] sm:$0xff] %v6028_v20 }
 0x2a4   : > { %v6034_v49 = vpop.permute.xlu0 %869 }
 0x2a5   : > { %9842 = vst [vmem:[#allocation245_spill] sm:$0xff] %v6034_v49  ;;  %v6058_v49 = vld [vmem:[%s4968_s26 + $0x48] sm:$0xff] }
 0x2a6   : > { %2234 = vperm.xlu1 %4635, %v5248_v50   ;;  %v6037_v61 = vpop.permute.xlu1 %1910  ;;  %973 = vperm.xlu0 %4654, %v6040_v44  }
 0x2a7   : > { %9843 = vst [vmem:[#allocation246_spill] sm:$0xff] %v6037_v61 }
 0x2a8   : > { %v6043_v58 = vpop.permute.xlu0 %877 }
 0x2a9   : > { %9844 = vst [vmem:[#allocation247_spill] sm:$0xff] %v6043_v58 }
 0x2aa   : > { %2242 = vperm.xlu1 %4635, %v5257_v0   ;;  %v6046_v20 = vpop.permute.xlu1 %1918  ;;  %981 = vperm.xlu0 %4654, %v6049_v60  }
 0x2ab   : > { %9845 = vst [vmem:[#allocation248_spill] sm:$0xff] %v6046_v20  ;;  %v6065_v20 = vld [vmem:[%s4968_s26 + $0x110] sm:$0xff] }
 0x2ac   : > { %v6052_v50 = vpop.permute.xlu0 %885 }
 0x2ad   : > { %9846 = vst [vmem:[#allocation249_spill] sm:$0xff] %v6052_v50 }
 0x2ae   : > { %4636 = vset.pattern.permute.xlu1 %v9680_v45  ;;  %v6055_v61 = vpop.permute.xlu1 %1926  ;;  %989 = vperm.xlu0 %4654, %v6058_v49   ;;  %v6183_v45 = vld [vmem:[%s4968_s26 + $0x128] sm:$0xff] }
 0x2af   : > { %9847 = vst [vmem:[#allocation250_spill] sm:$0xff] %v6055_v61  ;;  %2364 = vperm.xlu1 %4636, %v5266_v38  }
 0x2b0   : > { %v6062_v0 = vpop.permute.xlu0 %893 }
 0x2b1   : > { %9848 = vst [vmem:[#allocation251_spill] sm:$0xff] %v6062_v0  ;;  %v6088_v0 = vld [vmem:[%s4968_s26 + $0x78] sm:$0xff] }
 0x2b2   : > { %v6067_v58 = vpop.permute.xlu1 %1934  ;;  %997 = vperm.xlu0 %4654, %v6070_v33  }
 0x2b3   : > { %9849 = vst [vmem:[#allocation252_spill] sm:$0xff] %v6067_v58  ;;  %2374 = vperm.xlu1 %4636, %v6065_v20  }
 0x2b4   : > { %v6074_v61 = vpop.permute.xlu0 %901 }
 0x2b5   : > { %9850 = vst [vmem:[#allocation253_spill] sm:$0xff] %v6074_v61 }
 0x2b6   : > { %v6076_v50 = vpop.permute.xlu1 %1942  ;;  %1005 = vperm.xlu0 %4654, %v6079_v14  }
 0x2b7   : > { %9851 = vst [vmem:[#allocation254_spill] sm:$0xff] %v6076_v50  ;;  %2379 = vperm.xlu1 %4636, %v5275_v55  }
 0x2b8   : > { %v6083_v38 = vpop.permute.xlu0 %909 }
 0x2b9   : > { %9852 = vst [vmem:[#allocation255_spill] sm:$0xff] %v6083_v38  ;;  %v6122_v38 = vld [vmem:[%s4968_s26 + $0xc0] sm:$0xff] }
 0x2ba   : > { %v6085_v58 = vpop.permute.xlu1 %1950  ;;  %1013 = vperm.xlu0 %4654, %v6088_v0  }
 0x2bb   : > { %9853 = vst [vmem:[#allocation256_spill] sm:$0xff] %v6085_v58  ;;  %2389 = vperm.xlu1 %4636, %v5284_v54   ;;  %v6104_v58 = vld [vmem:[%s4968_s26 + $0xa0] sm:$0xff] }
 0x2bc   : > { %v6092_v61 = vpop.permute.xlu0 %1802 }
 0x2bd   : > { %9854 = vst [vmem:[#allocation257_spill] sm:$0xff] %v6092_v61 }
 0x2be   : > { %v6094_v50 = vpop.permute.xlu1 %1958  ;;  %1902 = vperm.xlu0 %4654, %v6097_v42  }
 0x2bf   : > { %9855 = vst [vmem:[#allocation258_spill] sm:$0xff] %v6094_v50  ;;  %2399 = vperm.xlu1 %4636, %v5293_v62   ;;  %v6113_v50 = vld [vmem:[%s4968_s26 + $0xb0] sm:$0xff] }
 0x2c0   : > { %v6101_v55 = vpop.permute.xlu0 %1814 }
 0x2c1   : > { %9856 = vst [vmem:[#allocation259_spill] sm:$0xff] %v6101_v55 }
 0x2c2   : > { %1914 = vperm.xlu0 %4654, %v6104_v58  }
 0x2c3   : > { %2409 = vperm.xlu1 %4636, %v5302_v53   ;;  %v6108_v54 = vpop.permute.xlu1 %1998 }
 0x2c4   : > { %9857 = vst [vmem:[#allocation260_spill] sm:$0xff] %v6108_v54  ;;  %v6110_v61 = vpop.permute.xlu0 %1822 }
 0x2c5   : > { %9858 = vst [vmem:[#allocation261_spill] sm:$0xff] %v6110_v61 }
 0x2c6   : > { %1922 = vperm.xlu0 %4654, %v6113_v50  }
 0x2c7   : > { %2419 = vperm.xlu1 %4636, %v5311_v52   ;;  %v6117_v62 = vpop.permute.xlu1 %2002 }
 0x2c8   : > { %9859 = vst [vmem:[#allocation262_spill] sm:$0xff] %v6117_v62  ;;  %v6119_v55 = vpop.permute.xlu0 %1830 }
 0x2c9   : > { %9860 = vst [vmem:[#allocation263_spill] sm:$0xff] %v6119_v55 }
 0x2ca   : > { %1930 = vperm.xlu0 %4654, %v6122_v38  }
 0x2cb   : > { %2429 = vperm.xlu1 %4636, %v5321_v59   ;;  %v6126_v54 = vpop.permute.xlu1 %2010 }
 0x2cc   : > { %9861 = vst [vmem:[#allocation264_spill] sm:$0xff] %v6126_v54  ;;  %v6128_v61 = vpop.permute.xlu0 %1838 }
 0x2cd   : > { %9862 = vst [vmem:[#allocation265_spill] sm:$0xff] %v6128_v61  ;;  %v6147_v61 = vld [vmem:[%s4968_s26 + $0x108] sm:$0xff] }
 0x2ce   : > { %1938 = vperm.xlu0 %4654, %v6131_v11  }
 0x2cf   : > { %2439 = vperm.xlu1 %4636, %v5330_v57   ;;  %v6135_v62 = vpop.permute.xlu1 %2018 }
 0x2d0   : > { %9863 = vst [vmem:[#allocation266_spill] sm:$0xff] %v6135_v62  ;;  %v6137_v55 = vpop.permute.xlu0 %1846 }
 0x2d1   : > { %9864 = vst [vmem:[#allocation267_spill] sm:$0xff] %v6137_v55 }
 0x2d2   : > { %1946 = vperm.xlu0 %4654, %v6140_v46  }
 0x2d3   : > { %4637 = vset.pattern.permute.xlu1 %v9698_v30  ;;  %v6144_v54 = vpop.permute.xlu1 %2026  ;;  %v6174_v30 = vld [vmem:[%s4968_s26 + $0x118] sm:$0xff] }
 0x2d4   : > { %9866 = vst [vmem:[#allocation269_spill] sm:$0xff] %v6144_v54  ;;  %2463 = vperm.xlu1 %4637, %v6147_v61   ;;  %v6150_v1 = vpop.permute.xlu0 %1854 }
 0x2d5   : > { %9867 = vst [vmem:[#allocation270_spill] sm:$0xff] %v6150_v1 }
 0x2d6   : > { %1954 = vperm.xlu0 %4654, %v6153_v10  }
 0x2d7   : > { %v6156_v62 = vpop.permute.xlu1 %2034 }
 0x2d8   : > { %9869 = vst [vmem:[#allocation272_spill] sm:$0xff] %v6156_v62  ;;  %2467 = vperm.xlu1 %4637, %v6065_v20   ;;  %v6159_v55 = vpop.permute.xlu0 %1862 }
 0x2d9   : > { %9870 = vst [vmem:[#allocation273_spill] sm:$0xff] %v6159_v55 }
 0x2da   : > { %2843 = vperm.xlu0 %4654, %v6162_v39  }
 0x2db   : > { %v6165_v54 = vpop.permute.xlu1 %2042 }
 0x2dc   : > { %9871 = vst [vmem:[#allocation274_spill] sm:$0xff] %v6165_v54  ;;  %2475 = vperm.xlu1 %4637, %v6168_v15   ;;  %v6171_v1 = vpop.permute.xlu0 %2751 }
 0x2dd   : > { %9872 = vst [vmem:[#allocation275_spill] sm:$0xff] %v6171_v1  ;;  %v6192_v1 = vld [vmem:[%s4968_s26 + $0x138] sm:$0xff] }
 0x2de   : > { %2855 = vperm.xlu0 %4654, %v6174_v30  }
 0x2df   : > { %v6177_v62 = vpop.permute.xlu1 %2050 }
 0x2e0   : > { %9873 = vst [vmem:[#allocation276_spill] sm:$0xff] %v6177_v62  ;;  %2483 = vperm.xlu1 %4637, %v5882_v12   ;;  %v6180_v55 = vpop.permute.xlu0 %2763 }
 0x2e1   : > { %9874 = vst [vmem:[#allocation277_spill] sm:$0xff] %v6180_v55 }
 0x2e2   : > { %2863 = vperm.xlu0 %4654, %v6183_v45  }
 0x2e4   : > { %2491 = vperm.xlu1 %4637, %v5891_v22   ;;  %v6187_v54 = vpop.permute.xlu1 %2090  ;;  %v6189_v10 = vpop.permute.xlu0 %2771 }
 0x2e5   : > { %9875 = vst [vmem:[#allocation278_spill] sm:$0xff] %v6187_v54  ;;  %9876 = vst [vmem:[#allocation279_spill] sm:$0xff] %v6189_v10 }
 0x2e6   : > { %2871 = vperm.xlu0 %4654, %v6192_v1  }
 0x2e8   : > { %2499 = vperm.xlu1 %4637, %v5903_v24   ;;  %v6196_v62 = vpop.permute.xlu1 %2098  ;;  %v6198_v40 = vpop.permute.xlu0 %2779 }
 0x2e9   : > { %9877 = vst [vmem:[#allocation280_spill] sm:$0xff] %v6196_v62  ;;  %9878 = vst [vmem:[#allocation281_spill] sm:$0xff] %v6198_v40  ;;  %v6327_v62 = vld [vmem:[%s4968_s26 + $0x60] sm:$0xff] }
 0x2ea   : > { %2879 = vperm.xlu0 %4654, %v5302_v53  }
 0x2ec   : > { %2507 = vperm.xlu1 %4637, %v5915_v8   ;;  %v6202_v55 = vpop.permute.xlu1 %2102  ;;  %v6204_v46 = vpop.permute.xlu0 %2787 }
 0x2ed   : > { %9879 = vst [vmem:[#allocation282_spill] sm:$0xff] %v6202_v55  ;;  %9880 = vst [vmem:[#allocation283_spill] sm:$0xff] %v6204_v46  ;;  %v6318_v55 = vld [vmem:[%s4968_s26 + $0x50] sm:$0xff] }
 0x2ee   : > { %2887 = vperm.xlu0 %4654, %v5311_v52  }
 0x2f0   : > { %2515 = vperm.xlu1 %4637, %v5927_v28   ;;  %v6208_v10 = vpop.permute.xlu1 %2110  ;;  %v6210_v54 = vpop.permute.xlu0 %2795 }
 0x2f1   : > { %9881 = vst [vmem:[#allocation284_spill] sm:$0xff] %v6208_v10  ;;  %9882 = vst [vmem:[#allocation285_spill] sm:$0xff] %v6210_v54 }
 0x2f2   : > { %2895 = vperm.xlu0 %4654, %v5321_v59  }
 0x2f4   : > { %4638 = vset.pattern.permute.xlu1 %v9647_v43  ;;  %v6214_v40 = vpop.permute.xlu1 %2118  ;;  %v6216_v53 = vpop.permute.xlu0 %2803 }
 0x2f5   : > { %9883 = vst [vmem:[#allocation286_spill] sm:$0xff] %v6214_v40  ;;  %9884 = vst [vmem:[#allocation287_spill] sm:$0xff] %v6216_v53  ;;  %2555 = vperm.xlu1 %4638, %v6162_v39   ;;  %v6309_v40 = vld [vmem:[%s4968_s26 + $0x40] sm:$0xff] }
 0x2f6   : > { %2903 = vperm.xlu0 %4654, %v5330_v57  }
 0x2f8   : > { %v6220_v46 = vpop.permute.xlu1 %2126  ;;  %v6222_v52 = vpop.permute.xlu0 %3692 }
 0x2f9   : > { %9885 = vst [vmem:[#allocation288_spill] sm:$0xff] %v6220_v46  ;;  %9886 = vst [vmem:[#allocation289_spill] sm:$0xff] %v6222_v52  ;;  %2563 = vperm.xlu1 %4638, %v6065_v20  }
 0x2fa   : > { %3792 = vperm.xlu0 %4654, %v5339_v48  }
 0x2fc   : > { %v6226_v59 = vpop.permute.xlu1 %2134  ;;  %v6228_v54 = vpop.permute.xlu0 %3704 }
 0x2fd   : > { %9887 = vst [vmem:[#allocation290_spill] sm:$0xff] %v6226_v59  ;;  %9888 = vst [vmem:[#allocation291_spill] sm:$0xff] %v6228_v54  ;;  %2567 = vperm.xlu1 %4638, %v6174_v30   ;;  %v6300_v59 = vld [vmem:[%s4968_s26 + $0x30] sm:$0xff] }
 0x2fe   : > { %3804 = vperm.xlu0 %4654, %v5348_v47   ;;  %v6247_v47 = vld [vmem:[%s4968_s26 + $0x148] sm:$0xff] }
 0x300   : > { %v6232_v53 = vpop.permute.xlu1 %2142  ;;  %v6234_v57 = vpop.permute.xlu0 %3712 }
 0x301   : > { %9889 = vst [vmem:[#allocation292_spill] sm:$0xff] %v6232_v53  ;;  %9890 = vst [vmem:[#allocation293_spill] sm:$0xff] %v6234_v57  ;;  %2575 = vperm.xlu1 %4638, %v6183_v45  }
 0x302   : > { %3812 = vperm.xlu0 %4654, %v9761_v37  }
 0x304   : > { %v6238_v52 = vpop.permute.xlu1 %2150  ;;  %v6240_v48 = vpop.permute.xlu0 %3720 }
 0x305   : > { %9891 = vst [vmem:[#allocation294_spill] sm:$0xff] %v6238_v52  ;;  %9892 = vst [vmem:[#allocation295_spill] sm:$0xff] %v6240_v48  ;;  %2583 = vperm.xlu1 %4638, %v6192_v1   ;;  %v6256_v52 = vld [vmem:[%s4968_s26 + $0x158] sm:$0xff] }
 0x306   : > { %3820 = vperm.xlu0 %4654, %v9764_v34  }
 0x308   : > { %v6244_v54 = vpop.permute.xlu0 %3728 }
 0x309   : > { %9893 = vst [vmem:[#allocation296_spill] sm:$0xff] %v6244_v54  ;;  %2591 = vperm.xlu1 %4638, %v6247_v47   ;;  %v6250_v57 = vpop.permute.xlu1 %2190  ;;  %v6265_v54 = vld [vmem:[%s4968_s26 + $0x168] sm:$0xff] }
 0x30a   : > { %9894 = vst [vmem:[#allocation297_spill] sm:$0xff] %v6250_v57  ;;  %3828 = vperm.xlu0 %4654, %v9767_v41  }
 0x30c   : > { %v6253_v37 = vpop.permute.xlu0 %3736 }
 0x30d   : > { %9895 = vst [vmem:[#allocation298_spill] sm:$0xff] %v6253_v37  ;;  %2599 = vperm.xlu1 %4638, %v6256_v52   ;;  %v6259_v48 = vpop.permute.xlu1 %2194  ;;  %v6274_v37 = vld [vmem:[%s4968_s26 + $0x178] sm:$0xff] }
 0x30e   : > { %9896 = vst [vmem:[#allocation299_spill] sm:$0xff] %v6259_v48  ;;  %3836 = vperm.xlu0 %4654, %v9770_v7   ;;  %v6281_v7 = vld [vmem:[%s4968_s26 + $0x8] sm:$0xff] }
 0x310   : > { %v6262_v34 = vpop.permute.xlu0 %3744 }
 0x311   : > { %9897 = vst [vmem:[#allocation300_spill] sm:$0xff] %v6262_v34  ;;  %2607 = vperm.xlu1 %4638, %v6265_v54   ;;  %v6268_v57 = vpop.permute.xlu1 %2202 }
 0x312   : > { %9898 = vst [vmem:[#allocation301_spill] sm:$0xff] %v6268_v57  ;;  %3844 = vperm.xlu0 %4654, %v5393_v56  }
 0x314   : > { %v6271_v41 = vpop.permute.xlu0 %3752 }
 0x315   : > { %9899 = vst [vmem:[#allocation302_spill] sm:$0xff] %v6271_v41  ;;  %2615 = vperm.xlu1 %4638, %v6274_v37   ;;  %v6277_v53 = vpop.permute.xlu1 %2210  ;;  %v6291_v41 = vld [vmem:[%s4968_s26 + $0x20] sm:$0xff] }
 0x316   : > { %9900 = vst [vmem:[#allocation303_spill] sm:$0xff] %v6277_v53  ;;  %4656 = vset.pattern.permute.xlu0 %v9792_v4 }
 0x317   : > { %1057 = vperm.xlu0 %4656, %v6281_v7  }
 0x319   : > { %4639 = vset.pattern.permute.xlu1 %v9710_v51  ;;  %v6285_v57 = vpop.permute.xlu1 %2218  ;;  %v6287_v56 = vpop.permute.xlu0 %953 }
 0x31a   : > { %9901 = vst [vmem:[#allocation304_spill] sm:$0xff] %v6285_v57  ;;  %9902 = vst [vmem:[#allocation305_spill] sm:$0xff] %v6287_v56  ;;  %2655 = vperm.xlu1 %4639, %v6147_v61  }
 0x31b   : > { %1069 = vperm.xlu0 %4656, %v6291_v41  }
 0x31d   : > { %v6294_v53 = vpop.permute.xlu1 %2226  ;;  %v6296_v34 = vpop.permute.xlu0 %965 }
 0x31e   : > { %9903 = vst [vmem:[#allocation306_spill] sm:$0xff] %v6294_v53  ;;  %9904 = vst [vmem:[#allocation307_spill] sm:$0xff] %v6296_v34  ;;  %2659 = vperm.xlu1 %4639, %v6065_v20  }
 0x31f   : > { %1077 = vperm.xlu0 %4656, %v6300_v59  }
 0x321   : > { %v6303_v46 = vpop.permute.xlu1 %2234  ;;  %v6305_v56 = vpop.permute.xlu0 %973 }
 0x322   : > { %9905 = vst [vmem:[#allocation308_spill] sm:$0xff] %v6303_v46  ;;  %9906 = vst [vmem:[#allocation309_spill] sm:$0xff] %v6305_v56  ;;  %2667 = vperm.xlu1 %4639, %v6168_v15  }
 0x323   : > { %1085 = vperm.xlu0 %4656, %v6309_v40  }
 0x325   : > { %v6312_v10 = vpop.permute.xlu1 %2242  ;;  %v6314_v34 = vpop.permute.xlu0 %981 }
 0x326   : > { %9907 = vst [vmem:[#allocation310_spill] sm:$0xff] %v6312_v10  ;;  %9908 = vst [vmem:[#allocation311_spill] sm:$0xff] %v6314_v34  ;;  %2675 = vperm.xlu1 %4639, %v5882_v12   ;;  %v6336_v10 = vld [vmem:[%s4968_s26 + $0x70] sm:$0xff] }
 0x327   : > { %1093 = vperm.xlu0 %4656, %v6318_v55  }
 0x329   : > { %v6321_v48 = vpop.permute.xlu0 %989 }
 0x32a   : > { %9909 = vst [vmem:[#allocation312_spill] sm:$0xff] %v6321_v48  ;;  %2683 = vperm.xlu1 %4639, %v5891_v22   ;;  %v6324_v56 = vpop.permute.xlu1 %2364 }
 0x32b   : > { %9910 = vst [vmem:[#allocation313_spill] sm:$0xff] %v6324_v56  ;;  %1101 = vperm.xlu0 %4656, %v6327_v62  }
 0x32d   : > { %v6330_v46 = vpop.permute.xlu0 %997 }
 0x32e   : > { %9911 = vst [vmem:[#allocation314_spill] sm:$0xff] %v6330_v46  ;;  %2691 = vperm.xlu1 %4639, %v5903_v24   ;;  %v6333_v34 = vpop.permute.xlu1 %2374 }
 0x32f   : > { %9912 = vst [vmem:[#allocation315_spill] sm:$0xff] %v6333_v34  ;;  %1109 = vperm.xlu0 %4656, %v6336_v10  }
 0x331   : > { %v6339_v53 = vpop.permute.xlu0 %1005 }
 0x332   : > { %9913 = vst [vmem:[#allocation316_spill] sm:$0xff] %v6339_v53  ;;  %2699 = vperm.xlu1 %4639, %v5915_v8   ;;  %v6342_v48 = vpop.permute.xlu1 %2379 }
 0x333   : > { %9914 = vst [vmem:[#allocation317_spill] sm:$0xff] %v6342_v48  ;;  %1994 = vperm.xlu0 %4656, %v5878_v23  }
 0x335   : > { %v6345_v56 = vpop.permute.xlu0 %1013 }
 0x336   : > { %9915 = vst [vmem:[#allocation318_spill] sm:$0xff] %v6345_v56  ;;  %2707 = vperm.xlu1 %4639, %v5927_v28   ;;  %v6348_v46 = vpop.permute.xlu1 %2389 }
 0x337   : > { %9916 = vst [vmem:[#allocation319_spill] sm:$0xff] %v6348_v46  ;;  %2006 = vperm.xlu0 %4656, %v5899_v31  }
 0x339   : > { %v6351_v34 = vpop.permute.xlu0 %1902 }
 0x33a   : > { %9917 = vst [vmem:[#allocation320_spill] sm:$0xff] %v6351_v34  ;;  %4640 = vset.pattern.permute.xlu1 %v9752_v35  ;;  %v6354_v57 = vpop.permute.xlu1 %2399 }
 0x33b   : > { %9918 = vst [vmem:[#allocation321_spill] sm:$0xff] %v6354_v57  ;;  %2747 = vperm.xlu1 %4640, %v6162_v39   ;;  %2014 = vperm.xlu0 %4656, %v5911_v9  }
 0x33d   : > { %v6358_v48 = vpop.permute.xlu0 %1914 }
 0x33e   : > { %9919 = vst [vmem:[#allocation322_spill] sm:$0xff] %v6358_v48  ;;  %v6360_v53 = vpop.permute.xlu1 %2409 }
 0x33f   : > { %9920 = vst [vmem:[#allocation323_spill] sm:$0xff] %v6360_v53  ;;  %2755 = vperm.xlu1 %4640, %v6065_v20   ;;  %2022 = vperm.xlu0 %4656, %v5923_v32  }
 0x341   : > { %v6364_v46 = vpop.permute.xlu0 %1922 }
 0x342   : > { %9921 = vst [vmem:[#allocation324_spill] sm:$0xff] %v6364_v46  ;;  %v6366_v56 = vpop.permute.xlu1 %2419 }
 0x343   : > { %9922 = vst [vmem:[#allocation325_spill] sm:$0xff] %v6366_v56  ;;  %2759 = vperm.xlu1 %4640, %v6174_v30   ;;  %2030 = vperm.xlu0 %4656, %v5933_v17  }
 0x345   : > { %v6370_v57 = vpop.permute.xlu0 %1930 }
 0x346   : > { %9923 = vst [vmem:[#allocation326_spill] sm:$0xff] %v6370_v57  ;;  %v6372_v34 = vpop.permute.xlu1 %2429 }
 0x347   : > { %9924 = vst [vmem:[#allocation327_spill] sm:$0xff] %v6372_v34  ;;  %2767 = vperm.xlu1 %4640, %v6183_v45   ;;  %2038 = vperm.xlu0 %4656, %v5945_v19  }
 0x349   : > { %v6376_v53 = vpop.permute.xlu0 %1938 }
 0x34a   : > { %9925 = vst [vmem:[#allocation328_spill] sm:$0xff] %v6376_v53  ;;  %v6378_v48 = vpop.permute.xlu1 %2439 }
 0x34b   : > { %9926 = vst [vmem:[#allocation329_spill] sm:$0xff] %v6378_v48  ;;  %2775 = vperm.xlu1 %4640, %v6192_v1   ;;  %2046 = vperm.xlu0 %4656, %v5957_v26  }
 0x34d   : > { %v6382_v56 = vpop.permute.xlu0 %1946 }
 0x34e   : > { %9927 = vst [vmem:[#allocation330_spill] sm:$0xff] %v6382_v56 }
 0x34f   : > { %2783 = vperm.xlu1 %4640, %v6247_v47   ;;  %v6385_v46 = vpop.permute.xlu1 %2463  ;;  %2054 = vperm.xlu0 %4656, %v5969_v5  }
 0x350   : > { %9928 = vst [vmem:[#allocation331_spill] sm:$0xff] %v6385_v46 }
 0x351   : > { %v6388_v34 = vpop.permute.xlu0 %1954 }
 0x352   : > { %9929 = vst [vmem:[#allocation332_spill] sm:$0xff] %v6388_v34 }
 0x353   : > { %2791 = vperm.xlu1 %4640, %v6256_v52   ;;  %v6391_v57 = vpop.permute.xlu1 %2467  ;;  %2943 = vperm.xlu0 %4656, %v6147_v61  }
 0x354   : > { %9930 = vst [vmem:[#allocation333_spill] sm:$0xff] %v6391_v57 }
 0x355   : > { %v6394_v48 = vpop.permute.xlu0 %2843 }
 0x356   : > { %9931 = vst [vmem:[#allocation334_spill] sm:$0xff] %v6394_v48 }
 0x357   : > { %2799 = vperm.xlu1 %4640, %v6265_v54   ;;  %v6397_v53 = vpop.permute.xlu1 %2475  ;;  %2955 = vperm.xlu0 %4656, %v6168_v15  }
 0x358   : > { %9932 = vst [vmem:[#allocation335_spill] sm:$0xff] %v6397_v53 }
 0x359   : > { %v6400_v56 = vpop.permute.xlu0 %2855 }
 0x35a   : > { %9933 = vst [vmem:[#allocation336_spill] sm:$0xff] %v6400_v56 }
 0x35b   : > { %2807 = vperm.xlu1 %4640, %v6274_v37   ;;  %v6403_v46 = vpop.permute.xlu1 %2483  ;;  %2963 = vperm.xlu0 %4656, %v5882_v12  }
 0x35c   : > { %9934 = vst [vmem:[#allocation337_spill] sm:$0xff] %v6403_v46 }
 0x35d   : > { %v6406_v34 = vpop.permute.xlu0 %2863 }
 0x35e   : > { %9935 = vst [vmem:[#allocation338_spill] sm:$0xff] %v6406_v34 }
 0x35f   : > { %4641 = vset.pattern.permute.xlu1 %v9773_v36  ;;  %v6409_v57 = vpop.permute.xlu1 %2491  ;;  %2971 = vperm.xlu0 %4656, %v5891_v22   ;;  %v10157_v36 = vld [vmem:[#allocation58_spill] sm:$0xff] }
 0x360   : > { %9936 = vst [vmem:[#allocation339_spill] sm:$0xff] %v6409_v57  ;;  %2847 = vperm.xlu1 %4641, %v6147_v61  }
 0x361   : > { %v6413_v48 = vpop.permute.xlu0 %2871 }
 0x362   : > { %9937 = vst [vmem:[#allocation340_spill] sm:$0xff] %v6413_v48 }
 0x363   : > { %v6415_v53 = vpop.permute.xlu1 %2499  ;;  %2979 = vperm.xlu0 %4656, %v5903_v24  }
 0x364   : > { %9938 = vst [vmem:[#allocation341_spill] sm:$0xff] %v6415_v53  ;;  %2851 = vperm.xlu1 %4641, %v6065_v20  }
 0x365   : > { %v6419_v56 = vpop.permute.xlu0 %2879 }
 0x366   : > { %9939 = vst [vmem:[#allocation342_spill] sm:$0xff] %v6419_v56 }
 0x367   : > { %v6421_v46 = vpop.permute.xlu1 %2507  ;;  %2987 = vperm.xlu0 %4656, %v5915_v8  }
 0x368   : > { %9940 = vst [vmem:[#allocation343_spill] sm:$0xff] %v6421_v46  ;;  %2859 = vperm.xlu1 %4641, %v6168_v15  }
 0x369   : > { %v6425_v34 = vpop.permute.xlu0 %2887 }
 0x36a   : > { %9941 = vst [vmem:[#allocation344_spill] sm:$0xff] %v6425_v34 }
 0x36b   : > { %v6427_v57 = vpop.permute.xlu1 %2515  ;;  %2995 = vperm.xlu0 %4656, %v5927_v28  }
 0x36c   : > { %9942 = vst [vmem:[#allocation345_spill] sm:$0xff] %v6427_v57  ;;  %2867 = vperm.xlu1 %4641, %v5882_v12  }
 0x36d   : > { %v6431_v48 = vpop.permute.xlu0 %2895 }
 0x36e   : > { %9943 = vst [vmem:[#allocation346_spill] sm:$0xff] %v6431_v48 }
 0x36f   : > { %3884 = vperm.xlu0 %4656, %v5939_v13  }
 0x370   : > { %2875 = vperm.xlu1 %4641, %v5891_v22   ;;  %v6435_v56 = vpop.permute.xlu1 %2555 }
 0x371   : > { %9944 = vst [vmem:[#allocation347_spill] sm:$0xff] %v6435_v56  ;;  %v6437_v46 = vpop.permute.xlu0 %2903 }
 0x372   : > { %9945 = vst [vmem:[#allocation348_spill] sm:$0xff] %v6437_v46 }
 0x373   : > { %3896 = vperm.xlu0 %4656, %v5951_v16  }
 0x374   : > { %2883 = vperm.xlu1 %4641, %v5903_v24   ;;  %v6441_v34 = vpop.permute.xlu1 %2563 }
 0x375   : > { %9946 = vst [vmem:[#allocation349_spill] sm:$0xff] %v6441_v34  ;;  %v6443_v57 = vpop.permute.xlu0 %3792 }
 0x376   : > { %9947 = vst [vmem:[#allocation350_spill] sm:$0xff] %v6443_v57 }
 0x377   : > { %3904 = vperm.xlu0 %4656, %v5963_v29  }
 0x378   : > { %2891 = vperm.xlu1 %4641, %v5915_v8   ;;  %v6447_v48 = vpop.permute.xlu1 %2567 }
 0x379   : > { %9948 = vst [vmem:[#allocation351_spill] sm:$0xff] %v6447_v48  ;;  %v6449_v53 = vpop.permute.xlu0 %3804 }
 0x37a   : > { %9949 = vst [vmem:[#allocation352_spill] sm:$0xff] %v6449_v53 }
 0x37b   : > { %3912 = vperm.xlu0 %4656, %v5975_v21  }
 0x37c   : > { %2899 = vperm.xlu1 %4641, %v5927_v28   ;;  %v6453_v46 = vpop.permute.xlu1 %2575 }
 0x37d   : > { %9950 = vst [vmem:[#allocation353_spill] sm:$0xff] %v6453_v46  ;;  %v6455_v56 = vpop.permute.xlu0 %3812 }
 0x37e   : > { %9951 = vst [vmem:[#allocation354_spill] sm:$0xff] %v6455_v56 }
 0x37f   : > { %3920 = vperm.xlu0 %4656, %v5984_v2  }
 0x380   : > { %4642 = vset.pattern.permute.xlu1 %v9792_v4  ;;  %v6459_v57 = vpop.permute.xlu1 %2583  ;;  %v10112_v4 = vld [vmem:[#allocation32_spill] sm:$0xff] }
 0x381   : > { %9952 = vst [vmem:[#allocation355_spill] sm:$0xff] %v6459_v57  ;;  %2939 = vperm.xlu1 %4642, %v6162_v39   ;;  %v6462_v34 = vpop.permute.xlu0 %3820 }
 0x382   : > { %9953 = vst [vmem:[#allocation356_spill] sm:$0xff] %v6462_v34 }
 0x383   : > { %3928 = vperm.xlu0 %4656, %v5993_v6  }
 0x384   : > { %v6465_v53 = vpop.permute.xlu1 %2591 }
 0x385   : > { %9954 = vst [vmem:[#allocation357_spill] sm:$0xff] %v6465_v53  ;;  %2947 = vperm.xlu1 %4642, %v6065_v20   ;;  %v6468_v48 = vpop.permute.xlu0 %3828 }
 0x386   : > { %9955 = vst [vmem:[#allocation358_spill] sm:$0xff] %v6468_v48 }
 0x387   : > { %3936 = vperm.xlu0 %4656, %v6002_v27  }
 0x388   : > { %v6471_v56 = vpop.permute.xlu1 %2599 }
 0x389   : > { %9956 = vst [vmem:[#allocation359_spill] sm:$0xff] %v6471_v56  ;;  %2951 = vperm.xlu1 %4642, %v6174_v30   ;;  %v6474_v46 = vpop.permute.xlu0 %3836 }
 0x38a   : > { %9957 = vst [vmem:[#allocation360_spill] sm:$0xff] %v6474_v46 }
 0x38b   : > { %3944 = vperm.xlu0 %4656, %v6011_v3  }
 0x38c   : > { %v6477_v57 = vpop.permute.xlu1 %2607 }
 0x38d   : > { %9958 = vst [vmem:[#allocation361_spill] sm:$0xff] %v6477_v57  ;;  %2959 = vperm.xlu1 %4642, %v6183_v45   ;;  %v6480_v34 = vpop.permute.xlu0 %3844 }
 0x38e   : > { %9959 = vst [vmem:[#allocation362_spill] sm:$0xff] %v6480_v34 }
 0x38f   : > { %4658 = vset.pattern.permute.xlu0 %v9811_v25 }
 0x390   : > { %v6483_v53 = vpop.permute.xlu1 %2615  ;;  %1153 = vperm.xlu0 %4658, %v6022_v63  }
 0x391   : > { %9960 = vst [vmem:[#allocation363_spill] sm:$0xff] %v6483_v53  ;;  %2967 = vperm.xlu1 %4642, %v6192_v1  }
 0x392   : > { %v6487_v48 = vpop.permute.xlu0 %1057 }
 0x393   : > { %9961 = vst [vmem:[#allocation364_spill] sm:$0xff] %v6487_v48 }
 0x394   : > { %1165 = vperm.xlu0 %4658, %v6031_v18  }
 0x395   : > { %2975 = vperm.xlu1 %4642, %v6247_v47   ;;  %v6491_v46 = vpop.permute.xlu1 %2655 }
 0x396   : > { %9962 = vst [vmem:[#allocation365_spill] sm:$0xff] %v6491_v46  ;;  %v6493_v57 = vpop.permute.xlu0 %1069 }
 0x397   : > { %9963 = vst [vmem:[#allocation366_spill] sm:$0xff] %v6493_v57 }
 0x398   : > { %1173 = vperm.xlu0 %4658, %v6040_v44  }
 0x399   : > { %2983 = vperm.xlu1 %4642, %v6256_v52   ;;  %v6497_v34 = vpop.permute.xlu1 %2659 }
 0x39a   : > { %9964 = vst [vmem:[#allocation367_spill] sm:$0xff] %v6497_v34  ;;  %v6499_v53 = vpop.permute.xlu0 %1077 }
 0x39b   : > { %9965 = vst [vmem:[#allocation368_spill] sm:$0xff] %v6499_v53  ;;  %v6927_v53 = vld [vmem:[%s4968_s26 + $0x180] sm:$0xff] }
 0x39c   : > { %1181 = vperm.xlu0 %4658, %v6049_v60  }
 0x39d   : > { %2991 = vperm.xlu1 %4642, %v6265_v54   ;;  %v6503_v63 = vpop.permute.xlu1 %2667 }
 0x39e   : > { %9966 = vst [vmem:[#allocation369_spill] sm:$0xff] %v6503_v63  ;;  %v6505_v18 = vpop.permute.xlu0 %1085 }
 0x3a0   : > { %1189 = vperm.xlu0 %4658, %v6058_v49  }
 0x3a1   : > { %2999 = vperm.xlu1 %4642, %v6274_v37   ;;  %v6509_v57 = vpop.permute.xlu1 %2675 }
 0x3a2   : > { %9967 = vst [vmem:[#allocation370_spill] sm:$0xff] %v6509_v57  ;;  %v6511_v44 = vpop.permute.xlu0 %1093 }
 0x3a4   : > { %1197 = vperm.xlu0 %4658, %v6070_v33  }
 0x3a5   : > { %4643 = vset.pattern.permute.xlu1 %v9811_v25  ;;  %v6515_v34 = vpop.permute.xlu1 %2683  ;;  %v10106_v25 = vld [vmem:[#allocation39_spill] sm:$0xff] }
 0x3a6   : > { %9968 = vst [vmem:[#allocation371_spill] sm:$0xff] %v6515_v34  ;;  %3039 = vperm.xlu1 %4643, %v6147_v61   ;;  %v6518_v60 = vpop.permute.xlu0 %1101 }
 0x3a7   : > { %9969 = vst [vmem:[#allocation372_spill] sm:$0xff] %v6518_v60  ;;  %v10167_v60 = vld [vmem:[#allocation84_spill] sm:$0xff] }
 0x3a8   : > { %1205 = vperm.xlu0 %4658, %v6079_v14  }
 0x3a9   : > { %v6521_v63 = vpop.permute.xlu1 %2691 }
 0x3aa   : > { %9970 = vst [vmem:[#allocation373_spill] sm:$0xff] %v6521_v63  ;;  %3043 = vperm.xlu1 %4643, %v6065_v20   ;;  %v6524_v49 = vpop.permute.xlu0 %1109 }
 0x3ab   : > { %9971 = vst [vmem:[#allocation374_spill] sm:$0xff] %v6524_v49 }
 0x3ac   : > { %1213 = vperm.xlu0 %4658, %v6088_v0  }
 0x3ad   : > { %v6527_v57 = vpop.permute.xlu1 %2699 }
 0x3ae   : > { %9972 = vst [vmem:[#allocation375_spill] sm:$0xff] %v6527_v57  ;;  %3051 = vperm.xlu1 %4643, %v6168_v15   ;;  %v6530_v33 = vpop.permute.xlu0 %1994  ;;  %v10096_v57 = vld [vmem:[#allocation33_spill] sm:$0xff] }
 0x3af   : > { %9973 = vst [vmem:[#allocation376_spill] sm:$0xff] %v6530_v33 }
 0x3b0   : > { %2094 = vperm.xlu0 %4658, %v6097_v42  }
 0x3b1   : > { %v6533_v34 = vpop.permute.xlu1 %2707 }
 0x3b2   : > { %9974 = vst [vmem:[#allocation377_spill] sm:$0xff] %v6533_v34  ;;  %3059 = vperm.xlu1 %4643, %v5882_v12   ;;  %v6536_v14 = vpop.permute.xlu0 %2006  ;;  %v10095_v34 = vld [vmem:[#allocation31_spill] sm:$0xff] }
 0x3b3   : > { %9975 = vst [vmem:[#allocation378_spill] sm:$0xff] %v6536_v14 }
 0x3b4   : > { %2106 = vperm.xlu0 %4658, %v6104_v58  }
 0x3b6   : > { %3067 = vperm.xlu1 %4643, %v5891_v22   ;;  %v6540_v63 = vpop.permute.xlu1 %2747  ;;  %v6542_v0 = vpop.permute.xlu0 %2014 }
 0x3b7   : > { %9976 = vst [vmem:[#allocation379_spill] sm:$0xff] %v6540_v63  ;;  %9977 = vst [vmem:[#allocation380_spill] sm:$0xff] %v6542_v0  ;;  %v9984_v63 = vld [vmem:[#allocation268_spill] sm:$0xff] }
 0x3b8   : > { %2114 = vperm.xlu0 %4658, %v6113_v50  }
 0x3ba   : > { %3075 = vperm.xlu1 %4643, %v5903_v24   ;;  %v6546_v33 = vpop.permute.xlu1 %2755  ;;  %v6548_v42 = vpop.permute.xlu0 %2022 }
 0x3bb   : > { %9978 = vst [vmem:[#allocation381_spill] sm:$0xff] %v6546_v33  ;;  %9979 = vst [vmem:[#allocation382_spill] sm:$0xff] %v6548_v42  ;;  %v9985_v33 = vmov 8  }
 0x3bc   : > { %2122 = vperm.xlu0 %4658, %v6122_v38  }
 0x3be   : > { %3083 = vperm.xlu1 %4643, %v5915_v8   ;;  %v6552_v14 = vpop.permute.xlu1 %2759  ;;  %v6554_v58 = vpop.permute.xlu0 %2030 }
 0x3bf   : > { %9980 = vst [vmem:[#allocation383_spill] sm:$0xff] %v6552_v14  ;;  %9981 = vst [vmem:[#allocation384_spill] sm:$0xff] %v6554_v58  ;;  %v9988_v14 = vld [vmem:[#allocation271_spill] sm:$0xff] }
 0x3c0   : > { %2130 = vperm.xlu0 %4658, %v6131_v11  }
 0x3c2   : > { %3091 = vperm.xlu1 %4643, %v5927_v28   ;;  %v6558_v0 = vpop.permute.xlu1 %2767  ;;  %v6560_v50 = vpop.permute.xlu0 %2038 }
 0x3c3   : > { %9982 = vst [vmem:[#allocation385_spill] sm:$0xff] %v6558_v0  ;;  %9983 = vst [vmem:[#allocation386_spill] sm:$0xff] %v6560_v50 }
 0x3c4   : > { %2138 = vperm.xlu0 %4658, %v9984_v63  }
 0x3c6   : > { %4644 = vset.pattern.permute.xlu1 %v9985_v33  ;;  %v6564_v42 = vpop.permute.xlu1 %2775  ;;  %v6566_v38 = vpop.permute.xlu0 %2046 }
 0x3c7   : > { %9986 = vst [vmem:[#allocation268_spill] sm:$0xff] %v6564_v42  ;;  %9987 = vst [vmem:[#allocation387_spill] sm:$0xff] %v6566_v38  ;;  %3131 = vperm.xlu1 %4644, %v6162_v39  }
 0x3c8   : > { %2146 = vperm.xlu0 %4658, %v9988_v14  }
 0x3ca   : > { %v6570_v58 = vpop.permute.xlu1 %2783  ;;  %v6572_v11 = vpop.permute.xlu0 %2054 }
 0x3cb   : > { %9989 = vst [vmem:[#allocation271_spill] sm:$0xff] %v6570_v58  ;;  %9990 = vst [vmem:[#allocation388_spill] sm:$0xff] %v6572_v11  ;;  %3139 = vperm.xlu1 %4644, %v6065_v20  }
 0x3cc   : > { %3035 = vperm.xlu0 %4658, %v6162_v39  }
 0x3ce   : > { %v6576_v28 = vpop.permute.xlu1 %2791  ;;  %v6578_v63 = vpop.permute.xlu0 %2943 }
 0x3cf   : > { %9991 = vst [vmem:[#allocation389_spill] sm:$0xff] %v6576_v28  ;;  %9992 = vst [vmem:[#allocation390_spill] sm:$0xff] %v6578_v63  ;;  %3143 = vperm.xlu1 %4644, %v6174_v30   ;;  %v6664_v63 = vld [vmem:[%s4968_s26 + $0x1d0] sm:$0xff] }
 0x3d0   : > { %3047 = vperm.xlu0 %4658, %v6174_v30  }
 0x3d2   : > { %v6582_v38 = vpop.permute.xlu1 %2799  ;;  %v6584_v42 = vpop.permute.xlu0 %2955 }
 0x3d3   : > { %9993 = vst [vmem:[#allocation391_spill] sm:$0xff] %v6582_v38  ;;  %9994 = vst [vmem:[#allocation392_spill] sm:$0xff] %v6584_v42  ;;  %3151 = vperm.xlu1 %4644, %v6183_v45  }
 0x3d4   : > { %3055 = vperm.xlu0 %4658, %v6183_v45  }
 0x3d6   : > { %v6588_v14 = vpop.permute.xlu1 %2807  ;;  %v6590_v20 = vpop.permute.xlu0 %2963 }
 0x3d7   : > { %9995 = vst [vmem:[#allocation393_spill] sm:$0xff] %v6588_v14  ;;  %9996 = vst [vmem:[#allocation394_spill] sm:$0xff] %v6590_v20  ;;  %3159 = vperm.xlu1 %4644, %v6192_v1  }
 0x3d8   : > { %3063 = vperm.xlu0 %4658, %v6192_v1  }
 0x3da   : > { %v6594_v39 = vpop.permute.xlu0 %2971 }
 0x3db   : > { %9997 = vst [vmem:[#allocation395_spill] sm:$0xff] %v6594_v39  ;;  %3167 = vperm.xlu1 %4644, %v6247_v47   ;;  %v6597_v30 = vpop.permute.xlu1 %2847  ;;  %v6624_v39 = vld [vmem:[%s4968_s26 + $0x188] sm:$0xff] }
 0x3dc   : > { %9998 = vst [vmem:[#allocation396_spill] sm:$0xff] %v6597_v30  ;;  %3071 = vperm.xlu0 %4658, %v6247_v47   ;;  %v6673_v30 = vld [vmem:[%s4968_s26 + $0x1e0] sm:$0xff] }
 0x3de   : > { %v6600_v42 = vpop.permute.xlu0 %2979 }
 0x3df   : > { %9999 = vst [vmem:[#allocation397_spill] sm:$0xff] %v6600_v42  ;;  %3175 = vperm.xlu1 %4644, %v6256_v52   ;;  %v6603_v45 = vpop.permute.xlu1 %2851 }
 0x3e0   : > { %10000 = vst [vmem:[#allocation398_spill] sm:$0xff] %v6603_v45  ;;  %3079 = vperm.xlu0 %4658, %v6256_v52   ;;  %v10006_v52 = vmov 0  }
 0x3e2   : > { %v6606_v20 = vpop.permute.xlu0 %2987 }
 0x3e3   : > { %10001 = vst [vmem:[#allocation399_spill] sm:$0xff] %v6606_v20  ;;  %3183 = vperm.xlu1 %4644, %v6265_v54   ;;  %v6609_v1 = vpop.permute.xlu1 %2859 }
 0x3e4   : > { %10002 = vst [vmem:[#allocation400_spill] sm:$0xff] %v6609_v1  ;;  %3087 = vperm.xlu0 %4658, %v6265_v54   ;;  %v6629_v54 = vld [vmem:[%s4968_s26 + $0x190] sm:$0xff]  ;;  %v6655_v1 = vld [vmem:[%s4968_s26 + $0x1c0] sm:$0xff] }
 0x3e6   : > { %v6612_v47 = vpop.permute.xlu0 %2995 }
 0x3e7   : > { %10003 = vst [vmem:[#allocation401_spill] sm:$0xff] %v6612_v47  ;;  %3191 = vperm.xlu1 %4644, %v6274_v37   ;;  %v6615_v42 = vpop.permute.xlu1 %2867 }
 0x3e8   : > { %10004 = vst [vmem:[#allocation402_spill] sm:$0xff] %v6615_v42  ;;  %3095 = vperm.xlu0 %4658, %v6274_v37   ;;  %v6637_v37 = vld [vmem:[%s4968_s26 + $0x1a0] sm:$0xff] }
 0x3ea   : > { %v6618_v45 = vpop.permute.xlu0 %3884 }
 0x3eb   : > { %10005 = vst [vmem:[#allocation403_spill] sm:$0xff] %v6618_v45  ;;  %4645 = vset.pattern.permute.xlu1 %v10006_v52  ;;  %v6621_v20 = vpop.permute.xlu1 %2875 }
 0x3ec   : > { %10007 = vst [vmem:[#allocation404_spill] sm:$0xff] %v6621_v20  ;;  %3314 = vperm.xlu1 %4645, %v6624_v39   ;;  %3984 = vperm.xlu0 %4658, %v6624_v39   ;;  %v6646_v20 = vld [vmem:[%s4968_s26 + $0x1b0] sm:$0xff] }
 0x3ee   : > { %v6631_v47 = vpop.permute.xlu0 %3896 }
 0x3ef   : > { %10008 = vst [vmem:[#allocation405_spill] sm:$0xff] %v6631_v47  ;;  %v6633_v42 = vpop.permute.xlu1 %2883 }
 0x3f0   : > { %10009 = vst [vmem:[#allocation406_spill] sm:$0xff] %v6633_v42  ;;  %3319 = vperm.xlu1 %4645, %v6629_v54   ;;  %3996 = vperm.xlu0 %4658, %v6637_v37  }
 0x3f2   : > { %v6640_v52 = vpop.permute.xlu0 %3904 }
 0x3f3   : > { %10010 = vst [vmem:[#allocation407_spill] sm:$0xff] %v6640_v52  ;;  %v6642_v45 = vpop.permute.xlu1 %2891 }
 0x3f4   : > { %10011 = vst [vmem:[#allocation408_spill] sm:$0xff] %v6642_v45  ;;  %3329 = vperm.xlu1 %4645, %v6637_v37   ;;  %4004 = vperm.xlu0 %4658, %v6646_v20  }
 0x3f6   : > { %v6649_v47 = vpop.permute.xlu0 %3912 }
 0x3f7   : > { %10012 = vst [vmem:[#allocation409_spill] sm:$0xff] %v6649_v47  ;;  %v6651_v42 = vpop.permute.xlu1 %2899 }
 0x3f8   : > { %10013 = vst [vmem:[#allocation410_spill] sm:$0xff] %v6651_v42  ;;  %3339 = vperm.xlu1 %4645, %v6646_v20   ;;  %4012 = vperm.xlu0 %4658, %v6655_v1  }
 0x3fa   : > { %v6658_v52 = vpop.permute.xlu0 %3920 }
 0x3fb   : > { %10014 = vst [vmem:[#allocation411_spill] sm:$0xff] %v6658_v52 }
 0x3fc   : > { %3349 = vperm.xlu1 %4645, %v6655_v1   ;;  %v6661_v45 = vpop.permute.xlu1 %2939  ;;  %4020 = vperm.xlu0 %4658, %v6664_v63  }
 0x3fd   : > { %10015 = vst [vmem:[#allocation412_spill] sm:$0xff] %v6661_v45  ;;  %v6682_v45 = vld [vmem:[%s4968_s26 + $0x1f0] sm:$0xff] }
 0x3fe   : > { %v6667_v47 = vpop.permute.xlu0 %3928  ;;  %10020 = vst [vmem:[#allocation417_spill] sm:$0xff] %v6682_v45 }
 0x3ff   : > { %10016 = vst [vmem:[#allocation413_spill] sm:$0xff] %v6667_v47 }
 0x400   : > { %3359 = vperm.xlu1 %4645, %v6664_v63   ;;  %v6670_v42 = vpop.permute.xlu1 %2947  ;;  %4028 = vperm.xlu0 %4658, %v6673_v30  }
 0x401   : > { %10017 = vst [vmem:[#allocation414_spill] sm:$0xff] %v6670_v42 }
 0x402   : > { %v6676_v14 = vpop.permute.xlu0 %3936 }
 0x403   : > { %10018 = vst [vmem:[#allocation415_spill] sm:$0xff] %v6676_v14  ;;  %v10024_v14 = vmov 1  }
 0x404   : > { %3369 = vperm.xlu1 %4645, %v6673_v30   ;;  %v6679_v52 = vpop.permute.xlu1 %2951  ;;  %4036 = vperm.xlu0 %4658, %v6682_v45  }
 0x405   : > { %10019 = vst [vmem:[#allocation416_spill] sm:$0xff] %v6679_v52 }
 0x406   : > { %v6685_v38 = vpop.permute.xlu0 %3944 }
 0x407   : > { %10021 = vst [vmem:[#allocation418_spill] sm:$0xff] %v6685_v38 }
 0x408   : > { %3379 = vperm.xlu1 %4645, %v6682_v45   ;;  %v6688_v47 = vpop.permute.xlu1 %2959  ;;  %4660 = vset.pattern.permute.xlu0 %v9985_v33  ;;  %v10093_v33 = vld [vmem:[#allocation22_spill] sm:$0xff] }
 0x409   : > { %10022 = vst [vmem:[#allocation419_spill] sm:$0xff] %v6688_v47  ;;  %1257 = vperm.xlu0 %4660, %v6281_v7  }
 0x40b   : > { %v6692_v42 = vpop.permute.xlu0 %1153 }
 0x40c   : > { %10023 = vst [vmem:[#allocation420_spill] sm:$0xff] %v6692_v42  ;;  %4647 = vset.pattern.permute.xlu1 %v10024_v14  ;;  %v6695_v28 = vpop.permute.xlu1 %2967  ;;  %v6899_v42 = vld [vmem:[%s4968_s26 + $0x1a8] sm:$0xff] }
 0x40d   : > { %10025 = vst [vmem:[#allocation421_spill] sm:$0xff] %v6695_v28  ;;  %3404 = vperm.xlu1 %4647, %v5939_v13   ;;  %1269 = vperm.xlu0 %4660, %v6291_v41  }
 0x40f   : > { %v6699_v52 = vpop.permute.xlu0 %1165 }
 0x410   : > { %10026 = vst [vmem:[#allocation422_spill] sm:$0xff] %v6699_v52  ;;  %v6701_v38 = vpop.permute.xlu1 %2975 }
 0x411   : > { %10027 = vst [vmem:[#allocation423_spill] sm:$0xff] %v6701_v38  ;;  %3412 = vperm.xlu1 %4647, %v6629_v54   ;;  %1277 = vperm.xlu0 %4660, %v6300_v59  }
 0x413   : > { %v6705_v47 = vpop.permute.xlu0 %1173 }
 0x414   : > { %10028 = vst [vmem:[#allocation424_spill] sm:$0xff] %v6705_v47  ;;  %v6707_v7 = vpop.permute.xlu1 %2983  ;;  %v10084_v47 = vld [vmem:[#allocation27_spill] sm:$0xff] }
 0x415   : > { %10029 = vst [vmem:[#allocation425_spill] sm:$0xff] %v6707_v7  ;;  %3416 = vperm.xlu1 %4647, %v5951_v16   ;;  %1285 = vperm.xlu0 %4660, %v6309_v40  }
 0x417   : > { %v6711_v14 = vpop.permute.xlu0 %1181 }
 0x418   : > { %10030 = vst [vmem:[#allocation426_spill] sm:$0xff] %v6711_v14  ;;  %v6713_v28 = vpop.permute.xlu1 %2991 }
 0x419   : > { %10031 = vst [vmem:[#allocation427_spill] sm:$0xff] %v6713_v28  ;;  %3424 = vperm.xlu1 %4647, %v5963_v29   ;;  %1293 = vperm.xlu0 %4660, %v6318_v55  }
 0x41b   : > { %v6717_v41 = vpop.permute.xlu0 %1189 }
 0x41c   : > { %10032 = vst [vmem:[#allocation428_spill] sm:$0xff] %v6717_v41  ;;  %v6719_v38 = vpop.permute.xlu1 %2999 }
 0x41d   : > { %10033 = vst [vmem:[#allocation429_spill] sm:$0xff] %v6719_v38  ;;  %3432 = vperm.xlu1 %4647, %v5975_v21   ;;  %1301 = vperm.xlu0 %4660, %v6327_v62   ;;  %v10078_v38 = vld [vmem:[#allocation15_spill] sm:$0xff] }
 0x41f   : > { %v6723_v59 = vpop.permute.xlu0 %1197 }
 0x420   : > { %10034 = vst [vmem:[#allocation430_spill] sm:$0xff] %v6723_v59 }
 0x421   : > { %3440 = vperm.xlu1 %4647, %v5984_v2   ;;  %v6726_v40 = vpop.permute.xlu1 %3039  ;;  %1309 = vperm.xlu0 %4660, %v6336_v10  }
 0x422   : > { %10035 = vst [vmem:[#allocation431_spill] sm:$0xff] %v6726_v40  ;;  %v10076_v40 = vld [vmem:[#allocation21_spill] sm:$0xff] }
 0x423   : > { %v6729_v28 = vpop.permute.xlu0 %1205 }
 0x424   : > { %10036 = vst [vmem:[#allocation432_spill] sm:$0xff] %v6729_v28  ;;  %v4722_v28 = vld [vmem:[%s4968_s26 + $0x170] sm:$0xff] }
 0x425   : > { %3448 = vperm.xlu1 %4647, %v5993_v6   ;;  %v6732_v29 = vpop.permute.xlu1 %3043  ;;  %2186 = vperm.xlu0 %4660, %v5878_v23  }
 0x426   : > { %10037 = vst [vmem:[#allocation433_spill] sm:$0xff] %v6732_v29  ;;  %v10073_v29 = vld [vmem:[#allocation11_spill] sm:$0xff] }
 0x427   : > { %v6735_v55 = vpop.permute.xlu0 %1213  ;;  %10097 = vst [vmem:[#allocation11_spill] sm:$0xff] %v6927_v53 }
 0x428   : > { %10038 = vst [vmem:[#allocation434_spill] sm:$0xff] %v6735_v55 }
 0x429   : > { %3456 = vperm.xlu1 %4647, %v6002_v27   ;;  %v6738_v21 = vpop.permute.xlu1 %3051  ;;  %2198 = vperm.xlu0 %4660, %v5899_v31  }
 0x42a   : > { %10039 = vst [vmem:[#allocation435_spill] sm:$0xff] %v6738_v21 }
 0x42b   : > { %v6741_v2 = vpop.permute.xlu0 %2094 }
 0x42c   : > { %10040 = vst [vmem:[#allocation436_spill] sm:$0xff] %v6741_v2 }
 0x42d   : > { %3464 = vperm.xlu1 %4647, %v6011_v3   ;;  %v6744_v10 = vpop.permute.xlu1 %3059  ;;  %2206 = vperm.xlu0 %4660, %v5911_v9  }
 0x42e   : > { %10041 = vst [vmem:[#allocation437_spill] sm:$0xff] %v6744_v10 }
 0x42f   : > { %v6747_v6 = vpop.permute.xlu0 %2106 }
 0x430   : > { %10042 = vst [vmem:[#allocation438_spill] sm:$0xff] %v6747_v6  ;;  %v10070_v6 = vld [vmem:[#allocation8_spill] sm:$0xff] }
 0x431   : > { %4649 = vset.pattern.permute.xlu1 %v9647_v43  ;;  %v6750_v23 = vpop.permute.xlu1 %3067  ;;  %2214 = vperm.xlu0 %4660, %v5923_v32  }
 0x432   : > { %10043 = vst [vmem:[#allocation439_spill] sm:$0xff] %v6750_v23  ;;  %3504 = vperm.xlu1 %4649, %v6624_v39  }
 0x433   : > { %v6754_v27 = vpop.permute.xlu0 %2114 }
 0x434   : > { %10044 = vst [vmem:[#allocation440_spill] sm:$0xff] %v6754_v27 }
 0x435   : > { %v6756_v31 = vpop.permute.xlu1 %3075  ;;  %2222 = vperm.xlu0 %4660, %v5933_v17  }
 0x436   : > { %10045 = vst [vmem:[#allocation441_spill] sm:$0xff] %v6756_v31  ;;  %3508 = vperm.xlu1 %4649, %v6629_v54  }
 0x437   : > { %v6760_v3 = vpop.permute.xlu0 %2122 }
 0x439   : > { %v6762_v9 = vpop.permute.xlu1 %3083  ;;  %2230 = vperm.xlu0 %4660, %v5945_v19  }
 0x43a   : > { %10046 = vst [vmem:[#allocation442_spill] sm:$0xff] %v6762_v9  ;;  %3516 = vperm.xlu1 %4649, %v6637_v37  }
 0x43b   : > { %v6766_v43 = vpop.permute.xlu0 %2130 }
 0x43d   : > { %v6768_v32 = vpop.permute.xlu1 %3091  ;;  %2238 = vperm.xlu0 %4660, %v5957_v26  }
 0x43e   : > { %10047 = vst [vmem:[#allocation443_spill] sm:$0xff] %v6768_v32  ;;  %3524 = vperm.xlu1 %4649, %v6646_v20  }
 0x43f   : > { %v6772_v62 = vpop.permute.xlu0 %2138 }
 0x441   : > { %2246 = vperm.xlu0 %4660, %v5969_v5   ;;  %v532_v5 = vlaneseq }
 0x442   : > { %3532 = vperm.xlu1 %4649, %v6655_v1   ;;  %v6776_v17 = vpop.permute.xlu1 %3131 }
 0x443   : > { %10048 = vst [vmem:[#allocation444_spill] sm:$0xff] %v6776_v17  ;;  %v6778_v9 = vpop.permute.xlu0 %2146  ;;  %v6796_v27 = vshrl.u32 %v532_v5, 7 }
 0x444   : > { %10049 = vst [vmem:[#allocation445_spill] sm:$0xff] %v6778_v9  ;;  %v10166_v9 = vld [vmem:[#allocation82_spill] sm:$0xff] }
 0x445   : > { %3135 = vperm.xlu0 %4660, %v6147_v61   ;;  %v618_v5 = vsub.s32 1, %v6796_v27 }
 0x446   : > { %3540 = vperm.xlu1 %4649, %v6664_v63   ;;  %v6782_v19 = vpop.permute.xlu1 %3139 }
 0x447   : > { %10050 = vst [vmem:[#allocation446_spill] sm:$0xff] %v6782_v19  ;;  %v6784_v32 = vpop.permute.xlu0 %3035 }
 0x448   : > { %10051 = vst [vmem:[#allocation447_spill] sm:$0xff] %v6784_v32 }
 0x449   : > { %3147 = vperm.xlu0 %4660, %v6168_v15  }
 0x44a   : > { %3548 = vperm.xlu1 %4649, %v6673_v30   ;;  %v6788_v26 = vpop.permute.xlu1 %3143 }
 0x44b   : > { %10052 = vst [vmem:[#allocation448_spill] sm:$0xff] %v6788_v26  ;;  %v6790_v31 = vpop.permute.xlu0 %3047  ;;  %v534_v26 = vsub.s32 0, %v6796_v27 }
 0x44c   : > { %10053 = vst [vmem:[#allocation449_spill] sm:$0xff] %v6790_v31 }
 0x44d   : > { %3155 = vperm.xlu0 %4660, %v5882_v12   ;;  %v6811_v12 = vld [vmem:[%s9506_s1] sm:$0xff] }
 0x44e   : > { %3556 = vperm.xlu1 %4649, %v6682_v45   ;;  %v6794_v61 = vpop.permute.xlu1 %3151  ;;  %v10163_v45 = vld [vmem:[#allocation62_spill] sm:$0xff] }
 0x44f   : > { %10054 = vst [vmem:[#allocation450_spill] sm:$0xff] %v6794_v61  ;;  %v6798_v19 = vpop.permute.xlu0 %3055  ;;  %v6820_v61 = vrot.slane %v6811_v12, %v534_v26 }
 0x450   : > { %10055 = vst [vmem:[#allocation451_spill] sm:$0xff] %v6798_v19  ;;  %v6827_v19 = vrot.slane %v6811_v12, %v618_v5  ;;  %v10067_v5 = vld [vmem:[#allocation6_spill] sm:$0xff] }
 0x451   : > { %3163 = vperm.xlu0 %4660, %v5891_v22   ;;  %v718_v22 = vsub.s32 2, %v6796_v27  ;;  %10059 = vst [vmem:[#allocation455_spill] sm:$0xff] %v6820_v61  ;;  %v6846_v10 = vmul.f32 %v6820_v61, %v10067_v5  ;;  %v546_v59 = vmul.f32 %v6820_v61, %v10078_v38  ;;  %v1018_v38 = vsub.s32 5, %v6796_v27  ;;  %10085 = vst [vmem:[#allocation6_spill] sm:$0xff] %v6899_v42 }
 0x452   : > { %4651 = vset.pattern.permute.xlu1 %v9710_v51  ;;  %v6802_v15 = vpop.permute.xlu1 %3159  ;;  %v818_v51 = vsub.s32 3, %v6796_v27  ;;  %10061 = vst [vmem:[#allocation457_spill] sm:$0xff] %v6827_v19  ;;  %v626_v52 = vmul.f32 %v6827_v19, %v10084_v47  ;;  %v10091_v47 = vld [vmem:[#allocation29_spill] sm:$0xff] }
 0x453   : > { %10056 = vst [vmem:[#allocation452_spill] sm:$0xff] %v6802_v15  ;;  %3596 = vperm.xlu1 %4651, %v5939_v13   ;;  %v6806_v17 = vpop.permute.xlu0 %3063  ;;  %v628_v50 = vmul.f32 %v6827_v19, %v10091_v47  ;;  %v10101_v47 = vld [vmem:[#allocation35_spill] sm:$0xff] }
 0x454   : > { %10057 = vst [vmem:[#allocation453_spill] sm:$0xff] %v6806_v17  ;;  %v918_v17 = vsub.s32 4, %v6796_v27  ;;  %v6834_v23 = vrot.slane %v6811_v12, %v818_v51 }
 0x455   : > { %3171 = vperm.xlu0 %4660, %v5903_v24   ;;  %v6831_v24 = vrot.slane %v6811_v12, %v718_v22 }
 0x456   : > { %v6817_v15 = vpop.permute.xlu1 %3167  ;;  %10063 = vst [vmem:[#allocation459_spill] sm:$0xff] %v6834_v23  ;;  %v6864_v5 = vrot.slane %v6811_v12, %v918_v17 }
 0x457   : > { %10058 = vst [vmem:[#allocation454_spill] sm:$0xff] %v6817_v15  ;;  %3604 = vperm.xlu1 %4651, %v6629_v54   ;;  %v6823_v13 = vpop.permute.xlu0 %3071  ;;  %10062 = vst [vmem:[#allocation458_spill] sm:$0xff] %v6831_v24  ;;  %v10065_v15 = vld [vmem:[#allocation4_spill] sm:$0xff] }
 0x458   : > { %10060 = vst [vmem:[#allocation456_spill] sm:$0xff] %v6823_v13  ;;  %v538_v31 = vmul.f32 %v6820_v61, %v10065_v15  ;;  %v10066_v13 = vld [vmem:[#allocation5_spill] sm:$0xff] }
 0x459   : > { %3179 = vperm.xlu0 %4660, %v5915_v8   ;;  %v6842_v32 = vmul.f32 %v6820_v61, %v10066_v13  ;;  %v10068_v8 = vld [vmem:[#allocation7_spill] sm:$0xff]  ;;  %v10071_v15 = vld [vmem:[#allocation9_spill] sm:$0xff]  ;;  %v10072_v13 = vld [vmem:[#allocation10_spill] sm:$0xff] }
 0x45a   : > { %v6836_v26 = vpop.permute.xlu1 %3175  ;;  %v537_v22 = vmul.f32 %v6820_v61, %v10068_v8  ;;  %v540_v21 = vmul.f32 %v6820_v61, %v10071_v15  ;;  %v6861_v2 = vmul.f32 %v6820_v61, %v10072_v13  ;;  %v10074_v8 = vld [vmem:[#allocation12_spill] sm:$0xff]  ;;  %v621_v15 = vmul.f32 %v6827_v19, %v10076_v40  ;;  %v10077_v13 = vld [vmem:[#allocation14_spill] sm:$0xff] }
 0x45b   : > { %10064 = vst [vmem:[#allocation460_spill] sm:$0xff] %v6836_v26  ;;  %3608 = vperm.xlu1 %4651, %v5951_v16   ;;  %v6851_v51 = vpop.permute.xlu0 %3079  ;;  %v6855_v26 = vmul.f32 %v6820_v61, %v10070_v6  ;;  %v542_v16 = vmul.f32 %v6820_v61, %v10073_v29  ;;  %v10075_v6 = vld [vmem:[#allocation13_spill] sm:$0xff]  ;;  %v6879_v17 = vmul.f32 %v6820_v61, %v10077_v13  ;;  %v10079_v29 = vld [vmem:[#allocation23_spill] sm:$0xff] }
 0x45c   : > { %10069 = vst [vmem:[#allocation4_spill] sm:$0xff] %v6851_v51  ;;  %v6870_v51 = vmul.f32 %v6820_v61, %v10074_v8  ;;  %v544_v55 = vmul.f32 %v6820_v61, %v10075_v6  ;;  %v622_v7 = vmul.f32 %v6827_v19, %v10079_v29  ;;  %v10080_v8 = vld [vmem:[#allocation25_spill] sm:$0xff]  ;;  %v10082_v6 = vld [vmem:[#allocation16_spill] sm:$0xff]  ;;  %v6916_v0 = vadd.f32 %v621_v15, %v537_v22 }
 0x45d   : > { %3187 = vperm.xlu0 %4660, %v4722_v28   ;;  %v624_v41 = vmul.f32 %v6827_v19, %v10080_v8  ;;  %v6891_v40 = vmul.f32 %v6820_v61, %v10082_v6  ;;  %v10083_v28 = vld [vmem:[#allocation17_spill] sm:$0xff]  ;;  %v10087_v8 = vld [vmem:[#allocation18_spill] sm:$0xff]  ;;  %v10088_v6 = vld [vmem:[#allocation19_spill] sm:$0xff] }
 0x45e   : > { %v6887_v14 = vpop.permute.xlu1 %3183  ;;  %v548_v13 = vmul.f32 %v6820_v61, %v10083_v28  ;;  %v550_v11 = vmul.f32 %v6820_v61, %v10088_v6  ;;  %v10089_v28 = vld [vmem:[#allocation20_spill] sm:$0xff]  ;;  %10092 = vst [vmem:[#allocation9_spill] sm:$0xff] %v6916_v0  ;;  %v632_v6 = vmul.f32 %v6827_v19, %v10096_v57  ;;  %v10104_v57 = vld [vmem:[#allocation26_spill] sm:$0xff] }
 0x45f   : > { %10081 = vst [vmem:[#allocation5_spill] sm:$0xff] %v6887_v14  ;;  %3616 = vperm.xlu1 %4651, %v6899_v42   ;;  %v6902_v29 = vpop.permute.xlu0 %3087  ;;  %v6906_v14 = vmul.f32 %v6820_v61, %v10087_v8  ;;  %v6912_v58 = vmul.f32 %v10089_v28, %v6820_v61  ;;  %v630_v8 = vmul.f32 %v6827_v19, %v10095_v34  ;;  %v10099_v22 = vld [vmem:[#allocation24_spill] sm:$0xff] }
 0x460   : > { %10086 = vst [vmem:[#allocation7_spill] sm:$0xff] %v6902_v29  ;;  %v6920_v29 = vmul.f32 %v10093_v33, %v6820_v61  ;;  %v638_v28 = vadd.f32 %v622_v7, %v538_v31  ;;  %v6930_v46 = vadd.f32 %v624_v41, %v540_v21  ;;  %v6934_v15 = vmul.f32 %v10099_v22, %v6820_v61  ;;  %v6952_v21 = vld [vmem:[%s4968_s26 + $0x1b8] sm:$0xff]  ;;  %v10153_v0 = vld [vmem:[#allocation56_spill] sm:$0xff] }
 0x461   : > { %10090 = vst [vmem:[#allocation8_spill] sm:$0xff] %v6912_v58  ;;  %4076 = vperm.xlu0 %4660, %v6927_v53   ;;  %v634_v33 = vmul.f32 %v6827_v19, %v10101_v47  ;;  %v6940_v34 = vadd.f32 %v626_v52, %v542_v16  ;;  %v6944_v56 = vmul.f32 %v10104_v57, %v6820_v61  ;;  %v10108_v52 = vld [vmem:[#allocation28_spill] sm:$0xff]  ;;  %v10110_v47 = vld [vmem:[#allocation30_spill] sm:$0xff]  ;;  %v10145_v58 = vld [vmem:[#allocation53_spill] sm:$0xff] }
 0x462   : > { %10094 = vst [vmem:[#allocation10_spill] sm:$0xff] %v6920_v29  ;;  %10098 = vst [vmem:[#allocation12_spill] sm:$0xff] %v6930_v46  ;;  %v6938_v48 = vpop.permute.xlu1 %3191  ;;  %v722_v7 = vmul.f32 %v6831_v24, %v10106_v25  ;;  %v6949_v41 = vrot.slane %v6811_v12, %v1018_v38  ;;  %v6957_v22 = vadd.f32 %v628_v50, %v544_v55  ;;  %v1118_v25 = vsub.s32 6, %v6796_v27  ;;  %v10114_v50 = vld [vmem:[#allocation34_spill] sm:$0xff] }
 0x463   : > { %10100 = vst [vmem:[#allocation13_spill] sm:$0xff] %v6934_v15  ;;  %10102 = vst [vmem:[#allocation21_spill] sm:$0xff] %v6938_v48  ;;  %3624 = vperm.xlu1 %4651, %v6952_v21   ;;  %v6955_v31 = vpop.permute.xlu0 %3095  ;;  %v6961_v16 = vmul.f32 %v10108_v52, %v6820_v61  ;;  %v6965_v57 = vmul.f32 %v10110_v47, %v6820_v61  ;;  %v6968_v38 = vadd.f32 %v630_v8, %v546_v59  ;;  %v6981_v52 = vld [vmem:[%s4968_s26 + $0x198] sm:$0xff] }
 0x464   : > { %10103 = vst [vmem:[#allocation14_spill] sm:$0xff] %v6940_v34  ;;  %10105 = vst [vmem:[#allocation15_spill] sm:$0xff] %v6944_v56  ;;  %v6970_v48 = vadd.f32 %v632_v6, %v548_v13  ;;  %v6978_v55 = vmul.f32 %v10114_v50, %v6820_v61  ;;  %v6984_v47 = vadd.f32 %v634_v33, %v550_v11  ;;  %v10119_v13 = vld [vmem:[#allocation37_spill] sm:$0xff]  ;;  %v10125_v33 = vld [vmem:[#allocation42_spill] sm:$0xff] }
 0x465   : > { %10107 = vst [vmem:[#allocation23_spill] sm:$0xff] %v6955_v31  ;;  %10109 = vst [vmem:[#allocation25_spill] sm:$0xff] %v6961_v16  ;;  %v6974_v31 = vmul.f32 %v10112_v4, %v6820_v61  ;;  %4088 = vperm.xlu0 %4660, %v6981_v52   ;;  %v6992_v8 = vmul.f32 %v6831_v24, %v10119_v13  ;;  %v10120_v4 = vld [vmem:[#allocation38_spill] sm:$0xff]  ;;  %v738_v50 = vadd.f32 %v722_v7, %v638_v28  ;;  %v10124_v16 = vld [vmem:[#allocation41_spill] sm:$0xff] }
 0x466   : > { %10111 = vst [vmem:[#allocation16_spill] sm:$0xff] %v6965_v57  ;;  %10115 = vst [vmem:[#allocation27_spill] sm:$0xff] %v6978_v55  ;;  %v10117_v57 = vld [vmem:[#allocation36_spill] sm:$0xff]  ;;  %v6996_v6 = vmul.f32 %v10120_v4, %v6820_v61  ;;  %v7004_v11 = vmul.f32 %v6831_v24, %v10124_v16  ;;  %v10129_v28 = vld [vmem:[#allocation43_spill] sm:$0xff] }
 0x467   : > { %10113 = vst [vmem:[#allocation17_spill] sm:$0xff] %v6974_v31  ;;  %10116 = vst [vmem:[#allocation18_spill] sm:$0xff] %v6981_v52  ;;  %v6988_v59 = vmul.f32 %v10117_v57, %v6820_v61  ;;  %v10122_v55 = vld [vmem:[#allocation40_spill] sm:$0xff]  ;;  %v7008_v57 = vmul.f32 %v10125_v33, %v6820_v61  ;;  %v7014_v13 = vpop.permute.xlu1 %3314  ;;  %v7016_v4 = vpop.permute.xlu0 %3984  ;;  %v7020_v7 = vmul.f32 %v6831_v24, %v10129_v28  ;;  %v7074_v46 = vld [vmem:[%s4968_s26 + $0x1d8] sm:$0xff] }
 0x468   : > { %10121 = vst [vmem:[#allocation20_spill] sm:$0xff] %v6996_v6  ;;  %v7000_v31 = vmul.f32 %v10122_v55, %v6820_v61  ;;  %10127 = vst [vmem:[#allocation31_spill] sm:$0xff] %v7014_v13  ;;  %v10130_v55 = vld [vmem:[#allocation44_spill] sm:$0xff]  ;;  %v10133_v13 = vld [vmem:[#allocation46_spill] sm:$0xff] }
 0x469   : > { %10118 = vst [vmem:[#allocation19_spill] sm:$0xff] %v6988_v59  ;;  %10126 = vst [vmem:[#allocation22_spill] sm:$0xff] %v7008_v57  ;;  %v7011_v59 = vld [vmem:[%s4968_s26 + $0x1c8] sm:$0xff]  ;;  %v7024_v16 = vmul.f32 %v10130_v55, %v6820_v61  ;;  %v7031_v57 = vrot.slane %v6811_v12, %v1118_v25  ;;  %v7035_v6 = vmul.f32 %v10133_v13, %v6820_v61  ;;  %4096 = vperm.xlu0 %4660, %v6899_v42   ;;  %v10141_v13 = vld [vmem:[#allocation51_spill] sm:$0xff] }
 0x46a   : > { %10123 = vst [vmem:[#allocation29_spill] sm:$0xff] %v7000_v31  ;;  %3632 = vperm.xlu1 %4651, %v7011_v59   ;;  %10128 = vst [vmem:[#allocation33_spill] sm:$0xff] %v7016_v4  ;;  %v10132_v31 = vld [vmem:[#allocation45_spill] sm:$0xff]  ;;  %v10135_v4 = vld [vmem:[#allocation47_spill] sm:$0xff] }
 0x46b   : > { %10131 = vst [vmem:[#allocation24_spill] sm:$0xff] %v7024_v16  ;;  %v7028_v33 = vmul.f32 %v6831_v24, %v10132_v31  ;;  %10134 = vst [vmem:[#allocation35_spill] sm:$0xff] %v7035_v6  ;;  %v7039_v28 = vmul.f32 %v6831_v24, %v10135_v4  ;;  %v10136_v56 = vld [vmem:[#allocation48_spill] sm:$0xff]  ;;  %v10138_v16 = vld [vmem:[#allocation49_spill] sm:$0xff]  ;;  %v7056_v6 = vmul.f32 %v6831_v24, %v10141_v13  ;;  %v1218_v13 = vsub.s32 7, %v6796_v27 }
 0x46c   : > { %v7043_v55 = vmul.f32 %v10136_v56, %v6820_v61  ;;  %v7047_v15 = vmul.f32 %v6831_v24, %v10138_v16  ;;  %v10139_v31 = vld [vmem:[#allocation50_spill] sm:$0xff]  ;;  %v10142_v4 = vld [vmem:[#allocation52_spill] sm:$0xff]  ;;  %v10144_v56 = vld [vmem:[#allocation59_spill] sm:$0xff]  ;;  %v7066_v16 = vmul.f32 %v6831_v24, %v10145_v58  ;;  %10148 = vst [vmem:[#allocation30_spill] sm:$0xff] %v7074_v46 }
 0x46d   : > { %v7052_v25 = vmul.f32 %v10139_v31, %v6820_v61  ;;  %v7060_v29 = vmul.f32 %v10142_v4, %v6820_v61  ;;  %v10146_v42 = vld [vmem:[#allocation70_spill] sm:$0xff]  ;;  %v10147_v31 = vld [vmem:[#allocation72_spill] sm:$0xff]  ;;  %v7077_v4 = vpop.permute.xlu1 %3319  ;;  %4104 = vperm.xlu0 %4660, %v6952_v21  }
 0x46e   : > { %10137 = vst [vmem:[#allocation26_spill] sm:$0xff] %v7043_v55  ;;  %v822_v55 = vmul.f32 %v6834_v23, %v10144_v56  ;;  %v620_v34 = vmul.f32 %v6827_v19, %v10146_v42  ;;  %3640 = vperm.xlu1 %4651, %v7074_v46   ;;  %10149 = vst [vmem:[#allocation32_spill] sm:$0xff] %v7077_v4  ;;  %v10151_v56 = vld [vmem:[#allocation55_spill] sm:$0xff]  ;;  %v7087_v42 = vmul.f32 %v6834_v23, %v10153_v0  ;;  %v10155_v52 = vld [vmem:[#allocation74_spill] sm:$0xff] }
 0x46f   : > { %10140 = vst [vmem:[#allocation39_spill] sm:$0xff] %v7052_v25  ;;  %10143 = vst [vmem:[#allocation28_spill] sm:$0xff] %v7060_v29  ;;  %v623_v25 = vmul.f32 %v6827_v19, %v10147_v31  ;;  %v7079_v29 = vpop.permute.xlu0 %3996  ;;  %v7083_v58 = vmul.f32 %v10151_v56, %v6820_v61  ;;  %v625_v27 = vmul.f32 %v6827_v19, %v10155_v52  ;;  %v10156_v31 = vld [vmem:[#allocation76_spill] sm:$0xff]  ;;  %v10161_v56 = vld [vmem:[#allocation78_spill] sm:$0xff] }
 0x470   : > { %10150 = vst [vmem:[#allocation34_spill] sm:$0xff] %v7079_v29  ;;  %10154 = vst [vmem:[#allocation37_spill] sm:$0xff] %v7087_v42  ;;  %v627_v53 = vmul.f32 %v6827_v19, %v10156_v31  ;;  %v7095_v4 = vmul.f32 %v10157_v36, %v6820_v61  ;;  %v10159_v29 = vld [vmem:[#allocation61_spill] sm:$0xff]  ;;  %v10162_v0 = vld [vmem:[#allocation80_spill] sm:$0xff]  ;;  %v838_v52 = vadd.f32 %v822_v55, %v738_v50 }
 0x471   : > { %10152 = vst [vmem:[#allocation36_spill] sm:$0xff] %v7083_v58  ;;  %v7099_v49 = vmul.f32 %v10159_v29, %v6820_v61  ;;  %v629_v58 = vmul.f32 %v6827_v19, %v10161_v56  ;;  %v631_v42 = vmul.f32 %v6827_v19, %v10162_v0  ;;  %v7108_v31 = vmul.f32 %v6834_v23, %v10163_v45  ;;  %v10164_v36 = vld [vmem:[#allocation64_spill] sm:$0xff]  ;;  %v7127_v45 = vpop.permute.xlu1 %3329 }
 0x472   : > { %10158 = vst [vmem:[#allocation38_spill] sm:$0xff] %v7095_v4  ;;  %v7112_v4 = vmul.f32 %v10164_v36, %v6820_v61  ;;  %v633_v29 = vmul.f32 %v6827_v19, %v10166_v9  ;;  %v639_v56 = vadd.f32 %v623_v25, %v6846_v10  ;;  %v635_v0 = vmul.f32 %v6827_v19, %v10167_v60  ;;  %v7124_v55 = vld [vmem:[%s4968_s26 + $0x1e8] sm:$0xff] }
 0x473   : > { %10160 = vst [vmem:[#allocation40_spill] sm:$0xff] %v7099_v49  ;;  %v636_v49 = vadd.f32 %v620_v34, %v6842_v32  ;;  %v7121_v50 = vrot.slane %v6811_v12, %v1218_v13  ;;  %10169 = vst [vmem:[#allocation43_spill] sm:$0xff] %v7124_v55  ;;  %3648 = vperm.xlu1 %4651, %v7124_v55   ;;  %v7129_v36 = vpop.permute.xlu0 %4004  ;;  %v641_v10 = vadd.f32 %v625_v27, %v6855_v26  ;;  %v10173_v32 = vld [vmem:[#allocation77_spill] sm:$0xff]  ;;  %v10174_v34 = vld [vmem:[#allocation66_spill] sm:$0xff] }
 0x474   : > { %10165 = vst [vmem:[#allocation41_spill] sm:$0xff] %v7112_v4  ;;  %10170 = vst [vmem:[#allocation44_spill] sm:$0xff] %v7127_v45  ;;  %v10172_v4 = vld [vmem:[#allocation65_spill] sm:$0xff]  ;;  %v643_v60 = vadd.f32 %v627_v53, %v6861_v2  ;;  %v922_v12 = vmul.f32 %v6864_v5, %v10173_v32  ;;  %v7141_v25 = vmul.f32 %v10174_v34, %v6820_v61  ;;  %v10176_v13 = vld [vmem:[#allocation67_spill] sm:$0xff]  ;;  %4112 = vperm.xlu0 %4660, %v7011_v59  }
 0x475   : > { %10168 = vst [vmem:[#allocation42_spill] sm:$0xff] %v7121_v50  ;;  %10171 = vst [vmem:[#allocation45_spill] sm:$0xff] %v7129_v36  ;;  %v7133_v9 = vmul.f32 %v6834_v23, %v10172_v4  ;;  %v7145_v45 = vmul.f32 %v6834_v23, %v10176_v13  ;;  %v645_v36 = vadd.f32 %v629_v58, %v6870_v51  ;;  %v10177_v26 = vld [vmem:[#allocation68_spill] sm:$0xff]  ;;  %v10179_v2 = vld [vmem:[#allocation69_spill] sm:$0xff] }
 0x476   : > { %10175 = vst [vmem:[#allocation46_spill] sm:$0xff] %v7141_v25  ;;  %v647_v4 = vadd.f32 %v631_v42, %v6879_v17  ;;  %v7152_v53 = vmul.f32 %v10177_v26, %v6820_v61  ;;  %v7156_v27 = vmul.f32 %v6834_v23, %v10179_v2  ;;  %v10180_v32 = vld [vmem:[#allocation71_spill] sm:$0xff]  ;;  %v649_v13 = vadd.f32 %v633_v29, %v6891_v40  ;;  %v10181_v25 = vld [vmem:[#allocation73_spill] sm:$0xff]  ;;  %v7175_v26 = vld [vmem:[%s4968_s26 + $0x1f8] sm:$0xff]  ;;  %v7178_v2 = vpop.permute.xlu1 %3339 }
 0x477   : > { %v7160_v34 = vmul.f32 %v6834_v23, %v10180_v32  ;;  %v7165_v51 = vmul.f32 %v6834_v23, %v10181_v25  ;;  %v651_v17 = vadd.f32 %v635_v0, %v6906_v14  ;;  %v7169_v58 = vadd.f32 %v6992_v8, %v636_v49  ;;  %10184 = vst [vmem:[#allocation50_spill] sm:$0xff] %v7175_v26  ;;  %v7180_v32 = vpop.permute.xlu0 %4012  ;;  %v10187_v40 = vld [vmem:[#allocation75_spill] sm:$0xff] }
 0x478   : > { %10178 = vst [vmem:[#allocation47_spill] sm:$0xff] %v7152_v53  ;;  %v7172_v42 = vadd.f32 %v7004_v11, %v639_v56  ;;  %3656 = vperm.xlu1 %4651, %v7175_v26   ;;  %10185 = vst [vmem:[#allocation51_spill] sm:$0xff] %v7178_v2  ;;  %v7184_v29 = vmul.f32 %v6864_v5, %v10187_v40  ;;  %v938_v25 = vadd.f32 %v922_v12, %v838_v52  ;;  %v10191_v8 = vld [vmem:[#allocation79_spill] sm:$0xff]  ;;  %v10193_v56 = vld [vmem:[#allocation81_spill] sm:$0xff] }
 0x479   : > { %10182 = vst [vmem:[#allocation48_spill] sm:$0xff] %v7169_v58  ;;  %10186 = vst [vmem:[#allocation52_spill] sm:$0xff] %v7180_v32  ;;  %v7187_v14 = vadd.f32 %v7020_v7, %v641_v10  ;;  %v7190_v49 = vadd.f32 %v7028_v33, %v643_v60  ;;  %v7194_v11 = vmul.f32 %v6864_v5, %v10191_v8  ;;  %4120 = vperm.xlu0 %4660, %v7074_v46   ;;  %v10197_v7 = vld [vmem:[#allocation83_spill] sm:$0xff]  ;;  %v10201_v12 = vld [vmem:[#allocation85_spill] sm:$0xff] }
 0x47a   : > { %10183 = vst [vmem:[#allocation49_spill] sm:$0xff] %v7172_v42  ;;  %10188 = vst [vmem:[#allocation59_spill] sm:$0xff] %v7184_v29  ;;  %v7198_v0 = vmul.f32 %v6864_v5, %v10193_v56  ;;  %v7201_v32 = vadd.f32 %v7039_v28, %v645_v36  ;;  %v7204_v40 = vadd.f32 %v7047_v15, %v647_v4  ;;  %v10199_v52 = vld [vmem:[#allocation95_spill] sm:$0xff]  ;;  %v10203_v28 = vld [vmem:[#allocation86_spill] sm:$0xff] }
 0x47b   : > { %10189 = vst [vmem:[#allocation53_spill] sm:$0xff] %v7187_v14  ;;  %10190 = vst [vmem:[#allocation70_spill] sm:$0xff] %v7190_v49  ;;  %v7209_v33 = vmul.f32 %v6864_v5, %v10197_v7  ;;  %v1022_v10 = vmul.f32 %v6949_v41, %v10199_v52  ;;  %v7214_v60 = vadd.f32 %v7056_v6, %v649_v13  ;;  %v10204_v36 = vld [vmem:[#allocation87_spill] sm:$0xff]  ;;  %v7232_v7 = vpop.permute.xlu1 %3349  ;;  %v7234_v6 = vpop.permute.xlu0 %4020  ;;  %v10209_v13 = vld [vmem:[#allocation88_spill] sm:$0xff] }
 0x47c   : > { %10192 = vst [vmem:[#allocation72_spill] sm:$0xff] %v7194_v11  ;;  %10194 = vst [vmem:[#allocation55_spill] sm:$0xff] %v7198_v0  ;;  %v7218_v8 = vmul.f32 %v6864_v5, %v10201_v12  ;;  %v7222_v15 = vmul.f32 %v10203_v28, %v6827_v19  ;;  %v7226_v4 = vmul.f32 %v6864_v5, %v10204_v36  ;;  %4653 = vset.pattern.permute.xlu1 %v9752_v35  ;;  %v10210_v12 = vld [vmem:[#allocation89_spill] sm:$0xff]  ;;  %v10212_v36 = vld [vmem:[#allocation90_spill] sm:$0xff] }
 0x47d   : > { %10195 = vst [vmem:[#allocation56_spill] sm:$0xff] %v7201_v32  ;;  %10196 = vst [vmem:[#allocation74_spill] sm:$0xff] %v7204_v40  ;;  %v7229_v56 = vadd.f32 %v7066_v16, %v651_v17  ;;  %v7238_v52 = vmul.f32 %v10209_v13, %v6827_v19  ;;  %v7242_v28 = vmul.f32 %v6864_v5, %v10210_v12  ;;  %v10214_v16 = vld [vmem:[#allocation91_spill] sm:$0xff]  ;;  %3696 = vperm.xlu1 %4653, %v6624_v39   ;;  %v10216_v35 = vld [vmem:[#allocation92_spill] sm:$0xff] }
 0x47e   : > { %10198 = vst [vmem:[#allocation76_spill] sm:$0xff] %v7209_v33  ;;  %10200 = vst [vmem:[#allocation58_spill] sm:$0xff] %v7214_v60  ;;  %v7246_v2 = vmul.f32 %v10212_v36, %v6827_v19  ;;  %v7250_v17 = vmul.f32 %v6864_v5, %v10214_v16  ;;  %v10219_v12 = vld [vmem:[#allocation94_spill] sm:$0xff]  ;;  %4128 = vperm.xlu0 %4660, %v7124_v55   ;;  %v10221_v16 = vld [vmem:[#allocation96_spill] sm:$0xff] }
 0x47f   : > { %10202 = vst [vmem:[#allocation61_spill] sm:$0xff] %v7218_v8  ;;  %10205 = vst [vmem:[#allocation78_spill] sm:$0xff] %v7226_v4  ;;  %v1587_v53 = vmul.f32 %v10219_v12, %v6827_v19  ;;  %v7264_v4 = vadd.f32 %v1022_v10, %v938_v25  ;;  %v1589_v39 = vmul.f32 %v10221_v16, %v6827_v19  ;;  %v10224_v8 = vld [vmem:[#allocation135_spill] sm:$0xff]  ;;  %v10228_v25 = vld [vmem:[#allocation100_spill] sm:$0xff]  ;;  %v7286_v60 = vpop.permute.xlu1 %3359 }
 0x480   : > { %10206 = vst [vmem:[#allocation80_spill] sm:$0xff] %v7229_v56  ;;  %10207 = vst [vmem:[#allocation62_spill] sm:$0xff] %v7232_v7  ;;  %v10217_v7 = vld [vmem:[#allocation93_spill] sm:$0xff]  ;;  %v10226_v33 = vld [vmem:[#allocation99_spill] sm:$0xff]  ;;  %v7282_v10 = vmul.f32 %v10228_v25, %v6827_v19 }
 0x481   : > { %10208 = vst [vmem:[#allocation64_spill] sm:$0xff] %v7234_v6  ;;  %10211 = vst [vmem:[#allocation82_spill] sm:$0xff] %v7242_v28  ;;  %v1585_v6 = vmul.f32 %v10216_v35, %v6827_v19  ;;  %v7257_v13 = vmul.f32 %v6949_v41, %v10217_v7  ;;  %v10220_v28 = vld [vmem:[#allocation170_spill] sm:$0xff]  ;;  %v728_v7 = vmul.f32 %v6831_v24, %v10224_v8  ;;  %v10230_v16 = vld [vmem:[#allocation200_spill] sm:$0xff]  ;;  %3700 = vperm.xlu1 %4653, %v6629_v54  }
 0x482   : > { %10213 = vst [vmem:[#allocation84_spill] sm:$0xff] %v7246_v2  ;;  %10215 = vst [vmem:[#allocation65_spill] sm:$0xff] %v7250_v17  ;;  %v1505_v36 = vmul.f32 %v10220_v28, %v6820_v61  ;;  %v10222_v17 = vld [vmem:[#allocation97_spill] sm:$0xff]  ;;  %v7278_v28 = vmul.f32 %v6949_v41, %v10226_v33  ;;  %v1681_v56 = vmul.f32 %v10230_v16, %v6831_v24  ;;  %v10236_v33 = vld [vmem:[#allocation103_spill] sm:$0xff]  ;;  %4136 = vperm.xlu0 %4660, %v7175_v26  }
 0x483   : > { %10218 = vst [vmem:[#allocation77_spill] sm:$0xff] %v7257_v13  ;;  %v7270_v35 = vmul.f32 %v6949_v41, %v10222_v17  ;;  %v10225_v13 = vld [vmem:[#allocation98_spill] sm:$0xff]  ;;  %10229 = vst [vmem:[#allocation68_spill] sm:$0xff] %v7282_v10  ;;  %v7288_v17 = vpop.permute.xlu0 %4028  ;;  %v10237_v25 = vld [vmem:[#allocation172_spill] sm:$0xff]  ;;  %v7331_v14 = vpop.permute.xlu1 %3369 }
 0x484   : > { %v1591_v12 = vmul.f32 %v10225_v13, %v6827_v19  ;;  %10227 = vst [vmem:[#allocation67_spill] sm:$0xff] %v7278_v28  ;;  %10231 = vst [vmem:[#allocation69_spill] sm:$0xff] %v7286_v60  ;;  %v10234_v13 = vld [vmem:[#allocation102_spill] sm:$0xff]  ;;  %v7300_v28 = vmul.f32 %v6949_v41, %v10236_v33  ;;  %v1507_v10 = vmul.f32 %v10237_v25, %v6820_v61  ;;  %v10238_v16 = vld [vmem:[#allocation104_spill] sm:$0xff] }
 0x485   : > { %10223 = vst [vmem:[#allocation66_spill] sm:$0xff] %v7270_v35  ;;  %10232 = vst [vmem:[#allocation71_spill] sm:$0xff] %v7288_v17  ;;  %v10233_v35 = vld [vmem:[#allocation101_spill] sm:$0xff]  ;;  %v7296_v40 = vmul.f32 %v10234_v13, %v6827_v19  ;;  %v7307_v17 = vmul.f32 %v10238_v16, %v6827_v19  ;;  %v1601_v0 = vadd.f32 %v1585_v6, %v1505_v36  ;;  %v10241_v13 = vld [vmem:[#allocation207_spill] sm:$0xff]  ;;  %3708 = vperm.xlu1 %4653, %v6637_v37  }
 0x486   : > { %v7292_v8 = vmul.f32 %v6949_v41, %v10233_v35  ;;  %v10240_v60 = vld [vmem:[#allocation137_spill] sm:$0xff]  ;;  %v10243_v25 = vld [vmem:[#allocation106_spill] sm:$0xff]  ;;  %v744_v16 = vadd.f32 %v728_v7, %v6957_v22  ;;  %10249 = vst [vmem:[#allocation81_spill] sm:$0xff] %v7331_v14  ;;  %v10252_v7 = vld [vmem:[#allocation136_spill] sm:$0xff] }
 0x487   : > { %10235 = vst [vmem:[#allocation73_spill] sm:$0xff] %v7296_v40  ;;  %10239 = vst [vmem:[#allocation75_spill] sm:$0xff] %v7307_v17  ;;  %v730_v35 = vmul.f32 %v6831_v24, %v10240_v60  ;;  %v1777_v40 = vmul.f32 %v10241_v13, %v6834_v23  ;;  %v10242_v33 = vld [vmem:[#allocation105_spill] sm:$0xff]  ;;  %v7320_v11 = vmul.f32 %v10243_v25, %v6827_v19  ;;  %v10245_v17 = vld [vmem:[#allocation202_spill] sm:$0xff]  ;;  %v7333_v42 = vpop.permute.xlu0 %4036 }
 0x488   : > { %v7316_v32 = vmul.f32 %v6949_v41, %v10242_v33  ;;  %v1683_v29 = vmul.f32 %v10245_v17, %v6831_v24  ;;  %v10246_v60 = vld [vmem:[#allocation139_spill] sm:$0xff]  ;;  %v10247_v36 = vld [vmem:[#allocation174_spill] sm:$0xff]  ;;  %v1697_v26 = vadd.f32 %v1681_v56, %v1601_v0  ;;  %10250 = vst [vmem:[#allocation83_spill] sm:$0xff] %v7333_v42  ;;  %v7341_v17 = vmul.f32 %v7121_v50, %v10252_v7  ;;  %v10254_v0 = vld [vmem:[#allocation176_spill] sm:$0xff] }
 0x489   : > { %10244 = vst [vmem:[#allocation79_spill] sm:$0xff] %v7320_v11  ;;  %v732_v6 = vmul.f32 %v6831_v24, %v10246_v60  ;;  %v1509_v13 = vmul.f32 %v10247_v36, %v6820_v61  ;;  %v10248_v49 = vld [vmem:[#allocation234_spill] sm:$0xff]  ;;  %v10251_v25 = vld [vmem:[#allocation107_spill] sm:$0xff]  ;;  %v1603_v60 = vadd.f32 %v1587_v53, %v1507_v10  ;;  %v10253_v11 = vld [vmem:[#allocation208_spill] sm:$0xff]  ;;  %v1511_v56 = vmul.f32 %v10254_v0, %v6820_v61 }
 0x48a   : > { %v1873_v33 = vmul.f32 %v10248_v49, %v6864_v5  ;;  %v7337_v22 = vmul.f32 %v6949_v41, %v10251_v25  ;;  %v1779_v36 = vmul.f32 %v10253_v11, %v6834_v23  ;;  %v746_v49 = vadd.f32 %v730_v35, %v6968_v38  ;;  %v10255_v14 = vld [vmem:[#allocation326_spill] sm:$0xff]  ;;  %v10256_v55 = vld [vmem:[#allocation204_spill] sm:$0xff]  ;;  %v10258_v35 = vld [vmem:[#allocation249_spill] sm:$0xff]  ;;  %3716 = vperm.xlu1 %4653, %v6646_v20  }
 0x48b   : > { %v1793_v42 = vadd.f32 %v1777_v40, %v1697_v26  ;;  %v1969_v25 = vmul.f32 %v10255_v14, %v6949_v41  ;;  %v1699_v58 = vadd.f32 %v1683_v29, %v1603_v60  ;;  %v1685_v7 = vmul.f32 %v10256_v55, %v6831_v24  ;;  %v10257_v53 = vld [vmem:[#allocation236_spill] sm:$0xff]  ;;  %v7359_v26 = vpop.permute.xlu1 %3379  ;;  %v10260_v14 = vld [vmem:[#allocation206_spill] sm:$0xff] }
 0x48c   : > { %v1875_v10 = vmul.f32 %v10257_v53, %v6864_v5  ;;  %v844_v11 = vadd.f32 %v7145_v45, %v744_v16  ;;  %v748_v37 = vadd.f32 %v732_v6, %v6970_v48  ;;  %v1605_v46 = vadd.f32 %v1589_v39, %v1509_v13  ;;  %10259 = vst [vmem:[#allocation95_spill] sm:$0xff] %v7359_v26  ;;  %v10261_v55 = vld [vmem:[#allocation210_spill] sm:$0xff]  ;;  %v10262_v53 = vld [vmem:[#allocation328_spill] sm:$0xff]  ;;  %v7368_v48 = vpop.permute.xlu0 %1257  ;;  %v10264_v45 = vld [vmem:[#allocation141_spill] sm:$0xff] }
 0x48d   : > { %v1889_v38 = vadd.f32 %v1873_v33, %v1793_v42  ;;  %v928_v0 = vmul.f32 %v6864_v5, %v10258_v35  ;;  %v1687_v29 = vmul.f32 %v10260_v14, %v6831_v24  ;;  %v1795_v40 = vadd.f32 %v1779_v36, %v1699_v58  ;;  %10263 = vst [vmem:[#allocation85_spill] sm:$0xff] %v7368_v48  ;;  %v10265_v58 = vld [vmem:[#allocation212_spill] sm:$0xff]  ;;  %v10266_v35 = vld [vmem:[#allocation251_spill] sm:$0xff]  ;;  %v10268_v48 = vld [vmem:[#allocation269_spill] sm:$0xff] }
 0x48e   : > { %v1781_v60 = vmul.f32 %v10261_v55, %v6834_v23  ;;  %v1971_v2 = vmul.f32 %v10262_v53, %v6949_v41  ;;  %v734_v42 = vmul.f32 %v6831_v24, %v10264_v45  ;;  %v1607_v39 = vadd.f32 %v1591_v12, %v1511_v56  ;;  %v10267_v55 = vld [vmem:[#allocation238_spill] sm:$0xff]  ;;  %3724 = vperm.xlu1 %4653, %v6655_v1   ;;  %v10274_v1 = vld [vmem:[#allocation272_spill] sm:$0xff] }
 0x48f   : > { %v846_v16 = vadd.f32 %v7156_v27, %v746_v49  ;;  %v1985_v6 = vadd.f32 %v1969_v25, %v1889_v38  ;;  %v1701_v13 = vadd.f32 %v1685_v7, %v1605_v46  ;;  %v1783_v33 = vmul.f32 %v10265_v58, %v6834_v23  ;;  %v7385_v25 = vpop.permute.xlu1 %3404  ;;  %v10272_v38 = vld [vmem:[#allocation330_spill] sm:$0xff] }
 0x490   : > { %v1891_v36 = vadd.f32 %v1875_v10, %v1795_v40  ;;  %v930_v14 = vmul.f32 %v6864_v5, %v10266_v35  ;;  %v1877_v20 = vmul.f32 %v10267_v55, %v6864_v5  ;;  %v944_v53 = vadd.f32 %v928_v0, %v844_v11  ;;  %10269 = vst [vmem:[#allocation86_spill] sm:$0xff] %v7385_v25  ;;  %v7387_v7 = vpop.permute.xlu0 %1269  ;;  %v10271_v10 = vld [vmem:[#allocation240_spill] sm:$0xff]  ;;  %v10374_v25 = vld [vmem:[#allocation154_spill] sm:$0xff] }
 0x491   : > { %v2065_v26 = vmul.f32 %v10268_v48, %v7031_v57  ;;  %v2161_v12 = vmul.f32 %v6760_v3, %v7121_v50  ;;  %v1703_v27 = vadd.f32 %v1687_v29, %v1607_v39  ;;  %v1797_v49 = vadd.f32 %v1781_v60, %v1701_v13  ;;  %10270 = vst [vmem:[#allocation87_spill] sm:$0xff] %v7387_v7  ;;  %v10273_v60 = vld [vmem:[#allocation253_spill] sm:$0xff] }
 0x492   : > { %v848_v46 = vadd.f32 %v7160_v34, %v748_v37  ;;  %v1987_v56 = vadd.f32 %v1971_v2, %v1891_v36  ;;  %v1879_v11 = vmul.f32 %v10271_v10, %v6864_v5  ;;  %v1973_v0 = vmul.f32 %v10272_v38, %v6949_v41  ;;  %3732 = vperm.xlu1 %4653, %v6664_v63  }
 0x493   : > { %v1128_v3 = vmul.f32 %v7031_v57, %v6505_v18  ;;  %v2081_v29 = vadd.f32 %v2065_v26, %v1985_v6  ;;  %v946_v40 = vadd.f32 %v930_v14, %v846_v16  ;;  %v932_v34 = vmul.f32 %v6864_v5, %v10273_v60  ;;  %v7406_v18 = vld [vmem:[%s9506_s1 + $0x8] ss:$0 sm:$0xff] }
 0x494   : > { %v2067_v2 = vmul.f32 %v10274_v1, %v7031_v57  ;;  %v2163_v37 = vmul.f32 %v6766_v43, %v7121_v50  ;;  %v1799_v48 = vadd.f32 %v1783_v33, %v1703_v27  ;;  %v1893_v45 = vadd.f32 %v1877_v20, %v1797_v49  ;;  %v10275_v26 = vld [vmem:[#allocation332_spill] sm:$0xff]  ;;  %v7413_v43 = vpop.permute.xlu1 %3412  ;;  %v10279_v20 = vld [vmem:[#allocation255_spill] sm:$0xff]  ;;  %v10280_v27 = vld [vmem:[#allocation138_spill] sm:$0xff] }
 0x495   : > { %v1044_v39 = vadd.f32 %v7292_v8, %v944_v53  ;;  %v2177_v13 = vadd.f32 %v2161_v12, %v2081_v29  ;;  %v750_v58 = vadd.f32 %v734_v42, %v6984_v47  ;;  %v1975_v16 = vmul.f32 %v10275_v26, %v6949_v41  ;;  %10276 = vst [vmem:[#allocation88_spill] sm:$0xff] %v7413_v43  ;;  %v7415_v8 = vpop.permute.xlu0 %1277  ;;  %v10278_v47 = vld [vmem:[#allocation304_spill] sm:$0xff]  ;;  %v10281_v49 = vld [vmem:[#allocation274_spill] sm:$0xff] }
 0x496   : > { %v1130_v6 = vmul.f32 %v7031_v57, %v6511_v44  ;;  %v2083_v36 = vadd.f32 %v2067_v2, %v1987_v56  ;;  %10277 = vst [vmem:[#allocation89_spill] sm:$0xff] %v7415_v8  ;;  %v1895_v33 = vadd.f32 %v1879_v11, %v1799_v48  ;;  %v2257_v42 = vmul.f32 %v7406_v18, %v10278_v47  ;;  %v10284_v60 = vld [vmem:[#allocation372_spill] sm:$0xff]  ;;  %v10289_v47 = vld [vmem:[#allocation417_spill] sm:$0xff]  ;;  %v10418_v43 = vld [vmem:[#allocation30_spill] sm:$0xff] }
 0x497   : > { %v1989_v35 = vadd.f32 %v1973_v0, %v1893_v45  ;;  %v1144_v14 = vadd.f32 %v1128_v3, %v1044_v39  ;;  %v948_v55 = vadd.f32 %v932_v34, %v848_v46  ;;  %v934_v53 = vmul.f32 %v6864_v5, %v10279_v20  ;;  %v10282_v0 = vld [vmem:[#allocation306_spill] sm:$0xff]  ;;  %3740 = vperm.xlu1 %4653, %v6673_v30  }
 0x498   : > { %v1046_v12 = vadd.f32 %v7300_v28, %v946_v40  ;;  %v2179_v44 = vadd.f32 %v2163_v37, %v2083_v36  ;;  %v1230_v63 = vmul.f32 %v7121_v50, %v10280_v27  ;;  %v2069_v56 = vmul.f32 %v10281_v49, %v7031_v57  ;;  %v7432_v28 = vpop.permute.xlu1 %3416  ;;  %v10288_v36 = vld [vmem:[#allocation308_spill] sm:$0xff] }
 0x499   : > { %v2273_v10 = vadd.f32 %v2257_v42, %v2177_v13  ;;  %v2165_v11 = vmul.f32 %v6772_v62, %v7121_v50  ;;  %v850_v38 = vadd.f32 %v7165_v51, %v750_v58  ;;  %v2259_v46 = vmul.f32 %v7406_v18, %v10282_v0  ;;  %10283 = vst [vmem:[#allocation90_spill] sm:$0xff] %v7432_v28  ;;  %v1286_v40 = vpop.permute.xlu0 %1285  ;;  %v10285_v51 = vld [vmem:[#allocation276_spill] sm:$0xff]  ;;  %v10286_v13 = vld [vmem:[#allocation445_spill] sm:$0xff] }
 0x49a   : > { %v1991_v3 = vadd.f32 %v1975_v16, %v1895_v33  ;;  %v1146_v29 = vadd.f32 %v1130_v6, %v1046_v12  ;;  %v1132_v34 = vmul.f32 %v7031_v57, %v10284_v60  ;;  %v2085_v1 = vadd.f32 %v2069_v56, %v1989_v35  ;;  %v10287_v16 = vld [vmem:[#allocation140_spill] sm:$0xff] }
 0x49b   : > { %v1244_v2 = vadd.f32 %v7341_v17, %v1144_v14  ;;  %v1328_v62 = vmul.f32 %v7406_v18, %v1286_v40  ;;  %v950_v37 = vadd.f32 %v934_v53, %v850_v38  ;;  %v2071_v48 = vmul.f32 %v10285_v51, %v7031_v57  ;;  %3748 = vperm.xlu1 %4653, %v10289_v47   ;;  %v10294_v0 = vld [vmem:[#allocation108_spill] sm:$0xff]  ;;  %v10299_v40 = vld [vmem:[#allocation310_spill] sm:$0xff] }
 0x49c   : > { %v1048_v45 = vadd.f32 %v7316_v32, %v948_v55  ;;  %v2275_v39 = vadd.f32 %v2259_v46, %v2179_v44  ;;  %vm2289_vm0 = vcmp.ge.f32.partialorder %v2273_v10, 1.0  ;;  %v2181_v30 = vadd.f32 %v2165_v11, %v2085_v1  ;;  %v7448_v42 = vpop.permute.xlu1 %3424  ;;  %v10291_v55 = vld [vmem:[#allocation374_spill] sm:$0xff]  ;;  %v10298_v10 = vld [vmem:[#allocation112_spill] sm:$0xff] }
 0x49d   : > { %v2167_v58 = vmul.f32 %v10286_v13, %v7121_v50  ;;  %v1344_v26 = vadd.f32 %v1328_v62, %v1244_v2  ;;  %v1232_v6 = vmul.f32 %v7121_v50, %v10287_v16  ;;  %v2261_v17 = vmul.f32 %v7406_v18, %v10288_v36  ;;  %10290 = vst [vmem:[#allocation91_spill] sm:$0xff] %v7448_v42  ;;  %v1294_v32 = vpop.permute.xlu0 %1293  ;;  %v10304_v13 = vld [vmem:[#allocation142_spill] sm:$0xff]  ;;  %v10351_v11 = vld [vmem:[#allocation132_spill] sm:$0xff]  ;;  %v10411_v42 = vld [vmem:[#allocation175_spill] sm:$0xff] }
 0x49e   : > { %v2087_v33 = vadd.f32 %v2071_v48, %v1991_v3  ;;  %v1246_v35 = vadd.f32 %v1230_v63, %v1146_v29  ;;  %v1148_v14 = vadd.f32 %v1132_v34, %v1048_v45  ;;  %v1134_v20 = vmul.f32 %v7031_v57, %v10291_v55  ;;  %v10302_v48 = vld [vmem:[#allocation11_spill] sm:$0xff]  ;;  %v10303_v45 = vld [vmem:[#allocation130_spill] sm:$0xff] }
 0x49f   : > { %vm1360_vm1 = vcmp.ge.f32.partialorder %v1344_v26, 1.0  ;;  %v1330_v53 = vmul.f32 %v7406_v18, %v1294_v32  ;;  %v1050_v12 = vadd.f32 %v7337_v22, %v950_v37  ;;  %vm2291_vm2 = vcmp.ge.f32.partialorder %v2275_v39, 1.0  ;;  %v10296_v22 = vld [vmem:[#allocation109_spill] sm:$0xff]  ;;  %v10308_v32 = vld [vmem:[#allocation111_spill] sm:$0xff] }
 0x4a0   : > { %v9550_v44 = vmov 0.0   ;;  %v2277_v63 = vadd.f32 %v2261_v17, %v2181_v30  ;;  %v2183_v56 = vadd.f32 %v2167_v58, %v2087_v33  ;;  %v7465_v46 = vmul.f32 %v10294_v0, %v6827_v19  ;;  %v7476_v1 = vpop.permute.xlu1 %3432  ;;  %v10307_v33 = vld [vmem:[#allocation110_spill] sm:$0xff] }
 0x4a1   : > { %v7456_v27 = vsel %vm2289_vm0, 1.0, %v9550_v44  ;;  %v7459_v49 = vsel %vm1360_vm1, 1.0, %v9550_v44  ;;  %v1346_v38 = vadd.f32 %v1330_v53, %v1246_v35  ;;  %v7469_v3 = vmul.f32 %v10296_v22, %v6827_v19  ;;  %10301 = vst [vmem:[#allocation96_spill] sm:$0xff] %v7476_v1  ;;  %v1302_v2 = vpop.permute.xlu0 %1301  ;;  %v10313_v22 = vld [vmem:[#allocation131_spill] sm:$0xff]  ;;  %v10410_v1 = vld [vmem:[#allocation182_spill] sm:$0xff] }
 0x4a2   : > { %10292 = vst [vmem:[#allocation92_spill] sm:$0xff] %v7456_v27  ;;  %10293 = vst [vmem:[#allocation93_spill] sm:$0xff] %v7459_v49  ;;  %v1122_v29 = vmul.f32 %v7031_v57, %v10298_v10  ;;  %v2263_v60 = vmul.f32 %v7406_v18, %v10299_v40  ;;  %v10300_v34 = vmov 5   ;;  %v1150_v62 = vadd.f32 %v1134_v20, %v1050_v12  ;;  %v10312_v12 = vld [vmem:[#allocation146_spill] sm:$0xff]  ;;  %v10369_v27 = vld [vmem:[#allocation151_spill] sm:$0xff] }
 0x4a3   : > { %10295 = vst [vmem:[#allocation94_spill] sm:$0xff] %v7465_v46  ;;  %10297 = vst [vmem:[#allocation170_spill] sm:$0xff] %v7469_v3  ;;  %4655 = vset.pattern.permute.xlu1 %v10300_v34  ;;  %vm1362_vm3 = vcmp.ge.f32.partialorder %v1346_v38, 1.0  ;;  %v1248_v37 = vadd.f32 %v1232_v6, %v1148_v14  ;;  %v1332_v51 = vmul.f32 %v7406_v18, %v1302_v2  ;;  %v7486_v26 = vsel %vm2291_vm2, 1.0, %v9550_v44  ;;  %v10310_v14 = vld [vmem:[#allocation129_spill] sm:$0xff]  ;;  %v10349_v6 = vld [vmem:[#allocation128_spill] sm:$0xff] }
 0x4a4   : > { %3788 = vperm.xlu1 %4655, %v10302_v48   ;;  %v1222_v30 = vmul.f32 %v7121_v50, %v10303_v45  ;;  %v1234_v58 = vmul.f32 %v7121_v50, %v10304_v13  ;;  %10305 = vst [vmem:[#allocation97_spill] sm:$0xff] %v7486_v26  ;;  %v7489_v16 = vsel %vm1362_vm3, 1.0, %v9550_v44  ;;  %vm2293_vm4 = vcmp.ge.f32.partialorder %v2277_v63, 1.0  ;;  %v7504_v20 = vpop.permute.xlu1 %3440  ;;  %v10320_v48 = vld [vmem:[#allocation116_spill] sm:$0xff] }
 0x4a5   : > { %10306 = vst [vmem:[#allocation135_spill] sm:$0xff] %v7489_v16  ;;  %v2279_v36 = vadd.f32 %v2263_v60, %v2183_v56  ;;  %v1348_v17 = vadd.f32 %v1332_v51, %v1248_v37  ;;  %v7495_v47 = vmul.f32 %v7031_v57, %v10307_v33  ;;  %v1138_v35 = vadd.f32 %v1122_v29, %v7264_v4  ;;  %v1310_v53 = vpop.permute.xlu0 %1309  ;;  %v10316_v60 = vld [vmem:[#allocation133_spill] sm:$0xff]  ;;  %v10363_v26 = vld [vmem:[#allocation148_spill] sm:$0xff]  ;;  %v10367_v16 = vld [vmem:[#allocation150_spill] sm:$0xff] }
 0x4a6   : > { %v7500_v39 = vmul.f32 %v10308_v32, %v6827_v19  ;;  %v721_v55 = vmul.f32 %v6831_v24, %v10310_v14  ;;  %10311 = vst [vmem:[#allocation99_spill] sm:$0xff] %v7504_v20  ;;  %v1322_v56 = vmul.f32 %v7406_v18, %v10312_v12  ;;  %v1250_v38 = vadd.f32 %v1234_v58, %v1150_v62  ;;  %v10318_v51 = vld [vmem:[#allocation113_spill] sm:$0xff]  ;;  %v10327_v14 = vld [vmem:[#allocation18_spill] sm:$0xff] }
 0x4a7   : > { %vm1364_vm5 = vcmp.ge.f32.partialorder %v1348_v17, 1.0  ;;  %v1334_v0 = vmul.f32 %v7406_v18, %v1310_v53  ;;  %v1238_v4 = vadd.f32 %v1222_v30, %v1138_v35  ;;  %v724_v10 = vmul.f32 %v6831_v24, %v10313_v22  ;;  %v10321_v30 = vld [vmem:[#allocation115_spill] sm:$0xff]  ;;  %v10325_v33 = vld [vmem:[#allocation117_spill] sm:$0xff] }
 0x4a8   : > { %10309 = vst [vmem:[#allocation98_spill] sm:$0xff] %v7500_v39  ;;  %3796 = vperm.xlu1 %4655, %v6629_v54   ;;  %v7514_v29 = vsel %vm2293_vm4, 1.0, %v9550_v44  ;;  %v7517_v40 = vsel %vm1364_vm5, 1.0, %v9550_v44  ;;  %v726_v34 = vmul.f32 %v6831_v24, %v10316_v60  ;;  %vm2295_vm6 = vcmp.ge.f32.partialorder %v2279_v36, 1.0  ;;  %v10317_v54 = vld [vmem:[#allocation114_spill] sm:$0xff]  ;;  %v7539_v58 = vpop.permute.xlu1 %3448  ;;  %v10328_v53 = vld [vmem:[#allocation9_spill] sm:$0xff] }
 0x4a9   : > { %10314 = vst [vmem:[#allocation100_spill] sm:$0xff] %v7514_v29  ;;  %10315 = vst [vmem:[#allocation200_spill] sm:$0xff] %v7517_v40  ;;  %v1350_v62 = vadd.f32 %v1334_v0, %v1250_v38  ;;  %v7525_v37 = vmul.f32 %v7031_v57, %v10317_v54  ;;  %v7529_v63 = vmul.f32 %v10318_v51, %v6827_v19  ;;  %v10324_v36 = vld [vmem:[#allocation118_spill] sm:$0xff]  ;;  %v10329_v38 = vld [vmem:[#allocation12_spill] sm:$0xff]  ;;  %v7553_v22 = vsel %vm2295_vm6, 1.0, %v9550_v44 }
 0x4aa   : > { %v7533_v45 = vmul.f32 %v7031_v57, %v10320_v48  ;;  %v7537_v13 = vmul.f32 %v10321_v30, %v6827_v19  ;;  %10323 = vst [vmem:[#allocation103_spill] sm:$0xff] %v7539_v58  ;;  %v7543_v17 = vmul.f32 %v7031_v57, %v10324_v36  ;;  %v7547_v35 = vmul.f32 %v10325_v33, %v6827_v19  ;;  %v10332_v54 = vld [vmem:[#allocation120_spill] sm:$0xff]  ;;  %v10333_v48 = vld [vmem:[#allocation119_spill] sm:$0xff]  ;;  %v10337_v36 = vld [vmem:[#allocation121_spill] sm:$0xff] }
 0x4ab   : > { %10319 = vst [vmem:[#allocation101_spill] sm:$0xff] %v7529_v63  ;;  %v1338_v32 = vadd.f32 %v1322_v56, %v1238_v4  ;;  %vm1366_vm7 = vcmp.ge.f32.partialorder %v1350_v62, 1.0  ;;  %v737_v12 = vadd.f32 %v721_v55, %v10328_v53  ;;  %v740_v0 = vadd.f32 %v724_v10, %v10329_v38  ;;  %10330 = vst [vmem:[#allocation104_spill] sm:$0xff] %v7553_v22  ;;  %v10335_v4 = vld [vmem:[#allocation14_spill] sm:$0xff]  ;;  %v10340_v38 = vld [vmem:[#allocation123_spill] sm:$0xff] }
 0x4ac   : > { %10322 = vst [vmem:[#allocation102_spill] sm:$0xff] %v7537_v13  ;;  %10326 = vst [vmem:[#allocation172_spill] sm:$0xff] %v7547_v35  ;;  %3800 = vperm.xlu1 %4655, %v10327_v14   ;;  %v7556_v60 = vsel %vm1366_vm7, 1.0, %v9550_v44  ;;  %v7560_v51 = vmul.f32 %v7031_v57, %v10332_v54  ;;  %v7564_v56 = vmul.f32 %v10333_v48, %v6827_v19  ;;  %v10336_v10 = vld [vmem:[#allocation122_spill] sm:$0xff]  ;;  %v10339_v14 = vld [vmem:[#allocation124_spill] sm:$0xff] }
 0x4ad   : > { %10331 = vst [vmem:[#allocation137_spill] sm:$0xff] %v7556_v60  ;;  %v742_v62 = vadd.f32 %v726_v34, %v10335_v4  ;;  %v7571_v30 = vmul.f32 %v7031_v57, %v10336_v10  ;;  %v7575_v33 = vmul.f32 %v10337_v36, %v6827_v19  ;;  %v7579_v53 = vmul.f32 %v7031_v57, %v10339_v14  ;;  %v7585_v34 = vpop.permute.xlu1 %3456  ;;  %v10343_v48 = vld [vmem:[#allocation126_spill] sm:$0xff]  ;;  %v10344_v10 = vld [vmem:[#allocation125_spill] sm:$0xff]  ;;  %v10346_v36 = vld [vmem:[#allocation127_spill] sm:$0xff] }
 0x4ae   : > { %10334 = vst [vmem:[#allocation207_spill] sm:$0xff] %v7564_v56  ;;  %v7583_v54 = vmul.f32 %v10340_v38, %v6827_v19  ;;  %10342 = vst [vmem:[#allocation202_spill] sm:$0xff] %v7585_v34  ;;  %v7589_v4 = vmul.f32 %v7031_v57, %v10343_v48  ;;  %v7593_v55 = vmul.f32 %v10344_v10, %v6827_v19  ;;  %vm1354_vm8 = vcmp.ge.f32.partialorder %v1338_v32, 1.0  ;;  %v10348_v14 = vld [vmem:[#allocation6_spill] sm:$0xff]  ;;  %v10353_v48 = vld [vmem:[#allocation37_spill] sm:$0xff] }
 0x4af   : > { %10338 = vst [vmem:[#allocation105_spill] sm:$0xff] %v7575_v33  ;;  %v7597_v2 = vmul.f32 %v10346_v36, %v6827_v19  ;;  %v7602_v38 = vmul.f32 %v7121_v50, %v10349_v6  ;;  %v7606_v44 = vmul.f32 %v7121_v50, %v10351_v11  ;;  %v7609_v22 = vadd.f32 %v10353_v48, %v737_v12  ;;  %v10354_v60 = vld [vmem:[#allocation134_spill] sm:$0xff]  ;;  %v10356_v32 = vld [vmem:[#allocation143_spill] sm:$0xff]  ;;  %v10357_v29 = vld [vmem:[#allocation144_spill] sm:$0xff] }
 0x4b0   : > { %10341 = vst [vmem:[#allocation106_spill] sm:$0xff] %v7583_v54  ;;  %10345 = vst [vmem:[#allocation139_spill] sm:$0xff] %v7593_v55  ;;  %3808 = vperm.xlu1 %4655, %v10348_v14   ;;  %v7612_v10 = vadd.f32 %v7108_v31, %v740_v0  ;;  %v7616_v36 = vmul.f32 %v7121_v50, %v10354_v60  ;;  %v1673_v14 = vmul.f32 %v10356_v32, %v6831_v24  ;;  %v10359_v12 = vld [vmem:[#allocation145_spill] sm:$0xff]  ;;  %v10360_v31 = vmov 0.0   ;;  %v10362_v60 = vld [vmem:[#allocation147_spill] sm:$0xff] }
 0x4b1   : > { %10347 = vst [vmem:[#allocation174_spill] sm:$0xff] %v7597_v2  ;;  %10350 = vst [vmem:[#allocation234_spill] sm:$0xff] %v7602_v38  ;;  %v7622_v6 = vmul.f32 %v7406_v18, %v10357_v29  ;;  %v7625_v11 = vadd.f32 %v7133_v9, %v742_v62  ;;  %v7629_v48 = vmul.f32 %v10359_v12, %v6831_v24  ;;  %v7632_v0 = vsel %vm1354_vm8, 1.0, %v10360_v31  ;;  %v7642_v29 = vpop.permute.xlu1 %3464  ;;  %v10366_v9 = vld [vmem:[#allocation149_spill] sm:$0xff]  ;;  %v10377_v54 = vld [vmem:[#allocation155_spill] sm:$0xff] }
 0x4b2   : > { %10352 = vst [vmem:[#allocation107_spill] sm:$0xff] %v7606_v44  ;;  %10355 = vst [vmem:[#allocation136_spill] sm:$0xff] %v7616_v36  ;;  %v7636_v40 = vmul.f32 %v10362_v60, %v6831_v24  ;;  %v7640_v32 = vmul.f32 %v7406_v18, %v10363_v26  ;;  %v7646_v62 = vmul.f32 %v10366_v9, %v6831_v24  ;;  %v10370_v60 = vld [vmem:[#allocation162_spill] sm:$0xff]  ;;  %v10371_v26 = vld [vmem:[#allocation152_spill] sm:$0xff] }
 0x4b3   : > { %10358 = vst [vmem:[#allocation208_spill] sm:$0xff] %v7622_v6  ;;  %10361 = vst [vmem:[#allocation176_spill] sm:$0xff] %v7632_v0  ;;  %v7650_v12 = vmul.f32 %v7406_v18, %v10367_v16  ;;  %v7654_v49 = vmul.f32 %v10369_v27, %v6831_v24  ;;  %v1498_v8 = vmul.f32 %v10370_v60, %v6820_v61  ;;  %v10373_v9 = vld [vmem:[#allocation153_spill] sm:$0xff]  ;;  %v10376_v27 = vld [vmem:[#allocation166_spill] sm:$0xff] }
 0x4b4   : > { %10364 = vst [vmem:[#allocation326_spill] sm:$0xff] %v7640_v32  ;;  %10365 = vst [vmem:[#allocation204_spill] sm:$0xff] %v7642_v29  ;;  %3816 = vperm.xlu1 %4655, %v6952_v21   ;;  %v7661_v7 = vmul.f32 %v7406_v18, %v10371_v26  ;;  %v7665_v2 = vmul.f32 %v10373_v9, %v6831_v24  ;;  %v7669_v16 = vmul.f32 %v7406_v18, %v10374_v25  ;;  %v10378_v21 = vld [vmem:[#allocation156_spill] sm:$0xff]  ;;  %v10381_v9 = vld [vmem:[#allocation54_spill] sm:$0xff] }
 0x4b5   : > { %10368 = vst [vmem:[#allocation236_spill] sm:$0xff] %v7650_v12  ;;  %v1501_v55 = vmul.f32 %v10376_v27, %v6820_v61  ;;  %v7675_v60 = vmul.f32 %v10377_v54, %v6831_v24  ;;  %v7679_v33 = vmul.f32 %v7406_v18, %v10378_v21  ;;  %v10380_v26 = vld [vmem:[#allocation168_spill] sm:$0xff]  ;;  %v1577_v35 = vmul.f32 %v10381_v9, %v6827_v19  ;;  %v10382_v25 = vld [vmem:[#allocation157_spill] sm:$0xff]  ;;  %v10385_v54 = vld [vmem:[#allocation159_spill] sm:$0xff] }
 0x4b6   : > { %10372 = vst [vmem:[#allocation249_spill] sm:$0xff] %v7661_v7  ;;  %10375 = vst [vmem:[#allocation206_spill] sm:$0xff] %v7669_v16  ;;  %v1503_v56 = vmul.f32 %v10380_v26, %v6820_v61  ;;  %v7687_v16 = vmul.f32 %v10382_v25, %v6831_v24  ;;  %v10383_v7 = vld [vmem:[#allocation158_spill] sm:$0xff]  ;;  %v7695_v12 = vmul.f32 %v10385_v54, %v6831_v24  ;;  %v10387_v21 = vld [vmem:[#allocation160_spill] sm:$0xff]  ;;  %v7715_v54 = vpop.permute.xlu1 %3504 }
 0x4b7   : > { %10379 = vst [vmem:[#allocation210_spill] sm:$0xff] %v7679_v33  ;;  %v7691_v27 = vmul.f32 %v7406_v18, %v10383_v7  ;;  %v7699_v33 = vmul.f32 %v7406_v18, %v10387_v21  ;;  %v10389_v26 = vld [vmem:[#allocation161_spill] sm:$0xff]  ;;  %v7706_v9 = vadd.f32 %v7222_v15, %v1498_v8  ;;  %v10391_v25 = vld [vmem:[#allocation163_spill] sm:$0xff]  ;;  %v10393_v7 = vld [vmem:[#allocation164_spill] sm:$0xff]  ;;  %v7754_v28 = vmul.f32 %v10411_v42, %v6831_v24 }
 0x4b8   : > { %10386 = vst [vmem:[#allocation141_spill] sm:$0xff] %v7695_v12  ;;  %v7703_v13 = vmul.f32 %v10389_v26, %v6831_v24  ;;  %v7710_v32 = vmul.f32 %v10391_v25, %v6831_v24  ;;  %3824 = vperm.xlu1 %4655, %v7011_v59   ;;  %10394 = vst [vmem:[#allocation269_spill] sm:$0xff] %v7715_v54  ;;  %v10395_v21 = vld [vmem:[#allocation165_spill] sm:$0xff]  ;;  %v7722_v26 = vadd.f32 %v7238_v52, %v1501_v55  ;;  %v10397_v15 = vld [vmem:[#allocation167_spill] sm:$0xff] }
 0x4b9   : > { %10384 = vst [vmem:[#allocation328_spill] sm:$0xff] %v7691_v27  ;;  %10388 = vst [vmem:[#allocation212_spill] sm:$0xff] %v7699_v33  ;;  %v1499_v27 = vmul.f32 %v10393_v7, %v6820_v61  ;;  %v7719_v33 = vmul.f32 %v10395_v21, %v6831_v24  ;;  %v7726_v8 = vmul.f32 %v10397_v15, %v6831_v24  ;;  %v10399_v25 = vld [vmem:[#allocation60_spill] sm:$0xff]  ;;  %v10401_v59 = vld [vmem:[#allocation169_spill] sm:$0xff] }
 0x4ba   : > { %10390 = vst [vmem:[#allocation251_spill] sm:$0xff] %v7703_v13  ;;  %10392 = vst [vmem:[#allocation238_spill] sm:$0xff] %v7710_v32  ;;  %v1580_v6 = vmul.f32 %v10399_v25, %v6827_v19  ;;  %v10400_v29 = vld [vmem:[#allocation84_spill] sm:$0xff]  ;;  %v7735_v54 = vmul.f32 %v10401_v59, %v6831_v24  ;;  %v10403_v21 = vld [vmem:[#allocation171_spill] sm:$0xff]  ;;  %v1584_v59 = vmul.f32 %v10410_v1, %v6827_v19 }
 0x4bb   : > { %10396 = vst [vmem:[#allocation240_spill] sm:$0xff] %v7719_v33  ;;  %10398 = vst [vmem:[#allocation330_spill] sm:$0xff] %v7726_v8  ;;  %v7731_v7 = vadd.f32 %v10400_v29, %v1503_v56  ;;  %v7739_v34 = vmul.f32 %v10403_v21, %v6831_v24  ;;  %v10405_v52 = vld [vmem:[#allocation8_spill] sm:$0xff]  ;;  %v10406_v58 = vld [vmem:[#allocation173_spill] sm:$0xff] }
 0x4bc   : > { %10402 = vst [vmem:[#allocation253_spill] sm:$0xff] %v7735_v54  ;;  %v1593_v55 = vadd.f32 %v1577_v35, %v10405_v52  ;;  %v7744_v15 = vmul.f32 %v10406_v58, %v6831_v24  ;;  %v10408_v20 = vld [vmem:[#allocation57_spill] sm:$0xff]  ;;  %v10409_v56 = vld [vmem:[#allocation63_spill] sm:$0xff]  ;;  %10412 = vst [vmem:[#allocation304_spill] sm:$0xff] %v7754_v28  ;;  %3832 = vperm.xlu1 %4655, %v10418_v43  }
 0x4bd   : > { %10404 = vst [vmem:[#allocation272_spill] sm:$0xff] %v7739_v34  ;;  %v1579_v25 = vmul.f32 %v10408_v20, %v6827_v19  ;;  %v1582_v29 = vmul.f32 %v10409_v56, %v6827_v19  ;;  %v10413_v21 = vld [vmem:[#allocation177_spill] sm:$0xff]  ;;  %v10415_v58 = vld [vmem:[#allocation178_spill] sm:$0xff]  ;;  %v10417_v20 = vld [vmem:[#allocation184_spill] sm:$0xff]  ;;  %v7767_v56 = vpop.permute.xlu1 %3508 }
 0x4be   : > { %10407 = vst [vmem:[#allocation332_spill] sm:$0xff] %v7744_v15  ;;  %v7758_v35 = vmul.f32 %v10413_v21, %v6831_v24  ;;  %v7762_v52 = vmul.f32 %v10415_v58, %v6831_v24  ;;  %v1586_v15 = vmul.f32 %v10417_v20, %v6827_v19  ;;  %10419 = vst [vmem:[#allocation274_spill] sm:$0xff] %v7767_v56  ;;  %v10420_v1 = vld [vmem:[#allocation10_spill] sm:$0xff]  ;;  %v10421_v44 = vld [vmem:[#allocation185_spill] sm:$0xff] }
 0x4bf   : > { %v1596_v36 = vadd.f32 %v1580_v6, %v10420_v1  ;;  %v820_v42 = vmul.f32 %v6834_v23, %v10421_v44  ;;  %v10422_v28 = vld [vmem:[#allocation186_spill] sm:$0xff]  ;;  %v10424_v58 = vld [vmem:[#allocation179_spill] sm:$0xff]  ;;  %v10426_v20 = vld [vmem:[#allocation188_spill] sm:$0xff]  ;;  %v7784_v6 = vadd.f32 %v1673_v14, %v1593_v55  ;;  %v1595_v1 = vadd.f32 %v1579_v25, %v1499_v27 }
 0x4c0   : > { %10414 = vst [vmem:[#allocation255_spill] sm:$0xff] %v7758_v35  ;;  %10416 = vst [vmem:[#allocation138_spill] sm:$0xff] %v7762_v52  ;;  %v1588_v21 = vmul.f32 %v10422_v28, %v6827_v19  ;;  %v10423_v35 = vld [vmem:[#allocation187_spill] sm:$0xff]  ;;  %v7778_v52 = vmul.f32 %v10424_v58, %v6831_v24  ;;  %v1590_v43 = vmul.f32 %v10426_v20, %v6827_v19  ;;  %v10427_v34 = vld [vmem:[#allocation189_spill] sm:$0xff] }
 0x4c1   : > { %v823_v38 = vmul.f32 %v6834_v23, %v10423_v35  ;;  %v825_v56 = vmul.f32 %v6834_v23, %v10427_v34  ;;  %v10428_v44 = vld [vmem:[#allocation13_spill] sm:$0xff]  ;;  %v10429_v8 = vld [vmem:[#allocation15_spill] sm:$0xff]  ;;  %v10430_v33 = vld [vmem:[#allocation190_spill] sm:$0xff]  ;;  %v7802_v25 = vpop.permute.xlu1 %3516 }
 0x4c2   : > { %10425 = vst [vmem:[#allocation306_spill] sm:$0xff] %v7778_v52  ;;  %v1598_v54 = vadd.f32 %v1582_v29, %v10428_v44  ;;  %v1600_v28 = vadd.f32 %v1584_v59, %v10429_v8  ;;  %v1592_v35 = vmul.f32 %v10430_v33, %v6827_v19  ;;  %v10431_v32 = vld [vmem:[#allocation180_spill] sm:$0xff]  ;;  %v10433_v52 = vld [vmem:[#allocation181_spill] sm:$0xff]  ;;  %v10436_v14 = vld [vmem:[#allocation191_spill] sm:$0xff] }
 0x4c3   : > { %v7792_v58 = vmul.f32 %v10431_v32, %v6831_v24  ;;  %v7796_v20 = vmul.f32 %v10433_v52, %v6831_v24  ;;  %v10435_v13 = vld [vmem:[#allocation25_spill] sm:$0xff]  ;;  %v827_v27 = vmul.f32 %v6834_v23, %v10436_v14  ;;  %v10437_v55 = vld [vmem:[#allocation43_spill] sm:$0xff]  ;;  %10438 = vst [vmem:[#allocation445_spill] sm:$0xff] %v7802_v25  ;;  %v10439_v8 = vld [vmem:[#allocation48_spill] sm:$0xff] }
 0x4c4   : > { %v1602_v34 = vadd.f32 %v1586_v15, %v10435_v13  ;;  %3840 = vperm.xlu1 %4655, %v10437_v55   ;;  %v836_v29 = vadd.f32 %v820_v42, %v10439_v8  ;;  %v10440_v33 = vld [vmem:[#allocation16_spill] sm:$0xff]  ;;  %v10441_v44 = vld [vmem:[#allocation49_spill] sm:$0xff]  ;;  %v10442_v52 = vld [vmem:[#allocation183_spill] sm:$0xff] }
 0x4c5   : > { %10432 = vst [vmem:[#allocation372_spill] sm:$0xff] %v7792_v58  ;;  %10434 = vst [vmem:[#allocation276_spill] sm:$0xff] %v7796_v20  ;;  %v1604_v59 = vadd.f32 %v1588_v21, %v10440_v33  ;;  %v839_v32 = vadd.f32 %v823_v38, %v10441_v44  ;;  %v1692_v58 = vadd.f32 %v7629_v48, %v1596_v36  ;;  %v10444_v13 = vld [vmem:[#allocation17_spill] sm:$0xff]  ;;  %v10447_v25 = vld [vmem:[#allocation27_spill] sm:$0xff] }
 0x4c6   : > { %v7810_v20 = vmul.f32 %v10442_v52, %v6831_v24  ;;  %v1606_v15 = vadd.f32 %v1590_v43, %v10444_v13  ;;  %v10445_v12 = vld [vmem:[#allocation53_spill] sm:$0xff]  ;;  %v1608_v39 = vadd.f32 %v1592_v35, %v10447_v25  ;;  %v10448_v42 = vld [vmem:[#allocation195_spill] sm:$0xff]  ;;  %v1694_v38 = vadd.f32 %v7636_v40, %v1598_v54  ;;  %v10449_v48 = vld [vmem:[#allocation70_spill] sm:$0xff]  ;;  %v7828_v35 = vpop.permute.xlu1 %3524 }
 0x4c7   : > { %v841_v14 = vadd.f32 %v825_v56, %v10445_v12  ;;  %v10446_v63 = vld [vmem:[#allocation193_spill] sm:$0xff]  ;;  %v831_v21 = vmul.f32 %v6834_v23, %v10448_v42  ;;  %v1696_v36 = vadd.f32 %v7646_v62, %v1600_v28  ;;  %v843_v8 = vadd.f32 %v827_v27, %v10449_v48  ;;  %v10451_v43 = vld [vmem:[#allocation199_spill] sm:$0xff]  ;;  %10453 = vst [vmem:[#allocation308_spill] sm:$0xff] %v7828_v35  ;;  %v10454_v25 = vld [vmem:[#allocation192_spill] sm:$0xff] }
 0x4c8   : > { %10443 = vst [vmem:[#allocation140_spill] sm:$0xff] %v7810_v20  ;;  %v829_v55 = vmul.f32 %v6834_v23, %v10446_v63  ;;  %v10450_v33 = vld [vmem:[#allocation197_spill] sm:$0xff]  ;;  %v835_v12 = vmul.f32 %v6834_v23, %v10451_v43  ;;  %v1698_v56 = vadd.f32 %v7654_v49, %v1602_v34  ;;  %v10452_v63 = vld [vmem:[#allocation50_spill] sm:$0xff]  ;;  %v1674_v52 = vmul.f32 %v10454_v25, %v6831_v24  ;;  %v10455_v62 = vld [vmem:[#allocation59_spill] sm:$0xff] }
 0x4c9   : > { %v833_v44 = vmul.f32 %v6834_v23, %v10450_v33  ;;  %3848 = vperm.xlu1 %4655, %v10452_v63   ;;  %v1700_v40 = vadd.f32 %v7665_v2, %v1604_v59  ;;  %v7834_v54 = vadd.f32 %v10455_v62, %v836_v29  ;;  %v10456_v28 = vld [vmem:[#allocation72_spill] sm:$0xff]  ;;  %v10458_v48 = vld [vmem:[#allocation194_spill] sm:$0xff]  ;;  %v1702_v34 = vadd.f32 %v7675_v60, %v1606_v15  ;;  %v10459_v33 = vld [vmem:[#allocation55_spill] sm:$0xff] }
 0x4ca   : > { %v7837_v27 = vadd.f32 %v10456_v28, %v839_v32  ;;  %v10457_v13 = vld [vmem:[#allocation56_spill] sm:$0xff]  ;;  %v1675_v49 = vmul.f32 %v10458_v48, %v6831_v24  ;;  %v7844_v43 = vadd.f32 %v10459_v33, %v841_v14  ;;  %v10460_v63 = vld [vmem:[#allocation74_spill] sm:$0xff]  ;;  %v1704_v62 = vadd.f32 %v7687_v16, %v1608_v39  ;;  %v10465_v60 = vld [vmem:[#allocation201_spill] sm:$0xff] }
 0x4cb   : > { %v845_v42 = vadd.f32 %v829_v55, %v10457_v13  ;;  %v847_v25 = vadd.f32 %v831_v21, %v10460_v63  ;;  %v10461_v2 = vld [vmem:[#allocation196_spill] sm:$0xff]  ;;  %v10462_v59 = vld [vmem:[#allocation198_spill] sm:$0xff]  ;;  %v1770_v15 = vmul.f32 %v10465_v60, %v6834_v23  ;;  %v10467_v33 = vmov 6   ;;  %v7860_v21 = vpop.permute.xlu1 %3532  ;;  %v10470_v39 = vld [vmem:[#allocation205_spill] sm:$0xff] }
 0x4cc   : > { %v1677_v29 = vmul.f32 %v10461_v2, %v6831_v24  ;;  %v1679_v32 = vmul.f32 %v10462_v59, %v6831_v24  ;;  %v10463_v55 = vld [vmem:[#allocation58_spill] sm:$0xff]  ;;  %v10464_v13 = vld [vmem:[#allocation80_spill] sm:$0xff]  ;;  %10468 = vst [vmem:[#allocation417_spill] sm:$0xff] %v7860_v21  ;;  %v1690_v63 = vadd.f32 %v1674_v52, %v7706_v9  ;;  %v10469_v2 = vld [vmem:[#allocation203_spill] sm:$0xff]  ;;  %v1775_v16 = vmul.f32 %v10470_v39, %v6834_v23 }
 0x4cd   : > { %v849_v28 = vadd.f32 %v833_v44, %v10463_v55  ;;  %v851_v48 = vadd.f32 %v835_v12, %v10464_v13  ;;  %v10466_v35 = vld [vmem:[#allocation76_spill] sm:$0xff]  ;;  %4657 = vset.pattern.permute.xlu1 %v10467_v33  ;;  %v1773_v59 = vmul.f32 %v10469_v2, %v6834_v23  ;;  %v10471_v44 = vld [vmem:[#allocation209_spill] sm:$0xff]  ;;  %v10477_v20 = vld [vmem:[#allocation78_spill] sm:$0xff] }
 0x4ce   : > { %v7857_v14 = vadd.f32 %v10466_v35, %v843_v8  ;;  %v1769_v12 = vmul.f32 %v10471_v44, %v6834_v23  ;;  %v7870_v55 = vld [vmem:[%s4968_s26 + $0x188] sm:$0xff]  ;;  %v1691_v8 = vadd.f32 %v1675_v49, %v1595_v1  ;;  %v10473_v35 = vld [vmem:[#allocation211_spill] sm:$0xff]  ;;  %v10474_v60 = vld [vmem:[#allocation213_spill] sm:$0xff]  ;;  %v1693_v2 = vadd.f32 %v1677_v29, %v7722_v26 }
 0x4cf   : > { %10472 = vst [vmem:[#allocation374_spill] sm:$0xff] %v7870_v55  ;;  %3888 = vperm.xlu1 %4657, %v7870_v55   ;;  %v1771_v13 = vmul.f32 %v10473_v35, %v6834_v23  ;;  %v1772_v9 = vmul.f32 %v10474_v60, %v6834_v23  ;;  %v10475_v52 = vld [vmem:[#allocation61_spill] sm:$0xff]  ;;  %v1695_v39 = vadd.f32 %v1679_v32, %v7731_v7  ;;  %v10476_v44 = vld [vmem:[#allocation214_spill] sm:$0xff]  ;;  %v10478_v49 = vld [vmem:[#allocation216_spill] sm:$0xff] }
 0x4d0   : > { %v7878_v33 = vadd.f32 %v10475_v52, %v845_v42  ;;  %v1774_v21 = vmul.f32 %v10476_v44, %v6834_v23  ;;  %v7885_v55 = vadd.f32 %v10477_v20, %v847_v25  ;;  %v1786_v1 = vadd.f32 %v1770_v15, %v1690_v63  ;;  %v10479_v24 = vld [vmem:[#allocation82_spill] sm:$0xff]  ;;  %v10480_v60 = vld [vmem:[#allocation65_spill] sm:$0xff]  ;;  %v7895_v52 = vpop.permute.xlu1 %3540 }
 0x4d1   : > { %v1776_v35 = vmul.f32 %v10478_v49, %v6834_v23  ;;  %v7890_v3 = vadd.f32 %v10479_v24, %v849_v28  ;;  %v7893_v42 = vadd.f32 %v10480_v60, %v851_v48  ;;  %10481 = vst [vmem:[#allocation108_spill] sm:$0xff] %v7895_v52  ;;  %v1789_v26 = vadd.f32 %v1773_v59, %v1693_v2  ;;  %v10482_v20 = vld [vmem:[#allocation218_spill] sm:$0xff]  ;;  %v7903_v32 = vld [vmem:[%s4968_s26 + $0x190] sm:$0xff]  ;;  %v10483_v28 = vld [vmem:[#allocation220_spill] sm:$0xff] }
 0x4d2   : > { %v1791_v7 = vadd.f32 %v1775_v16, %v1695_v39  ;;  %v7898_v29 = vadd.f32 %v1769_v12, %v7784_v6  ;;  %v1778_v25 = vmul.f32 %v10482_v20, %v6834_v23  ;;  %v1787_v15 = vadd.f32 %v1771_v13, %v1691_v8  ;;  %v10484_v63 = vld [vmem:[#allocation222_spill] sm:$0xff]  ;;  %v10485_v6 = vld [vmem:[#allocation3_spill] sm:$0xff]  ;;  %v10493_v49 = vld [vmem:[#allocation228_spill] sm:$0xff] }
 0x4d3   : > { %3892 = vperm.xlu1 %4657, %v7903_v32   ;;  %v7906_v24 = vadd.f32 %v1772_v9, %v1692_v58  ;;  %v1780_v48 = vmul.f32 %v10483_v28, %v6834_v23  ;;  %v1782_v59 = vmul.f32 %v10484_v63, %v6834_v23  ;;  %v7912_v16 = vadd.f32 %v1774_v21, %v1694_v38  ;;  %v10487_v2 = vld [vmem:[#allocation215_spill] sm:$0xff]  ;;  %v10489_v58 = vld [vmem:[#allocation224_spill] sm:$0xff]  ;;  %v10490_v9 = vld [vmem:[#allocation217_spill] sm:$0xff] }
 0x4d4   : > { %v7916_v12 = vmul.f32 %v10485_v6, %v6834_v23  ;;  %v7920_v39 = vmul.f32 %v10487_v2, %v6834_v23  ;;  %v1784_v8 = vmul.f32 %v10489_v58, %v6834_v23  ;;  %v7924_v13 = vadd.f32 %v1776_v35, %v1696_v36  ;;  %v10492_v38 = vld [vmem:[#allocation226_spill] sm:$0xff]  ;;  %v7934_v20 = vpop.permute.xlu1 %3548  ;;  %v10495_v63 = vld [vmem:[#allocation219_spill] sm:$0xff] }
 0x4d5   : > { %v7928_v44 = vmul.f32 %v10490_v9, %v6834_v23  ;;  %v1866_v21 = vmul.f32 %v10492_v38, %v6864_v5  ;;  %v1867_v60 = vmul.f32 %v10493_v49, %v6864_v5  ;;  %10494 = vst [vmem:[#allocation11_spill] sm:$0xff] %v7934_v20  ;;  %v7936_v28 = vadd.f32 %v1778_v25, %v1698_v56  ;;  %v10497_v36 = vld [vmem:[#allocation230_spill] sm:$0xff]  ;;  %v10498_v2 = vld [vmem:[#allocation243_spill] sm:$0xff]  ;;  %v10500_v20 = vld [vmem:[#allocation221_spill] sm:$0xff] }
 0x4d6   : > { %10486 = vst [vmem:[#allocation109_spill] sm:$0xff] %v7916_v12  ;;  %10488 = vst [vmem:[#allocation112_spill] sm:$0xff] %v7920_v39  ;;  %v7940_v6 = vmul.f32 %v10495_v63, %v6834_v23  ;;  %v1869_v35 = vmul.f32 %v10497_v36, %v6864_v5  ;;  %v921_v58 = vmul.f32 %v6864_v5, %v10498_v2  ;;  %v7947_v9 = vld [vmem:[%s4968_s26 + $0x1a0] sm:$0xff]  ;;  %v10502_v25 = vld [vmem:[#allocation232_spill] sm:$0xff] }
 0x4d7   : > { %10491 = vst [vmem:[#allocation310_spill] sm:$0xff] %v7928_v44  ;;  %10499 = vst [vmem:[#allocation142_spill] sm:$0xff] %v7947_v9  ;;  %3900 = vperm.xlu1 %4657, %v7947_v9   ;;  %v1796_v38 = vadd.f32 %v1780_v48, %v1700_v40  ;;  %v1798_v49 = vadd.f32 %v1782_v59, %v1702_v34  ;;  %v7952_v56 = vmul.f32 %v10500_v20, %v6834_v23  ;;  %v10503_v36 = vld [vmem:[#allocation223_spill] sm:$0xff]  ;;  %v10505_v2 = vld [vmem:[#allocation225_spill] sm:$0xff] }
 0x4d8   : > { %10496 = vst [vmem:[#allocation130_spill] sm:$0xff] %v7940_v6  ;;  %v1871_v63 = vmul.f32 %v10502_v25, %v6864_v5  ;;  %v1800_v52 = vadd.f32 %v1784_v8, %v1704_v62  ;;  %v7958_v6 = vmul.f32 %v10503_v36, %v6834_v23  ;;  %v7962_v44 = vmul.f32 %v10505_v2, %v6834_v23  ;;  %v10507_v9 = vld [vmem:[#allocation245_spill] sm:$0xff]  ;;  %v10508_v48 = vld [vmem:[#allocation227_spill] sm:$0xff]  ;;  %v7974_v8 = vpop.permute.xlu1 %3556 }
 0x4d9   : > { %10501 = vst [vmem:[#allocation110_spill] sm:$0xff] %v7952_v56  ;;  %v924_v40 = vmul.f32 %v6864_v5, %v10507_v9  ;;  %v7966_v34 = vadd.f32 %v1866_v21, %v1786_v1  ;;  %v7970_v59 = vmul.f32 %v10508_v48, %v6834_v23  ;;  %v1883_v20 = vadd.f32 %v1867_v60, %v1787_v15  ;;  %v10510_v25 = vld [vmem:[#allocation247_spill] sm:$0xff]  ;;  %v10512_v36 = vld [vmem:[#allocation229_spill] sm:$0xff]  ;;  %v10514_v1 = vld [vmem:[#allocation244_spill] sm:$0xff] }
 0x4da   : > { %10504 = vst [vmem:[#allocation111_spill] sm:$0xff] %v7958_v6  ;;  %10506 = vst [vmem:[#allocation129_spill] sm:$0xff] %v7962_v44  ;;  %v926_v62 = vmul.f32 %v6864_v5, %v10510_v25  ;;  %v7978_v6 = vmul.f32 %v10512_v36, %v6834_v23  ;;  %v7980_v2 = vadd.f32 %v1869_v35, %v1789_v26  ;;  %v7986_v44 = vld [vmem:[%s4968_s26 + $0x1b0] sm:$0xff]  ;;  %v10516_v15 = vld [vmem:[#allocation231_spill] sm:$0xff] }
 0x4db   : > { %10509 = vst [vmem:[#allocation146_spill] sm:$0xff] %v7970_v59  ;;  %10511 = vst [vmem:[#allocation131_spill] sm:$0xff] %v7974_v8  ;;  %v937_v9 = vadd.f32 %v921_v58, %v7609_v22  ;;  %v1963_v21 = vmul.f32 %v10514_v1, %v6949_v41  ;;  %3908 = vperm.xlu1 %4657, %v7986_v44   ;;  %v7991_v60 = vmul.f32 %v10516_v15, %v6834_v23  ;;  %v10518_v25 = vld [vmem:[#allocation233_spill] sm:$0xff]  ;;  %v10520_v22 = vld [vmem:[#allocation235_spill] sm:$0xff] }
 0x4dc   : > { %10513 = vst [vmem:[#allocation133_spill] sm:$0xff] %v7978_v6  ;;  %10515 = vst [vmem:[#allocation114_spill] sm:$0xff] %v7986_v44  ;;  %v7993_v48 = vadd.f32 %v1871_v63, %v1791_v7  ;;  %v7997_v26 = vmul.f32 %v10518_v25, %v6834_v23  ;;  %v8001_v35 = vmul.f32 %v10520_v22, %v6834_v23  ;;  %v10522_v58 = vld [vmem:[#allocation237_spill] sm:$0xff]  ;;  %v10524_v1 = vld [vmem:[#allocation239_spill] sm:$0xff] }
 0x4dd   : > { %10517 = vst [vmem:[#allocation113_spill] sm:$0xff] %v7991_v60  ;;  %v8005_v36 = vmul.f32 %v10522_v58, %v6834_v23  ;;  %v8009_v8 = vmul.f32 %v10524_v1, %v6834_v23  ;;  %v10526_v15 = vld [vmem:[#allocation241_spill] sm:$0xff]  ;;  %v940_v63 = vadd.f32 %v924_v40, %v7612_v10  ;;  %v10528_v25 = vld [vmem:[#allocation242_spill] sm:$0xff]  ;;  %v942_v22 = vadd.f32 %v926_v62, %v7625_v11  ;;  %v10530_v58 = vld [vmem:[#allocation259_spill] sm:$0xff]  ;;  %v8034_v11 = vpop.permute.xlu1 %3596 }
 0x4de   : > { %10519 = vst [vmem:[#allocation116_spill] sm:$0xff] %v7997_v26  ;;  %10521 = vst [vmem:[#allocation115_spill] sm:$0xff] %v8001_v35  ;;  %v8013_v7 = vmul.f32 %v10526_v15, %v6834_v23  ;;  %v1961_v26 = vmul.f32 %v10528_v25, %v6949_v41  ;;  %v10529_v35 = vld [vmem:[#allocation257_spill] sm:$0xff]  ;;  %v1979_v6 = vadd.f32 %v1963_v21, %v1883_v20  ;;  %v10532_v15 = vld [vmem:[#allocation263_spill] sm:$0xff] }
 0x4df   : > { %10523 = vst [vmem:[#allocation118_spill] sm:$0xff] %v8005_v36  ;;  %10525 = vst [vmem:[#allocation117_spill] sm:$0xff] %v8009_v8  ;;  %v1865_v60 = vmul.f32 %v10529_v35, %v6864_v5  ;;  %v1868_v36 = vmul.f32 %v10530_v58, %v6864_v5  ;;  %v10531_v1 = vld [vmem:[#allocation261_spill] sm:$0xff]  ;;  %v8031_v40 = vld [vmem:[%s4968_s26 + $0x1c0] sm:$0xff] }
 0x4e0   : > { %10527 = vst [vmem:[#allocation18_spill] sm:$0xff] %v8013_v7  ;;  %v1870_v8 = vmul.f32 %v10531_v1, %v6864_v5  ;;  %v1872_v7 = vmul.f32 %v10532_v15, %v6864_v5  ;;  %v10533_v44 = vld [vmem:[#allocation77_spill] sm:$0xff]  ;;  %10535 = vst [vmem:[#allocation12_spill] sm:$0xff] %v8031_v40  ;;  %3916 = vperm.xlu1 %4657, %v8031_v40   ;;  %v10537_v62 = vld [vmem:[#allocation246_spill] sm:$0xff] }
 0x4e1   : > { %v8028_v10 = vadd.f32 %v10533_v44, %v937_v9  ;;  %10536 = vst [vmem:[#allocation120_spill] sm:$0xff] %v8034_v11  ;;  %v1964_v35 = vmul.f32 %v10537_v62, %v6949_v41  ;;  %v10538_v20 = vld [vmem:[#allocation265_spill] sm:$0xff]  ;;  %v10539_v25 = vld [vmem:[#allocation267_spill] sm:$0xff]  ;;  %v10540_v1 = vld [vmem:[#allocation270_spill] sm:$0xff]  ;;  %v1884_v39 = vadd.f32 %v1868_v36, %v7906_v24 }
 0x4e2   : > { %v1874_v21 = vmul.f32 %v10538_v20, %v6864_v5  ;;  %v1876_v58 = vmul.f32 %v10539_v25, %v6864_v5  ;;  %v1878_v44 = vmul.f32 %v10540_v1, %v6864_v5  ;;  %v10541_v9 = vld [vmem:[#allocation248_spill] sm:$0xff]  ;;  %v10542_v40 = vld [vmem:[#allocation262_spill] sm:$0xff]  ;;  %v10543_v11 = vld [vmem:[#allocation273_spill] sm:$0xff]  ;;  %v1881_v25 = vadd.f32 %v1865_v60, %v7898_v29  ;;  %v8070_v29 = vpop.permute.xlu1 %3604 }
 0x4e3   : > { %10534 = vst [vmem:[#allocation9_spill] sm:$0xff] %v8028_v10  ;;  %v1966_v15 = vmul.f32 %v10541_v9, %v6949_v41  ;;  %v2059_v59 = vmul.f32 %v10542_v40, %v7031_v57  ;;  %v1880_v10 = vmul.f32 %v10543_v11, %v6864_v5  ;;  %v10544_v62 = vld [vmem:[#allocation66_spill] sm:$0xff]  ;;  %v10547_v1 = vld [vmem:[#allocation67_spill] sm:$0xff]  ;;  %v10549_v9 = vld [vmem:[#allocation252_spill] sm:$0xff]  ;;  %v1886_v40 = vadd.f32 %v1870_v8, %v7912_v16 }
 0x4e4   : > { %v8051_v56 = vadd.f32 %v10544_v62, %v940_v63  ;;  %v10546_v20 = vld [vmem:[#allocation250_spill] sm:$0xff]  ;;  %v8058_v12 = vadd.f32 %v10547_v1, %v942_v22  ;;  %v1970_v46 = vmul.f32 %v10549_v9, %v6949_v41  ;;  %v1888_v11 = vadd.f32 %v1872_v7, %v7924_v13  ;;  %v10550_v63 = vld [vmem:[#allocation280_spill] sm:$0xff]  ;;  %10552 = vst [vmem:[#allocation121_spill] sm:$0xff] %v8070_v29  ;;  %v10555_v1 = vld [vmem:[#allocation299_spill] sm:$0xff] }
 0x4e5   : > { %v1968_v23 = vmul.f32 %v10546_v20, %v6949_v41  ;;  %v2155_v62 = vmul.f32 %v10550_v63, %v7121_v50  ;;  %v10553_v24 = vld [vmem:[#allocation254_spill] sm:$0xff]  ;;  %v1890_v36 = vadd.f32 %v1874_v21, %v7936_v28  ;;  %v1892_v22 = vadd.f32 %v1876_v58, %v1796_v38  ;;  %v10554_v16 = vld [vmem:[#allocation256_spill] sm:$0xff] }
 0x4e6   : > { %10545 = vst [vmem:[#allocation119_spill] sm:$0xff] %v8051_v56  ;;  %10548 = vst [vmem:[#allocation14_spill] sm:$0xff] %v8058_v12  ;;  %v8067_v56 = vld [vmem:[%s4968_s26 + $0x1d0] sm:$0xff]  ;;  %v1972_v60 = vmul.f32 %v10553_v24, %v6949_v41  ;;  %v1894_v20 = vadd.f32 %v1878_v44, %v1798_v49  ;;  %v1974_v13 = vmul.f32 %v10554_v16, %v6949_v41  ;;  %v10556_v63 = vld [vmem:[#allocation258_spill] sm:$0xff]  ;;  %v8101_v21 = vpop.permute.xlu1 %3608 }
 0x4e7   : > { %10551 = vst [vmem:[#allocation122_spill] sm:$0xff] %v8067_v56  ;;  %3924 = vperm.xlu1 %4657, %v8067_v56   ;;  %v2075_v8 = vadd.f32 %v2059_v59, %v1979_v6  ;;  %v1896_v7 = vadd.f32 %v1880_v10, %v1800_v52  ;;  %v2251_v9 = vmul.f32 %v7406_v18, %v10555_v1  ;;  %v10557_v29 = vld [vmem:[#allocation260_spill] sm:$0xff]  ;;  %v8098_v10 = vld [vmem:[%s4968_s26 + $0x1e0] sm:$0xff]  ;;  %10560 = vst [vmem:[#allocation123_spill] sm:$0xff] %v8101_v21 }
 0x4e8   : > { %v1976_v56 = vmul.f32 %v10556_v63, %v6949_v41  ;;  %v8083_v12 = vmul.f32 %v10557_v29, %v7031_v57  ;;  %v8085_v24 = vadd.f32 %v1961_v26, %v1881_v25  ;;  %v8087_v28 = vadd.f32 %v1964_v35, %v1884_v39  ;;  %v10558_v38 = vld [vmem:[#allocation264_spill] sm:$0xff]  ;;  %10559 = vst [vmem:[#allocation124_spill] sm:$0xff] %v8098_v10  ;;  %v10561_v26 = vld [vmem:[#allocation266_spill] sm:$0xff]  ;;  %v10563_v25 = vld [vmem:[#allocation277_spill] sm:$0xff] }
 0x4e9   : > { %v8091_v49 = vmul.f32 %v10558_v38, %v7031_v57  ;;  %v2171_v6 = vadd.f32 %v2155_v62, %v2075_v8  ;;  %v8093_v52 = vadd.f32 %v1966_v15, %v1886_v40  ;;  %v8095_v59 = vadd.f32 %v1968_v23, %v1888_v11  ;;  %v10562_v23 = vld [vmem:[#allocation275_spill] sm:$0xff]  ;;  %v10565_v29 = vld [vmem:[#allocation278_spill] sm:$0xff]  ;;  %v10588_v21 = vld [vmem:[#allocation292_spill] sm:$0xff] }
 0x4ea   : > { %v8105_v58 = vmul.f32 %v10561_v26, %v7031_v57  ;;  %v8107_v39 = vadd.f32 %v1970_v46, %v1890_v36  ;;  %v8109_v35 = vadd.f32 %v1972_v60, %v1892_v22  ;;  %v8111_v44 = vadd.f32 %v1974_v13, %v1894_v20  ;;  %v10566_v46 = vld [vmem:[#allocation279_spill] sm:$0xff]  ;;  %v10567_v36 = vld [vmem:[#allocation281_spill] sm:$0xff]  ;;  %v10568_v20 = vld [vmem:[#allocation282_spill] sm:$0xff] }
 0x4eb   : > { %3932 = vperm.xlu1 %4657, %v8098_v10   ;;  %v8115_v15 = vmul.f32 %v10562_v23, %v6864_v5  ;;  %v8119_v40 = vmul.f32 %v10563_v25, %v6864_v5  ;;  %v2267_v11 = vadd.f32 %v2251_v9, %v2171_v6  ;;  %v8121_v62 = vadd.f32 %v1976_v56, %v1896_v7  ;;  %v10569_v8 = vld [vmem:[#allocation283_spill] sm:$0xff]  ;;  %v10570_v7 = vld [vmem:[#allocation284_spill] sm:$0xff]  ;;  %v10572_v9 = vld [vmem:[#allocation285_spill] sm:$0xff]  ;;  %v8159_v23 = vpop.permute.xlu1 %3616 }
 0x4ec   : > { %v8125_v16 = vmul.f32 %v10565_v29, %v7121_v50  ;;  %v8129_v60 = vmul.f32 %v10566_v46, %v6864_v5  ;;  %v8133_v22 = vmul.f32 %v10567_v36, %v6864_v5  ;;  %v8137_v13 = vmul.f32 %v10568_v20, %v7121_v50  ;;  %v10573_v38 = vld [vmem:[#allocation286_spill] sm:$0xff]  ;;  %v8156_v26 = vld [vmem:[%s4968_s26 + $0x1f0] sm:$0xff]  ;;  %10576 = vst [vmem:[#allocation128_spill] sm:$0xff] %v8159_v23  ;;  %v10577_v25 = vld [vmem:[#allocation287_spill] sm:$0xff] }
 0x4ed   : > { %10564 = vst [vmem:[#allocation126_spill] sm:$0xff] %v8121_v62  ;;  %v8141_v56 = vmul.f32 %v10569_v8, %v6864_v5  ;;  %v8145_v1 = vmul.f32 %v10570_v7, %v7121_v50  ;;  %v8149_v63 = vmul.f32 %v10572_v9, %v6864_v5  ;;  %v8153_v6 = vmul.f32 %v10573_v38, %v7121_v50  ;;  %v10578_v46 = vld [vmem:[#allocation288_spill] sm:$0xff]  ;;  %v10580_v20 = vld [vmem:[#allocation289_spill] sm:$0xff]  ;;  %v10583_v38 = vld [vmem:[#allocation290_spill] sm:$0xff] }
 0x4ee   : > { %10575 = vst [vmem:[#allocation6_spill] sm:$0xff] %v8156_v26  ;;  %v8163_v29 = vmul.f32 %v10577_v25, %v6864_v5  ;;  %v8167_v36 = vmul.f32 %v10578_v46, %v7121_v50  ;;  %v8171_v8 = vmul.f32 %v10580_v20, %v6864_v5  ;;  %v10582_v7 = vld [vmem:[#allocation305_spill] sm:$0xff]  ;;  %v10585_v10 = vld [vmem:[#allocation291_spill] sm:$0xff]  ;;  %vm2283_vm9 = vcmp.ge.f32.partialorder %v2267_v11, 1.0  ;;  %v10594_v11 = vld [vmem:[#allocation294_spill] sm:$0xff] }
 0x4ef   : > { %10571 = vst [vmem:[#allocation125_spill] sm:$0xff] %v8145_v1  ;;  %10574 = vst [vmem:[#allocation127_spill] sm:$0xff] %v8153_v6  ;;  %3940 = vperm.xlu1 %4657, %v8156_v26   ;;  %v1020_v9 = vmul.f32 %v6949_v41, %v10582_v7  ;;  %v8177_v26 = vmul.f32 %v10583_v38, %v7121_v50  ;;  %v8181_v23 = vmul.f32 %v10585_v10, %v6864_v5  ;;  %v10587_v25 = vld [vmem:[#allocation307_spill] sm:$0xff]  ;;  %v10601_v62 = vmov 7  }
 0x4f0   : > { %10579 = vst [vmem:[#allocation132_spill] sm:$0xff] %v8167_v36  ;;  %10581 = vst [vmem:[#allocation37_spill] sm:$0xff] %v8171_v8  ;;  %v1023_v46 = vmul.f32 %v6949_v41, %v10587_v25  ;;  %v8187_v20 = vmul.f32 %v10588_v21, %v7121_v50  ;;  %v10590_v8 = vld [vmem:[#allocation293_spill] sm:$0xff]  ;;  %v10596_v25 = vld [vmem:[#allocation295_spill] sm:$0xff] }
 0x4f1   : > { %10584 = vst [vmem:[#allocation134_spill] sm:$0xff] %v8177_v26  ;;  %10586 = vst [vmem:[#allocation143_spill] sm:$0xff] %v8181_v23  ;;  %v8191_v7 = vmul.f32 %v10590_v8, %v6864_v5  ;;  %v10592_v36 = vld [vmem:[#allocation309_spill] sm:$0xff]  ;;  %v10593_v26 = vld [vmem:[#allocation311_spill] sm:$0xff]  ;;  %v8199_v23 = vmul.f32 %v10594_v11, %v7121_v50  ;;  %v8203_v6 = vmul.f32 %v10596_v25, %v6864_v5  ;;  %v8219_v11 = vsel %vm2283_vm9, 1.0, %v10360_v31 }
 0x4f2   : > { %10589 = vst [vmem:[#allocation144_spill] sm:$0xff] %v8187_v20  ;;  %v1025_v38 = vmul.f32 %v6949_v41, %v10592_v36  ;;  %v1027_v10 = vmul.f32 %v6949_v41, %v10593_v26  ;;  %v10598_v21 = vld [vmem:[#allocation296_spill] sm:$0xff]  ;;  %v8212_v36 = vpop.permute.xlu1 %3624  ;;  %v10603_v26 = vld [vmem:[#allocation297_spill] sm:$0xff]  ;;  %10605 = vst [vmem:[#allocation162_spill] sm:$0xff] %v8219_v11  ;;  %v1036_v25 = vadd.f32 %v1020_v9, %v7834_v54 }
 0x4f3   : > { %10591 = vst [vmem:[#allocation145_spill] sm:$0xff] %v8191_v7  ;;  %10595 = vst [vmem:[#allocation147_spill] sm:$0xff] %v8199_v23  ;;  %v8207_v20 = vmul.f32 %v10598_v21, %v6864_v5  ;;  %v10600_v8 = vld [vmem:[#allocation312_spill] sm:$0xff]  ;;  %4659 = vset.pattern.permute.xlu1 %v10601_v62  ;;  %v8216_v1 = vmul.f32 %v7406_v18, %v10603_v26  ;;  %v1039_v26 = vadd.f32 %v1023_v46, %v7837_v27  ;;  %v10612_v23 = vld [vmem:[#allocation301_spill] sm:$0xff] }
 0x4f4   : > { %10597 = vst [vmem:[#allocation148_spill] sm:$0xff] %v8203_v6  ;;  %v1029_v7 = vmul.f32 %v6949_v41, %v10600_v8  ;;  %10602 = vst [vmem:[#allocation150_spill] sm:$0xff] %v8212_v36  ;;  %v10606_v6 = vld [vmem:[#allocation314_spill] sm:$0xff]  ;;  %v10609_v62 = vld [vmem:[#allocation300_spill] sm:$0xff]  ;;  %v8238_v54 = vmul.f32 %v7406_v18, %v10612_v23  ;;  %v1043_v9 = vadd.f32 %v1027_v10, %v7857_v14 }
 0x4f5   : > { %10599 = vst [vmem:[#allocation149_spill] sm:$0xff] %v8207_v20  ;;  %10604 = vst [vmem:[#allocation151_spill] sm:$0xff] %v8216_v1  ;;  %v1031_v21 = vmul.f32 %v6949_v41, %v10606_v6  ;;  %v4739_v20 = vld [vmem:[%s4968_s26 + $0x180] sm:$0xff]  ;;  %v10607_v8 = vld [vmem:[#allocation298_spill] sm:$0xff]  ;;  %v8231_v36 = vmul.f32 %v10609_v62, %v6864_v5  ;;  %v1041_v6 = vadd.f32 %v1025_v38, %v7844_v43 }
 0x4f6   : > { %3980 = vperm.xlu1 %4659, %v4739_v20   ;;  %v8227_v50 = vmul.f32 %v10607_v8, %v6864_v5  ;;  %v10611_v1 = vld [vmem:[#allocation316_spill] sm:$0xff]  ;;  %10613 = vst [vmem:[#allocation154_spill] sm:$0xff] %v8238_v54  ;;  %v10614_v20 = vld [vmem:[#allocation318_spill] sm:$0xff]  ;;  %v10617_v46 = vld [vmem:[#allocation313_spill] sm:$0xff]  ;;  %v8253_v54 = vpop.permute.xlu1 %3632  ;;  %v8263_v62 = vadd.f32 %v7495_v47, %v1036_v25 }
 0x4f7   : > { %10610 = vst [vmem:[#allocation153_spill] sm:$0xff] %v8231_v36  ;;  %v1033_v31 = vmul.f32 %v6949_v41, %v10611_v1  ;;  %v1035_v8 = vmul.f32 %v6949_v41, %v10614_v20  ;;  %v10615_v36 = vld [vmem:[#allocation302_spill] sm:$0xff]  ;;  %v1045_v1 = vadd.f32 %v1029_v7, %v7878_v33  ;;  %v2442_v23 = vmul.f32 %v10617_v46, %v6820_v61  ;;  %v10619_v43 = vld [vmem:[#allocation303_spill] sm:$0xff]  ;;  %v10621_v10 = vld [vmem:[#allocation317_spill] sm:$0xff] }
 0x4f8   : > { %10608 = vst [vmem:[#allocation152_spill] sm:$0xff] %v8227_v50  ;;  %v8248_v27 = vmul.f32 %v10615_v36, %v6864_v5  ;;  %10618 = vst [vmem:[#allocation155_spill] sm:$0xff] %v8253_v54  ;;  %v8257_v14 = vmul.f32 %v7406_v18, %v10619_v43  ;;  %v1047_v38 = vadd.f32 %v1031_v21, %v7885_v55  ;;  %v10623_v7 = vld [vmem:[#allocation320_spill] sm:$0xff]  ;;  %v10624_v46 = vld [vmem:[#allocation322_spill] sm:$0xff] }
 0x4f9   : > { %v2445_v20 = vmul.f32 %v10621_v10, %v6820_v61  ;;  %10622 = vst [vmem:[#allocation168_spill] sm:$0xff] %v8263_v62  ;;  %v1049_v33 = vadd.f32 %v1033_v31, %v7890_v3  ;;  %v1962_v36 = vmul.f32 %v10623_v7, %v6949_v41  ;;  %v1965_v18 = vmul.f32 %v10624_v46, %v6949_v41  ;;  %v10626_v21 = vld [vmem:[#allocation319_spill] sm:$0xff]  ;;  %v10629_v31 = vld [vmem:[#allocation68_spill] sm:$0xff]  ;;  %v10630_v7 = vld [vmem:[#allocation321_spill] sm:$0xff] }
 0x4fa   : > { %10616 = vst [vmem:[#allocation166_spill] sm:$0xff] %v8248_v27  ;;  %10620 = vst [vmem:[#allocation156_spill] sm:$0xff] %v8257_v14  ;;  %3988 = vperm.xlu1 %4659, %v7903_v32   ;;  %v8272_v43 = vadd.f32 %v7525_v37, %v1039_v26  ;;  %v1051_v55 = vadd.f32 %v1035_v8, %v7893_v42  ;;  %v2447_v47 = vmul.f32 %v10626_v21, %v6820_v61  ;;  %v10631_v46 = vld [vmem:[#allocation324_spill] sm:$0xff]  ;;  %v8291_v42 = vpop.permute.xlu1 %3640  ;;  %v10634_v8 = vld [vmem:[#allocation315_spill] sm:$0xff] }
 0x4fb   : > { %v8278_v25 = vadd.f32 %v7533_v45, %v1041_v6  ;;  %v8281_v3 = vadd.f32 %v7543_v17, %v1043_v9  ;;  %v2538_v10 = vadd.f32 %v10629_v31, %v2442_v23  ;;  %v2449_v11 = vmul.f32 %v10630_v7, %v6820_v61  ;;  %10633 = vst [vmem:[#allocation160_spill] sm:$0xff] %v8291_v42  ;;  %v10635_v6 = vld [vmem:[#allocation73_spill] sm:$0xff]  ;;  %v10636_v17 = vld [vmem:[#allocation331_spill] sm:$0xff]  ;;  %v4740_v31 = vld [vmem:[%s4968_s26 + $0x198] sm:$0xff] }
 0x4fc   : > { %10625 = vst [vmem:[#allocation54_spill] sm:$0xff] %v8272_v43  ;;  %v1967_v37 = vmul.f32 %v10631_v46, %v6949_v41  ;;  %v8289_v26 = vadd.f32 %v7560_v51, %v1045_v1  ;;  %v2444_v45 = vmul.f32 %v10634_v8, %v6820_v61  ;;  %v8296_v21 = vadd.f32 %v10635_v6, %v2445_v20  ;;  %v10638_v1 = vld [vmem:[#allocation323_spill] sm:$0xff]  ;;  %v10694_v43 = vld [vmem:[#allocation272_spill] sm:$0xff] }
 0x4fd   : > { %10627 = vst [vmem:[#allocation157_spill] sm:$0xff] %v8278_v25  ;;  %10628 = vst [vmem:[#allocation158_spill] sm:$0xff] %v8281_v3  ;;  %v2523_v9 = vmul.f32 %v10636_v17, %v6827_v19  ;;  %v8301_v23 = vadd.f32 %v7571_v30, %v1047_v38  ;;  %v1978_v7 = vadd.f32 %v1962_v36, %v7966_v34  ;;  %v10640_v20 = vld [vmem:[#allocation75_spill] sm:$0xff]  ;;  %v10641_v17 = vld [vmem:[#allocation325_spill] sm:$0xff] }
 0x4fe   : > { %10632 = vst [vmem:[#allocation159_spill] sm:$0xff] %v8289_v26  ;;  %3992 = vperm.xlu1 %4659, %v4740_v31   ;;  %v1981_v51 = vadd.f32 %v1965_v18, %v7980_v2  ;;  %v2451_v46 = vmul.f32 %v10638_v1, %v6820_v61  ;;  %v8309_v8 = vadd.f32 %v7579_v53, %v1049_v33  ;;  %v10642_v30 = vld [vmem:[#allocation335_spill] sm:$0xff]  ;;  %v10646_v53 = vld [vmem:[#allocation337_spill] sm:$0xff] }
 0x4ff   : > { %10637 = vst [vmem:[#allocation161_spill] sm:$0xff] %v8301_v23  ;;  %v2543_v6 = vadd.f32 %v10640_v20, %v2447_v47  ;;  %v2453_v0 = vmul.f32 %v10641_v17, %v6820_v61  ;;  %v2526_v38 = vmul.f32 %v10642_v30, %v6827_v19  ;;  %v8317_v31 = vadd.f32 %v7589_v4, %v1051_v55  ;;  %v10644_v34 = vld [vmem:[#allocation79_spill] sm:$0xff]  ;;  %v8325_v47 = vpop.permute.xlu1 %3648  ;;  %v10648_v20 = vld [vmem:[#allocation329_spill] sm:$0xff]  ;;  %v10660_v23 = vld [vmem:[#allocation98_spill] sm:$0xff] }
 0x500   : > { %10639 = vst [vmem:[#allocation163_spill] sm:$0xff] %v8309_v8  ;;  %v2545_v2 = vadd.f32 %v10644_v34, %v2449_v11  ;;  %v1983_v36 = vadd.f32 %v1967_v37, %v7993_v48  ;;  %v10645_v18 = vld [vmem:[#allocation327_spill] sm:$0xff]  ;;  %v2528_v33 = vmul.f32 %v10646_v53, %v6827_v19  ;;  %10647 = vst [vmem:[#allocation165_spill] sm:$0xff] %v8325_v47  ;;  %v10650_v4 = vld [vmem:[#allocation333_spill] sm:$0xff] }
 0x501   : > { %10643 = vst [vmem:[#allocation164_spill] sm:$0xff] %v8317_v31  ;;  %v2455_v1 = vmul.f32 %v10645_v18, %v6820_v61  ;;  %v2457_v17 = vmul.f32 %v10648_v20, %v6820_v61  ;;  %v10649_v14 = vld [vmem:[#allocation19_spill] sm:$0xff]  ;;  %v2524_v55 = vmul.f32 %v10650_v4, %v6827_v19  ;;  %v4741_v48 = vld [vmem:[%s4968_s26 + $0x1a8] sm:$0xff]  ;;  %v10652_v37 = vld [vmem:[#allocation94_spill] sm:$0xff]  ;;  %v8339_v8 = vadd.f32 %v8083_v12, %v1978_v7 }
 0x502   : > { %v2539_v30 = vadd.f32 %v2523_v9, %v10649_v14  ;;  %v10651_v11 = vld [vmem:[#allocation339_spill] sm:$0xff]  ;;  %4000 = vperm.xlu1 %4659, %v4741_v48   ;;  %v2547_v18 = vadd.f32 %v10652_v37, %v2451_v46  ;;  %v10653_v31 = vld [vmem:[#allocation341_spill] sm:$0xff]  ;;  %v8342_v20 = vadd.f32 %v8091_v49, %v1981_v51  ;;  %v10656_v14 = vld [vmem:[#allocation170_spill] sm:$0xff]  ;;  %v8357_v49 = vadd.f32 %v8105_v58, %v1983_v36 }
 0x503   : > { %v2530_v34 = vmul.f32 %v10651_v11, %v6827_v19  ;;  %v2532_v53 = vmul.f32 %v10653_v31, %v6827_v19  ;;  %10654 = vst [vmem:[#allocation167_spill] sm:$0xff] %v8339_v8  ;;  %v8345_v9 = vadd.f32 %v10656_v14, %v2453_v0  ;;  %v10657_v4 = vld [vmem:[#allocation20_spill] sm:$0xff]  ;;  %v10658_v11 = vld [vmem:[#allocation343_spill] sm:$0xff]  ;;  %v10659_v46 = vld [vmem:[#allocation345_spill] sm:$0xff]  ;;  %v2551_v31 = vadd.f32 %v10660_v23, %v2455_v1  ;;  %v8359_v0 = vpop.permute.xlu1 %3656 }
 0x504   : > { %10655 = vst [vmem:[#allocation60_spill] sm:$0xff] %v8342_v20  ;;  %v2542_v27 = vadd.f32 %v2526_v38, %v10657_v4  ;;  %v2534_v48 = vmul.f32 %v10658_v11, %v6827_v19  ;;  %v2536_v37 = vmul.f32 %v10659_v46, %v6827_v19  ;;  %v10661_v26 = vld [vmem:[#allocation29_spill] sm:$0xff]  ;;  %v10662_v12 = vld [vmem:[#allocation458_spill] sm:$0xff]  ;;  %v10663_v7 = vld [vmem:[#allocation347_spill] sm:$0xff]  ;;  %v2540_v14 = vadd.f32 %v2524_v55, %v2444_v45 }
 0x505   : > { %v2544_v3 = vadd.f32 %v2528_v33, %v10661_v26  ;;  %v2618_v8 = vmul.f32 %v10663_v7, %v10662_v12  ;;  %10664 = vst [vmem:[#allocation84_spill] sm:$0xff] %v8357_v49  ;;  %10665 = vst [vmem:[#allocation169_spill] sm:$0xff] %v8359_v0  ;;  %v10666_v51 = vld [vmem:[#allocation101_spill] sm:$0xff]  ;;  %v10667_v4 = vld [vmem:[#allocation22_spill] sm:$0xff] }
 0x506   : > { %v8362_v38 = vadd.f32 %v10666_v51, %v2457_v17  ;;  %v2546_v11 = vadd.f32 %v2530_v34, %v10667_v4  ;;  %v10668_v20 = vld [vmem:[#allocation141_spill] sm:$0xff]  ;;  %v4742_v23 = vld [vmem:[%s4968_s26 + $0x1b8] sm:$0xff]  ;;  %v10670_v33 = vld [vmem:[#allocation24_spill] sm:$0xff] }
 0x507   : > { %v8366_v46 = vadd.f32 %v10668_v20, %v2539_v30  ;;  %4008 = vperm.xlu1 %4659, %v4742_v23   ;;  %v10669_v26 = vld [vmem:[#allocation334_spill] sm:$0xff]  ;;  %v2548_v58 = vadd.f32 %v2532_v53, %v10670_v33  ;;  %v10671_v36 = vld [vmem:[#allocation351_spill] sm:$0xff]  ;;  %v10672_v17 = vld [vmem:[#allocation353_spill] sm:$0xff]  ;;  %v2634_v33 = vadd.f32 %v2618_v8, %v2538_v10  ;;  %v8408_v8 = vpop.permute.xlu1 %3696 }
 0x508   : > { %v8371_v1 = vmul.f32 %v10669_v26, %v6949_v41  ;;  %v2621_v7 = vmul.f32 %v10671_v36, %v10662_v12  ;;  %v2623_v45 = vmul.f32 %v10672_v17, %v10662_v12  ;;  %v10673_v55 = vld [vmem:[#allocation336_spill] sm:$0xff]  ;;  %v10674_v30 = vld [vmem:[#allocation35_spill] sm:$0xff]  ;;  %v10675_v51 = vld [vmem:[#allocation26_spill] sm:$0xff]  ;;  %10685 = vst [vmem:[#allocation8_spill] sm:$0xff] %v8408_v8 }
 0x509   : > { %v8380_v34 = vmul.f32 %v10673_v55, %v6949_v41  ;;  %v2550_v20 = vadd.f32 %v2534_v48, %v10674_v30  ;;  %v2552_v4 = vadd.f32 %v2536_v37, %v10675_v51  ;;  %v10676_v23 = vld [vmem:[#allocation251_spill] sm:$0xff]  ;;  %v10677_v49 = vld [vmem:[#allocation338_spill] sm:$0xff]  ;;  %v10680_v55 = vld [vmem:[#allocation340_spill] sm:$0xff] }
 0x50a   : > { %v8385_v26 = vadd.f32 %v10676_v23, %v2542_v27  ;;  %v8389_v53 = vmul.f32 %v10677_v49, %v6949_v41  ;;  %v10678_v36 = vld [vmem:[#allocation355_spill] sm:$0xff]  ;;  %v10679_v17 = vld [vmem:[#allocation238_spill] sm:$0xff]  ;;  %v8398_v25 = vmul.f32 %v10680_v55, %v6949_v41  ;;  %v10682_v48 = vld [vmem:[#allocation349_spill] sm:$0xff] }
 0x50b   : > { %v2625_v50 = vmul.f32 %v10678_v36, %v10662_v12  ;;  %v8394_v0 = vadd.f32 %v10679_v17, %v2544_v3  ;;  %v2620_v37 = vmul.f32 %v10682_v48, %v10662_v12  ;;  %v10683_v27 = vld [vmem:[#allocation357_spill] sm:$0xff]  ;;  %v10684_v51 = vld [vmem:[#allocation240_spill] sm:$0xff]  ;;  %v10686_v3 = vld [vmem:[#allocation342_spill] sm:$0xff]  ;;  %v2637_v36 = vadd.f32 %v2621_v7, %v8296_v21 }
 0x50c   : > { %10681 = vst [vmem:[#allocation171_spill] sm:$0xff] %v8398_v25  ;;  %v2627_v30 = vmul.f32 %v10683_v27, %v10662_v12  ;;  %v8405_v49 = vadd.f32 %v10684_v51, %v2546_v11  ;;  %v4743_v10 = vld [vmem:[%s4968_s26 + $0x1c8] sm:$0xff]  ;;  %v8412_v23 = vmul.f32 %v10686_v3, %v6949_v41  ;;  %v2639_v17 = vadd.f32 %v2623_v45, %v2543_v6  ;;  %v10688_v55 = vld [vmem:[#allocation330_spill] sm:$0xff]  ;;  %v10697_v6 = vld [vmem:[#allocation359_spill] sm:$0xff] }
 0x50d   : > { %4016 = vperm.xlu1 %4659, %v4743_v10   ;;  %v2644_v48 = vadd.f32 %v10688_v55, %v2548_v58  ;;  %v10689_v47 = vld [vmem:[#allocation344_spill] sm:$0xff]  ;;  %v10691_v11 = vld [vmem:[#allocation346_spill] sm:$0xff]  ;;  %v10693_v10 = vld [vmem:[#allocation253_spill] sm:$0xff]  ;;  %v8426_v42 = vadd.f32 %v10694_v43, %v2552_v4  ;;  %v2641_v21 = vadd.f32 %v2625_v50, %v2545_v2  ;;  %v2629_v58 = vmul.f32 %v10697_v6, %v10662_v12 }
 0x50e   : > { %10687 = vst [vmem:[#allocation173_spill] sm:$0xff] %v8412_v23  ;;  %v8418_v27 = vmul.f32 %v10689_v47, %v6949_v41  ;;  %v8422_v51 = vmul.f32 %v10691_v11, %v6949_v41  ;;  %v2646_v8 = vadd.f32 %v10693_v10, %v2550_v20  ;;  %v10695_v3 = vld [vmem:[#allocation348_spill] sm:$0xff]  ;;  %v10698_v7 = vld [vmem:[#allocation109_spill] sm:$0xff]  ;;  %v2636_v45 = vadd.f32 %v2620_v37, %v2540_v14  ;;  %v10699_v55 = vld [vmem:[#allocation350_spill] sm:$0xff] }
 0x50f   : > { %v8430_v62 = vmul.f32 %v10695_v3, %v6949_v41  ;;  %v8435_v47 = vadd.f32 %v10698_v7, %v2634_v33  ;;  %v8439_v11 = vmul.f32 %v10699_v55, %v6949_v41  ;;  %v2643_v20 = vadd.f32 %v2627_v30, %v2547_v18  ;;  %v10701_v43 = vld [vmem:[#allocation361_spill] sm:$0xff]  ;;  %v4744_v10 = vld [vmem:[%s4968_s26 + $0x1d8] sm:$0xff]  ;;  %v8444_v3 = vpop.permute.xlu1 %3700  ;;  %v10703_v50 = vld [vmem:[#allocation352_spill] sm:$0xff]  ;;  %v8460_v7 = vpop.permute.xlu0 %2186 }
 0x510   : > { %10690 = vst [vmem:[#allocation57_spill] sm:$0xff] %v8418_v27  ;;  %10692 = vst [vmem:[#allocation63_spill] sm:$0xff] %v8422_v51  ;;  %v2631_v4 = vmul.f32 %v10701_v43, %v10662_v12  ;;  %v8448_v2 = vmul.f32 %v10703_v50, %v6949_v41  ;;  %v10705_v33 = vld [vmem:[#allocation354_spill] sm:$0xff]  ;;  %v10707_v14 = vld [vmem:[#allocation112_spill] sm:$0xff] }
 0x511   : > { %10696 = vst [vmem:[#allocation182_spill] sm:$0xff] %v8430_v62  ;;  %10700 = vst [vmem:[#allocation175_spill] sm:$0xff] %v8439_v11  ;;  %4024 = vperm.xlu1 %4659, %v4744_v10   ;;  %v8452_v6 = vmul.f32 %v10705_v33, %v6949_v41  ;;  %v8455_v37 = vadd.f32 %v10707_v14, %v2637_v36  ;;  %v10708_v18 = vld [vmem:[#allocation310_spill] sm:$0xff]  ;;  %v10710_v55 = vld [vmem:[#allocation356_spill] sm:$0xff] }
 0x512   : > { %10702 = vst [vmem:[#allocation177_spill] sm:$0xff] %v8444_v3  ;;  %10704 = vst [vmem:[#allocation178_spill] sm:$0xff] %v8448_v2  ;;  %v8458_v30 = vadd.f32 %v10708_v18, %v2639_v17  ;;  %v8464_v43 = vmul.f32 %v10710_v55, %v6949_v41  ;;  %v10712_v10 = vld [vmem:[#allocation363_spill] sm:$0xff]  ;;  %v10713_v2 = vld [vmem:[#allocation364_spill] sm:$0xff]  ;;  %v2645_v17 = vadd.f32 %v2629_v58, %v8345_v9 }
 0x513   : > { %10706 = vst [vmem:[#allocation184_spill] sm:$0xff] %v8452_v6  ;;  %10709 = vst [vmem:[#allocation30_spill] sm:$0xff] %v8460_v7  ;;  %v2633_v50 = vmul.f32 %v10712_v10, %v10662_v12  ;;  %v1121_v33 = vmul.f32 %v7031_v57, %v10713_v2  ;;  %v10714_v6 = vld [vmem:[#allocation459_spill] sm:$0xff]  ;;  %v10715_v11 = vld [vmem:[#allocation365_spill] sm:$0xff]  ;;  %v2647_v3 = vadd.f32 %v2631_v4, %v2551_v31 }
 0x514   : > { %10711 = vst [vmem:[#allocation10_spill] sm:$0xff] %v8464_v43  ;;  %v2715_v54 = vmul.f32 %v10715_v11, %v10714_v6  ;;  %v10716_v36 = vld [vmem:[#allocation358_spill] sm:$0xff]  ;;  %v10720_v10 = vld [vmem:[#allocation368_spill] sm:$0xff]  ;;  %v10721_v2 = vld [vmem:[#allocation369_spill] sm:$0xff] }
 0x515   : > { %v8474_v14 = vmul.f32 %v10716_v36, %v6949_v41  ;;  %v10718_v18 = vld [vmem:[#allocation366_spill] sm:$0xff]  ;;  %v1126_v62 = vmul.f32 %v7031_v57, %v10720_v10  ;;  %v2718_v51 = vmul.f32 %v10721_v2, %v10714_v6  ;;  %v4745_v36 = vld [vmem:[%s4968_s26 + $0x1e8] sm:$0xff]  ;;  %v10727_v4 = vld [vmem:[#allocation371_spill] sm:$0xff] }
 0x516   : > { %v1124_v7 = vmul.f32 %v7031_v57, %v10718_v18  ;;  %v10719_v55 = vld [vmem:[#allocation130_spill] sm:$0xff]  ;;  %4032 = vperm.xlu1 %4659, %v4745_v36   ;;  %v10724_v9 = vld [vmem:[#allocation360_spill] sm:$0xff]  ;;  %v2722_v18 = vmul.f32 %v10727_v4, %v10714_v6  ;;  %v10729_v2 = vld [vmem:[#allocation9_spill] sm:$0xff]  ;;  %v2731_v36 = vadd.f32 %v2715_v54, %v8366_v46 }
 0x517   : > { %10717 = vst [vmem:[#allocation185_spill] sm:$0xff] %v8474_v14  ;;  %v8480_v43 = vadd.f32 %v10719_v55, %v2641_v21  ;;  %v10722_v11 = vld [vmem:[#allocation110_spill] sm:$0xff]  ;;  %v8490_v14 = vpop.permute.xlu1 %3708  ;;  %v8494_v58 = vmul.f32 %v10724_v9, %v6949_v41  ;;  %v10728_v55 = vld [vmem:[#allocation373_spill] sm:$0xff]  ;;  %v10733_v23 = vld [vmem:[#allocation376_spill] sm:$0xff] }
 0x518   : > { %v8487_v12 = vadd.f32 %v10722_v11, %v2643_v20  ;;  %10723 = vst [vmem:[#allocation186_spill] sm:$0xff] %v8490_v14  ;;  %v10726_v21 = vld [vmem:[#allocation370_spill] sm:$0xff]  ;;  %v2724_v10 = vmul.f32 %v10728_v55, %v10714_v6  ;;  %v2649_v20 = vadd.f32 %v2633_v50, %v8362_v38  ;;  %v1137_v11 = vadd.f32 %v1121_v33, %v10729_v2  ;;  %v10730_v14 = vld [vmem:[#allocation375_spill] sm:$0xff]  ;;  %v8515_v55 = vpop.permute.xlu0 %2198 }
 0x519   : > { %10725 = vst [vmem:[#allocation187_spill] sm:$0xff] %v8494_v58  ;;  %v2720_v31 = vmul.f32 %v10726_v21, %v10714_v6  ;;  %v2726_v9 = vmul.f32 %v10730_v14, %v10714_v6  ;;  %v10731_v58 = vld [vmem:[#allocation119_spill] sm:$0xff]  ;;  %v2057_v4 = vmul.f32 %v10733_v23, %v7031_v57  ;;  %10735 = vst [vmem:[#allocation179_spill] sm:$0xff] %v8515_v55  ;;  %v10736_v38 = vld [vmem:[#allocation362_spill] sm:$0xff] }
 0x51a   : > { %v1140_v61 = vadd.f32 %v1124_v7, %v10731_v58  ;;  %v10732_v21 = vld [vmem:[#allocation367_spill] sm:$0xff]  ;;  %v8519_v50 = vmul.f32 %v10736_v38, %v6949_v41  ;;  %v10738_v54 = vld [vmem:[#allocation14_spill] sm:$0xff]  ;;  %v2734_v33 = vadd.f32 %v2718_v51, %v8385_v26  ;;  %v10739_v7 = vld [vmem:[#allocation129_spill] sm:$0xff]  ;;  %v2738_v23 = vadd.f32 %v2722_v18, %v8405_v49 }
 0x51b   : > { %v2716_v27 = vmul.f32 %v10732_v21, %v10714_v6  ;;  %v10734_v19 = vld [vmem:[#allocation111_spill] sm:$0xff]  ;;  %v1142_v46 = vadd.f32 %v1126_v62, %v10738_v54  ;;  %v8524_v14 = vadd.f32 %v10739_v7, %v2647_v3  ;;  %v4746_v58 = vld [vmem:[%s4968_s26 + $0x1f8] sm:$0xff]  ;;  %v8527_v2 = vpop.permute.xlu1 %3716  ;;  %v10740_v21 = vld [vmem:[#allocation377_spill] sm:$0xff]  ;;  %v8537_v26 = vadd.f32 %v8115_v15, %v2731_v36 }
 0x51c   : > { %v8513_v25 = vadd.f32 %v10734_v19, %v2645_v17  ;;  %10737 = vst [vmem:[#allocation188_spill] sm:$0xff] %v8519_v50  ;;  %4040 = vperm.xlu1 %4659, %v4746_v58   ;;  %v2736_v19 = vadd.f32 %v2720_v31, %v8394_v0  ;;  %v2740_v17 = vadd.f32 %v2724_v10, %v2644_v48  ;;  %v10741_v55 = vld [vmem:[#allocation146_spill] sm:$0xff]  ;;  %v10745_v48 = vld [vmem:[#allocation107_spill] sm:$0xff]  ;;  %v10748_v10 = vld [vmem:[#allocation380_spill] sm:$0xff] }
 0x51d   : > { %v2728_v38 = vmul.f32 %v10740_v21, %v10714_v6  ;;  %v2742_v50 = vadd.f32 %v2726_v9, %v2646_v8  ;;  %v8534_v62 = vadd.f32 %v10741_v55, %v2649_v20  ;;  %v10742_v51 = vld [vmem:[#allocation234_spill] sm:$0xff]  ;;  %v2732_v54 = vadd.f32 %v2716_v27, %v2636_v45  ;;  %v10747_v8 = vld [vmem:[#allocation379_spill] sm:$0xff] }
 0x51e   : > { %v8540_v3 = vadd.f32 %v10742_v51, %v1137_v11  ;;  %v2073_v7 = vadd.f32 %v2057_v4, %v8085_v24  ;;  %v10744_v0 = vld [vmem:[#allocation378_spill] sm:$0xff]  ;;  %v8546_v31 = vadd.f32 %v10745_v48, %v1140_v61  ;;  %v2810_v18 = vmul.f32 %v10747_v8, %v6864_v5  ;;  %v10749_v11 = vld [vmem:[#allocation136_spill] sm:$0xff]  ;;  %v10754_v58 = vld [vmem:[#allocation383_spill] sm:$0xff] }
 0x51f   : > { %v2060_v49 = vmul.f32 %v10744_v0, %v7031_v57  ;;  %v2062_v20 = vmul.f32 %v10748_v10, %v7031_v57  ;;  %v8553_v15 = vadd.f32 %v8119_v40, %v2734_v33  ;;  %v8556_v36 = vadd.f32 %v10749_v11, %v1142_v46  ;;  %v8559_v24 = vpop.permute.xlu1 %3724  ;;  %v8571_v40 = vpop.permute.xlu0 %2206  ;;  %v10752_v55 = vld [vmem:[#allocation374_spill] sm:$0xff]  ;;  %v10758_v8 = vld [vmem:[#allocation268_spill] sm:$0xff] }
 0x520   : > { %10743 = vst [vmem:[#allocation189_spill] sm:$0xff] %v8540_v3  ;;  %10746 = vst [vmem:[#allocation13_spill] sm:$0xff] %v8546_v31  ;;  %v10751_v27 = vmov 8   ;;  %v2744_v45 = vadd.f32 %v2728_v38, %v8426_v42  ;;  %v8563_v61 = vadd.f32 %v8129_v60, %v2736_v19  ;;  %v8566_v9 = vadd.f32 %v8133_v22, %v2738_v23  ;;  %v10753_v46 = vld [vmem:[#allocation382_spill] sm:$0xff]  ;;  %v10755_v42 = vld [vmem:[#allocation384_spill] sm:$0xff] }
 0x521   : > { %10750 = vst [vmem:[#allocation15_spill] sm:$0xff] %v8556_v36  ;;  %4661 = vset.pattern.permute.xlu1 %v10751_v27  ;;  %v8569_v4 = vadd.f32 %v8141_v56, %v2740_v17  ;;  %v2064_v33 = vmul.f32 %v10753_v46, %v7031_v57  ;;  %v2813_v21 = vmul.f32 %v10754_v58, %v6864_v5  ;;  %v10756_v56 = vld [vmem:[#allocation385_spill] sm:$0xff]  ;;  %v10757_v17 = vld [vmem:[#allocation386_spill] sm:$0xff]  ;;  %v10761_v27 = vld [vmem:[#allocation271_spill] sm:$0xff] }
 0x522   : > { %4080 = vperm.xlu1 %4661, %v10752_v55   ;;  %v2066_v60 = vmul.f32 %v10755_v42, %v7031_v57  ;;  %v8581_v19 = vadd.f32 %v8149_v63, %v2742_v50  ;;  %v2076_v22 = vadd.f32 %v2060_v49, %v8087_v28  ;;  %v2815_v23 = vmul.f32 %v10756_v56, %v6864_v5  ;;  %v10759_v63 = vld [vmem:[#allocation387_spill] sm:$0xff]  ;;  %v10760_v49 = vld [vmem:[#allocation381_spill] sm:$0xff] }
 0x523   : > { %v2068_v38 = vmul.f32 %v10757_v17, %v7031_v57  ;;  %v8589_v51 = vadd.f32 %v8125_v16, %v2073_v7  ;;  %v2826_v0 = vadd.f32 %v2810_v18, %v8435_v47  ;;  %v2078_v48 = vadd.f32 %v2062_v20, %v8093_v52  ;;  %v8597_v28 = vpop.permute.xlu1 %3732  ;;  %v10762_v16 = vld [vmem:[#allocation388_spill] sm:$0xff]  ;;  %v10764_v46 = vld [vmem:[#allocation389_spill] sm:$0xff]  ;;  %v10765_v17 = vld [vmem:[#allocation391_spill] sm:$0xff] }
 0x524   : > { %v2817_v10 = vmul.f32 %v10758_v8, %v6864_v5  ;;  %v2070_v50 = vmul.f32 %v10759_v63, %v7031_v57  ;;  %v2812_v11 = vmul.f32 %v10760_v49, %v6864_v5  ;;  %v2819_v55 = vmul.f32 %v10761_v27, %v6864_v5  ;;  %v10775_v49 = vld [vmem:[#allocation134_spill] sm:$0xff]  ;;  %v10778_v27 = vld [vmem:[#allocation457_spill] sm:$0xff] }
 0x525   : > { %v2072_v7 = vmul.f32 %v10762_v16, %v7031_v57  ;;  %v8606_v47 = vadd.f32 %v8163_v29, %v2744_v45  ;;  %v2080_v52 = vadd.f32 %v2064_v33, %v8095_v59  ;;  %v2829_v18 = vadd.f32 %v2813_v21, %v8455_v37  ;;  %v10766_v45 = vld [vmem:[#allocation125_spill] sm:$0xff] }
 0x526   : > { %4084 = vperm.xlu1 %4661, %v7903_v32   ;;  %v2082_v20 = vadd.f32 %v2066_v60, %v8107_v39  ;;  %v2821_v58 = vmul.f32 %v10764_v46, %v6864_v5  ;;  %v2831_v42 = vadd.f32 %v2815_v23, %v8458_v30  ;;  %v2084_v56 = vadd.f32 %v2068_v38, %v8109_v35  ;;  %v8621_v32 = vpop.permute.xlu0 %2214  ;;  %v10767_v60 = vld [vmem:[#allocation126_spill] sm:$0xff]  ;;  %v10808_v36 = vld [vmem:[#allocation177_spill] sm:$0xff] }
 0x527   : > { %10763 = vst [vmem:[#allocation190_spill] sm:$0xff] %v8606_v47  ;;  %v2823_v8 = vmul.f32 %v10765_v17, %v6864_v5  ;;  %v8619_v29 = vadd.f32 %v8137_v13, %v2076_v22  ;;  %v2833_v59 = vadd.f32 %v2817_v10, %v8480_v43  ;;  %v2086_v37 = vadd.f32 %v2070_v50, %v8111_v44  ;;  %v8631_v30 = vpop.permute.xlu1 %3740  ;;  %v10768_v22 = vld [vmem:[#allocation393_spill] sm:$0xff]  ;;  %v10769_v38 = vld [vmem:[#allocation142_spill] sm:$0xff]  ;;  %v10770_v43 = vld [vmem:[#allocation127_spill] sm:$0xff] }
 0x528   : > { %v8626_v39 = vadd.f32 %v8371_v1, %v2826_v0  ;;  %v8629_v33 = vadd.f32 %v10766_v45, %v2078_v48  ;;  %v2828_v35 = vadd.f32 %v2812_v11, %v2732_v54  ;;  %v2835_v21 = vadd.f32 %v2819_v55, %v8487_v12  ;;  %v10772_v48 = vld [vmem:[#allocation132_spill] sm:$0xff]  ;;  %v10788_v45 = vld [vmem:[#allocation114_spill] sm:$0xff] }
 0x529   : > { %v2088_v13 = vadd.f32 %v2072_v7, %v10767_v60  ;;  %v2825_v23 = vmul.f32 %v10768_v22, %v6864_v5  ;;  %v2837_v44 = vadd.f32 %v2821_v58, %v8513_v25  ;;  %v8640_v1 = vadd.f32 %v8380_v34, %v2829_v18  ;;  %v10774_v54 = vld [vmem:[#allocation396_spill] sm:$0xff]  ;;  %v10777_v25 = vld [vmem:[#allocation171_spill] sm:$0xff]  ;;  %v10780_v7 = vld [vmem:[#allocation90_spill] sm:$0xff] }
 0x52a   : > { %4092 = vperm.xlu1 %4661, %v10769_v38   ;;  %v8643_v0 = vadd.f32 %v10770_v43, %v2080_v52  ;;  %v8646_v10 = vadd.f32 %v10772_v48, %v2082_v20  ;;  %v2839_v12 = vadd.f32 %v2823_v8, %v8524_v14  ;;  %v2907_v63 = vmul.f32 %v10774_v54, %v6949_v41  ;;  %v10779_v55 = vld [vmem:[#allocation88_spill] sm:$0xff]  ;;  %v8675_v17 = vpop.permute.xlu0 %2222  ;;  %v10786_v8 = vld [vmem:[#allocation147_spill] sm:$0xff]  ;;  %v10790_v22 = vld [vmem:[#allocation57_spill] sm:$0xff] }
 0x52b   : > { %v8652_v50 = vadd.f32 %v8389_v53, %v2831_v42  ;;  %v8655_v11 = vadd.f32 %v10775_v49, %v2084_v56  ;;  %v8658_v34 = vadd.f32 %v10777_v25, %v2833_v59  ;;  %v3469_v16 = vmul.f32 %v10779_v55, %v10778_v27  ;;  %v10781_v18 = vld [vmem:[#allocation144_spill] sm:$0xff]  ;;  %v8667_v20 = vpop.permute.xlu1 %3748  ;;  %v10783_v53 = vld [vmem:[#allocation390_spill] sm:$0xff]  ;;  %v10784_v42 = vld [vmem:[#allocation173_spill] sm:$0xff]  ;;  %10785 = vst [vmem:[#allocation43_spill] sm:$0xff] %v8675_v17 }
 0x52c   : > { %10771 = vst [vmem:[#allocation180_spill] sm:$0xff] %v8643_v0  ;;  %10773 = vst [vmem:[#allocation181_spill] sm:$0xff] %v8646_v10  ;;  %v3470_v52 = vmul.f32 %v10780_v7, %v10778_v27  ;;  %v8665_v14 = vadd.f32 %v10781_v18, %v2086_v37  ;;  %v3003_v46 = vmul.f32 %v10783_v53, %v7031_v57  ;;  %v10789_v37 = vld [vmem:[#allocation392_spill] sm:$0xff]  ;;  %v10791_v43 = vld [vmem:[#allocation455_spill] sm:$0xff]  ;;  %v10901_v0 = vmov 0.0  }
 0x52d   : > { %10776 = vst [vmem:[#allocation25_spill] sm:$0xff] %v8655_v11  ;;  %v2841_v58 = vadd.f32 %v2825_v23, %v8534_v62  ;;  %v8673_v56 = vadd.f32 %v10784_v42, %v2835_v21  ;;  %v8678_v59 = vadd.f32 %v10786_v8, %v2088_v13  ;;  %v3006_v60 = vmul.f32 %v10789_v37, %v7031_v57  ;;  %v10792_v48 = vld [vmem:[#allocation32_spill] sm:$0xff]  ;;  %v10793_v62 = vld [vmem:[#allocation458_spill] sm:$0xff]  ;;  %v10797_v18 = vld [vmem:[#allocation63_spill] sm:$0xff] }
 0x52e   : > { %10782 = vst [vmem:[#allocation191_spill] sm:$0xff] %v8665_v14  ;;  %4100 = vperm.xlu1 %4661, %v10788_v45   ;;  %v8684_v38 = vadd.f32 %v10790_v22, %v2837_v44  ;;  %v3389_v54 = vmul.f32 %v10792_v48, %v10791_v43  ;;  %v10794_v23 = vld [vmem:[#allocation274_spill] sm:$0xff]  ;;  %v2923_v13 = vadd.f32 %v2907_v63, %v8537_v26  ;;  %v10796_v55 = vld [vmem:[#allocation400_spill] sm:$0xff]  ;;  %v10799_v45 = vld [vmem:[#allocation91_spill] sm:$0xff] }
 0x52f   : > { %10787 = vst [vmem:[#allocation48_spill] sm:$0xff] %v8678_v59  ;;  %v3565_v21 = vmul.f32 %v10794_v23, %v10793_v62  ;;  %v10795_v49 = vld [vmem:[#allocation394_spill] sm:$0xff]  ;;  %v2910_v7 = vmul.f32 %v10796_v55, %v6949_v41  ;;  %v8696_v53 = vadd.f32 %v10797_v18, %v2839_v12  ;;  %v10798_v44 = vld [vmem:[#allocation28_spill] sm:$0xff]  ;;  %v3472_v37 = vmul.f32 %v10799_v45, %v10778_v27  ;;  %v10800_v22 = vld [vmem:[#allocation121_spill] sm:$0xff]  ;;  %v8728_v59 = vpop.permute.xlu0 %2230 }
 0x530   : > { %v3008_v25 = vmul.f32 %v10795_v49, %v7031_v57  ;;  %v3485_v42 = vadd.f32 %v3469_v16, %v3389_v54  ;;  %v3486_v8 = vadd.f32 %v3470_v52, %v10798_v44  ;;  %v3661_v48 = vmul.f32 %v10800_v22, %v10714_v6  ;;  %v10801_v23 = vld [vmem:[#allocation395_spill] sm:$0xff]  ;;  %v10802_v26 = vld [vmem:[#allocation398_spill] sm:$0xff]  ;;  %v10805_v16 = vld [vmem:[#allocation12_spill] sm:$0xff]  ;;  %v8713_v52 = vpop.permute.xlu1 %3788  ;;  %10811 = vst [vmem:[#allocation16_spill] sm:$0xff] %v8728_v59 }
 0x531   : > { %v3010_v49 = vmul.f32 %v10801_v23, %v7031_v57  ;;  %v2908_v63 = vmul.f32 %v10802_v26, %v6949_v41  ;;  %v10803_v55 = vld [vmem:[#allocation402_spill] sm:$0xff]  ;;  %v10806_v54 = vld [vmem:[#allocation397_spill] sm:$0xff]  ;;  %v10807_v22 = vld [vmem:[#allocation123_spill] sm:$0xff]  ;;  %v3757_v26 = vmul.f32 %v10808_v36, %v6864_v5  ;;  %v2926_v31 = vadd.f32 %v2910_v7, %v8553_v15 }
 0x532   : > { %v2912_v47 = vmul.f32 %v10803_v55, %v6949_v41  ;;  %v10804_v12 = vld [vmem:[#allocation182_spill] sm:$0xff]  ;;  %4108 = vperm.xlu1 %4661, %v10805_v16   ;;  %v3012_v44 = vmul.f32 %v10806_v54, %v7031_v57  ;;  %v3581_v45 = vadd.f32 %v3565_v21, %v3485_v42  ;;  %v3662_v23 = vmul.f32 %v10807_v22, %v10714_v6  ;;  %v10809_v55 = vld [vmem:[#allocation404_spill] sm:$0xff]  ;;  %v10815_v15 = vld [vmem:[#allocation399_spill] sm:$0xff] }
 0x533   : > { %v8710_v18 = vadd.f32 %v10804_v12, %v2841_v58  ;;  %v2914_v58 = vmul.f32 %v10809_v55, %v6949_v41  ;;  %v10810_v12 = vld [vmem:[#allocation406_spill] sm:$0xff]  ;;  %v8726_v3 = vadd.f32 %v3003_v46, %v2923_v13  ;;  %v10812_v54 = vld [vmem:[#allocation36_spill] sm:$0xff]  ;;  %v8734_v10 = vadd.f32 %v2908_v63, %v2828_v35  ;;  %v10819_v35 = vld [vmem:[#allocation401_spill] sm:$0xff] }
 0x534   : > { %v2916_v16 = vmul.f32 %v10810_v12, %v6949_v41  ;;  %v3488_v21 = vadd.f32 %v3472_v37, %v10812_v54  ;;  %v10813_v42 = vld [vmem:[#allocation96_spill] sm:$0xff]  ;;  %v3677_v14 = vadd.f32 %v3661_v48, %v3581_v45  ;;  %v3014_v7 = vmul.f32 %v10815_v15, %v7031_v57  ;;  %v10817_v12 = vld [vmem:[#allocation122_spill] sm:$0xff]  ;;  %v3797_v59 = vpop.permute.xlu1 %3796 }
 0x535   : > { %v3474_v22 = vmul.f32 %v10813_v42, %v10778_v27  ;;  %v10814_v11 = vld [vmem:[#allocation304_spill] sm:$0xff]  ;;  %v2928_v55 = vadd.f32 %v2912_v47, %v8563_v61  ;;  %v2930_v63 = vadd.f32 %v2914_v58, %v8566_v9  ;;  %v8751_v47 = vadd.f32 %v3006_v60, %v2926_v31  ;;  %v10821_v45 = vld [vmem:[#allocation38_spill] sm:$0xff]  ;;  %v8770_v60 = vpop.permute.xlu0 %2238 }
 0x536   : > { %v3582_v36 = vadd.f32 %v10814_v11, %v3486_v8  ;;  %v10816_v46 = vld [vmem:[#allocation408_spill] sm:$0xff]  ;;  %4116 = vperm.xlu1 %4661, %v10817_v12   ;;  %v3773_v48 = vadd.f32 %v3757_v26, %v3677_v14  ;;  %v3853_v11 = vmul.f32 %v3797_v59, %v6949_v41  ;;  %v8747_v8 = vmul.f32 %v10819_v35, %v7031_v57  ;;  %v10824_v59 = vld [vmem:[#allocation403_spill] sm:$0xff] }
 0x537   : > { %v2918_v13 = vmul.f32 %v10816_v46, %v6949_v41  ;;  %v10818_v54 = vld [vmem:[#allocation128_spill] sm:$0xff]  ;;  %v2932_v61 = vadd.f32 %v2916_v16, %v8569_v4  ;;  %v3490_v15 = vadd.f32 %v3474_v22, %v10821_v45  ;;  %v10823_v46 = vld [vmem:[#allocation255_spill] sm:$0xff]  ;;  %v8761_v26 = vmul.f32 %v10824_v59, %v7031_v57  ;;  %10827 = vst [vmem:[#allocation17_spill] sm:$0xff] %v8770_v60  ;;  %v10829_v22 = vld [vmem:[#allocation150_spill] sm:$0xff] }
 0x538   : > { %v3678_v37 = vadd.f32 %v3662_v23, %v3582_v36  ;;  %v3664_v42 = vmul.f32 %v10818_v54, %v10714_v6  ;;  %10820 = vst [vmem:[#allocation49_spill] sm:$0xff] %v8747_v8  ;;  %v10822_v23 = vld [vmem:[#allocation99_spill] sm:$0xff]  ;;  %v3584_v12 = vadd.f32 %v10823_v46, %v3488_v21  ;;  %v8757_v14 = vadd.f32 %v3853_v11, %v3773_v48  ;;  %v10825_v54 = vld [vmem:[#allocation405_spill] sm:$0xff]  ;;  %v10828_v58 = vld [vmem:[#allocation124_spill] sm:$0xff]  ;;  %v3801_v16 = vpop.permute.xlu1 %3800 }
 0x539   : > { %v3476_v36 = vmul.f32 %v10822_v23, %v10778_v27  ;;  %v8765_v9 = vmul.f32 %v10825_v54, %v7031_v57  ;;  %v2934_v31 = vadd.f32 %v2918_v13, %v8581_v19  ;;  %v8768_v4 = vadd.f32 %v3008_v25, %v2928_v55  ;;  %v10830_v11 = vld [vmem:[#allocation143_spill] sm:$0xff]  ;;  %v10833_v19 = vld [vmem:[#allocation412_spill] sm:$0xff] }
 0x53a   : > { %4124 = vperm.xlu1 %4661, %v10828_v58   ;;  %v3680_v21 = vadd.f32 %v3664_v42, %v3584_v12  ;;  %v3666_v48 = vmul.f32 %v10829_v22, %v10714_v6  ;;  %v3774_v35 = vadd.f32 %v10830_v11, %v3678_v37  ;;  %v3854_v45 = vmul.f32 %v3801_v16, %v6949_v41  ;;  %v10831_v23 = vld [vmem:[#allocation407_spill] sm:$0xff]  ;;  %v10835_v59 = vld [vmem:[#allocation40_spill] sm:$0xff]  ;;  %v10837_v58 = vld [vmem:[#allocation138_spill] sm:$0xff] }
 0x53b   : > { %10826 = vst [vmem:[#allocation183_spill] sm:$0xff] %v8765_v9  ;;  %v8779_v46 = vmul.f32 %v10831_v23, %v7031_v57  ;;  %v3002_v25 = vmul.f32 %v10833_v19, %v7031_v57  ;;  %v8783_v55 = vadd.f32 %v3010_v49, %v2930_v63  ;;  %v8785_v13 = vadd.f32 %v3012_v44, %v2932_v61  ;;  %v10836_v12 = vld [vmem:[#allocation103_spill] sm:$0xff]  ;;  %v10839_v16 = vld [vmem:[#allocation410_spill] sm:$0xff]  ;;  %v10841_v23 = vld [vmem:[#allocation409_spill] sm:$0xff] }
 0x53c   : > { %v3492_v42 = vadd.f32 %v3476_v36, %v10835_v59  ;;  %v3478_v54 = vmul.f32 %v10836_v12, %v10778_v27  ;;  %v3586_v37 = vadd.f32 %v10837_v58, %v3490_v15  ;;  %v8791_v22 = vadd.f32 %v3854_v45, %v3774_v35  ;;  %v10843_v49 = vld [vmem:[#allocation420_spill] sm:$0xff]  ;;  %v10844_v44 = vld [vmem:[#allocation42_spill] sm:$0xff]  ;;  %v3809_v59 = vpop.permute.xlu1 %3808  ;;  %v10847_v15 = vld [vmem:[#allocation155_spill] sm:$0xff] }
 0x53d   : > { %10832 = vst [vmem:[#allocation53_spill] sm:$0xff] %v8779_v46  ;;  %10834 = vst [vmem:[#allocation193_spill] sm:$0xff] %v8785_v13  ;;  %v8795_v11 = vmul.f32 %v10839_v16, %v6949_v41  ;;  %v8799_v19 = vmul.f32 %v10841_v23, %v7031_v57  ;;  %v1220_v63 = vmul.f32 %v10844_v44, %v10843_v49  ;;  %v10846_v36 = vld [vmem:[#allocation6_spill] sm:$0xff]  ;;  %v10848_v45 = vld [vmem:[#allocation145_spill] sm:$0xff] }
 0x53e   : > { %10838 = vst [vmem:[#allocation27_spill] sm:$0xff] %v8791_v22  ;;  %v8803_v61 = vadd.f32 %v3014_v7, %v2934_v31  ;;  %4132 = vperm.xlu1 %4661, %v10846_v36   ;;  %v3682_v12 = vadd.f32 %v3666_v48, %v3586_v37  ;;  %v3668_v35 = vmul.f32 %v10847_v15, %v10714_v6  ;;  %v10849_v8 = vld [vmem:[#allocation411_spill] sm:$0xff]  ;;  %v10851_v7 = vld [vmem:[#allocation414_spill] sm:$0xff]  ;;  %v10852_v49 = vld [vmem:[#allocation416_spill] sm:$0xff]  ;;  %v8821_v37 = vpop.permute.xlu0 %2246 }
 0x53f   : > { %10840 = vst [vmem:[#allocation195_spill] sm:$0xff] %v8795_v11  ;;  %10842 = vst [vmem:[#allocation70_spill] sm:$0xff] %v8799_v19  ;;  %v3776_v58 = vadd.f32 %v10848_v45, %v3680_v21  ;;  %v3856_v16 = vmul.f32 %v3809_v59, %v6949_v41  ;;  %v8812_v23 = vmul.f32 %v10849_v8, %v7031_v57  ;;  %v10854_v36 = vld [vmem:[#allocation41_spill] sm:$0xff]  ;;  %v10855_v21 = vld [vmem:[#allocation202_spill] sm:$0xff] }
 0x540   : > { %10845 = vst [vmem:[#allocation197_spill] sm:$0xff] %v8803_v61  ;;  %v8815_v13 = vadd.f32 %v3002_v25, %v8626_v39  ;;  %v3004_v31 = vmul.f32 %v10851_v7, %v7031_v57  ;;  %v3005_v48 = vmul.f32 %v10852_v49, %v7031_v57  ;;  %10853 = vst [vmem:[#allocation50_spill] sm:$0xff] %v8821_v37  ;;  %v10856_v45 = vld [vmem:[#allocation306_spill] sm:$0xff]  ;;  %v10858_v39 = vld [vmem:[#allocation413_spill] sm:$0xff] }
 0x541   : > { %10850 = vst [vmem:[#allocation199_spill] sm:$0xff] %v8812_v23  ;;  %v3494_v15 = vadd.f32 %v3478_v54, %v10854_v36  ;;  %v3480_v59 = vmul.f32 %v10855_v21, %v10778_v27  ;;  %v3588_v61 = vadd.f32 %v10856_v45, %v3492_v42  ;;  %v8827_v8 = vadd.f32 %v3856_v16, %v3776_v58  ;;  %v10860_v7 = vld [vmem:[#allocation419_spill] sm:$0xff]  ;;  %v10861_v23 = vld [vmem:[#allocation168_spill] sm:$0xff]  ;;  %v10862_v19 = vld [vmem:[#allocation422_spill] sm:$0xff]  ;;  %v3817_v54 = vpop.permute.xlu1 %3816 }
 0x542   : > { %v8831_v25 = vmul.f32 %v10858_v39, %v7031_v57  ;;  %v3007_v11 = vmul.f32 %v10860_v7, %v7031_v57  ;;  %v1236_v49 = vadd.f32 %v1220_v63, %v10861_v23  ;;  %v1223_v37 = vmul.f32 %v10844_v44, %v10862_v19  ;;  %v10863_v21 = vld [vmem:[#allocation160_spill] sm:$0xff]  ;;  %v10865_v39 = vld [vmem:[#allocation415_spill] sm:$0xff]  ;;  %v8869_v46 = vpop.permute.xlu0 %3135  ;;  %v10889_v9 = vld [vmem:[#allocation269_spill] sm:$0xff] }
 0x543   : > { %10857 = vst [vmem:[#allocation192_spill] sm:$0xff] %v8827_v8  ;;  %v3684_v36 = vadd.f32 %v3668_v35, %v3588_v61  ;;  %v3670_v60 = vmul.f32 %v10863_v21, %v10714_v6  ;;  %v10864_v42 = vld [vmem:[#allocation148_spill] sm:$0xff]  ;;  %v3858_v16 = vmul.f32 %v3817_v54, %v6949_v41  ;;  %v8843_v45 = vadd.f32 %v3004_v31, %v8734_v10  ;;  %v10868_v35 = vld [vmem:[#allocation46_spill] sm:$0xff] }
 0x544   : > { %10859 = vst [vmem:[#allocation59_spill] sm:$0xff] %v8831_v25  ;;  %v3778_v58 = vadd.f32 %v10864_v42, %v3682_v12  ;;  %v8847_v7 = vmul.f32 %v10865_v39, %v7031_v57  ;;  %v8850_v63 = vadd.f32 %v3005_v48, %v8640_v1  ;;  %v10867_v19 = vld [vmem:[#allocation424_spill] sm:$0xff]  ;;  %v3496_v23 = vadd.f32 %v3480_v59, %v10868_v35  ;;  %v10872_v10 = vld [vmem:[#allocation418_spill] sm:$0xff] }
 0x545   : > { %v1225_v61 = vmul.f32 %v10844_v44, %v10867_v19  ;;  %v10869_v21 = vld [vmem:[#allocation204_spill] sm:$0xff]  ;;  %v8862_v31 = vmul.f32 %v10872_v10, %v7031_v57  ;;  %v8865_v39 = vadd.f32 %v3007_v11, %v8652_v50  ;;  %10876 = vst [vmem:[#allocation55_spill] sm:$0xff] %v8869_v46  ;;  %v3825_v59 = vpop.permute.xlu1 %3824  ;;  %v10879_v10 = vld [vmem:[#allocation421_spill] sm:$0xff]  ;;  %v10880_v50 = vld [vmem:[#allocation423_spill] sm:$0xff] }
 0x546   : > { %10866 = vst [vmem:[#allocation72_spill] sm:$0xff] %v8847_v7  ;;  %v3482_v12 = vmul.f32 %v10869_v21, %v10778_v27  ;;  %v10870_v42 = vld [vmem:[#allocation372_spill] sm:$0xff]  ;;  %v8858_v25 = vadd.f32 %v3858_v16, %v3778_v58  ;;  %v10875_v7 = vld [vmem:[#allocation54_spill] sm:$0xff]  ;;  %v10877_v21 = vld [vmem:[#allocation165_spill] sm:$0xff]  ;;  %v3011_v11 = vmul.f32 %v10880_v50, %v7031_v57 }
 0x547   : > { %v3590_v54 = vadd.f32 %v10870_v42, %v3494_v15  ;;  %10873 = vst [vmem:[#allocation194_spill] sm:$0xff] %v8862_v31  ;;  %v10874_v1 = vld [vmem:[#allocation208_spill] sm:$0xff]  ;;  %v1239_v19 = vadd.f32 %v1223_v37, %v10875_v7  ;;  %v3672_v15 = vmul.f32 %v10877_v21, %v10714_v6  ;;  %v10878_v58 = vld [vmem:[#allocation149_spill] sm:$0xff]  ;;  %v3860_v42 = vmul.f32 %v3825_v59, %v6949_v41  ;;  %v10882_v7 = vld [vmem:[#allocation31_spill] sm:$0xff] }
 0x548   : > { %10871 = vst [vmem:[#allocation56_spill] sm:$0xff] %v8858_v25  ;;  %v1336_v48 = vadd.f32 %v10874_v1, %v1236_v49  ;;  %v3780_v16 = vadd.f32 %v10878_v58, %v3684_v36  ;;  %v3009_v31 = vmul.f32 %v10879_v10, %v7031_v57  ;;  %v10881_v49 = vld [vmem:[#allocation426_spill] sm:$0xff]  ;;  %v3388_v1 = vmul.f32 %v10882_v7, %v10791_v43  ;;  %v10884_v46 = vld [vmem:[#allocation47_spill] sm:$0xff]  ;;  %v10885_v25 = vld [vmem:[#allocation276_spill] sm:$0xff] }
 0x549   : > { %v3686_v35 = vadd.f32 %v3670_v60, %v3590_v54  ;;  %v1227_v37 = vmul.f32 %v10844_v44, %v10881_v49  ;;  %v10883_v60 = vld [vmem:[#allocation157_spill] sm:$0xff]  ;;  %v3498_v21 = vadd.f32 %v3482_v12, %v10884_v46  ;;  %v3592_v36 = vadd.f32 %v10885_v25, %v3496_v23  ;;  %v10887_v59 = vld [vmem:[#allocation326_spill] sm:$0xff]  ;;  %v10888_v8 = vld [vmem:[#allocation428_spill] sm:$0xff]  ;;  %v3833_v22 = vpop.permute.xlu1 %3832 }
 0x54a   : > { %v1241_v54 = vadd.f32 %v1225_v61, %v10883_v60  ;;  %v8886_v58 = vadd.f32 %v3860_v42, %v3780_v16  ;;  %vm1352_vm10 = vcmp.ge.f32.partialorder %v1336_v48, 1.0  ;;  %v1339_v10 = vadd.f32 %v10887_v59, %v1239_v19  ;;  %v10890_v7 = vld [vmem:[#allocation169_spill] sm:$0xff]  ;;  %v10891_v60 = vld [vmem:[#allocation152_spill] sm:$0xff]  ;;  %v10893_v16 = vld [vmem:[#allocation158_spill] sm:$0xff] }
 0x54b   : > { %v1229_v50 = vmul.f32 %v10844_v44, %v10888_v8  ;;  %v3564_v49 = vmul.f32 %v10889_v9, %v10793_v62  ;;  %v3688_v17 = vadd.f32 %v3672_v15, %v3592_v36  ;;  %v3674_v61 = vmul.f32 %v10890_v7, %v10714_v6  ;;  %v10892_v12 = vld [vmem:[#allocation425_spill] sm:$0xff]  ;;  %v10894_v42 = vld [vmem:[#allocation102_spill] sm:$0xff]  ;;  %v8904_v9 = vpop.permute.xlu0 %3147  ;;  %v10896_v15 = vld [vmem:[#allocation236_spill] sm:$0xff] }
 0x54c   : > { %10886 = vst [vmem:[#allocation74_spill] sm:$0xff] %v8886_v58  ;;  %v3782_v46 = vadd.f32 %v10891_v60, %v3686_v35  ;;  %v3862_v25 = vmul.f32 %v3833_v22, %v6949_v41  ;;  %v8898_v23 = vadd.f32 %v3009_v31, %v8658_v34  ;;  %v3013_v19 = vmul.f32 %v10892_v12, %v7031_v57  ;;  %v10897_v58 = vld [vmem:[#allocation430_spill] sm:$0xff]  ;;  %v10898_v35 = vld [vmem:[#allocation140_spill] sm:$0xff]  ;;  %v10900_v31 = vld [vmem:[#allocation159_spill] sm:$0xff] }
 0x54d   : > { %v1243_v8 = vadd.f32 %v1227_v37, %v10893_v16  ;;  %v3484_v59 = vadd.f32 %v10894_v42, %v3388_v1  ;;  %10895 = vst [vmem:[#allocation196_spill] sm:$0xff] %v8904_v9  ;;  %v1341_v36 = vadd.f32 %v10896_v15, %v1241_v54  ;;  %v1231_v7 = vmul.f32 %v10844_v44, %v10897_v58  ;;  %v3841_v16 = vpop.permute.xlu1 %3840  ;;  %v10902_v42 = vld [vmem:[#allocation153_spill] sm:$0xff]  ;;  %v10905_v48 = vld [vmem:[#allocation8_spill] sm:$0xff] }
 0x54e   : > { %v3594_v60 = vadd.f32 %v10898_v35, %v3498_v21  ;;  %v8910_v22 = vadd.f32 %v3862_v25, %v3782_v46  ;;  %v8913_v34 = vadd.f32 %v3011_v11, %v8673_v56  ;;  %v1245_v12 = vadd.f32 %v1229_v50, %v10900_v31  ;;  %v10903_v46 = vld [vmem:[#allocation249_spill] sm:$0xff]  ;;  %v10904_v11 = vld [vmem:[#allocation44_spill] sm:$0xff] }
 0x54f   : > { %v8918_v37 = vsel %vm1352_vm10, 1.0, %v10901_v0  ;;  %v3580_v1 = vadd.f32 %v3564_v49, %v3484_v59  ;;  %vm1355_vm11 = vcmp.ge.f32.partialorder %v1339_v10, 1.0  ;;  %v3784_v15 = vadd.f32 %v10902_v42, %v3688_v17  ;;  %v10906_v49 = vld [vmem:[#allocation427_spill] sm:$0xff]  ;;  %v8940_v42 = vpop.permute.xlu0 %3155  ;;  %v10914_v9 = vld [vmem:[#allocation432_spill] sm:$0xff] }
 0x550   : > { %10899 = vst [vmem:[#allocation198_spill] sm:$0xff] %v8910_v22  ;;  %v3690_v54 = vadd.f32 %v3674_v61, %v3594_v60  ;;  %v3864_v58 = vmul.f32 %v3841_v16, %v6949_v41  ;;  %v8923_v21 = vadd.f32 %v3013_v19, %v8684_v38  ;;  %v1343_v56 = vadd.f32 %v10903_v46, %v1243_v8  ;;  %v10907_v61 = vld [vmem:[#allocation161_spill] sm:$0xff]  ;;  %v10909_v60 = vld [vmem:[#allocation206_spill] sm:$0xff] }
 0x551   : > { %v3391_v50 = vmul.f32 %v10904_v11, %v10791_v43  ;;  %v3756_v25 = vmul.f32 %v10905_v48, %v6864_v5  ;;  %vm1357_vm12 = vcmp.ge.f32.partialorder %v1341_v36, 1.0  ;;  %v3015_v59 = vmul.f32 %v10906_v49, %v7031_v57  ;;  %v10910_v38 = vld [vmem:[#allocation429_spill] sm:$0xff]  ;;  %10912 = vst [vmem:[#allocation80_spill] sm:$0xff] %v8940_v42  ;;  %v3849_v48 = vpop.permute.xlu1 %3848 }
 0x552   : > { %v1247_v35 = vadd.f32 %v1231_v7, %v10907_v61  ;;  %v8933_v17 = vadd.f32 %v3864_v58, %v3784_v15  ;;  %v1345_v31 = vadd.f32 %v10909_v60, %v1245_v12  ;;  %v3017_v19 = vmul.f32 %v10910_v38, %v7031_v57  ;;  %v10911_v8 = vld [vmem:[#allocation445_spill] sm:$0xff]  ;;  %v10915_v15 = vld [vmem:[#allocation166_spill] sm:$0xff]  ;;  %v10916_v61 = vld [vmem:[#allocation172_spill] sm:$0xff] }
 0x553   : > { %v3567_v16 = vmul.f32 %v10911_v8, %v10793_v62  ;;  %v10913_v46 = vld [vmem:[#allocation133_spill] sm:$0xff]  ;;  %v1233_v49 = vmul.f32 %v10844_v44, %v10914_v9  ;;  %v8947_v7 = vsel %vm1355_vm11, 1.0, %v10901_v0  ;;  %v3786_v12 = vadd.f32 %v10915_v15, %v3690_v54  ;;  %v10917_v38 = vld [vmem:[#allocation51_spill] sm:$0xff] }
 0x554   : > { %10908 = vst [vmem:[#allocation58_spill] sm:$0xff] %v8933_v17  ;;  %v3676_v11 = vadd.f32 %v10913_v46, %v3580_v1  ;;  %v3866_v58 = vmul.f32 %v3849_v48, %v6949_v41  ;;  %vm1359_vm13 = vcmp.ge.f32.partialorder %v1343_v56, 1.0  ;;  %v3487_v60 = vadd.f32 %v10916_v61, %v3391_v50  ;;  %v10919_v46 = vld [vmem:[#allocation210_spill] sm:$0xff]  ;;  %v10923_v50 = vld [vmem:[#allocation308_spill] sm:$0xff]  ;;  %v10937_v22 = vld [vmem:[#allocation433_spill] sm:$0xff] }
 0x555   : > { %v3393_v8 = vmul.f32 %v10917_v38, %v10791_v43  ;;  %v8955_v1 = vadd.f32 %v3015_v59, %v8696_v53  ;;  %v1347_v9 = vadd.f32 %v10919_v46, %v1247_v35  ;;  %v8960_v10 = vsel %vm1357_vm12, 1.0, %v10901_v0  ;;  %v10925_v59 = vld [vmem:[#allocation163_spill] sm:$0xff]  ;;  %v10926_v35 = vld [vmem:[#allocation62_spill] sm:$0xff] }
 0x556   : > { %v3772_v42 = vadd.f32 %v3756_v25, %v3676_v11  ;;  %10920 = vst [vmem:[#allocation76_spill] sm:$0xff] %v8960_v10  ;;  %v8962_v17 = vadd.f32 %v3866_v58, %v3786_v12  ;;  %vm1361_vm14 = vcmp.ge.f32.partialorder %v1345_v31, 1.0  ;;  %v8965_v54 = vadd.f32 %v3017_v19, %v8710_v18  ;;  %v10924_v25 = vld [vmem:[#allocation431_spill] sm:$0xff]  ;;  %v3889_v12 = vpop.permute.xlu1 %3888  ;;  %v8978_v18 = vpop.permute.xlu0 %3163  ;;  %v10930_v19 = vld [vmem:[#allocation186_spill] sm:$0xff] }
 0x557   : > { %10918 = vst [vmem:[#allocation201_spill] sm:$0xff] %v8955_v1  ;;  %v3583_v56 = vadd.f32 %v3567_v16, %v3487_v60  ;;  %v3569_v48 = vmul.f32 %v10923_v50, %v10793_v62  ;;  %v3099_v53 = vmul.f32 %v10924_v25, %v10844_v44  ;;  %v1249_v11 = vadd.f32 %v1233_v49, %v10925_v59  ;;  %v10928_v58 = vld [vmem:[#allocation207_spill] sm:$0xff]  ;;  %v10932_v49 = vld [vmem:[#allocation434_spill] sm:$0xff]  ;;  %v10933_v25 = vld [vmem:[#allocation33_spill] sm:$0xff] }
 0x558   : > { %10921 = vst [vmem:[#allocation203_spill] sm:$0xff] %v8962_v17  ;;  %10922 = vst [vmem:[#allocation205_spill] sm:$0xff] %v8965_v54  ;;  %v3395_v36 = vmul.f32 %v10926_v35, %v10791_v43  ;;  %v8975_v15 = vsel %vm1359_vm13, 1.0, %v10901_v0  ;;  %v3489_v61 = vadd.f32 %v10928_v58, %v3393_v8  ;;  %v3759_v16 = vmul.f32 %v10930_v19, %v6864_v5  ;;  %v10931_v60 = vld [vmem:[#allocation175_spill] sm:$0xff]  ;;  %v10934_v58 = vld [vmem:[#allocation417_spill] sm:$0xff] }
 0x559   : > { %10927 = vst [vmem:[#allocation209_spill] sm:$0xff] %v8975_v15  ;;  %10929 = vst [vmem:[#allocation211_spill] sm:$0xff] %v8978_v18  ;;  %v3868_v38 = vadd.f32 %v10931_v60, %v3772_v42  ;;  %v3948_v46 = vmul.f32 %v3889_v12, %v7031_v57  ;;  %vm1363_vm15 = vcmp.ge.f32.partialorder %v1347_v9, 1.0  ;;  %v1235_v50 = vmul.f32 %v10844_v44, %v10932_v49  ;;  %v10935_v19 = vld [vmem:[#allocation113_spill] sm:$0xff]  ;;  %v10936_v60 = vld [vmem:[#allocation328_spill] sm:$0xff] }
 0x55a   : > { %v4044_v59 = vmul.f32 %v10933_v25, %v10844_v44  ;;  %v8990_v35 = vsel %vm1361_vm14, 1.0, %v10901_v0  ;;  %v3585_v8 = vadd.f32 %v3569_v48, %v3489_v61  ;;  %v3571_v18 = vmul.f32 %v10934_v58, %v10793_v62  ;;  %v10938_v49 = vld [vmem:[#allocation105_spill] sm:$0xff]  ;;  %v3893_v31 = vpop.permute.xlu1 %3892 }
 0x55b   : > { %v3679_v17 = vadd.f32 %v10935_v19, %v3583_v56  ;;  %v3964_v42 = vadd.f32 %v3948_v46, %v3868_v38  ;;  %v1349_v12 = vadd.f32 %v10936_v60, %v1249_v11  ;;  %v3100_v54 = vmul.f32 %v10937_v22, %v10844_v44  ;;  %v10939_v25 = vld [vmem:[#allocation69_spill] sm:$0xff]  ;;  %v10940_v11 = vld [vmem:[#allocation164_spill] sm:$0xff] }
 0x55c   : > { %v3491_v15 = vadd.f32 %v10938_v49, %v3395_v36  ;;  %v3397_v10 = vmul.f32 %v10939_v25, %v10791_v43  ;;  %v3761_v48 = vmul.f32 %v8527_v2, %v6864_v5  ;;  %v3949_v61 = vmul.f32 %v3893_v31, %v7031_v57  ;;  %v10941_v22 = vld [vmem:[#allocation436_spill] sm:$0xff]  ;;  %v10946_v49 = vld [vmem:[#allocation81_spill] sm:$0xff] }
 0x55d   : > { %v3775_v1 = vadd.f32 %v3759_v16, %v3679_v17  ;;  %v9004_v58 = vadd.f32 %v4044_v59, %v3964_v42  ;;  %v9007_v56 = vadd.f32 %v3099_v53, %v8726_v3  ;;  %v1251_v38 = vadd.f32 %v1235_v50, %v10940_v11  ;;  %v10942_v46 = vld [vmem:[#allocation108_spill] sm:$0xff]  ;;  %v9018_v16 = vpop.permute.xlu0 %3171  ;;  %v10945_v50 = vld [vmem:[#allocation106_spill] sm:$0xff] }
 0x55e   : > { %v2154_v36 = vmul.f32 %v10941_v22, %v10844_v44  ;;  %v3573_v19 = vmul.f32 %v10942_v46, %v10793_v62  ;;  %v9016_v17 = vsel %vm1363_vm15, 1.0, %v10901_v0  ;;  %v3587_v2 = vadd.f32 %v3571_v18, %v3491_v15  ;;  %10943 = vst [vmem:[#allocation213_spill] sm:$0xff] %v9018_v16  ;;  %v10944_v59 = vld [vmem:[#allocation116_spill] sm:$0xff]  ;;  %v3901_v9 = vpop.permute.xlu1 %3900  ;;  %v10947_v18 = vld [vmem:[#allocation178_spill] sm:$0xff]  ;;  %v10949_v22 = vld [vmem:[#allocation435_spill] sm:$0xff] }
 0x55f   : > { %v3681_v42 = vadd.f32 %v10944_v59, %v3585_v8  ;;  %v9022_v3 = vadd.f32 %v3949_v61, %v8757_v14  ;;  %vm1365_vm0 = vcmp.ge.f32.partialorder %v1349_v12, 1.0  ;;  %v9025_v53 = vadd.f32 %v3100_v54, %v8843_v45  ;;  %v10948_v14 = vld [vmem:[#allocation212_spill] sm:$0xff]  ;;  %v10950_v54 = vld [vmem:[#allocation167_spill] sm:$0xff]  ;;  %v10951_v59 = vld [vmem:[#allocation34_spill] sm:$0xff] }
 0x560   : > { %v3493_v60 = vadd.f32 %v10945_v50, %v3397_v10  ;;  %v3399_v25 = vmul.f32 %v10946_v49, %v10791_v43  ;;  %v3763_v15 = vmul.f32 %v8559_v24, %v6864_v5  ;;  %v3871_v11 = vadd.f32 %v10947_v18, %v3775_v1  ;;  %v10953_v49 = vld [vmem:[#allocation115_spill] sm:$0xff]  ;;  %v10958_v12 = vld [vmem:[#allocation86_spill] sm:$0xff] }
 0x561   : > { %v3777_v31 = vadd.f32 %v3761_v48, %v3681_v42  ;;  %v3951_v8 = vmul.f32 %v3901_v9, %v7031_v57  ;;  %v1351_v61 = vadd.f32 %v10948_v14, %v1251_v38  ;;  %v3102_v45 = vmul.f32 %v10949_v22, %v10844_v44  ;;  %v10952_v48 = vld [vmem:[#allocation11_spill] sm:$0xff] }
 0x562   : > { %v2170_v46 = vadd.f32 %v2154_v36, %v10950_v54  ;;  %v3589_v10 = vadd.f32 %v3573_v19, %v3493_v60  ;;  %v4047_v50 = vmul.f32 %v10951_v59, %v10844_v44  ;;  %v3575_v42 = vmul.f32 %v10952_v48, %v10793_v62  ;;  %v10954_v1 = vld [vmem:[#allocation139_spill] sm:$0xff]  ;;  %v3909_v19 = vpop.permute.xlu1 %3908  ;;  %v9052_v60 = vpop.permute.xlu0 %3179  ;;  %v10956_v54 = vld [vmem:[#allocation184_spill] sm:$0xff]  ;;  %v10959_v48 = vld [vmem:[#allocation118_spill] sm:$0xff] }
 0x563   : > { %v3683_v24 = vadd.f32 %v10953_v49, %v3587_v2  ;;  %v3967_v16 = vadd.f32 %v3951_v8, %v3871_v11  ;;  %v3495_v18 = vadd.f32 %v10954_v1, %v3399_v25  ;;  %v10955_v9 = vld [vmem:[#allocation95_spill] sm:$0xff]  ;;  %v9048_v14 = vsel %vm1365_vm0, 1.0, %v10901_v0 }
 0x564   : > { %v3401_v38 = vmul.f32 %v10955_v9, %v10791_v43  ;;  %v3765_v36 = vmul.f32 %v8597_v28, %v6864_v5  ;;  %v3873_v59 = vadd.f32 %v10956_v54, %v3777_v31  ;;  %v3953_v2 = vmul.f32 %v3909_v19, %v7031_v57  ;;  %v10957_v25 = vld [vmem:[#allocation151_spill] sm:$0xff]  ;;  %v10960_v28 = vld [vmem:[#allocation45_spill] sm:$0xff] }
 0x565   : > { %v3779_v22 = vadd.f32 %v3763_v15, %v3683_v24  ;;  %v9056_v11 = vadd.f32 %v4047_v50, %v3967_v16  ;;  %vm1367_vm1 = vcmp.ge.f32.partialorder %v1351_v61, 1.0  ;;  %v2266_v43 = vadd.f32 %v10957_v25, %v2170_v46  ;;  %v10961_v15 = vld [vmem:[#allocation131_spill] sm:$0xff]  ;;  %v10962_v16 = vld [vmem:[#allocation438_spill] sm:$0xff] }
 0x566   : > { %v3467_v8 = vmul.f32 %v10958_v12, %v10778_v27  ;;  %v3685_v49 = vadd.f32 %v10959_v48, %v3589_v10  ;;  %v4049_v1 = vmul.f32 %v10960_v28, %v10844_v44  ;;  %v3591_v9 = vadd.f32 %v3575_v42, %v3495_v18  ;;  %v10963_v46 = vld [vmem:[#allocation174_spill] sm:$0xff]  ;;  %v3917_v27 = vpop.permute.xlu1 %3916 }
 0x567   : > { %v3577_v24 = vmul.f32 %v10961_v15, %v10793_v62  ;;  %v3969_v31 = vadd.f32 %v3953_v2, %v3873_v59  ;;  %v9067_v19 = vadd.f32 %v3102_v45, %v8751_v47  ;;  %v2157_v50 = vmul.f32 %v10962_v16, %v10844_v44  ;;  %v10964_v12 = vld [vmem:[#allocation10_spill] sm:$0xff]  ;;  %v10965_v62 = vld [vmem:[#allocation437_spill] sm:$0xff]  ;;  %v10966_v45 = vld [vmem:[#allocation39_spill] sm:$0xff] }
 0x568   : > { %v3497_v54 = vadd.f32 %v10963_v46, %v3401_v38  ;;  %v3781_v25 = vadd.f32 %v3765_v36, %v3685_v49  ;;  %v3767_v10 = vmul.f32 %v8631_v30, %v6864_v5  ;;  %v3875_v48 = vadd.f32 %v10964_v12, %v3779_v22  ;;  %v10967_v36 = vld [vmem:[#allocation52_spill] sm:$0xff]  ;;  %v9087_v49 = vpop.permute.xlu0 %3187  ;;  %v10968_v22 = vld [vmem:[#allocation117_spill] sm:$0xff]  ;;  %v10970_v16 = vld [vmem:[#allocation447_spill] sm:$0xff] }
 0x569   : > { %v3955_v42 = vmul.f32 %v3917_v27, %v7031_v57  ;;  %v9076_v18 = vadd.f32 %v4049_v1, %v3969_v31  ;;  %vm2282_vm2 = vcmp.ge.f32.partialorder %v2266_v43, 1.0  ;;  %v3104_v47 = vmul.f32 %v10965_v62, %v10844_v44  ;;  %v10969_v15 = vld [vmem:[#allocation60_spill] sm:$0xff]  ;;  %v10972_v12 = vld [vmem:[#allocation185_spill] sm:$0xff] }
 0x56a   : > { %v3483_v59 = vadd.f32 %v3467_v8, %v10966_v45  ;;  %v9083_v38 = vsel %vm1367_vm1, 1.0, %v10901_v0  ;;  %v4051_v2 = vmul.f32 %v10967_v36, %v10844_v44  ;;  %v3593_v30 = vadd.f32 %v3577_v24, %v3497_v54  ;;  %v10971_v8 = vld [vmem:[#allocation120_spill] sm:$0xff]  ;;  %v3925_v61 = vpop.permute.xlu1 %3924 }
 0x56b   : > { %v3687_v28 = vadd.f32 %v10968_v22, %v3591_v9  ;;  %v3971_v1 = vadd.f32 %v3955_v42, %v3875_v48  ;;  %v2173_v31 = vadd.f32 %v2157_v50, %v10969_v15  ;;  %v3098_v46 = vmul.f32 %v10970_v16, %v10844_v44  ;;  %v10974_v50 = vld [vmem:[#allocation449_spill] sm:$0xff]  ;;  %v10976_v42 = vld [vmem:[#allocation332_spill] sm:$0xff]  ;;  %v10980_v16 = vld [vmem:[#allocation154_spill] sm:$0xff] }
 0x56c   : > { %v3659_v27 = vmul.f32 %v10971_v8, %v10714_v6  ;;  %v3877_v62 = vadd.f32 %v10972_v12, %v3781_v25  ;;  %v3769_v24 = vmul.f32 %v8667_v20, %v6864_v5  ;;  %v3957_v54 = vmul.f32 %v3925_v61, %v7031_v57  ;;  %v9109_v6 = vld [vmem:[%s9506_s1 + $0x8] ss:$0 sm:$0xff]  ;;  %v10975_v25 = vld [vmem:[#allocation30_spill] sm:$0xff]  ;;  %v10977_v20 = vld [vmem:[#allocation439_spill] sm:$0xff] }
 0x56d   : > { %v3783_v45 = vadd.f32 %v3767_v10, %v3687_v28  ;;  %v9099_v36 = vadd.f32 %v4051_v2, %v3971_v1  ;;  %v9102_v9 = vadd.f32 %v3104_v47, %v8768_v4  ;;  %v3101_v48 = vmul.f32 %v10974_v50, %v10844_v44  ;;  %v10978_v22 = vld [vmem:[#allocation64_spill] sm:$0xff]  ;;  %v4077_v47 = vpop.permute.xlu0 %4076  ;;  %v10979_v28 = vld [vmem:[#allocation18_spill] sm:$0xff] }
 0x56e   : > { %v2249_v10 = vmul.f32 %v9109_v6, %v10975_v25  ;;  %v3579_v5 = vadd.f32 %v10976_v42, %v3483_v59  ;;  %v3106_v2 = vmul.f32 %v10977_v20, %v10844_v44  ;;  %v4053_v4 = vmul.f32 %v10978_v22, %v10844_v44  ;;  %v3933_v50 = vpop.permute.xlu1 %3932  ;;  %v10981_v42 = vld [vmem:[#allocation187_spill] sm:$0xff] }
 0x56f   : > { %10973 = vst [vmem:[#allocation61_spill] sm:$0xff] %v9099_v36  ;;  %v3689_v1 = vadd.f32 %v10979_v28, %v3593_v30  ;;  %v3973_v15 = vadd.f32 %v3957_v54, %v3877_v62  ;;  %v9120_v8 = vadd.f32 %v10980_v16, %v2173_v31  ;;  %v3114_v61 = vadd.f32 %v3098_v46, %v8815_v13  ;;  %v10982_v30 = vld [vmem:[#allocation444_spill] sm:$0xff]  ;;  %v10983_v46 = vld [vmem:[#allocation451_spill] sm:$0xff] }
 0x570   : > { %v9125_v12 = vsel %vm2282_vm2, 1.0, %v10901_v0  ;;  %v3675_v59 = vadd.f32 %v3659_v27, %v3579_v5  ;;  %v3879_v20 = vadd.f32 %v10981_v42, %v3783_v45  ;;  %v3959_v22 = vmul.f32 %v3933_v50, %v7031_v57  ;;  %v10985_v54 = vld [vmem:[#allocation71_spill] sm:$0xff]  ;;  %v10989_v50 = vld [vmem:[#allocation188_spill] sm:$0xff] }
 0x571   : > { %v3785_v25 = vadd.f32 %v3769_v24, %v3689_v1  ;;  %v9129_v36 = vadd.f32 %v4053_v4, %v3973_v15  ;;  %v3194_v62 = vmul.f32 %v9109_v6, %v10982_v30  ;;  %v3117_v31 = vadd.f32 %v3101_v48, %v8850_v63  ;;  %v10984_v24 = vld [vmem:[#allocation453_spill] sm:$0xff]  ;;  %v10986_v63 = vld [vmem:[#allocation448_spill] sm:$0xff]  ;;  %v9151_v16 = vpop.permute.xlu0 %4088 }
 0x572   : > { %v2265_v13 = vadd.f32 %v2249_v10, %v8589_v51  ;;  %v3851_v43 = vmul.f32 %v8713_v52, %v6949_v41  ;;  %v3103_v27 = vmul.f32 %v10983_v46, %v10844_v44  ;;  %v3105_v45 = vmul.f32 %v10984_v24, %v10844_v44  ;;  %v10987_v48 = vld [vmem:[#allocation37_spill] sm:$0xff]  ;;  %v3941_v41 = vpop.permute.xlu1 %3940  ;;  %v10988_v52 = vld [vmem:[#allocation179_spill] sm:$0xff] }
 0x573   : > { %v4055_v5 = vmul.f32 %v10985_v54, %v10844_v44  ;;  %v3975_v4 = vadd.f32 %v3959_v22, %v3879_v20  ;;  %v9144_v28 = vadd.f32 %v3106_v2, %v8783_v55  ;;  %v3210_v1 = vadd.f32 %v3194_v62, %v3114_v61  ;;  %v10990_v2 = vld [vmem:[#allocation456_spill] sm:$0xff]  ;;  %v10991_v46 = vld [vmem:[#allocation83_spill] sm:$0xff] }
 0x574   : > { %v3197_v51 = vmul.f32 %v9109_v6, %v10986_v63  ;;  %v3771_v10 = vadd.f32 %v10987_v48, %v3675_v59  ;;  %v2252_v15 = vmul.f32 %v9109_v6, %v10988_v52  ;;  %v3881_v42 = vadd.f32 %v10989_v50, %v3785_v25  ;;  %v10992_v63 = vld [vmem:[#allocation446_spill] sm:$0xff] }
 0x575   : > { %v3961_v30 = vmul.f32 %v3941_v41, %v7031_v57  ;;  %v9155_v20 = vadd.f32 %v4055_v5, %v3975_v4  ;;  %v3107_v61 = vmul.f32 %v10990_v2, %v10844_v44  ;;  %vm2281_vm3 = vcmp.ge.f32.partialorder %v2265_v13, 1.0  ;;  %v10993_v57 = vld [vmem:[#allocation450_spill] sm:$0xff]  ;;  %v10995_v13 = vld [vmem:[#allocation4_spill] sm:$0xff] }
 0x576   : > { %v3213_v55 = vadd.f32 %v3197_v51, %v3117_v31  ;;  %v3867_v22 = vadd.f32 %v3851_v43, %v3771_v10  ;;  %v3119_v59 = vadd.f32 %v3103_v27, %v8865_v39  ;;  %v3121_v62 = vadd.f32 %v3105_v45, %v8898_v23  ;;  %v10994_v31 = vld [vmem:[#allocation452_spill] sm:$0xff]  ;;  %v3981_v45 = vpop.permute.xlu1 %3980 }
 0x577   : > { %v4057_v24 = vmul.f32 %v10991_v46, %v10844_v44  ;;  %v3977_v54 = vadd.f32 %v3961_v30, %v3881_v42  ;;  %v3196_v25 = vmul.f32 %v9109_v6, %v10992_v63  ;;  %v3199_v5 = vmul.f32 %v9109_v6, %v10993_v57  ;;  %v10996_v42 = vld [vmem:[#allocation454_spill] sm:$0xff] }
 0x578   : > { %v3201_v4 = vmul.f32 %v9109_v6, %v10994_v31  ;;  %v3109_v43 = vmul.f32 %v10995_v13, %v10844_v44  ;;  %v4421_v39 = vsel %vm2281_vm3, 1.0, %v10901_v0  ;;  %v2268_v23 = vadd.f32 %v2252_v15, %v8619_v29  ;;  %v4097_v29 = vpop.permute.xlu0 %4096 }
 0x579   : > { %v2254_v27 = vmul.f32 %v9109_v6, %v8571_v40  ;;  %v9175_v51 = vadd.f32 %v4057_v24, %v3977_v54  ;;  %vm3226_vm4 = vcmp.ge.f32.partialorder %v3210_v1, 1.0  ;;  %v3123_v48 = vadd.f32 %v3107_v61, %v8913_v34  ;;  %v10997_v34 = vld [vmem:[#allocation440_spill] sm:$0xff] }
 0x57a   : > { %v3963_v10 = vadd.f32 %v8761_v26, %v3867_v22  ;;  %v4043_v41 = vmul.f32 %v3981_v45, %v10844_v44  ;;  %vm3229_vm5 = vcmp.ge.f32.partialorder %v3213_v55, 1.0  ;;  %v3215_v52 = vadd.f32 %v3199_v5, %v3119_v59  ;;  %v9192_v59 = vpop.permute.xlu1 %3988  ;;  %v11000_v5 = vld [vmem:[#allocation43_spill] sm:$0xff] }
 0x57b   : > { %v3217_v50 = vadd.f32 %v3201_v4, %v3121_v62  ;;  %v3203_v30 = vmul.f32 %v9109_v6, %v10996_v42  ;;  %v3125_v15 = vadd.f32 %v3109_v43, %v8923_v21  ;;  %v2329_v40 = vmax.f32 %v8918_v37, %v4421_v39  ;;  %v10998_v37 = vld [vmem:[#allocation460_spill] sm:$0xff]  ;;  %v11001_v43 = vld [vmem:[#allocation27_spill] sm:$0xff] }
 0x57c   : > { %v4139_v2 = vmul.f32 %v9109_v6, %v4077_v47  ;;  %v4059_v46 = vadd.f32 %v4043_v41, %v3963_v10  ;;  %v9187_v61 = vmul.f32 %v10997_v34, %v10844_v44  ;;  %vm2284_vm6 = vcmp.ge.f32.partialorder %v2268_v23, 1.0  ;;  %v4105_v4 = vpop.permute.xlu0 %4104  ;;  %v11002_v39 = vld [vmem:[#allocation183_spill] sm:$0xff] }
 0x57d   : > { %v2270_v26 = vadd.f32 %v2254_v27, %v8629_v33  ;;  %v2256_v22 = vmul.f32 %v9109_v6, %v8621_v32  ;;  %v9195_v62 = vadd.f32 %v3196_v25, %v9025_v53  ;;  %v3219_v21 = vadd.f32 %v3203_v30, %v3123_v48  ;;  %v10999_v53 = vld [vmem:[#allocation180_spill] sm:$0xff]  ;;  %v11003_v10 = vld [vmem:[#allocation7_spill] sm:$0xff] }
 0x57e   : > { %v3205_v47 = vmul.f32 %v9109_v6, %v10998_v37  ;;  %v4155_v24 = vadd.f32 %v4139_v2, %v4059_v46  ;;  %v4453_v54 = vsel %vm3226_vm4, 1.0, %v10901_v0  ;;  %v4456_v63 = vsel %vm3229_vm5, 1.0, %v10901_v0  ;;  %v3993_v55 = vpop.permute.xlu1 %3992  ;;  %v11007_v37 = vld [vmem:[#allocation192_spill] sm:$0xff] }
 0x57f   : > { %vm3231_vm7 = vcmp.ge.f32.partialorder %v3215_v52, 1.0  ;;  %vm3233_vm8 = vcmp.ge.f32.partialorder %v3217_v50, 1.0  ;;  %v9203_v32 = vmax.f32 %v2329_v40, %v4453_v54  ;;  %v4424_v57 = vsel %vm2284_vm6, 1.0, %v10901_v0  ;;  %v11004_v52 = vld [vmem:[#allocation181_spill] sm:$0xff]  ;;  %v11005_v50 = vld [vmem:[#allocation16_spill] sm:$0xff] }
 0x580   : > { %v3221_v33 = vadd.f32 %v3205_v47, %v3125_v15  ;;  %vm4171_vm9 = vcmp.ge.f32.partialorder %v4155_v24, 1.0  ;;  %vm2286_vm10 = vcmp.ge.f32.partialorder %v2270_v26, 1.0  ;;  %v2272_v25 = vadd.f32 %v2256_v22, %v10999_v53  ;;  %v11006_v22 = vld [vmem:[#allocation5_spill] sm:$0xff] }
 0x581   : > { %v2258_v31 = vmul.f32 %v9109_v6, %v11000_v5  ;;  %v9210_v1 = vsel %vm4171_vm9, 1.0, %v10901_v0  ;;  %vm3235_vm11 = vcmp.ge.f32.partialorder %v3219_v21, 1.0  ;;  %v3966_v23 = vadd.f32 %v11002_v39, %v11001_v43  ;;  %v11008_v47 = vld [vmem:[#allocation53_spill] sm:$0xff] }
 0x582   : > { %v4219_v13 = vmax.f32 %v9203_v32, %v9210_v1  ;;  %v4046_v27 = vmul.f32 %v3993_v55, %v10844_v44  ;;  %v4458_v45 = vsel %vm3231_vm7, 1.0, %v10901_v0  ;;  %v4460_v48 = vsel %vm3233_vm8, 1.0, %v10901_v0  ;;  %v4001_v26 = vpop.permute.xlu1 %4000 }
 0x583   : > { %v3111_v41 = vmul.f32 %v11003_v10, %v10844_v44  ;;  %v2332_v42 = vmax.f32 %v8947_v7, %v4424_v57  ;;  %vm3237_vm12 = vcmp.ge.f32.partialorder %v3221_v33, 1.0  ;;  %v4426_v30 = vsel %vm2286_vm10, 1.0, %v10901_v0  ;;  %v11009_v33 = vld [vmem:[#allocation201_spill] sm:$0xff] }
 0x584   : > { %v4142_v15 = vmul.f32 %v9109_v6, %v9151_v16  ;;  %v4062_v40 = vadd.f32 %v4046_v27, %v3966_v23  ;;  %v9228_v2 = vsel %vm3235_vm11, 1.0, %v10901_v0  ;;  %vm2288_vm13 = vcmp.ge.f32.partialorder %v2272_v25, 1.0  ;;  %v11010_v25 = vld [vmem:[#allocation76_spill] sm:$0xff]  ;;  %v11011_v23 = vld [vmem:[#allocation25_spill] sm:$0xff] }
 0x585   : > { %v2274_v46 = vadd.f32 %v2258_v31, %v11004_v52  ;;  %v2260_v34 = vmul.f32 %v9109_v6, %v11005_v50  ;;  %v3207_v7 = vmul.f32 %v9109_v6, %v11006_v22  ;;  %v3968_v24 = vadd.f32 %v11008_v47, %v11007_v37  ;;  %v4113_v31 = vpop.permute.xlu0 %4112  ;;  %v11012_v10 = vld [vmem:[#allocation17_spill] sm:$0xff]  ;;  %v11014_v52 = vld [vmem:[#allocation70_spill] sm:$0xff] }
 0x586   : > { %v4158_v21 = vadd.f32 %v4142_v15, %v4062_v40  ;;  %v4048_v16 = vmul.f32 %v4001_v26, %v10844_v44  ;;  %v9239_v54 = vsel %vm3237_vm12, 1.0, %v10901_v0  ;;  %v3127_v57 = vadd.f32 %v3111_v41, %v11009_v33  ;;  %v11015_v26 = vld [vmem:[#allocation21_spill] sm:$0xff] }
 0x587   : > { %v9242_v53 = vmax.f32 %v2332_v42, %v4456_v63  ;;  %v2334_v5 = vmax.f32 %v11010_v25, %v4426_v30  ;;  %v4428_v55 = vsel %vm2288_vm13, 1.0, %v10901_v0  ;;  %v4144_v43 = vmul.f32 %v9109_v6, %v4097_v29  ;;  %v4009_v63 = vpop.permute.xlu1 %4008  ;;  %v11013_v30 = vld [vmem:[#allocation56_spill] sm:$0xff]  ;;  %v11017_v37 = vld [vmem:[#allocation209_spill] sm:$0xff]  ;;  %v11018_v25 = vld [vmem:[#allocation191_spill] sm:$0xff] }
 0x588   : > { %vm4174_vm14 = vcmp.ge.f32.partialorder %v4158_v21, 1.0  ;;  %v4064_v39 = vadd.f32 %v4048_v16, %v3968_v24  ;;  %vm2290_vm15 = vcmp.ge.f32.partialorder %v2274_v46, 1.0  ;;  %v2276_v27 = vadd.f32 %v2260_v34, %v11011_v23  ;;  %v11016_v34 = vld [vmem:[#allocation23_spill] sm:$0xff] }
 0x589   : > { %v2262_v15 = vmul.f32 %v9109_v6, %v11012_v10  ;;  %v9251_v40 = vsel %vm4174_vm14, 1.0, %v10901_v0  ;;  %v3970_v50 = vadd.f32 %v11014_v52, %v11013_v30  ;;  %v4050_v29 = vmul.f32 %v4009_v63, %v10844_v44  ;;  %v4121_v10 = vpop.permute.xlu0 %4120  ;;  %v11020_v30 = vld [vmem:[#allocation74_spill] sm:$0xff]  ;;  %v11021_v52 = vld [vmem:[#allocation199_spill] sm:$0xff] }
 0x58a   : > { %v4222_v41 = vmax.f32 %v9242_v53, %v9251_v40  ;;  %v4160_v42 = vadd.f32 %v4144_v43, %v4064_v39  ;;  %v3209_v46 = vmul.f32 %v9109_v6, %v11015_v26  ;;  %v3113_v22 = vmul.f32 %v11016_v34, %v10844_v44  ;;  %v11019_v39 = vld [vmem:[#allocation50_spill] sm:$0xff]  ;;  %v11051_v53 = vld [vmem:[#allocation197_spill] sm:$0xff] }
 0x58b   : > { %v9262_v21 = vmax.f32 %v2334_v5, %v4458_v45  ;;  %v2336_v47 = vmax.f32 %v11017_v37, %v4428_v55  ;;  %v4430_v24 = vsel %vm2290_vm15, 1.0, %v10901_v0  ;;  %v4146_v16 = vmul.f32 %v9109_v6, %v4105_v4  ;;  %v4017_v45 = vpop.permute.xlu1 %4016 }
 0x58c   : > { %vm4176_vm0 = vcmp.ge.f32.partialorder %v4160_v42, 1.0  ;;  %v4066_v33 = vadd.f32 %v4050_v29, %v3970_v50  ;;  %vm2292_vm1 = vcmp.ge.f32.partialorder %v2276_v27, 1.0  ;;  %v2278_v43 = vadd.f32 %v2262_v15, %v11018_v25  ;;  %v11022_v50 = vld [vmem:[#allocation85_spill] sm:$0xff] }
 0x58d   : > { %v2264_v23 = vmul.f32 %v9109_v6, %v11019_v39  ;;  %v9271_v63 = vsel %vm4176_vm0, 1.0, %v10901_v0  ;;  %v3972_v4 = vadd.f32 %v11021_v52, %v11020_v30  ;;  %v4052_v42 = vmul.f32 %v4017_v45, %v10844_v44  ;;  %v11024_v39 = vld [vmem:[#allocation48_spill] sm:$0xff] }
 0x58e   : > { %v4224_v5 = vmax.f32 %v9262_v21, %v9271_v63  ;;  %v4162_v55 = vadd.f32 %v4146_v16, %v4066_v33  ;;  %v3223_v27 = vadd.f32 %v3207_v7, %v3127_v57  ;;  %v1321_v15 = vmul.f32 %v9109_v6, %v11022_v50  ;;  %v11023_v16 = vld [vmem:[#allocation205_spill] sm:$0xff] }
 0x58f   : > { %v9280_v29 = vmax.f32 %v2336_v47, %v4460_v48  ;;  %v2338_v26 = vmax.f32 %v8990_v35, %v4430_v24  ;;  %v4432_v34 = vsel %vm2292_vm1, 1.0, %v10901_v0  ;;  %v4148_v37 = vmul.f32 %v9109_v6, %v4113_v31  ;;  %v4025_v57 = vpop.permute.xlu1 %4024  ;;  %v11025_v35 = vld [vmem:[#allocation198_spill] sm:$0xff]  ;;  %v11026_v24 = vld [vmem:[#allocation59_spill] sm:$0xff] }
 0x590   : > { %vm4178_vm2 = vcmp.ge.f32.partialorder %v4162_v55, 1.0  ;;  %v4068_v25 = vadd.f32 %v4052_v42, %v3972_v4  ;;  %v3129_v33 = vadd.f32 %v3113_v22, %v11023_v16  ;;  %vm2294_vm3 = vcmp.ge.f32.partialorder %v2278_v43, 1.0  ;;  %v11027_v55 = vld [vmem:[#allocation189_spill] sm:$0xff] }
 0x591   : > { %v2280_v30 = vadd.f32 %v2264_v23, %v11024_v39  ;;  %v9288_v7 = vsel %vm4178_vm2, 1.0, %v10901_v0  ;;  %v3974_v45 = vadd.f32 %v11026_v24, %v11025_v35  ;;  %v4054_v31 = vmul.f32 %v4025_v57, %v10844_v44  ;;  %v4129_v23 = vpop.permute.xlu0 %4128  ;;  %v11030_v39 = vld [vmem:[#allocation72_spill] sm:$0xff] }
 0x592   : > { %v4226_v48 = vmax.f32 %v9280_v29, %v9288_v7  ;;  %v4164_v47 = vadd.f32 %v4148_v37, %v4068_v25  ;;  %vm3239_vm4 = vcmp.ge.f32.partialorder %v3223_v27, 1.0  ;;  %v1337_v52 = vadd.f32 %v1321_v15, %v11027_v55  ;;  %v11028_v25 = vld [vmem:[#allocation55_spill] sm:$0xff] }
 0x593   : > { %v9297_v22 = vmax.f32 %v2338_v26, %v9228_v2  ;;  %v2340_v43 = vmax.f32 %v9016_v17, %v4432_v34  ;;  %v4434_v4 = vsel %vm2294_vm3, 1.0, %v10901_v0  ;;  %v4150_v42 = vmul.f32 %v9109_v6, %v4121_v10  ;;  %v4033_v2 = vpop.permute.xlu1 %4032  ;;  %v11029_v34 = vld [vmem:[#allocation58_spill] sm:$0xff] }
 0x594   : > { %vm4180_vm5 = vcmp.ge.f32.partialorder %v4164_v47, 1.0  ;;  %v4070_v50 = vadd.f32 %v4054_v31, %v3974_v45  ;;  %v3225_v37 = vadd.f32 %v3209_v46, %v3129_v33  ;;  %vm2296_vm6 = vcmp.ge.f32.partialorder %v2280_v30, 1.0  ;;  %v11031_v45 = vld [vmem:[#allocation87_spill] sm:$0xff] }
 0x595   : > { %v3195_v16 = vmul.f32 %v9109_v6, %v11028_v25  ;;  %v9305_v15 = vsel %vm4180_vm5, 1.0, %v10901_v0  ;;  %v3976_v57 = vadd.f32 %v11030_v39, %v11029_v34  ;;  %v4056_v10 = vmul.f32 %v4033_v2, %v10844_v44  ;;  %v11035_v39 = vld [vmem:[#allocation196_spill] sm:$0xff] }
 0x596   : > { %v4228_v17 = vmax.f32 %v9297_v22, %v9305_v15  ;;  %v4166_v26 = vadd.f32 %v4150_v42, %v4070_v50  ;;  %v4466_v46 = vsel %vm3239_vm4, 1.0, %v10901_v0  ;;  %vm1353_vm7 = vcmp.ge.f32.partialorder %v1337_v52, 1.0  ;;  %v11033_v42 = vld [vmem:[#allocation194_spill] sm:$0xff] }
 0x597   : > { %v9315_v33 = vmax.f32 %v2340_v43, %v9239_v54  ;;  %v2342_v30 = vmax.f32 %v9048_v14, %v4434_v4  ;;  %v4436_v47 = vsel %vm2296_vm6, 1.0, %v10901_v0  ;;  %v4152_v35 = vmul.f32 %v9109_v6, %v4129_v23  ;;  %v4137_v54 = vpop.permute.xlu0 %4136  ;;  %v4041_v14 = vpop.permute.xlu1 %4040  ;;  %v11032_v4 = vld [vmem:[#allocation203_spill] sm:$0xff] }
 0x598   : > { %vm4182_vm8 = vcmp.ge.f32.partialorder %v4166_v26, 1.0  ;;  %v4072_v24 = vadd.f32 %v4056_v10, %v3976_v57  ;;  %vm3241_vm9 = vcmp.ge.f32.partialorder %v3225_v37, 1.0  ;;  %v1324_v27 = vmul.f32 %v9109_v6, %v11031_v45  ;;  %v11034_v26 = vld [vmem:[#allocation89_spill] sm:$0xff] }
 0x599   : > { %v3211_v31 = vadd.f32 %v3195_v16, %v9007_v56  ;;  %v9328_v55 = vsel %vm4182_vm8, 1.0, %v10901_v0  ;;  %v3978_v50 = vadd.f32 %v11033_v42, %v11032_v4  ;;  %v4058_v25 = vmul.f32 %v4041_v14, %v10844_v44  ;;  %v11037_v45 = vld [vmem:[#allocation13_spill] sm:$0xff]  ;;  %v11038_v4 = vld [vmem:[#allocation15_spill] sm:$0xff] }
 0x59a   : > { %v4230_v43 = vmax.f32 %v9315_v33, %v9328_v55  ;;  %v4168_v23 = vadd.f32 %v4152_v35, %v4072_v24  ;;  %v4390_v2 = vsel %vm1353_vm7, 1.0, %v10901_v0  ;;  %v1326_v56 = vmul.f32 %v9109_v6, %v11034_v26  ;;  %v11036_v24 = vld [vmem:[#allocation84_spill] sm:$0xff] }
 0x59b   : > { %v9339_v16 = vmax.f32 %v2342_v30, %v4466_v46  ;;  %v2344_v34 = vmax.f32 %v9083_v38, %v4436_v47  ;;  %v3198_v57 = vmul.f32 %v9109_v6, %v11035_v39  ;;  %v4154_v10 = vmul.f32 %v9109_v6, %v4137_v54  ;;  %v11040_v26 = vld [vmem:[#allocation156_spill] sm:$0xff] }
 0x59c   : > { %vm4184_vm10 = vcmp.ge.f32.partialorder %v4168_v23, 1.0  ;;  %v4074_v35 = vadd.f32 %v4058_v25, %v3978_v50  ;;  %v2175_v52 = vadd.f32 %v9187_v61, %v11036_v24  ;;  %v1340_v14 = vadd.f32 %v1324_v27, %v11037_v45 }
 0x59d   : > { %vm3227_vm11 = vcmp.ge.f32.partialorder %v3211_v31, 1.0  ;;  %v9350_v46 = vsel %vm4184_vm10, 1.0, %v10901_v0  ;;  %vm3228_vm12 = vcmp.ge.f32.partialorder %v9195_v62, 1.0  ;;  %v4468_v38 = vsel %vm3241_vm9, 1.0, %v10901_v0  ;;  %v4081_v54 = vpop.permute.xlu1 %4080 }
 0x59e   : > { %v4232_v30 = vmax.f32 %v9339_v16, %v9350_v46  ;;  %v4170_v47 = vadd.f32 %v4154_v10, %v4074_v35  ;;  %v2330_v23 = vmax.f32 %v4390_v2, %v9125_v12  ;;  %v1342_v61 = vadd.f32 %v1326_v56, %v11038_v4  ;;  %v11039_v12 = vld [vmem:[#allocation80_spill] sm:$0xff] }
 0x59f   : > { %v4045_v27 = vmul.f32 %v9192_v59, %v10844_v44  ;;  %v4140_v31 = vmul.f32 %v9109_v6, %v4081_v54  ;;  %v9367_v37 = vmax.f32 %v2344_v34, %v4468_v38  ;;  %v4454_v42 = vsel %vm3227_vm11, 1.0, %v10901_v0  ;;  %v11043_v54 = vld [vmem:[#allocation176_spill] sm:$0xff] }
 0x5a0   : > { %v3214_v50 = vadd.f32 %v3198_v57, %v9067_v19  ;;  %vm4186_vm13 = vcmp.ge.f32.partialorder %v4170_v47, 1.0  ;;  %vm1356_vm14 = vcmp.ge.f32.partialorder %v1340_v14, 1.0  ;;  %v3200_v25 = vmul.f32 %v9109_v6, %v11039_v12 }
 0x5a1   : > { %v9374_v2 = vsel %vm4186_vm13, 1.0, %v10901_v0  ;;  %v4156_v59 = vadd.f32 %v4140_v31, %v9004_v58  ;;  %vm2285_vm15 = vcmp.ge.f32.partialorder %v9120_v8, 1.0  ;;  %v2271_v56 = vadd.f32 %v11040_v26, %v2175_v52  ;;  %v4085_v39 = vpop.permute.xlu1 %4084  ;;  %v11041_v52 = vld [vmem:[#allocation211_spill] sm:$0xff]  ;;  %v11046_v26 = vld [vmem:[#allocation213_spill] sm:$0xff] }
 0x5a2   : > { %v4455_v34 = vsel %vm3228_vm12, 1.0, %v10901_v0  ;;  %v4234_v19 = vmax.f32 %v9367_v37, %v9374_v2  ;;  %v3275_v57 = vmax.f32 %v2330_v23, %v4454_v42  ;;  %v4061_v10 = vadd.f32 %v4045_v27, %v9022_v3  ;;  %v11042_v3 = vld [vmem:[#allocation441_spill] sm:$0xff]  ;;  %v11044_v23 = vld [vmem:[#allocation162_spill] sm:$0xff] }
 0x5a3   : > { %vm4172_vm0 = vcmp.ge.f32.partialorder %v4156_v59, 1.0  ;;  %v4141_v35 = vmul.f32 %v9109_v6, %v4085_v39  ;;  %v4393_v58 = vsel %vm1356_vm14, 1.0, %v10901_v0  ;;  %vm1358_vm1 = vcmp.ge.f32.partialorder %v1342_v61, 1.0 }
 0x5a4   : > { %vm3230_vm2 = vcmp.ge.f32.partialorder %v3214_v50, 1.0  ;;  %v4486_v24 = vsel %vm4172_vm0, 1.0, %v10901_v0  ;;  %v3216_v62 = vadd.f32 %v3200_v25, %v9102_v9  ;;  %v3202_v45 = vmul.f32 %v9109_v6, %v11041_v52  ;;  %v11050_v50 = vld [vmem:[#allocation442_spill] sm:$0xff] }
 0x5a5   : > { %v4220_v14 = vmax.f32 %v3275_v57, %v4486_v24  ;;  %v4157_v38 = vadd.f32 %v4141_v35, %v4061_v10  ;;  %vm2287_vm3 = vcmp.ge.f32.partialorder %v2271_v56, 1.0  ;;  %v3108_v47 = vmul.f32 %v11042_v3, %v10844_v44  ;;  %v4093_v9 = vpop.permute.xlu1 %4092  ;;  %v11048_v10 = vld [vmem:[#allocation195_spill] sm:$0xff]  ;;  %v11049_v35 = vld [vmem:[#allocation193_spill] sm:$0xff] }
 0x5a6   : > { %v11045_v4 = vmax.f32 %v11043_v54, %v11044_v23  ;;  %v4425_v31 = vsel %vm2285_vm15, 1.0, %v10901_v0  ;;  %v4143_v25 = vmul.f32 %v9109_v6, %v4093_v9  ;;  %v4395_v59 = vsel %vm1358_vm1, 1.0, %v10901_v0 }
 0x5a7   : > { %v2333_v42 = vmax.f32 %v4393_v58, %v4425_v31  ;;  %v4539_v12 = vpack.c.bf16 %v4220_v14, %v4219_v13  ;;  %vm4173_vm4 = vcmp.ge.f32.partialorder %v4157_v38, 1.0  ;;  %v4457_v8 = vsel %vm3230_vm2, 1.0, %v10901_v0  ;;  %v11047_v13 = vld [vmem:[#allocation190_spill] sm:$0xff] }
 0x5a8   : > { %v3276_v27 = vmax.f32 %v11045_v4, %v4455_v34  ;;  %v3204_v34 = vmul.f32 %v9109_v6, %v11046_v26  ;;  %v4487_v39 = vsel %vm4173_vm4, 1.0, %v10901_v0  ;;  %vm3232_vm5 = vcmp.ge.f32.partialorder %v3216_v62, 1.0  ;;  %v11054_v26 = vld [vmem:[#allocation61_spill] sm:$0xff] }
 0x5a9   : > { %v3218_v57 = vadd.f32 %v3202_v45, %v9144_v28  ;;  %4540 = vst [vmem:[%s9403_s9] sm:$0xff] %v4539_v12   ;;  %v4159_v1 = vadd.f32 %v4143_v25, %v9056_v11  ;;  %v2936_v61 = vadd.f32 %v11048_v10, %v11047_v13  ;;  %v3124_v58 = vadd.f32 %v3108_v47, %v11049_v35  ;;  %v4101_v14 = vpop.permute.xlu1 %4100 }
 0x5aa   : > { %v4221_v32 = vmax.f32 %v3276_v27, %v4487_v39  ;;  %v3110_v24 = vmul.f32 %v11050_v50, %v10844_v44  ;;  %v4427_v52 = vsel %vm2287_vm3, 1.0, %v10901_v0  ;;  %v3278_v62 = vmax.f32 %v2333_v42, %v4457_v8  ;;  %v11056_v39 = vld [vmem:[#allocation92_spill] sm:$0xff] }
 0x5ab   : > { %vm4175_vm6 = vcmp.ge.f32.partialorder %v4159_v1, 1.0  ;;  %v4145_v11 = vmul.f32 %v9109_v6, %v4101_v14  ;;  %v2335_v45 = vmax.f32 %v4395_v59, %v4427_v52  ;;  %v4459_v38 = vsel %vm3232_vm5, 1.0, %v10901_v0  ;;  %v11059_v52 = vld [vmem:[#allocation97_spill] sm:$0xff] }
 0x5ac   : > { %v4544_v28 = vpack.c.bf16 %v4222_v41, %v4221_v32  ;;  %v3220_v3 = vadd.f32 %v3204_v34, %v3124_v58  ;;  %v4489_v47 = vsel %vm4175_vm6, 1.0, %v10901_v0  ;;  %vm3234_vm7 = vcmp.ge.f32.partialorder %v3218_v57, 1.0  ;;  %v11052_v41 = vld [vmem:[#allocation443_spill] sm:$0xff]  ;;  %v11055_v34 = vld [vmem:[#allocation93_spill] sm:$0xff] }
 0x5ad   : > { %v3206_v56 = vmul.f32 %v9109_v6, %v9052_v60  ;;  %v4223_v54 = vmax.f32 %v3278_v62, %v4489_v47  ;;  %v4161_v23 = vadd.f32 %v4145_v11, %v9076_v18  ;;  %v3126_v40 = vadd.f32 %v3110_v24, %v11051_v53  ;;  %v4109_v27 = vpop.permute.xlu1 %4108  ;;  %v11053_v60 = vld [vmem:[#allocation49_spill] sm:$0xff]  ;;  %v11058_v24 = vld [vmem:[#allocation135_spill] sm:$0xff] }
 0x5ae   : > { %4576 = vst [vmem:[%s9403_s9 + $0x8] sm:$0xff] %v4544_v28   ;;  %v3112_v4 = vmul.f32 %v11052_v41, %v10844_v44  ;;  %v3280_v31 = vmax.f32 %v2335_v45, %v4459_v38  ;;  %v4147_v42 = vmul.f32 %v9109_v6, %v4109_v27  ;;  %v3032_v12 = vadd.f32 %v11053_v60, %v2936_v61  ;;  %v11061_v38 = vld [vmem:[#allocation200_spill] sm:$0xff]  ;;  %v11064_v53 = vld [vmem:[#allocation137_spill] sm:$0xff] }
 0x5af   : > { %v4549_v9 = vpack.c.bf16 %v4224_v5, %v4223_v54  ;;  %vm4177_vm8 = vcmp.ge.f32.partialorder %v4161_v23, 1.0  ;;  %v4461_v25 = vsel %vm3234_vm7, 1.0, %v10901_v0  ;;  %vm3236_vm9 = vcmp.ge.f32.partialorder %v3220_v3, 1.0  ;;  %v11062_v3 = vld [vmem:[#allocation100_spill] sm:$0xff] }
 0x5b0   : > { %v4491_v18 = vsel %vm4177_vm8, 1.0, %v10901_v0  ;;  %v3222_v59 = vadd.f32 %v3206_v56, %v3126_v40  ;;  %v3208_v44 = vmul.f32 %v9109_v6, %v9087_v49  ;;  %v4163_v21 = vadd.f32 %v4147_v42, %v11054_v26  ;;  %v11065_v40 = vld [vmem:[#allocation104_spill] sm:$0xff] }
 0x5b1   : > { %4577 = vst [vmem:[%s9403_s9 + $0x10] sm:$0xff] %v4549_v9   ;;  %v4225_v8 = vmax.f32 %v3280_v31, %v4491_v18  ;;  %v3128_v63 = vadd.f32 %v3112_v4, %v3032_v12  ;;  %v4117_v5 = vpop.permute.xlu1 %4116  ;;  %v11057_v57 = vmax.f32 %v11055_v34, %v11056_v39  ;;  %v4463_v49 = vsel %vm3236_vm9, 1.0, %v10901_v0 }
 0x5b2   : > { %vm4179_vm10 = vcmp.ge.f32.partialorder %v4163_v21, 1.0  ;;  %v4149_v13 = vmul.f32 %v9109_v6, %v4117_v5  ;;  %vm3238_vm11 = vcmp.ge.f32.partialorder %v3222_v59, 1.0  ;;  %v11060_v14 = vmax.f32 %v11058_v24, %v11059_v52 }
 0x5b3   : > { %v3282_v32 = vmax.f32 %v11057_v57, %v4461_v25  ;;  %v4554_v1 = vpack.c.bf16 %v4226_v48, %v4225_v8  ;;  %v4493_v10 = vsel %vm4179_vm10, 1.0, %v10901_v0  ;;  %v3224_v61 = vadd.f32 %v3208_v44, %v3128_v63 }
 0x5b4   : > { %v4165_v58 = vadd.f32 %v4149_v13, %v9129_v36  ;;  %v3284_v29 = vmax.f32 %v11060_v14, %v4463_v49  ;;  %v4465_v62 = vsel %vm3238_vm11, 1.0, %v10901_v0  ;;  %v11063_v47 = vmax.f32 %v11061_v38, %v11062_v3 }
 0x5b5   : > { %4578 = vst [vmem:[%s9403_s9 + $0x18] sm:$0xff] %v4554_v1   ;;  %v4227_v35 = vmax.f32 %v3282_v32, %v4493_v10  ;;  %v4125_v50 = vpop.permute.xlu1 %4124  ;;  %vm3240_vm13 = vcmp.ge.f32.partialorder %v3224_v61, 1.0  ;;  %v11066_v41 = vmax.f32 %v11064_v53, %v11065_v40 }
 0x5b6   : > { %vm4181_vm12 = vcmp.ge.f32.partialorder %v4165_v58, 1.0  ;;  %v4151_v48 = vmul.f32 %v9109_v6, %v4125_v50  ;;  %v3286_v22 = vmax.f32 %v11063_v47, %v4465_v62  ;;  %v4467_v56 = vsel %vm3240_vm13, 1.0, %v10901_v0 }
 0x5b7   : > { %v4559_v7 = vpack.c.bf16 %v4228_v17, %v4227_v35  ;;  %v4495_v28 = vsel %vm4181_vm12, 1.0, %v10901_v0  ;;  %v3288_v4 = vmax.f32 %v11066_v41, %v4467_v56 }
 0x5b8   : > { %v4229_v36 = vmax.f32 %v3284_v29, %v4495_v28  ;;  %v4167_v11 = vadd.f32 %v4151_v48, %v9155_v20 }
 0x5b9   : > { %4579 = vst [vmem:[%s9403_s9 + $0x20] sm:$0xff] %v4559_v7   ;;  %v4133_v45 = vpop.permute.xlu1 %4132 }
 0x5ba   : > { %v4564_v15 = vpack.c.bf16 %v4230_v43, %v4229_v36  ;;  %vm4183_vm14 = vcmp.ge.f32.partialorder %v4167_v11, 1.0  ;;  %v4153_v17 = vmul.f32 %v9109_v6, %v4133_v45 }
 0x5bb   : > { %v4497_v54 = vsel %vm4183_vm14, 1.0, %v10901_v0 }
 0x5bc   : > { %4580 = vst [vmem:[%s9403_s9 + $0x28] sm:$0xff] %v4564_v15   ;;  %v4231_v23 = vmax.f32 %v3286_v22, %v4497_v54  ;;  %v4169_v20 = vadd.f32 %v4153_v17, %v9175_v51 }
 0x5be   : > { %v4569_v33 = vpack.c.bf16 %v4232_v30, %v4231_v23  ;;  %vm4185_vm15 = vcmp.ge.f32.partialorder %v4169_v20, 1.0 }
 0x5bf   : > { %v4499_v55 = vsel %vm4185_vm15, 1.0, %v10901_v0 }
 0x5c0   : > { %4581 = vst [vmem:[%s9403_s9 + $0x30] sm:$0xff] %v4569_v33   ;;  %v4233_v6 = vmax.f32 %v3288_v4, %v4499_v55 }
 0x5c2   : > { %v4574_v43 = vpack.c.bf16 %v4234_v19, %v4233_v6 }
 0x5c4   : > { %4582 = vst [vmem:[%s9403_s9 + $0x38] sm:$0xff] %v4574_v43  }
 0x5c5 PF: > { %p9_p9 = scmp.ge.s32.totalorder %s4814_s13, 6   ;;  %s11067_s9 = smov %s4766_s10 }
 0x5c6   : > { %s11068_s10 = smov %s4823_s16  ;;  %s11069_s11 = smov %s4814_s13 }
 0x5c7   :  { %11 = sbr.rel (!%p9_p9) target bundleno = 2 (0x2), region = 104 }

// kernel: snn_forward.4
= control target key start
LH: loop header
LB: loop body
LE: loop exit
PB: predicated region body
PF: predicated region fallthrough
CT: control target
= control target key end

     0   :  { %vm140_vm0 = vcmask 1044480   ;;  %vm115_vm1 = vcmask 736256   ;;  %v1571_v61 = vmov 0.0   ;;  %s1995_s1 = inlined_call_operand.vmem [shape: bf16[90,128], index: 1, kind: input, shape index: {}]   ;;  %s1996_s0 = inlined_call_operand.vmem [shape: bf16[4,128,90], index: 0, kind: input, shape index: {}]   ;;  %s1997_s2 = inlined_call_operand.vmem [shape: bf16[128,128], index: 2, kind: output, shape index: {}]  }
   0x1   :  { %v1533_v0 = vld [vmem:[%s1995_s1 + $0x28] sm:$0x1f]   ;;  %v1534_v1 = vld [vmem:[%s1995_s1 + $0x20] sm:$0xff]   ;;  %v1535_v3 = vld [vmem:[%s1995_s1 + $0x18] sm:$0xff]  }
   0x2   :  { %1528 = vmatprep.subr.msk.bf16.mxu0 %vm140_vm0, %v1533_v0  ;;  %1529 = vmatprep.subr.msk.bf16.mxu1 %vm140_vm0, %v1533_v0  ;;  %v142_v2 = vsel %vm140_vm0, %v1533_v0, 0  ;;  %v1539_v4 = vld [vmem:[%s1996_s0] sm:$0xff]   ;;  %v1536_v6 = vld [vmem:[%s1995_s1 + $0x10] sm:$0xff]   ;;  %v1537_v7 = vld [vmem:[%s1995_s1 + $0x8] sm:$0xff]  }
   0x3   :  { %1417 = vmatpush3.bf16.msra.mxu0 %v142_v2  ;;  %1445 = vmatpush3.bf16.msra.mxu1 %v142_v2  ;;  %v1540_v5 = vld [vmem:[%s1996_s0 + $0x40] sm:$0xff]   ;;  %v1541_v9 = vld [vmem:[%s1996_s0 + $0x8] sm:$0xff]   ;;  %v1543_v11 = vld [vmem:[%s1996_s0 + $0x10] sm:$0xff]  }
   0x4   :  { %1418 = vmatprep.subr.bf16.mxu0 %v1534_v1  ;;  %1446 = vmatprep.subr.bf16.mxu1 %v1534_v1  ;;  %v1538_v8 = vld [vmem:[%s1995_s1] sm:$0xff]   ;;  %v1542_v10 = vld [vmem:[%s1996_s0 + $0x48] sm:$0xff]   ;;  %v1544_v12 = vld [vmem:[%s1996_s0 + $0x50] sm:$0xff]  }
   0x5   :  { %1428 = vmatprep.mubr.msk.bf16.mxu0 %vm115_vm1, %v1539_v4  ;;  %1456 = vmatprep.mubr.msk.bf16.mxu1 %vm115_vm1, %v1540_v5  ;;  %v1545_v13 = vld [vmem:[%s1996_s0 + $0x18] sm:$0xff]   ;;  %v1547_v15 = vld [vmem:[%s1996_s0 + $0x20] sm:$0xff]   ;;  %v1549_v17 = vld [vmem:[%s1996_s0 + $0x28] sm:$0xff]  }
   0x6   :  { %v1546_v14 = vld [vmem:[%s1996_s0 + $0x58] sm:$0xff]   ;;  %v1548_v16 = vld [vmem:[%s1996_s0 + $0x60] sm:$0xff]   ;;  %v1550_v18 = vld [vmem:[%s1996_s0 + $0x68] sm:$0xff]  }
   0x7   :  { %1419 = vmatpush3.bf16.msra.mxu0 %v1534_v1  ;;  %1447 = vmatpush3.bf16.msra.mxu1 %v1534_v1  ;;  %v1551_v19 = vld [vmem:[%s1996_s0 + $0x30] sm:$0xff]   ;;  %v1553_v21 = vld [vmem:[%s1996_s0 + $0x38] sm:$0xff]   ;;  %v1555_v23 = vld [vmem:[%s1996_s0 + $0x80] sm:$0xff]  }
   0x8   :  { %1420 = vmatprep.subr.bf16.mxu0 %v1535_v3  ;;  %1448 = vmatprep.subr.bf16.mxu1 %v1535_v3  ;;  %v1552_v20 = vld [vmem:[%s1996_s0 + $0x70] sm:$0xff]   ;;  %v1554_v22 = vld [vmem:[%s1996_s0 + $0x78] sm:$0xff]   ;;  %v1556_v24 = vld [vmem:[%s1996_s0 + $0xc0] sm:$0xff]  }
   0x9   :  { %v1557_v25 = vld [vmem:[%s1996_s0 + $0x88] sm:$0xff]   ;;  %v1559_v27 = vld [vmem:[%s1996_s0 + $0x90] sm:$0xff]   ;;  %v1561_v29 = vld [vmem:[%s1996_s0 + $0x98] sm:$0xff]  }
   0xa   :  { %v1558_v26 = vld [vmem:[%s1996_s0 + $0xc8] sm:$0xff]   ;;  %v1560_v28 = vld [vmem:[%s1996_s0 + $0xd0] sm:$0xff]   ;;  %v1562_v30 = vld [vmem:[%s1996_s0 + $0xd8] sm:$0xff]  }
   0xb   :  { %1421 = vmatpush3.bf16.msra.mxu0 %v1535_v3  ;;  %1449 = vmatpush3.bf16.msra.mxu1 %v1535_v3  ;;  %v1563_v31 = vld [vmem:[%s1996_s0 + $0xa0] sm:$0xff]   ;;  %v1565_v33 = vld [vmem:[%s1996_s0 + $0xa8] sm:$0xff]   ;;  %v1567_v35 = vld [vmem:[%s1996_s0 + $0xb0] sm:$0xff]  }
   0xc   :  { %1422 = vmatprep.subr.bf16.mxu0 %v1536_v6  ;;  %1450 = vmatprep.subr.bf16.mxu1 %v1536_v6  ;;  %v1564_v32 = vld [vmem:[%s1996_s0 + $0xe0] sm:$0xff]   ;;  %v1566_v34 = vld [vmem:[%s1996_s0 + $0xe8] sm:$0xff]   ;;  %v1568_v36 = vld [vmem:[%s1996_s0 + $0xf0] sm:$0xff]  }
   0xd   :  { %v1569_v37 = vld [vmem:[%s1996_s0 + $0xb8] sm:$0xff]  }
   0xe   :  { %v1570_v38 = vld [vmem:[%s1996_s0 + $0xf8] sm:$0xff]  }
   0xf   :  { %1423 = vmatpush3.bf16.msra.mxu0 %v1536_v6  ;;  %1451 = vmatpush3.bf16.msra.mxu1 %v1536_v6 }
  0x10   :  { %1424 = vmatprep.subr.bf16.mxu0 %v1537_v7  ;;  %1452 = vmatprep.subr.bf16.mxu1 %v1537_v7 }
  0x13   :  { %1425 = vmatpush3.bf16.msra.mxu0 %v1537_v7  ;;  %1453 = vmatpush3.bf16.msra.mxu1 %v1537_v7 }
  0x14   :  { %1426 = vmatprep.subr.bf16.mxu0 %v1538_v8  ;;  %1454 = vmatprep.subr.bf16.mxu1 %v1538_v8 }
  0x17   :  { %1427 = vmatpush3.bf16.msra.mxu0 %v1538_v8  ;;  %1455 = vmatpush3.bf16.msra.mxu1 %v1538_v8 }
  0x18   :  { %1530 = vmatprep.subr.msk.bf16.mxu0 %vm140_vm0, %v1533_v0  ;;  %1531 = vmatprep.subr.msk.bf16.mxu1 %vm140_vm0, %v1533_v0 }
  0x1a   :  { %1429 = vmatmul.mubr.msk.bf16.vlgmr.msra.gmra.mxu0 %vm115_vm1, %v1541_v9  ;;  %1457 = vmatmul.mubr.msk.bf16.vlgmr.msra.gmra.mxu1 %vm115_vm1, %v1542_v10 }
  0x1b   :  { %1473 = vmatpush3.bf16.msra.mxu0 %v142_v2  ;;  %1501 = vmatpush3.bf16.msra.mxu1 %v142_v2 }
  0x1c   :  { %1474 = vmatprep.subr.bf16.mxu0 %v1534_v1  ;;  %1432 = vmatprep.mubr.msk.bf16.mxu0 %vm115_vm1, %v1543_v11 }
  0x1d   :  { %1460 = vmatprep.mubr.msk.bf16.mxu1 %vm115_vm1, %v1544_v12  ;;  %1502 = vmatprep.subr.bf16.mxu1 %v1534_v1 }
  0x1f   :  { %1475 = vmatpush3.bf16.msra.mxu0 %v1534_v1  ;;  %1503 = vmatpush3.bf16.msra.mxu1 %v1534_v1 }
  0x20   :  { %1476 = vmatprep.subr.bf16.mxu0 %v1535_v3  ;;  %1504 = vmatprep.subr.bf16.mxu1 %v1535_v3 }
  0x22   :  { %1433 = vmatmul.mubr.msk.bf16.gmra.mxu0 %vm115_vm1, %v1545_v13  ;;  %1461 = vmatmul.mubr.msk.bf16.gmra.mxu1 %vm115_vm1, %v1546_v14 }
  0x23   :  { %1477 = vmatpush3.bf16.msra.mxu0 %v1535_v3  ;;  %1505 = vmatpush3.bf16.msra.mxu1 %v1535_v3 }
  0x24   :  { %1436 = vmatprep.mubr.msk.bf16.mxu0 %vm115_vm1, %v1547_v15  ;;  %1464 = vmatprep.mubr.msk.bf16.mxu1 %vm115_vm1, %v1548_v16 }
  0x25   :  { %1478 = vmatprep.subr.bf16.mxu0 %v1536_v6  ;;  %1506 = vmatprep.subr.bf16.mxu1 %v1536_v6 }
  0x27   :  { %1479 = vmatpush3.bf16.msra.mxu0 %v1536_v6  ;;  %1507 = vmatpush3.bf16.msra.mxu1 %v1536_v6 }
  0x28   :  { %1480 = vmatprep.subr.bf16.mxu0 %v1537_v7  ;;  %1508 = vmatprep.subr.bf16.mxu1 %v1537_v7 }
  0x2a   :  { %1437 = vmatmul.mubr.msk.bf16.gmra.mxu0 %vm115_vm1, %v1549_v17  ;;  %1465 = vmatmul.mubr.msk.bf16.gmra.mxu1 %vm115_vm1, %v1550_v18 }
  0x2b   :  { %1440 = vmatprep.mubr.msk.bf16.mxu0 %vm115_vm1, %v1551_v19  ;;  %1468 = vmatprep.mubr.msk.bf16.mxu1 %vm115_vm1, %v1552_v20 }
  0x2c   :  { %1481 = vmatpush3.bf16.msra.mxu0 %v1537_v7  ;;  %1509 = vmatpush3.bf16.msra.mxu1 %v1537_v7 }
  0x2d   :  { %1482 = vmatprep.subr.bf16.mxu0 %v1538_v8  ;;  %1510 = vmatprep.subr.bf16.mxu1 %v1538_v8 }
  0x30   :  { %1483 = vmatpush3.bf16.msra.mxu0 %v1538_v8  ;;  %1511 = vmatpush3.bf16.msra.mxu1 %v1538_v8 }
  0x32   :  { %1441 = vmatmul.mubr.msk.bf16.gmra.mxu0 %vm115_vm1, %v1553_v21  ;;  %1469 = vmatmul.mubr.msk.bf16.gmra.mxu1 %vm115_vm1, %v1554_v22 }
  0x33   :  { %1484 = vmatprep.mubr.msk.bf16.mxu0 %vm115_vm1, %v1555_v23  ;;  %1512 = vmatprep.mubr.msk.bf16.mxu1 %vm115_vm1, %v1556_v24 }
  0x3a   :  { %1485 = vmatmul.mubr.msk.bf16.vlgmr.msra.gmra.mxu0 %vm115_vm1, %v1557_v25  ;;  %1513 = vmatmul.mubr.msk.bf16.vlgmr.msra.gmra.mxu1 %vm115_vm1, %v1558_v26 }
  0x3b   :  { %1488 = vmatprep.mubr.msk.bf16.mxu0 %vm115_vm1, %v1559_v27  ;;  %1516 = vmatprep.mubr.msk.bf16.mxu1 %vm115_vm1, %v1560_v28 }
  0x42   :  { %1489 = vmatmul.mubr.msk.bf16.gmra.mxu0 %vm115_vm1, %v1561_v29  ;;  %1517 = vmatmul.mubr.msk.bf16.gmra.mxu1 %vm115_vm1, %v1562_v30 }
  0x43   :  { %1492 = vmatprep.mubr.msk.bf16.mxu0 %vm115_vm1, %v1563_v31  ;;  %1520 = vmatprep.mubr.msk.bf16.mxu1 %vm115_vm1, %v1564_v32 }
  0x4a   :  { %1493 = vmatmul.mubr.msk.bf16.gmra.mxu0 %vm115_vm1, %v1565_v33  ;;  %1521 = vmatmul.mubr.msk.bf16.gmra.mxu1 %vm115_vm1, %v1566_v34 }
  0x4b   :  { %1496 = vmatprep.mubr.msk.bf16.mxu0 %vm115_vm1, %v1567_v35  ;;  %1524 = vmatprep.mubr.msk.bf16.mxu1 %vm115_vm1, %v1568_v36 }
  0x52   :  { %1497 = vmatmul.mubr.msk.bf16.gmra.mxu0 %vm115_vm1, %v1569_v37  ;;  %1525 = vmatmul.mubr.msk.bf16.gmra.mxu1 %vm115_vm1, %v1570_v38 }
  0xda   :  { %v1430_v39 = vpop.f32.mrf.mxu0  ;;  %v1458_v40 = vpop.f32.mrf.mxu1 }
  0xdb   :  { %vm243_vm2 = vcmp.ge.f32.partialorder %v1430_v39, 1.0  ;;  %vm469_vm3 = vcmp.ge.f32.partialorder %v1458_v40, 1.0 }
  0xdc   :  { %v178_v41 = vpop.f32.mrf.mxu0  ;;  %v404_v42 = vpop.f32.mrf.mxu1  ;;  %v1743_v62 = vsel %vm243_vm2, 1.0, %v1571_v61  ;;  %v1746_v63 = vsel %vm469_vm3, 1.0, %v1571_v61 }
  0xdd   :  { %vm241_vm4 = vcmp.ge.f32.partialorder %v178_v41, 1.0  ;;  %vm467_vm5 = vcmp.ge.f32.partialorder %v404_v42, 1.0  ;;  %v517_v6 = vmax.f32 %v1743_v62, %v1746_v63 }
  0xde   :  { %v1431_v43 = vpop.f32.mrf.mxu0  ;;  %v1459_v44 = vpop.f32.mrf.mxu1  ;;  %v1749_v0 = vsel %vm241_vm4, 1.0, %v1571_v61  ;;  %v1752_v1 = vsel %vm467_vm5, 1.0, %v1571_v61 }
  0xdf   :  { %vm244_vm6 = vcmp.ge.f32.partialorder %v1431_v43, 1.0  ;;  %vm470_vm7 = vcmp.ge.f32.partialorder %v1459_v44, 1.0  ;;  %v515_v7 = vmax.f32 %v1749_v0, %v1752_v1 }
  0xe0   :  { %v181_v45 = vpop.f32.mrf.mxu0  ;;  %v407_v46 = vpop.f32.mrf.mxu1  ;;  %v1755_v2 = vsel %vm244_vm6, 1.0, %v1571_v61  ;;  %v1758_v3 = vsel %vm470_vm7, 1.0, %v1571_v61 }
  0xe1   :  { %vm242_vm8 = vcmp.ge.f32.partialorder %v181_v45, 1.0  ;;  %vm468_vm9 = vcmp.ge.f32.partialorder %v407_v46, 1.0  ;;  %v518_v10 = vmax.f32 %v1755_v2, %v1758_v3 }
  0xe2   :  { %v1434_v47 = vpop.f32.mrf.mxu0  ;;  %v1462_v48 = vpop.f32.mrf.mxu1  ;;  %v1771_v11 = vsel %vm242_vm8, 1.0, %v1571_v61  ;;  %v1774_v12 = vsel %vm468_vm9, 1.0, %v1571_v61 }
  0xe3   :  { %vm247_vm10 = vcmp.ge.f32.partialorder %v1434_v47, 1.0  ;;  %vm473_vm11 = vcmp.ge.f32.partialorder %v1462_v48, 1.0  ;;  %v516_v23 = vmax.f32 %v1771_v11, %v1774_v12 }
  0xe4   :  { %v194_v49 = vpop.f32.mrf.mxu0  ;;  %v420_v50 = vpop.f32.mrf.mxu1  ;;  %v1781_v15 = vsel %vm247_vm10, 1.0, %v1571_v61  ;;  %v1784_v16 = vsel %vm473_vm11, 1.0, %v1571_v61 }
  0xe5   :  { %vm245_vm12 = vcmp.ge.f32.partialorder %v194_v49, 1.0  ;;  %vm471_vm13 = vcmp.ge.f32.partialorder %v420_v50, 1.0  ;;  %v521_v32 = vmax.f32 %v1781_v15, %v1784_v16 }
  0xe6   :  { %v1435_v51 = vpop.f32.mrf.mxu0  ;;  %v1463_v52 = vpop.f32.mrf.mxu1  ;;  %v1792_v19 = vsel %vm245_vm12, 1.0, %v1571_v61  ;;  %v1796_v20 = vsel %vm471_vm13, 1.0, %v1571_v61 }
  0xe7   :  { %vm248_vm14 = vcmp.ge.f32.partialorder %v1435_v51, 1.0  ;;  %vm474_vm15 = vcmp.ge.f32.partialorder %v1463_v52, 1.0  ;;  %v519_v33 = vmax.f32 %v1792_v19, %v1796_v20 }
  0xe8   :  { %v197_v53 = vpop.f32.mrf.mxu0  ;;  %v423_v54 = vpop.f32.mrf.mxu1  ;;  %v1800_v21 = vsel %vm248_vm14, 1.0, %v1571_v61  ;;  %v1804_v22 = vsel %vm474_vm15, 1.0, %v1571_v61 }
  0xe9   :  { %vm246_vm0 = vcmp.ge.f32.partialorder %v197_v53, 1.0  ;;  %vm472_vm1 = vcmp.ge.f32.partialorder %v423_v54, 1.0  ;;  %v522_v34 = vmax.f32 %v1800_v21, %v1804_v22 }
  0xea   :  { %v1438_v55 = vpop.f32.mrf.mxu0  ;;  %v1466_v56 = vpop.f32.mrf.mxu1  ;;  %v1809_v24 = vsel %vm246_vm0, 1.0, %v1571_v61  ;;  %v1812_v25 = vsel %vm472_vm1, 1.0, %v1571_v61 }
  0xeb   :  { %vm251_vm2 = vcmp.ge.f32.partialorder %v1438_v55, 1.0  ;;  %vm477_vm3 = vcmp.ge.f32.partialorder %v1466_v56, 1.0  ;;  %v520_v37 = vmax.f32 %v1809_v24, %v1812_v25 }
  0xec   :  { %v210_v57 = vpop.f32.mrf.mxu0  ;;  %v436_v58 = vpop.f32.mrf.mxu1  ;;  %v1815_v26 = vsel %vm251_vm2, 1.0, %v1571_v61  ;;  %v1822_v29 = vsel %vm477_vm3, 1.0, %v1571_v61 }
  0xed   :  { %vm249_vm4 = vcmp.ge.f32.partialorder %v210_v57, 1.0  ;;  %vm475_vm5 = vcmp.ge.f32.partialorder %v436_v58, 1.0  ;;  %v525_v38 = vmax.f32 %v1815_v26, %v1822_v29 }
  0xee   :  { %v1738_v59 = vpop.f32.mrf.mxu0  ;;  %v1740_v60 = vpop.f32.mrf.mxu1  ;;  %v1825_v30 = vsel %vm249_vm4, 1.0, %v1571_v61  ;;  %v1828_v31 = vsel %vm475_vm5, 1.0, %v1571_v61 }
  0xef   :  { %vm252_vm6 = vcmp.ge.f32.partialorder %v1738_v59, 1.0  ;;  %vm478_vm7 = vcmp.ge.f32.partialorder %v1740_v60, 1.0  ;;  %v523_v39 = vmax.f32 %v1825_v30, %v1828_v31 }
  0xf0   :  { %v213_v4 = vpop.f32.mrf.mxu0  ;;  %v439_v5 = vpop.f32.mrf.mxu1  ;;  %v1845_v40 = vsel %vm252_vm6, 1.0, %v1571_v61  ;;  %v1849_v44 = vsel %vm478_vm7, 1.0, %v1571_v61 }
  0xf1   :  { %vm250_vm8 = vcmp.ge.f32.partialorder %v213_v4, 1.0  ;;  %vm476_vm9 = vcmp.ge.f32.partialorder %v439_v5, 1.0  ;;  %v526_v11 = vmax.f32 %v1845_v40, %v1849_v44 }
  0xf2   :  { %v1764_v8 = vpop.f32.mrf.mxu0  ;;  %v1766_v9 = vpop.f32.mrf.mxu1  ;;  %v1853_v45 = vsel %vm250_vm8, 1.0, %v1571_v61  ;;  %v1856_v46 = vsel %vm476_vm9, 1.0, %v1571_v61 }
  0xf3   :  { %vm255_vm11 = vcmp.ge.f32.partialorder %v1764_v8, 1.0  ;;  %vm481_vm14 = vcmp.ge.f32.partialorder %v1766_v9, 1.0  ;;  %v524_v12 = vmax.f32 %v1853_v45, %v1856_v46 }
  0xf4   :  { %v1776_v13 = vpop.f32.mrf.mxu0  ;;  %v1778_v14 = vpop.f32.mrf.mxu1  ;;  %v1864_v51 = vsel %vm255_vm11, 1.0, %v1571_v61  ;;  %v1872_v57 = vsel %vm481_vm14, 1.0, %v1571_v61 }
  0xf5   :  { %vm253_vm4 = vcmp.ge.f32.partialorder %v1776_v13, 1.0  ;;  %vm479_vm6 = vcmp.ge.f32.partialorder %v1778_v14, 1.0 }
  0xf6   :  { %v1786_v17 = vpop.f32.mrf.mxu0  ;;  %v1788_v18 = vpop.f32.mrf.mxu1 }
  0xf7   :  { %vm256_vm9 = vcmp.ge.f32.partialorder %v1786_v17, 1.0  ;;  %vm482_vm14 = vcmp.ge.f32.partialorder %v1788_v18, 1.0 }
  0xf8   :  { %v1817_v27 = vpop.f32.mrf.mxu0  ;;  %v1819_v28 = vpop.f32.mrf.mxu1  ;;  %v1936_v24 = vsel %vm482_vm14, 1.0, %v1571_v61 }
  0xfa   :  { %v1486_v35 = vpop.f32.mrf.mxu0  ;;  %v1514_v36 = vpop.f32.mrf.mxu1 }
  0xfb   :  { %vm711_vm10 = vcmp.ge.f32.partialorder %v1486_v35, 1.0  ;;  %vm953_vm12 = vcmp.ge.f32.partialorder %v1514_v36, 1.0 }
  0xfc   :  { %v1219_v41 = vsel %vm711_vm10, 1.0, %v1571_v61  ;;  %v646_v42 = vpop.f32.mrf.mxu0  ;;  %v888_v43 = vpop.f32.mrf.mxu1  ;;  %v1267_v52 = vsel %vm953_vm12, 1.0, %v1571_v61 }
  0xfd   :  { %vm709_vm13 = vcmp.ge.f32.partialorder %v646_v42, 1.0  ;;  %v759_v50 = vmax.f32 %v517_v6, %v1219_v41  ;;  %vm951_vm15 = vcmp.ge.f32.partialorder %v888_v43, 1.0  ;;  %v1894_v42 = vsel %vm253_vm4, 1.0, %v1571_v61 }
  0xfe   :  { %v1217_v47 = vsel %vm709_vm13, 1.0, %v1571_v61  ;;  %v1487_v48 = vpop.f32.mrf.mxu0  ;;  %v1515_v49 = vpop.f32.mrf.mxu1  ;;  %v1265_v59 = vsel %vm951_vm15, 1.0, %v1571_v61  ;;  %v1899_v43 = vsel %vm479_vm6, 1.0, %v1571_v61 }
  0xff   :  { %vm712_vm0 = vcmp.ge.f32.partialorder %v1487_v48, 1.0  ;;  %vm954_vm1 = vcmp.ge.f32.partialorder %v1515_v49, 1.0  ;;  %v757_v53 = vmax.f32 %v515_v7, %v1217_v47  ;;  %v1001_v1 = vmax.f32 %v759_v50, %v1267_v52 }
 0x100   :  { %v1220_v54 = vsel %vm712_vm0, 1.0, %v1571_v61  ;;  %v649_v55 = vpop.f32.mrf.mxu0  ;;  %v891_v56 = vpop.f32.mrf.mxu1  ;;  %v1268_v60 = vsel %vm954_vm1, 1.0, %v1571_v61  ;;  %v527_v45 = vmax.f32 %v1894_v42, %v1899_v43 }
 0x101   :  { %v760_v58 = vmax.f32 %v518_v10, %v1220_v54  ;;  %vm710_vm2 = vcmp.ge.f32.partialorder %v649_v55, 1.0  ;;  %vm952_vm3 = vcmp.ge.f32.partialorder %v891_v56, 1.0  ;;  %v999_v2 = vmax.f32 %v757_v53, %v1265_v59 }
 0x102   :  { %v1218_v62 = vsel %vm710_vm2, 1.0, %v1571_v61  ;;  %v1490_v63 = vpop.f32.mrf.mxu0  ;;  %v1518_v0 = vpop.f32.mrf.mxu1  ;;  %v1266_v3 = vsel %vm952_vm3, 1.0, %v1571_v61  ;;  %vm254_vm3 = vcmp.ge.f32.partialorder %v1817_v27, 1.0 }
 0x103   :  { %v1002_v4 = vmax.f32 %v760_v58, %v1268_v60  ;;  %v758_v5 = vmax.f32 %v516_v23, %v1218_v62  ;;  %vm715_vm5 = vcmp.ge.f32.partialorder %v1490_v63, 1.0  ;;  %vm957_vm7 = vcmp.ge.f32.partialorder %v1518_v0, 1.0 }
 0x104   :  { %v1223_v6 = vsel %vm715_vm5, 1.0, %v1571_v61  ;;  %v662_v7 = vpop.f32.mrf.mxu0  ;;  %v904_v8 = vpop.f32.mrf.mxu1  ;;  %v529_v23 = vmax.f32 %v1864_v51, %v1872_v57  ;;  %v1271_v13 = vsel %vm957_vm7, 1.0, %v1571_v61  ;;  %v1931_v58 = vsel %vm256_vm9, 1.0, %v1571_v61 }
 0x105   :  { %v1321_v9 = vpack.c.bf16 %v1002_v4, %v1001_v1  ;;  %v1000_v10 = vmax.f32 %v758_v5, %v1266_v3  ;;  %vm713_vm8 = vcmp.ge.f32.partialorder %v662_v7, 1.0  ;;  %v763_v44 = vmax.f32 %v521_v32, %v1223_v6 }
 0x106   :  { %v1221_v35 = vsel %vm713_vm8, 1.0, %v1571_v61  ;;  %v1491_v36 = vpop.f32.mrf.mxu0  ;;  %v1519_v41 = vpop.f32.mrf.mxu1  ;;  %vm955_vm12 = vcmp.ge.f32.partialorder %v904_v8, 1.0  ;;  %vm480_vm5 = vcmp.ge.f32.partialorder %v1819_v28, 1.0  ;;  %v530_v46 = vmax.f32 %v1931_v58, %v1936_v24 }
 0x107   :  { %1353 = vst [vmem:[%s1997_s2 + $0x8] sm:$0xff] %v1321_v9   ;;  %v1316_v40 = vpack.c.bf16 %v1000_v10, %v999_v2  ;;  %vm716_vm10 = vcmp.ge.f32.partialorder %v1491_v36, 1.0  ;;  %vm958_vm11 = vcmp.ge.f32.partialorder %v1519_v41, 1.0  ;;  %v761_v14 = vmax.f32 %v519_v33, %v1221_v35 }
 0x108   :  { %v665_v47 = vpop.f32.mrf.mxu0  ;;  %v907_v48 = vpop.f32.mrf.mxu1  ;;  %v1224_v15 = vsel %vm716_vm10, 1.0, %v1571_v61  ;;  %v1005_v52 = vmax.f32 %v763_v44, %v1271_v13  ;;  %v1272_v53 = vsel %vm958_vm11, 1.0, %v1571_v61  ;;  %v1269_v20 = vsel %vm955_vm12, 1.0, %v1571_v61 }
 0x109   :  { %1317 = vst [vmem:[%s1997_s2] sm:$0xff] %v1316_v40   ;;  %vm714_vm13 = vcmp.ge.f32.partialorder %v665_v47, 1.0  ;;  %v764_v16 = vmax.f32 %v522_v34, %v1224_v15  ;;  %vm956_vm15 = vcmp.ge.f32.partialorder %v907_v48, 1.0  ;;  %v1003_v55 = vmax.f32 %v761_v14, %v1269_v20 }
 0x10a   :  { %v1222_v32 = vsel %vm714_vm13, 1.0, %v1571_v61  ;;  %v1494_v49 = vpop.f32.mrf.mxu0  ;;  %v1522_v50 = vpop.f32.mrf.mxu1  ;;  %v1270_v54 = vsel %vm956_vm15, 1.0, %v1571_v61  ;;  %v1182_v31 = vsel %vm480_vm5, 1.0, %v1571_v61 }
 0x10b   :  { %v762_v19 = vmax.f32 %v520_v37, %v1222_v32  ;;  %vm719_vm0 = vcmp.ge.f32.partialorder %v1494_v49, 1.0  ;;  %v1006_v33 = vmax.f32 %v764_v16, %v1272_v53  ;;  %vm961_vm1 = vcmp.ge.f32.partialorder %v1522_v50, 1.0 }
 0x10c   :  { %v1227_v21 = vsel %vm719_vm0, 1.0, %v1571_v61  ;;  %v678_v22 = vpop.f32.mrf.mxu0  ;;  %v920_v34 = vpop.f32.mrf.mxu1  ;;  %v1275_v17 = vsel %vm961_vm1, 1.0, %v1571_v61 }
 0x10d   :  { %v1004_v56 = vmax.f32 %v762_v19, %v1270_v54  ;;  %vm717_vm2 = vcmp.ge.f32.partialorder %v678_v22, 1.0  ;;  %v1331_v25 = vpack.c.bf16 %v1006_v33, %v1005_v52  ;;  %v767_v63 = vmax.f32 %v525_v38, %v1227_v21 }
 0x10e   :  { %v1225_v37 = vsel %vm717_vm2, 1.0, %v1571_v61  ;;  %v1495_v59 = vpop.f32.mrf.mxu0  ;;  %v1523_v60 = vpop.f32.mrf.mxu1  ;;  %vm959_vm7 = vcmp.ge.f32.partialorder %v920_v34, 1.0  ;;  %v1134_v38 = vsel %vm254_vm3, 1.0, %v1571_v61 }
 0x10f   :  { %v1326_v62 = vpack.c.bf16 %v1004_v56, %v1003_v55  ;;  %vm720_vm4 = vcmp.ge.f32.partialorder %v1495_v59, 1.0  ;;  %1355 = vst [vmem:[%s1997_s2 + $0x18] sm:$0xff] %v1331_v25   ;;  %vm962_vm6 = vcmp.ge.f32.partialorder %v1523_v60, 1.0  ;;  %v765_v26 = vmax.f32 %v523_v39, %v1225_v37 }
 0x110   :  { %v1228_v18 = vsel %vm720_vm4, 1.0, %v1571_v61  ;;  %v681_v0 = vpop.f32.mrf.mxu0  ;;  %v923_v1 = vpop.f32.mrf.mxu1  ;;  %v1276_v4 = vsel %vm962_vm6, 1.0, %v1571_v61  ;;  %v1009_v6 = vmax.f32 %v767_v63, %v1275_v17  ;;  %v1273_v27 = vsel %vm959_vm7, 1.0, %v1571_v61 }
 0x111   :  { %1354 = vst [vmem:[%s1997_s2 + $0x10] sm:$0xff] %v1326_v62   ;;  %v768_v29 = vmax.f32 %v526_v11, %v1228_v18  ;;  %vm718_vm8 = vcmp.ge.f32.partialorder %v681_v0, 1.0  ;;  %vm960_vm9 = vcmp.ge.f32.partialorder %v923_v1, 1.0  ;;  %v1007_v11 = vmax.f32 %v765_v26, %v1273_v27 }
 0x112   :  { %v1226_v5 = vsel %vm718_vm8, 1.0, %v1571_v61  ;;  %v1498_v2 = vpop.f32.mrf.mxu0  ;;  %v1526_v3 = vpop.f32.mrf.mxu1  ;;  %v1274_v39 = vsel %vm960_vm9, 1.0, %v1571_v61  ;;  %v528_v41 = vmax.f32 %v1134_v38, %v1182_v31 }
 0x113   :  { %v1010_v7 = vmax.f32 %v768_v29, %v1276_v4  ;;  %v766_v30 = vmax.f32 %v524_v12, %v1226_v5  ;;  %vm723_vm10 = vcmp.ge.f32.partialorder %v1498_v2, 1.0  ;;  %vm965_vm11 = vcmp.ge.f32.partialorder %v1526_v3, 1.0 }
 0x114   :  { %v1231_v8 = vsel %vm723_vm10, 1.0, %v1571_v61  ;;  %v694_v9 = vpop.f32.mrf.mxu0  ;;  %v936_v10 = vpop.f32.mrf.mxu1  ;;  %v1279_v42 = vsel %vm965_vm11, 1.0, %v1571_v61 }
 0x115   :  { %v1341_v35 = vpack.c.bf16 %v1010_v7, %v1009_v6  ;;  %v1008_v36 = vmax.f32 %v766_v30, %v1274_v39  ;;  %vm721_vm12 = vcmp.ge.f32.partialorder %v694_v9, 1.0  ;;  %v771_v44 = vmax.f32 %v529_v23, %v1231_v8 }
 0x116   :  { %v1499_v28 = vpop.f32.mrf.mxu0  ;;  %v1527_v12 = vpop.f32.mrf.mxu1  ;;  %v1229_v13 = vsel %vm721_vm12, 1.0, %v1571_v61  ;;  %vm963_vm13 = vcmp.ge.f32.partialorder %v936_v10, 1.0 }
 0x117   :  { %1357 = vst [vmem:[%s1997_s2 + $0x28] sm:$0xff] %v1341_v35   ;;  %v1336_v40 = vpack.c.bf16 %v1008_v36, %v1007_v11  ;;  %vm724_vm14 = vcmp.ge.f32.partialorder %v1499_v28, 1.0  ;;  %vm966_vm15 = vcmp.ge.f32.partialorder %v1527_v12, 1.0  ;;  %v769_v48 = vmax.f32 %v527_v45, %v1229_v13 }
 0x118   :  { %v697_v43 = vpop.f32.mrf.mxu0  ;;  %v939_v47 = vpop.f32.mrf.mxu1  ;;  %v1232_v14 = vsel %vm724_vm14, 1.0, %v1571_v61  ;;  %v1280_v23 = vsel %vm966_vm15, 1.0, %v1571_v61  ;;  %v1013_v16 = vmax.f32 %v771_v44, %v1279_v42  ;;  %v1277_v32 = vsel %vm963_vm13, 1.0, %v1571_v61 }
 0x119   :  { %1356 = vst [vmem:[%s1997_s2 + $0x20] sm:$0xff] %v1336_v40   ;;  %vm722_vm0 = vcmp.ge.f32.partialorder %v697_v43, 1.0  ;;  %vm964_vm1 = vcmp.ge.f32.partialorder %v939_v47, 1.0  ;;  %v772_v51 = vmax.f32 %v530_v46, %v1232_v14  ;;  %v1011_v52 = vmax.f32 %v769_v48, %v1277_v32 }
 0x11a   :  { %v1230_v57 = vsel %vm722_vm0, 1.0, %v1571_v61  ;;  %v1278_v50 = vsel %vm964_vm1, 1.0, %v1571_v61 }
 0x11b   :  { %v770_v15 = vmax.f32 %v528_v41, %v1230_v57  ;;  %v1014_v49 = vmax.f32 %v772_v51, %v1280_v23 }
 0x11d   :  { %v1012_v53 = vmax.f32 %v770_v15, %v1278_v50  ;;  %v1351_v19 = vpack.c.bf16 %v1014_v49, %v1013_v16 }
 0x11f   :  { %v1346_v20 = vpack.c.bf16 %v1012_v53, %v1011_v52  ;;  %1359 = vst [vmem:[%s1997_s2 + $0x38] sm:$0xff] %v1351_v19  }
 0x121   :  { %1358 = vst [vmem:[%s1997_s2 + $0x30] sm:$0xff] %v1346_v20  }

// kernel: snn_forward.5
= control target key start
LH: loop header
LB: loop body
LE: loop exit
PB: predicated region body
PF: predicated region fallthrough
CT: control target
= control target key end

     0   :  { %vm6496_vm0 = vmmov 0   ;;  %s8204_s1 = inlined_call_operand.vmem [shape: bf16[6272,128], index: 1, kind: input, shape index: {}]   ;;  %s8205_s0 = inlined_call_operand.vmem [shape: bf16[16,6272], index: 0, kind: input, shape index: {}]   ;;  %s8206_s2 = inlined_call_operand.vmem [shape: bf16[128,128], index: 2, kind: input, shape index: {}]   ;;  %s8207_s3 = inlined_call_operand.vmem [shape: f32[16,128], index: 3, kind: output, shape index: {}]  }
   0x1   :  { %v6014_v0 = vld [vmem:[%s8204_s1 + $0x78] sm:$0xff]   ;;  %v6018_v4 = vld [vmem:[%s8204_s1 + $0x70] sm:$0xff]   ;;  %v6022_v8 = vld [vmem:[%s8204_s1 + $0x68] sm:$0xff]  }
   0x2   :  { %v6015_v1 = vld [vmem:[%s8204_s1 + $0xf8] sm:$0xff]   ;;  %5338 = vmatprep.subr.bf16.mxu0 %v6014_v0  ;;  %v6019_v5 = vld [vmem:[%s8204_s1 + $0xf0] sm:$0xff]   ;;  %v6023_v9 = vld [vmem:[%s8204_s1 + $0xe8] sm:$0xff]  }
   0x3   :  { %v6016_v2 = vld [vmem:[%s8204_s1 + $0x38] sm:$0xff]   ;;  %5360 = vmatprep.subr.bf16.mxu1 %v6015_v1  ;;  %v6020_v6 = vld [vmem:[%s8204_s1 + $0x30] sm:$0xff]   ;;  %v6024_v10 = vld [vmem:[%s8204_s1 + $0x28] sm:$0xff]  }
   0x4   :  { %v6017_v3 = vld [vmem:[%s8204_s1 + $0xb8] sm:$0xff]   ;;  %5339 = vmatpush3.bf16.msra.mxu0 %v6016_v2  ;;  %v6021_v7 = vld [vmem:[%s8204_s1 + $0xb0] sm:$0xff]   ;;  %v6025_v11 = vld [vmem:[%s8204_s1 + $0xa8] sm:$0xff]  }
   0x5   :  { %5361 = vmatpush3.bf16.msra.mxu1 %v6017_v3  ;;  %5340 = vmatprep.subr.bf16.mxu0 %v6018_v4  ;;  %v6026_v12 = vld [vmem:[%s8204_s1 + $0x60] sm:$0xff]   ;;  %v6030_v16 = vld [vmem:[%s8204_s1 + $0x58] sm:$0xff]   ;;  %v6034_v20 = vld [vmem:[%s8204_s1 + $0x50] sm:$0xff]  }
   0x6   :  { %5362 = vmatprep.subr.bf16.mxu1 %v6019_v5  ;;  %v6027_v13 = vld [vmem:[%s8204_s1 + $0xe0] sm:$0xff]   ;;  %v6031_v17 = vld [vmem:[%s8204_s1 + $0xd8] sm:$0xff]   ;;  %v6035_v21 = vld [vmem:[%s8204_s1 + $0xd0] sm:$0xff]  }
   0x7   :  { %v6028_v14 = vld [vmem:[%s8204_s1 + $0x20] sm:$0xff]   ;;  %v6032_v18 = vld [vmem:[%s8204_s1 + $0x18] sm:$0xff]   ;;  %v6036_v22 = vld [vmem:[%s8204_s1 + $0x10] sm:$0xff]  }
   0x8   :  { %5341 = vmatpush3.bf16.msra.mxu0 %v6020_v6  ;;  %v6029_v15 = vld [vmem:[%s8204_s1 + $0xa0] sm:$0xff]   ;;  %v6033_v19 = vld [vmem:[%s8204_s1 + $0x98] sm:$0xff]   ;;  %v6037_v23 = vld [vmem:[%s8204_s1 + $0x90] sm:$0xff]  }
   0x9   :  { %5363 = vmatpush3.bf16.msra.mxu1 %v6021_v7  ;;  %5342 = vmatprep.subr.bf16.mxu0 %v6022_v8  ;;  %v6038_v24 = vld [vmem:[%s8204_s1 + $0x48] sm:$0xff]   ;;  %v6042_v28 = vld [vmem:[%s8204_s1 + $0x40] sm:$0xff]   ;;  %v6052_v36 = vld [vmem:[%s8204_s1 + $0x178] sm:$0xff]  }
   0xa   :  { %5364 = vmatprep.subr.bf16.mxu1 %v6023_v9  ;;  %v6039_v25 = vld [vmem:[%s8204_s1 + $0xc8] sm:$0xff]   ;;  %v6043_v29 = vld [vmem:[%s8204_s1 + $0xc0] sm:$0xff]   ;;  %v6053_v37 = vld [vmem:[%s8204_s1 + $0x138] sm:$0xff]  }
   0xb   :  { %v6040_v26 = vld [vmem:[%s8204_s1 + $0x8] sm:$0xff]   ;;  %v6044_v30 = vld [vmem:[%s8204_s1] sm:$0xff]   ;;  %v6054_v38 = vld [vmem:[%s8204_s1 + $0x1f8] sm:$0xff]  }
   0xc   :  { %5343 = vmatpush3.bf16.msra.mxu0 %v6024_v10  ;;  %v6041_v27 = vld [vmem:[%s8204_s1 + $0x88] sm:$0xff]   ;;  %v6045_v31 = vld [vmem:[%s8204_s1 + $0x80] sm:$0xff]   ;;  %v6055_v39 = vld [vmem:[%s8204_s1 + $0x1b8] sm:$0xff]  }
   0xd   :  { %5365 = vmatpush3.bf16.msra.mxu1 %v6025_v11  ;;  %5344 = vmatprep.subr.bf16.mxu0 %v6026_v12  ;;  %v6046_v32 = vld [vmem:[%s8205_s0] ss:$196 sps:$4 sm:$0xff]   ;;  %v6049_v34 = vld [vmem:[%s8205_s0 + $0x8] ss:$196 sps:$4 sm:$0xff]   ;;  %v6056_v40 = vld [vmem:[%s8204_s1 + $0x170] sm:$0xff]  }
   0xe   :  { %5366 = vmatprep.subr.bf16.mxu1 %v6027_v13  ;;  %v6048_v33 = vld [vmem:[%s8205_s0 + $0x4] ss:$196 sps:$4 sm:$0xff]   ;;  %v6051_v35 = vld [vmem:[%s8205_s0 + $0xc] ss:$196 sps:$4 sm:$0xff]   ;;  %v6068_v52 = vld [vmem:[%s8204_s1 + $0x158] sm:$0xff]  }
   0xf   :  { %3495 = vmatprep.mubr.bf16.mxu0 %v6048_v33  ;;  %3536 = vmatprep.mubr.bf16.mxu1 %v6051_v35  ;;  %v6057_v41 = vld [vmem:[%s8204_s1 + $0x130] sm:$0xff]   ;;  %v6060_v44 = vld [vmem:[%s8204_s1 + $0x168] sm:$0xff]   ;;  %v6064_v48 = vld [vmem:[%s8204_s1 + $0x160] sm:$0xff]  }
  0x10   :  { %5345 = vmatpush3.bf16.msra.mxu0 %v6028_v14  ;;  %v6058_v42 = vld [vmem:[%s8204_s1 + $0x1f0] sm:$0xff]   ;;  %v6061_v45 = vld [vmem:[%s8204_s1 + $0x128] sm:$0xff]   ;;  %v6065_v49 = vld [vmem:[%s8204_s1 + $0x120] sm:$0xff]  }
  0x11   :  { %5367 = vmatpush3.bf16.msra.mxu1 %v6029_v15  ;;  %5346 = vmatprep.subr.bf16.mxu0 %v6030_v16  ;;  %v6059_v43 = vld [vmem:[%s8204_s1 + $0x1b0] sm:$0xff]   ;;  %v6062_v46 = vld [vmem:[%s8204_s1 + $0x1e8] sm:$0xff]   ;;  %v6066_v50 = vld [vmem:[%s8204_s1 + $0x1e0] sm:$0xff]  }
  0x12   :  { %5368 = vmatprep.subr.bf16.mxu1 %v6031_v17  ;;  %v6063_v47 = vld [vmem:[%s8204_s1 + $0x1a8] sm:$0xff]   ;;  %v6067_v51 = vld [vmem:[%s8204_s1 + $0x1a0] sm:$0xff]   ;;  %v6069_v53 = vld [vmem:[%s8204_s1 + $0x118] sm:$0xff]  }
  0x13   :  { %v6070_v54 = vld [vmem:[%s8204_s1 + $0x1d8] sm:$0xff]   ;;  %v6072_v56 = vld [vmem:[%s8204_s1 + $0x150] sm:$0xff]   ;;  %v6076_v60 = vld [vmem:[%s8204_s1 + $0x148] sm:$0xff]  }
  0x14   :  { %5347 = vmatpush3.bf16.msra.mxu0 %v6032_v18  ;;  %v6071_v55 = vld [vmem:[%s8204_s1 + $0x198] sm:$0xff]   ;;  %v6073_v57 = vld [vmem:[%s8204_s1 + $0x110] sm:$0xff]   ;;  %v6077_v61 = vld [vmem:[%s8204_s1 + $0x108] sm:$0xff]  }
  0x15   :  { %5369 = vmatpush3.bf16.msra.mxu1 %v6033_v19  ;;  %5348 = vmatprep.subr.bf16.mxu0 %v6034_v20  ;;  %v6074_v58 = vld [vmem:[%s8204_s1 + $0x1d0] sm:$0xff]   ;;  %v6078_v62 = vld [vmem:[%s8204_s1 + $0x1c8] sm:$0xff]   ;;  %v6080_v0 = vld [vmem:[%s8204_s1 + $0x140] sm:$0xff]  }
  0x16   :  { %5370 = vmatprep.subr.bf16.mxu1 %v6035_v21  ;;  %v6075_v59 = vld [vmem:[%s8204_s1 + $0x190] sm:$0xff]   ;;  %v6079_v63 = vld [vmem:[%s8204_s1 + $0x188] sm:$0xff]   ;;  %v6081_v1 = vld [vmem:[%s8204_s1 + $0x100] sm:$0xff]  }
  0x17   :  { %v6082_v2 = vld [vmem:[%s8204_s1 + $0x1c0] sm:$0xff]   ;;  %v6083_v3 = vld [vmem:[%s8205_s0 + $0x10] ss:$196 sps:$4 sm:$0xff]   ;;  %v6087_v6 = vld [vmem:[%s8204_s1 + $0x278] sm:$0xff]  }
  0x18   :  { %5349 = vmatpush3.bf16.msra.mxu0 %v6036_v22  ;;  %v6085_v4 = vld [vmem:[%s8205_s0 + $0x14] ss:$196 sps:$4 sm:$0xff]   ;;  %v6086_v5 = vld [vmem:[%s8204_s1 + $0x180] sm:$0xff]   ;;  %v6098_v16 = vld [vmem:[%s8204_s1 + $0x268] sm:$0xff]  }
  0x19   :  { %5371 = vmatpush3.bf16.msra.mxu1 %v6037_v23  ;;  %5350 = vmatprep.subr.bf16.mxu0 %v6038_v24  ;;  %v6088_v7 = vld [vmem:[%s8205_s0 + $0x18] ss:$196 sps:$4 sm:$0xff]   ;;  %v6094_v12 = vld [vmem:[%s8204_s1 + $0x270] sm:$0xff]   ;;  %v6099_v17 = vld [vmem:[%s8204_s1 + $0x228] sm:$0xff]  }
  0x1a   :  { %5372 = vmatprep.subr.bf16.mxu1 %v6039_v25  ;;  %v6090_v8 = vld [vmem:[%s8205_s0 + $0x1c] ss:$196 sps:$4 sm:$0xff]   ;;  %v6095_v13 = vld [vmem:[%s8204_s1 + $0x230] sm:$0xff]   ;;  %v6100_v18 = vld [vmem:[%s8204_s1 + $0x2e8] sm:$0xff]  }
  0x1b   :  { %v6091_v9 = vld [vmem:[%s8204_s1 + $0x238] sm:$0xff]   ;;  %v6096_v14 = vld [vmem:[%s8204_s1 + $0x2f0] sm:$0xff]   ;;  %v6101_v19 = vld [vmem:[%s8204_s1 + $0x2a8] sm:$0xff]  }
  0x1c   :  { %5351 = vmatpush3.bf16.msra.mxu0 %v6040_v26  ;;  %v6092_v10 = vld [vmem:[%s8204_s1 + $0x2f8] sm:$0xff]   ;;  %v6097_v15 = vld [vmem:[%s8204_s1 + $0x2b0] sm:$0xff]   ;;  %v6102_v20 = vld [vmem:[%s8204_s1 + $0x260] sm:$0xff]  }
  0x1d   :  { %5373 = vmatpush3.bf16.msra.mxu1 %v6041_v27  ;;  %5352 = vmatprep.subr.bf16.mxu0 %v6042_v28  ;;  %v6093_v11 = vld [vmem:[%s8204_s1 + $0x2b8] sm:$0xff]   ;;  %v6103_v21 = vld [vmem:[%s8204_s1 + $0x220] sm:$0xff]   ;;  %v6110_v28 = vld [vmem:[%s8204_s1 + $0x250] sm:$0xff]  }
  0x1e   :  { %5374 = vmatprep.subr.bf16.mxu1 %v6043_v29  ;;  %v6104_v22 = vld [vmem:[%s8204_s1 + $0x2e0] sm:$0xff]   ;;  %v6106_v24 = vld [vmem:[%s8204_s1 + $0x258] sm:$0xff]   ;;  %v6111_v29 = vld [vmem:[%s8204_s1 + $0x210] sm:$0xff]  }
  0x1f   :  { %v6105_v23 = vld [vmem:[%s8204_s1 + $0x2a0] sm:$0xff]   ;;  %v6107_v25 = vld [vmem:[%s8204_s1 + $0x218] sm:$0xff]   ;;  %v6115_v33 = vld [vmem:[%s8204_s1 + $0x208] sm:$0xff]  }
  0x20   :  { %5353 = vmatpush3.bf16.msra.mxu0 %v6044_v30  ;;  %v6108_v26 = vld [vmem:[%s8204_s1 + $0x2d8] sm:$0xff]   ;;  %v6112_v30 = vld [vmem:[%s8204_s1 + $0x2d0] sm:$0xff]   ;;  %v6117_v35 = vld [vmem:[%s8204_s1 + $0x288] sm:$0xff]  }
  0x21   :  { %5375 = vmatpush3.bf16.msra.mxu1 %v6045_v31  ;;  %5382 = vmatprep.subr.bf16.mxu0 %v6052_v36  ;;  %v6109_v27 = vld [vmem:[%s8204_s1 + $0x298] sm:$0xff]   ;;  %v6113_v31 = vld [vmem:[%s8204_s1 + $0x290] sm:$0xff]   ;;  %v6118_v36 = vld [vmem:[%s8204_s1 + $0x240] sm:$0xff]  }
  0x22   :  { %5404 = vmatprep.subr.bf16.mxu1 %v6054_v38  ;;  %v6120_v38 = vld [vmem:[%s8204_s1 + $0x2c0] sm:$0xff]  }
  0x23   :  { %3496 = vmatmul.mubr.bf16.vlgmr.msra.gmra.mxu0 %v6046_v32  ;;  %v6114_v32 = vld [vmem:[%s8204_s1 + $0x248] sm:$0xff]  }
  0x24   :  { %3537 = vmatmul.mubr.bf16.vlgmr.msra.gmra.mxu1 %v6049_v34  ;;  %5383 = vmatpush3.bf16.msra.mxu0 %v6053_v37  ;;  %v6116_v34 = vld [vmem:[%s8204_s1 + $0x2c8] sm:$0xff]   ;;  %v6119_v37 = vld [vmem:[%s8204_s1 + $0x200] sm:$0xff]  }
  0x25   :  { %5405 = vmatpush3.bf16.msra.mxu1 %v6055_v39  ;;  %5384 = vmatprep.subr.bf16.mxu0 %v6056_v40  ;;  %v6121_v39 = vld [vmem:[%s8205_s0 + $0x20] ss:$196 sps:$4 sm:$0xff]  }
  0x26   :  { %5406 = vmatprep.subr.bf16.mxu1 %v6058_v42  ;;  %3577 = vmatprep.mubr.bf16.mxu0 %v6085_v4  ;;  %v6123_v40 = vld [vmem:[%s8205_s0 + $0x24] ss:$196 sps:$4 sm:$0xff]   ;;  %v6125_v42 = vld [vmem:[%s8204_s1 + $0x378] sm:$0xff]  }
  0x27   :  { %3618 = vmatprep.mubr.bf16.mxu1 %v6090_v8  ;;  %v6152_v4 = vld [vmem:[%s8204_s1 + $0x348] sm:$0xff]   ;;  %v6156_v8 = vld [vmem:[%s8204_s1 + $0x340] sm:$0xff]  }
  0x28   :  { %5385 = vmatpush3.bf16.msra.mxu0 %v6057_v41  ;;  %v6124_v41 = vld [vmem:[%s8204_s1 + $0x280] sm:$0xff]  }
  0x29   :  { %5407 = vmatpush3.bf16.msra.mxu1 %v6059_v43  ;;  %5386 = vmatprep.subr.bf16.mxu0 %v6060_v44  ;;  %v6126_v43 = vld [vmem:[%s8205_s0 + $0x28] ss:$196 sps:$4 sm:$0xff]  }
  0x2a   :  { %5408 = vmatprep.subr.bf16.mxu1 %v6062_v46  ;;  %v6128_v44 = vld [vmem:[%s8205_s0 + $0x2c] ss:$196 sps:$4 sm:$0xff]   ;;  %v6130_v46 = vld [vmem:[%s8204_s1 + $0x3f8] sm:$0xff]  }
  0x2c   :  { %5387 = vmatpush3.bf16.msra.mxu0 %v6061_v45  ;;  %v6129_v45 = vld [vmem:[%s8204_s1 + $0x338] sm:$0xff]  }
  0x2d   :  { %5409 = vmatpush3.bf16.msra.mxu1 %v6063_v47  ;;  %5388 = vmatprep.subr.bf16.mxu0 %v6064_v48  ;;  %v6131_v47 = vld [vmem:[%s8204_s1 + $0x3b8] sm:$0xff]   ;;  %v6132_v48 = vld [vmem:[%s8204_s1 + $0x370] sm:$0xff]  }
  0x2e   :  { %5410 = vmatprep.subr.bf16.mxu1 %v6066_v50  ;;  %v6134_v50 = vld [vmem:[%s8204_s1 + $0x3f0] sm:$0xff]  }
  0x30   :  { %5389 = vmatpush3.bf16.msra.mxu0 %v6065_v49  ;;  %v6133_v49 = vld [vmem:[%s8204_s1 + $0x330] sm:$0xff]  }
  0x31   :  { %5411 = vmatpush3.bf16.msra.mxu1 %v6067_v51  ;;  %5390 = vmatprep.subr.bf16.mxu0 %v6068_v52  ;;  %v6135_v51 = vld [vmem:[%s8204_s1 + $0x3b0] sm:$0xff]   ;;  %v6136_v52 = vld [vmem:[%s8204_s1 + $0x368] sm:$0xff]  }
  0x32   :  { %5412 = vmatprep.subr.bf16.mxu1 %v6070_v54  ;;  %v6138_v54 = vld [vmem:[%s8204_s1 + $0x3e8] sm:$0xff]  }
  0x34   :  { %5391 = vmatpush3.bf16.msra.mxu0 %v6069_v53  ;;  %v6137_v53 = vld [vmem:[%s8204_s1 + $0x328] sm:$0xff]  }
  0x35   :  { %5413 = vmatpush3.bf16.msra.mxu1 %v6071_v55  ;;  %5392 = vmatprep.subr.bf16.mxu0 %v6072_v56  ;;  %v6139_v55 = vld [vmem:[%s8204_s1 + $0x3a8] sm:$0xff]   ;;  %v6140_v56 = vld [vmem:[%s8204_s1 + $0x360] sm:$0xff]  }
  0x36   :  { %5414 = vmatprep.subr.bf16.mxu1 %v6074_v58  ;;  %v6142_v58 = vld [vmem:[%s8204_s1 + $0x3e0] sm:$0xff]  }
  0x38   :  { %5393 = vmatpush3.bf16.msra.mxu0 %v6073_v57  ;;  %v6141_v57 = vld [vmem:[%s8204_s1 + $0x320] sm:$0xff]  }
  0x39   :  { %5415 = vmatpush3.bf16.msra.mxu1 %v6075_v59  ;;  %5394 = vmatprep.subr.bf16.mxu0 %v6076_v60  ;;  %v6143_v59 = vld [vmem:[%s8204_s1 + $0x3a0] sm:$0xff]   ;;  %v6144_v60 = vld [vmem:[%s8204_s1 + $0x358] sm:$0xff]  }
  0x3a   :  { %5416 = vmatprep.subr.bf16.mxu1 %v6078_v62  ;;  %v6146_v62 = vld [vmem:[%s8204_s1 + $0x3d8] sm:$0xff]  }
  0x3c   :  { %5395 = vmatpush3.bf16.msra.mxu0 %v6077_v61  ;;  %v6145_v61 = vld [vmem:[%s8204_s1 + $0x318] sm:$0xff]  }
  0x3d   :  { %5417 = vmatpush3.bf16.msra.mxu1 %v6079_v63  ;;  %5396 = vmatprep.subr.bf16.mxu0 %v6080_v0  ;;  %v6147_v63 = vld [vmem:[%s8204_s1 + $0x398] sm:$0xff]   ;;  %v6148_v0 = vld [vmem:[%s8204_s1 + $0x350] sm:$0xff]  }
  0x3e   :  { %5418 = vmatprep.subr.bf16.mxu1 %v6082_v2  ;;  %v6150_v2 = vld [vmem:[%s8204_s1 + $0x3d0] sm:$0xff]  }
  0x40   :  { %5397 = vmatpush3.bf16.msra.mxu0 %v6081_v1  ;;  %v6149_v1 = vld [vmem:[%s8204_s1 + $0x310] sm:$0xff]  }
  0x41   :  { %5419 = vmatpush3.bf16.msra.mxu1 %v6086_v5  ;;  %5426 = vmatprep.subr.bf16.mxu0 %v6087_v6  ;;  %v6153_v5 = vld [vmem:[%s8204_s1 + $0x308] sm:$0xff]  }
  0x42   :  { %5448 = vmatprep.subr.bf16.mxu1 %v6092_v10  ;;  %v6154_v6 = vld [vmem:[%s8204_s1 + $0x3c8] sm:$0xff]   ;;  %v6158_v10 = vld [vmem:[%s8204_s1 + $0x3c0] sm:$0xff]  }
  0x43   :  { %3578 = vmatmul.mubr.bf16.vlgmr.msra.gmra.mxu0 %v6083_v3  ;;  %v6151_v3 = vld [vmem:[%s8204_s1 + $0x390] sm:$0xff]  }
  0x44   :  { %5427 = vmatpush3.bf16.msra.mxu0 %v6091_v9  ;;  %3619 = vmatmul.mubr.bf16.vlgmr.msra.gmra.mxu1 %v6088_v7  ;;  %v6155_v7 = vld [vmem:[%s8204_s1 + $0x388] sm:$0xff]   ;;  %v6157_v9 = vld [vmem:[%s8204_s1 + $0x300] sm:$0xff]  }
  0x45   :  { %5449 = vmatpush3.bf16.msra.mxu1 %v6093_v11  ;;  %5428 = vmatprep.subr.bf16.mxu0 %v6094_v12  ;;  %v6159_v11 = vld [vmem:[%s8205_s0 + $0x30] ss:$196 sps:$4 sm:$0xff]  }
  0x46   :  { %5450 = vmatprep.subr.bf16.mxu1 %v6096_v14  ;;  %3659 = vmatprep.mubr.bf16.mxu0 %v6123_v40  ;;  %v6161_v12 = vld [vmem:[%s8205_s0 + $0x34] ss:$196 sps:$4 sm:$0xff]   ;;  %v6190_v40 = vld [vmem:[%s8204_s1 + $0x448] sm:$0xff]  }
  0x47   :  { %3700 = vmatprep.mubr.bf16.mxu1 %v6128_v44  ;;  %v6163_v14 = vld [vmem:[%s8204_s1 + $0x478] sm:$0xff]   ;;  %v6194_v44 = vld [vmem:[%s8204_s1 + $0x440] sm:$0xff]  }
  0x48   :  { %5429 = vmatpush3.bf16.msra.mxu0 %v6095_v13  ;;  %v6162_v13 = vld [vmem:[%s8204_s1 + $0x380] sm:$0xff]  }
  0x49   :  { %5451 = vmatpush3.bf16.msra.mxu1 %v6097_v15  ;;  %5430 = vmatprep.subr.bf16.mxu0 %v6098_v16  ;;  %v6164_v15 = vld [vmem:[%s8205_s0 + $0x38] ss:$196 sps:$4 sm:$0xff]  }
  0x4a   :  { %5452 = vmatprep.subr.bf16.mxu1 %v6100_v18  ;;  %v6166_v16 = vld [vmem:[%s8205_s0 + $0x3c] ss:$196 sps:$4 sm:$0xff]  }
  0x4b   :  { %v6168_v18 = vld [vmem:[%s8204_s1 + $0x4f8] sm:$0xff]  }
  0x4c   :  { %5431 = vmatpush3.bf16.msra.mxu0 %v6099_v17  ;;  %v6167_v17 = vld [vmem:[%s8204_s1 + $0x438] sm:$0xff]  }
  0x4d   :  { %5453 = vmatpush3.bf16.msra.mxu1 %v6101_v19  ;;  %5432 = vmatprep.subr.bf16.mxu0 %v6102_v20  ;;  %v6169_v19 = vld [vmem:[%s8204_s1 + $0x4b8] sm:$0xff]   ;;  %v6170_v20 = vld [vmem:[%s8204_s1 + $0x470] sm:$0xff]  }
  0x4e   :  { %5454 = vmatprep.subr.bf16.mxu1 %v6104_v22  ;;  %v6172_v22 = vld [vmem:[%s8204_s1 + $0x4f0] sm:$0xff]  }
  0x50   :  { %5433 = vmatpush3.bf16.msra.mxu0 %v6103_v21  ;;  %v6171_v21 = vld [vmem:[%s8204_s1 + $0x430] sm:$0xff]  }
  0x51   :  { %5455 = vmatpush3.bf16.msra.mxu1 %v6105_v23  ;;  %5434 = vmatprep.subr.bf16.mxu0 %v6106_v24  ;;  %v6173_v23 = vld [vmem:[%s8204_s1 + $0x4b0] sm:$0xff]   ;;  %v6174_v24 = vld [vmem:[%s8204_s1 + $0x468] sm:$0xff]  }
  0x52   :  { %5456 = vmatprep.subr.bf16.mxu1 %v6108_v26  ;;  %v6176_v26 = vld [vmem:[%s8204_s1 + $0x4e8] sm:$0xff]  }
  0x54   :  { %5435 = vmatpush3.bf16.msra.mxu0 %v6107_v25  ;;  %v6175_v25 = vld [vmem:[%s8204_s1 + $0x428] sm:$0xff]  }
  0x55   :  { %5457 = vmatpush3.bf16.msra.mxu1 %v6109_v27  ;;  %5436 = vmatprep.subr.bf16.mxu0 %v6110_v28  ;;  %v6177_v27 = vld [vmem:[%s8204_s1 + $0x4a8] sm:$0xff]   ;;  %v6178_v28 = vld [vmem:[%s8204_s1 + $0x460] sm:$0xff]  }
  0x56   :  { %5458 = vmatprep.subr.bf16.mxu1 %v6112_v30  ;;  %v6180_v30 = vld [vmem:[%s8204_s1 + $0x4e0] sm:$0xff]  }
  0x58   :  { %5437 = vmatpush3.bf16.msra.mxu0 %v6111_v29  ;;  %v6179_v29 = vld [vmem:[%s8204_s1 + $0x420] sm:$0xff]  }
  0x59   :  { %5459 = vmatpush3.bf16.msra.mxu1 %v6113_v31  ;;  %5438 = vmatprep.subr.bf16.mxu0 %v6114_v32  ;;  %v6181_v31 = vld [vmem:[%s8204_s1 + $0x4a0] sm:$0xff]   ;;  %v6182_v32 = vld [vmem:[%s8204_s1 + $0x458] sm:$0xff]  }
  0x5a   :  { %5460 = vmatprep.subr.bf16.mxu1 %v6116_v34  ;;  %v6184_v34 = vld [vmem:[%s8204_s1 + $0x4d8] sm:$0xff]  }
  0x5c   :  { %5439 = vmatpush3.bf16.msra.mxu0 %v6115_v33  ;;  %v6183_v33 = vld [vmem:[%s8204_s1 + $0x418] sm:$0xff]  }
  0x5d   :  { %5461 = vmatpush3.bf16.msra.mxu1 %v6117_v35  ;;  %5440 = vmatprep.subr.bf16.mxu0 %v6118_v36  ;;  %v6185_v35 = vld [vmem:[%s8204_s1 + $0x498] sm:$0xff]   ;;  %v6186_v36 = vld [vmem:[%s8204_s1 + $0x450] sm:$0xff]  }
  0x5e   :  { %5462 = vmatprep.subr.bf16.mxu1 %v6120_v38  ;;  %v6188_v38 = vld [vmem:[%s8204_s1 + $0x4d0] sm:$0xff]  }
  0x60   :  { %5441 = vmatpush3.bf16.msra.mxu0 %v6119_v37  ;;  %v6187_v37 = vld [vmem:[%s8204_s1 + $0x410] sm:$0xff]  }
  0x61   :  { %5463 = vmatpush3.bf16.msra.mxu1 %v6124_v41  ;;  %5470 = vmatprep.subr.bf16.mxu0 %v6125_v42  ;;  %v6191_v41 = vld [vmem:[%s8204_s1 + $0x408] sm:$0xff]  }
  0x62   :  { %5492 = vmatprep.subr.bf16.mxu1 %v6130_v46  ;;  %v6192_v42 = vld [vmem:[%s8204_s1 + $0x4c8] sm:$0xff]   ;;  %v6196_v46 = vld [vmem:[%s8204_s1 + $0x4c0] sm:$0xff]  }
  0x63   :  { %3660 = vmatmul.mubr.bf16.vlgmr.msra.gmra.mxu0 %v6121_v39  ;;  %v6189_v39 = vld [vmem:[%s8204_s1 + $0x490] sm:$0xff]  }
  0x64   :  { %5471 = vmatpush3.bf16.msra.mxu0 %v6129_v45  ;;  %3701 = vmatmul.mubr.bf16.vlgmr.msra.gmra.mxu1 %v6126_v43  ;;  %v6193_v43 = vld [vmem:[%s8204_s1 + $0x488] sm:$0xff]   ;;  %v6195_v45 = vld [vmem:[%s8204_s1 + $0x400] sm:$0xff]  }
  0x65   :  { %5493 = vmatpush3.bf16.msra.mxu1 %v6131_v47  ;;  %5472 = vmatprep.subr.bf16.mxu0 %v6132_v48  ;;  %v6197_v47 = vld [vmem:[%s8205_s0 + $0x40] ss:$196 sps:$4 sm:$0xff]  }
  0x66   :  { %5494 = vmatprep.subr.bf16.mxu1 %v6134_v50  ;;  %3741 = vmatprep.mubr.bf16.mxu0 %v6161_v12  ;;  %v6199_v48 = vld [vmem:[%s8205_s0 + $0x44] ss:$196 sps:$4 sm:$0xff]   ;;  %v6201_v50 = vld [vmem:[%s8204_s1 + $0x578] sm:$0xff]  }
  0x67   :  { %3782 = vmatprep.mubr.bf16.mxu1 %v6166_v16  ;;  %v6228_v12 = vld [vmem:[%s8204_s1 + $0x548] sm:$0xff]   ;;  %v6232_v16 = vld [vmem:[%s8204_s1 + $0x540] sm:$0xff]  }
  0x68   :  { %5473 = vmatpush3.bf16.msra.mxu0 %v6133_v49  ;;  %v6200_v49 = vld [vmem:[%s8204_s1 + $0x480] sm:$0xff]  }
  0x69   :  { %5495 = vmatpush3.bf16.msra.mxu1 %v6135_v51  ;;  %5474 = vmatprep.subr.bf16.mxu0 %v6136_v52  ;;  %v6202_v51 = vld [vmem:[%s8205_s0 + $0x48] ss:$196 sps:$4 sm:$0xff]  }
  0x6a   :  { %5496 = vmatprep.subr.bf16.mxu1 %v6138_v54  ;;  %v6204_v52 = vld [vmem:[%s8205_s0 + $0x4c] ss:$196 sps:$4 sm:$0xff]   ;;  %v6206_v54 = vld [vmem:[%s8204_s1 + $0x5f8] sm:$0xff]  }
  0x6c   :  { %5475 = vmatpush3.bf16.msra.mxu0 %v6137_v53  ;;  %v6205_v53 = vld [vmem:[%s8204_s1 + $0x538] sm:$0xff]  }
  0x6d   :  { %5497 = vmatpush3.bf16.msra.mxu1 %v6139_v55  ;;  %5476 = vmatprep.subr.bf16.mxu0 %v6140_v56  ;;  %v6207_v55 = vld [vmem:[%s8204_s1 + $0x5b8] sm:$0xff]   ;;  %v6208_v56 = vld [vmem:[%s8204_s1 + $0x570] sm:$0xff]  }
  0x6e   :  { %5498 = vmatprep.subr.bf16.mxu1 %v6142_v58  ;;  %v6210_v58 = vld [vmem:[%s8204_s1 + $0x5f0] sm:$0xff]  }
  0x70   :  { %5477 = vmatpush3.bf16.msra.mxu0 %v6141_v57  ;;  %v6209_v57 = vld [vmem:[%s8204_s1 + $0x530] sm:$0xff]  }
  0x71   :  { %5499 = vmatpush3.bf16.msra.mxu1 %v6143_v59  ;;  %5478 = vmatprep.subr.bf16.mxu0 %v6144_v60  ;;  %v6211_v59 = vld [vmem:[%s8204_s1 + $0x5b0] sm:$0xff]   ;;  %v6212_v60 = vld [vmem:[%s8204_s1 + $0x568] sm:$0xff]  }
  0x72   :  { %5500 = vmatprep.subr.bf16.mxu1 %v6146_v62  ;;  %v6214_v62 = vld [vmem:[%s8204_s1 + $0x5e8] sm:$0xff]  }
  0x74   :  { %5479 = vmatpush3.bf16.msra.mxu0 %v6145_v61  ;;  %v6213_v61 = vld [vmem:[%s8204_s1 + $0x528] sm:$0xff]  }
  0x75   :  { %5501 = vmatpush3.bf16.msra.mxu1 %v6147_v63  ;;  %5480 = vmatprep.subr.bf16.mxu0 %v6148_v0  ;;  %v6215_v63 = vld [vmem:[%s8204_s1 + $0x5a8] sm:$0xff]   ;;  %v6216_v0 = vld [vmem:[%s8204_s1 + $0x560] sm:$0xff]  }
  0x76   :  { %5502 = vmatprep.subr.bf16.mxu1 %v6150_v2  ;;  %v6218_v2 = vld [vmem:[%s8204_s1 + $0x5e0] sm:$0xff]  }
  0x78   :  { %5481 = vmatpush3.bf16.msra.mxu0 %v6149_v1  ;;  %v6217_v1 = vld [vmem:[%s8204_s1 + $0x520] sm:$0xff]  }
  0x79   :  { %5503 = vmatpush3.bf16.msra.mxu1 %v6151_v3  ;;  %5482 = vmatprep.subr.bf16.mxu0 %v6152_v4  ;;  %v6219_v3 = vld [vmem:[%s8204_s1 + $0x5a0] sm:$0xff]   ;;  %v6220_v4 = vld [vmem:[%s8204_s1 + $0x558] sm:$0xff]  }
  0x7a   :  { %5504 = vmatprep.subr.bf16.mxu1 %v6154_v6  ;;  %v6222_v6 = vld [vmem:[%s8204_s1 + $0x5d8] sm:$0xff]  }
  0x7c   :  { %5483 = vmatpush3.bf16.msra.mxu0 %v6153_v5  ;;  %v6221_v5 = vld [vmem:[%s8204_s1 + $0x518] sm:$0xff]  }
  0x7d   :  { %5505 = vmatpush3.bf16.msra.mxu1 %v6155_v7  ;;  %5484 = vmatprep.subr.bf16.mxu0 %v6156_v8  ;;  %v6223_v7 = vld [vmem:[%s8204_s1 + $0x598] sm:$0xff]   ;;  %v6224_v8 = vld [vmem:[%s8204_s1 + $0x550] sm:$0xff]  }
  0x7e   :  { %5506 = vmatprep.subr.bf16.mxu1 %v6158_v10  ;;  %v6226_v10 = vld [vmem:[%s8204_s1 + $0x5d0] sm:$0xff]  }
  0x80   :  { %5485 = vmatpush3.bf16.msra.mxu0 %v6157_v9  ;;  %v6225_v9 = vld [vmem:[%s8204_s1 + $0x510] sm:$0xff]  }
  0x81   :  { %5507 = vmatpush3.bf16.msra.mxu1 %v6162_v13  ;;  %5514 = vmatprep.subr.bf16.mxu0 %v6163_v14  ;;  %v6229_v13 = vld [vmem:[%s8204_s1 + $0x508] sm:$0xff]  }
  0x82   :  { %5536 = vmatprep.subr.bf16.mxu1 %v6168_v18  ;;  %v6230_v14 = vld [vmem:[%s8204_s1 + $0x5c8] sm:$0xff]   ;;  %v6234_v18 = vld [vmem:[%s8204_s1 + $0x5c0] sm:$0xff]  }
  0x83   :  { %3742 = vmatmul.mubr.bf16.vlgmr.msra.gmra.mxu0 %v6159_v11  ;;  %v6227_v11 = vld [vmem:[%s8204_s1 + $0x590] sm:$0xff]  }
  0x84   :  { %5515 = vmatpush3.bf16.msra.mxu0 %v6167_v17  ;;  %3783 = vmatmul.mubr.bf16.vlgmr.msra.gmra.mxu1 %v6164_v15  ;;  %v6231_v15 = vld [vmem:[%s8204_s1 + $0x588] sm:$0xff]   ;;  %v6233_v17 = vld [vmem:[%s8204_s1 + $0x500] sm:$0xff]  }
  0x85   :  { %5537 = vmatpush3.bf16.msra.mxu1 %v6169_v19  ;;  %5516 = vmatprep.subr.bf16.mxu0 %v6170_v20  ;;  %v6235_v19 = vld [vmem:[%s8205_s0 + $0x50] ss:$196 sps:$4 sm:$0xff]  }
  0x86   :  { %5538 = vmatprep.subr.bf16.mxu1 %v6172_v22  ;;  %3823 = vmatprep.mubr.bf16.mxu0 %v6199_v48  ;;  %v6237_v20 = vld [vmem:[%s8205_s0 + $0x54] ss:$196 sps:$4 sm:$0xff]   ;;  %v6266_v48 = vld [vmem:[%s8204_s1 + $0x648] sm:$0xff]  }
  0x87   :  { %3864 = vmatprep.mubr.bf16.mxu1 %v6204_v52  ;;  %v6239_v22 = vld [vmem:[%s8204_s1 + $0x678] sm:$0xff]   ;;  %v6270_v52 = vld [vmem:[%s8204_s1 + $0x640] sm:$0xff]  }
  0x88   :  { %5517 = vmatpush3.bf16.msra.mxu0 %v6171_v21  ;;  %v6238_v21 = vld [vmem:[%s8204_s1 + $0x580] sm:$0xff]  }
  0x89   :  { %5539 = vmatpush3.bf16.msra.mxu1 %v6173_v23  ;;  %5518 = vmatprep.subr.bf16.mxu0 %v6174_v24  ;;  %v6240_v23 = vld [vmem:[%s8205_s0 + $0x58] ss:$196 sps:$4 sm:$0xff]  }
  0x8a   :  { %5540 = vmatprep.subr.bf16.mxu1 %v6176_v26  ;;  %v6242_v24 = vld [vmem:[%s8205_s0 + $0x5c] ss:$196 sps:$4 sm:$0xff]  }
  0x8b   :  { %v6244_v26 = vld [vmem:[%s8204_s1 + $0x6f8] sm:$0xff]  }
  0x8c   :  { %5519 = vmatpush3.bf16.msra.mxu0 %v6175_v25  ;;  %v6243_v25 = vld [vmem:[%s8204_s1 + $0x638] sm:$0xff]  }
  0x8d   :  { %5541 = vmatpush3.bf16.msra.mxu1 %v6177_v27  ;;  %5520 = vmatprep.subr.bf16.mxu0 %v6178_v28  ;;  %v6245_v27 = vld [vmem:[%s8204_s1 + $0x6b8] sm:$0xff]   ;;  %v6246_v28 = vld [vmem:[%s8204_s1 + $0x670] sm:$0xff]  }
  0x8e   :  { %5542 = vmatprep.subr.bf16.mxu1 %v6180_v30  ;;  %v6248_v30 = vld [vmem:[%s8204_s1 + $0x6f0] sm:$0xff]  }
  0x90   :  { %5521 = vmatpush3.bf16.msra.mxu0 %v6179_v29  ;;  %v6247_v29 = vld [vmem:[%s8204_s1 + $0x630] sm:$0xff]  }
  0x91   :  { %5543 = vmatpush3.bf16.msra.mxu1 %v6181_v31  ;;  %5522 = vmatprep.subr.bf16.mxu0 %v6182_v32  ;;  %v6249_v31 = vld [vmem:[%s8204_s1 + $0x6b0] sm:$0xff]   ;;  %v6250_v32 = vld [vmem:[%s8204_s1 + $0x668] sm:$0xff]  }
  0x92   :  { %5544 = vmatprep.subr.bf16.mxu1 %v6184_v34  ;;  %v6252_v34 = vld [vmem:[%s8204_s1 + $0x6e8] sm:$0xff]  }
  0x94   :  { %5523 = vmatpush3.bf16.msra.mxu0 %v6183_v33  ;;  %v6251_v33 = vld [vmem:[%s8204_s1 + $0x628] sm:$0xff]  }
  0x95   :  { %5545 = vmatpush3.bf16.msra.mxu1 %v6185_v35  ;;  %5524 = vmatprep.subr.bf16.mxu0 %v6186_v36  ;;  %v6253_v35 = vld [vmem:[%s8204_s1 + $0x6a8] sm:$0xff]   ;;  %v6254_v36 = vld [vmem:[%s8204_s1 + $0x660] sm:$0xff]  }
  0x96   :  { %5546 = vmatprep.subr.bf16.mxu1 %v6188_v38  ;;  %v6256_v38 = vld [vmem:[%s8204_s1 + $0x6e0] sm:$0xff]  }
  0x98   :  { %5525 = vmatpush3.bf16.msra.mxu0 %v6187_v37  ;;  %v6255_v37 = vld [vmem:[%s8204_s1 + $0x620] sm:$0xff]  }
  0x99   :  { %5547 = vmatpush3.bf16.msra.mxu1 %v6189_v39  ;;  %5526 = vmatprep.subr.bf16.mxu0 %v6190_v40  ;;  %v6257_v39 = vld [vmem:[%s8204_s1 + $0x6a0] sm:$0xff]   ;;  %v6258_v40 = vld [vmem:[%s8204_s1 + $0x658] sm:$0xff]  }
  0x9a   :  { %5548 = vmatprep.subr.bf16.mxu1 %v6192_v42  ;;  %v6260_v42 = vld [vmem:[%s8204_s1 + $0x6d8] sm:$0xff]  }
  0x9c   :  { %5527 = vmatpush3.bf16.msra.mxu0 %v6191_v41  ;;  %v6259_v41 = vld [vmem:[%s8204_s1 + $0x618] sm:$0xff]  }
  0x9d   :  { %5549 = vmatpush3.bf16.msra.mxu1 %v6193_v43  ;;  %5528 = vmatprep.subr.bf16.mxu0 %v6194_v44  ;;  %v6261_v43 = vld [vmem:[%s8204_s1 + $0x698] sm:$0xff]   ;;  %v6262_v44 = vld [vmem:[%s8204_s1 + $0x650] sm:$0xff]  }
  0x9e   :  { %5550 = vmatprep.subr.bf16.mxu1 %v6196_v46  ;;  %v6264_v46 = vld [vmem:[%s8204_s1 + $0x6d0] sm:$0xff]  }
  0xa0   :  { %5529 = vmatpush3.bf16.msra.mxu0 %v6195_v45  ;;  %v6263_v45 = vld [vmem:[%s8204_s1 + $0x610] sm:$0xff]  }
  0xa1   :  { %5551 = vmatpush3.bf16.msra.mxu1 %v6200_v49  ;;  %5558 = vmatprep.subr.bf16.mxu0 %v6201_v50  ;;  %v6267_v49 = vld [vmem:[%s8204_s1 + $0x608] sm:$0xff]  }
  0xa2   :  { %5580 = vmatprep.subr.bf16.mxu1 %v6206_v54  ;;  %v6268_v50 = vld [vmem:[%s8204_s1 + $0x6c8] sm:$0xff]   ;;  %v6272_v54 = vld [vmem:[%s8204_s1 + $0x6c0] sm:$0xff]  }
  0xa3   :  { %3824 = vmatmul.mubr.bf16.vlgmr.msra.gmra.mxu0 %v6197_v47  ;;  %v6265_v47 = vld [vmem:[%s8204_s1 + $0x690] sm:$0xff]  }
  0xa4   :  { %5559 = vmatpush3.bf16.msra.mxu0 %v6205_v53  ;;  %3865 = vmatmul.mubr.bf16.vlgmr.msra.gmra.mxu1 %v6202_v51  ;;  %v6269_v51 = vld [vmem:[%s8204_s1 + $0x688] sm:$0xff]   ;;  %v6271_v53 = vld [vmem:[%s8204_s1 + $0x600] sm:$0xff]  }
  0xa5   :  { %5581 = vmatpush3.bf16.msra.mxu1 %v6207_v55  ;;  %5560 = vmatprep.subr.bf16.mxu0 %v6208_v56  ;;  %v6273_v55 = vld [vmem:[%s8205_s0 + $0x60] ss:$196 sps:$4 sm:$0xff]  }
  0xa6   :  { %5582 = vmatprep.subr.bf16.mxu1 %v6210_v58  ;;  %3905 = vmatprep.mubr.bf16.mxu0 %v6237_v20  ;;  %v6275_v56 = vld [vmem:[%s8205_s0 + $0x64] ss:$196 sps:$4 sm:$0xff]   ;;  %v6277_v58 = vld [vmem:[%s8204_s1 + $0x778] sm:$0xff]  }
  0xa7   :  { %3946 = vmatprep.mubr.bf16.mxu1 %v6242_v24  ;;  %v6304_v20 = vld [vmem:[%s8204_s1 + $0x748] sm:$0xff]   ;;  %v6308_v24 = vld [vmem:[%s8204_s1 + $0x740] sm:$0xff]  }
  0xa8   :  { %5561 = vmatpush3.bf16.msra.mxu0 %v6209_v57  ;;  %v6276_v57 = vld [vmem:[%s8204_s1 + $0x680] sm:$0xff]  }
  0xa9   :  { %5583 = vmatpush3.bf16.msra.mxu1 %v6211_v59  ;;  %5562 = vmatprep.subr.bf16.mxu0 %v6212_v60  ;;  %v6278_v59 = vld [vmem:[%s8205_s0 + $0x68] ss:$196 sps:$4 sm:$0xff]  }
  0xaa   :  { %5584 = vmatprep.subr.bf16.mxu1 %v6214_v62  ;;  %v6280_v60 = vld [vmem:[%s8205_s0 + $0x6c] ss:$196 sps:$4 sm:$0xff]   ;;  %v6282_v62 = vld [vmem:[%s8204_s1 + $0x7f8] sm:$0xff]  }
  0xac   :  { %5563 = vmatpush3.bf16.msra.mxu0 %v6213_v61  ;;  %v6281_v61 = vld [vmem:[%s8204_s1 + $0x738] sm:$0xff]  }
  0xad   :  { %5585 = vmatpush3.bf16.msra.mxu1 %v6215_v63  ;;  %5564 = vmatprep.subr.bf16.mxu0 %v6216_v0  ;;  %v6283_v63 = vld [vmem:[%s8204_s1 + $0x7b8] sm:$0xff]   ;;  %v6284_v0 = vld [vmem:[%s8204_s1 + $0x770] sm:$0xff]  }
  0xae   :  { %5586 = vmatprep.subr.bf16.mxu1 %v6218_v2  ;;  %v6286_v2 = vld [vmem:[%s8204_s1 + $0x7f0] sm:$0xff]  }
  0xb0   :  { %5565 = vmatpush3.bf16.msra.mxu0 %v6217_v1  ;;  %v6285_v1 = vld [vmem:[%s8204_s1 + $0x730] sm:$0xff]  }
  0xb1   :  { %5587 = vmatpush3.bf16.msra.mxu1 %v6219_v3  ;;  %5566 = vmatprep.subr.bf16.mxu0 %v6220_v4  ;;  %v6287_v3 = vld [vmem:[%s8204_s1 + $0x7b0] sm:$0xff]   ;;  %v6288_v4 = vld [vmem:[%s8204_s1 + $0x768] sm:$0xff]  }
  0xb2   :  { %5588 = vmatprep.subr.bf16.mxu1 %v6222_v6  ;;  %v6290_v6 = vld [vmem:[%s8204_s1 + $0x7e8] sm:$0xff]  }
  0xb4   :  { %5567 = vmatpush3.bf16.msra.mxu0 %v6221_v5  ;;  %v6289_v5 = vld [vmem:[%s8204_s1 + $0x728] sm:$0xff]  }
  0xb5   :  { %5589 = vmatpush3.bf16.msra.mxu1 %v6223_v7  ;;  %5568 = vmatprep.subr.bf16.mxu0 %v6224_v8  ;;  %v6291_v7 = vld [vmem:[%s8204_s1 + $0x7a8] sm:$0xff]   ;;  %v6292_v8 = vld [vmem:[%s8204_s1 + $0x760] sm:$0xff]  }
  0xb6   :  { %5590 = vmatprep.subr.bf16.mxu1 %v6226_v10  ;;  %v6294_v10 = vld [vmem:[%s8204_s1 + $0x7e0] sm:$0xff]  }
  0xb8   :  { %5569 = vmatpush3.bf16.msra.mxu0 %v6225_v9  ;;  %v6293_v9 = vld [vmem:[%s8204_s1 + $0x720] sm:$0xff]  }
  0xb9   :  { %5591 = vmatpush3.bf16.msra.mxu1 %v6227_v11  ;;  %5570 = vmatprep.subr.bf16.mxu0 %v6228_v12  ;;  %v6295_v11 = vld [vmem:[%s8204_s1 + $0x7a0] sm:$0xff]   ;;  %v6296_v12 = vld [vmem:[%s8204_s1 + $0x758] sm:$0xff]  }
  0xba   :  { %5592 = vmatprep.subr.bf16.mxu1 %v6230_v14  ;;  %v6298_v14 = vld [vmem:[%s8204_s1 + $0x7d8] sm:$0xff]  }
  0xbc   :  { %5571 = vmatpush3.bf16.msra.mxu0 %v6229_v13  ;;  %v6297_v13 = vld [vmem:[%s8204_s1 + $0x718] sm:$0xff]  }
  0xbd   :  { %5593 = vmatpush3.bf16.msra.mxu1 %v6231_v15  ;;  %5572 = vmatprep.subr.bf16.mxu0 %v6232_v16  ;;  %v6299_v15 = vld [vmem:[%s8204_s1 + $0x798] sm:$0xff]   ;;  %v6300_v16 = vld [vmem:[%s8204_s1 + $0x750] sm:$0xff]  }
  0xbe   :  { %5594 = vmatprep.subr.bf16.mxu1 %v6234_v18  ;;  %v6302_v18 = vld [vmem:[%s8204_s1 + $0x7d0] sm:$0xff]  }
  0xc0   :  { %5573 = vmatpush3.bf16.msra.mxu0 %v6233_v17  ;;  %v6301_v17 = vld [vmem:[%s8204_s1 + $0x710] sm:$0xff]  }
  0xc1   :  { %5595 = vmatpush3.bf16.msra.mxu1 %v6238_v21  ;;  %5602 = vmatprep.subr.bf16.mxu0 %v6239_v22  ;;  %v6305_v21 = vld [vmem:[%s8204_s1 + $0x708] sm:$0xff]  }
  0xc2   :  { %5624 = vmatprep.subr.bf16.mxu1 %v6244_v26  ;;  %v6306_v22 = vld [vmem:[%s8204_s1 + $0x7c8] sm:$0xff]   ;;  %v6310_v26 = vld [vmem:[%s8204_s1 + $0x7c0] sm:$0xff]  }
  0xc3   :  { %3906 = vmatmul.mubr.bf16.vlgmr.msra.gmra.mxu0 %v6235_v19  ;;  %v6303_v19 = vld [vmem:[%s8204_s1 + $0x790] sm:$0xff]  }
  0xc4   :  { %5603 = vmatpush3.bf16.msra.mxu0 %v6243_v25  ;;  %3947 = vmatmul.mubr.bf16.vlgmr.msra.gmra.mxu1 %v6240_v23  ;;  %v6307_v23 = vld [vmem:[%s8204_s1 + $0x788] sm:$0xff]   ;;  %v6309_v25 = vld [vmem:[%s8204_s1 + $0x700] sm:$0xff]  }
  0xc5   :  { %5625 = vmatpush3.bf16.msra.mxu1 %v6245_v27  ;;  %5604 = vmatprep.subr.bf16.mxu0 %v6246_v28  ;;  %v6311_v27 = vld [vmem:[%s8205_s0 + $0x70] ss:$196 sps:$4 sm:$0xff]  }
  0xc6   :  { %5626 = vmatprep.subr.bf16.mxu1 %v6248_v30  ;;  %3987 = vmatprep.mubr.bf16.mxu0 %v6275_v56  ;;  %v6313_v28 = vld [vmem:[%s8205_s0 + $0x74] ss:$196 sps:$4 sm:$0xff]   ;;  %v6342_v56 = vld [vmem:[%s8204_s1 + $0x848] sm:$0xff]  }
  0xc7   :  { %4028 = vmatprep.mubr.bf16.mxu1 %v6280_v60  ;;  %v6315_v30 = vld [vmem:[%s8204_s1 + $0x878] sm:$0xff]   ;;  %v6346_v60 = vld [vmem:[%s8204_s1 + $0x840] sm:$0xff]  }
  0xc8   :  { %5605 = vmatpush3.bf16.msra.mxu0 %v6247_v29  ;;  %v6314_v29 = vld [vmem:[%s8204_s1 + $0x780] sm:$0xff]  }
  0xc9   :  { %5627 = vmatpush3.bf16.msra.mxu1 %v6249_v31  ;;  %5606 = vmatprep.subr.bf16.mxu0 %v6250_v32  ;;  %v6316_v31 = vld [vmem:[%s8205_s0 + $0x78] ss:$196 sps:$4 sm:$0xff]  }
  0xca   :  { %5628 = vmatprep.subr.bf16.mxu1 %v6252_v34  ;;  %v6318_v32 = vld [vmem:[%s8205_s0 + $0x7c] ss:$196 sps:$4 sm:$0xff]  }
  0xcb   :  { %v6320_v34 = vld [vmem:[%s8204_s1 + $0x8f8] sm:$0xff]  }
  0xcc   :  { %5607 = vmatpush3.bf16.msra.mxu0 %v6251_v33  ;;  %v6319_v33 = vld [vmem:[%s8204_s1 + $0x838] sm:$0xff]  }
  0xcd   :  { %5629 = vmatpush3.bf16.msra.mxu1 %v6253_v35  ;;  %5608 = vmatprep.subr.bf16.mxu0 %v6254_v36  ;;  %v6321_v35 = vld [vmem:[%s8204_s1 + $0x8b8] sm:$0xff]   ;;  %v6322_v36 = vld [vmem:[%s8204_s1 + $0x870] sm:$0xff]  }
  0xce   :  { %5630 = vmatprep.subr.bf16.mxu1 %v6256_v38  ;;  %v6324_v38 = vld [vmem:[%s8204_s1 + $0x8f0] sm:$0xff]  }
  0xd0   :  { %5609 = vmatpush3.bf16.msra.mxu0 %v6255_v37  ;;  %v6323_v37 = vld [vmem:[%s8204_s1 + $0x830] sm:$0xff]  }
  0xd1   :  { %5631 = vmatpush3.bf16.msra.mxu1 %v6257_v39  ;;  %5610 = vmatprep.subr.bf16.mxu0 %v6258_v40  ;;  %v6325_v39 = vld [vmem:[%s8204_s1 + $0x8b0] sm:$0xff]   ;;  %v6326_v40 = vld [vmem:[%s8204_s1 + $0x868] sm:$0xff]  }
  0xd2   :  { %5632 = vmatprep.subr.bf16.mxu1 %v6260_v42  ;;  %v6328_v42 = vld [vmem:[%s8204_s1 + $0x8e8] sm:$0xff]  }
  0xd4   :  { %5611 = vmatpush3.bf16.msra.mxu0 %v6259_v41  ;;  %v6327_v41 = vld [vmem:[%s8204_s1 + $0x828] sm:$0xff]  }
  0xd5   :  { %5633 = vmatpush3.bf16.msra.mxu1 %v6261_v43  ;;  %5612 = vmatprep.subr.bf16.mxu0 %v6262_v44  ;;  %v6329_v43 = vld [vmem:[%s8204_s1 + $0x8a8] sm:$0xff]   ;;  %v6330_v44 = vld [vmem:[%s8204_s1 + $0x860] sm:$0xff]  }
  0xd6   :  { %5634 = vmatprep.subr.bf16.mxu1 %v6264_v46  ;;  %v6332_v46 = vld [vmem:[%s8204_s1 + $0x8e0] sm:$0xff]  }
  0xd8   :  { %5613 = vmatpush3.bf16.msra.mxu0 %v6263_v45  ;;  %v6331_v45 = vld [vmem:[%s8204_s1 + $0x820] sm:$0xff]  }
  0xd9   :  { %5635 = vmatpush3.bf16.msra.mxu1 %v6265_v47  ;;  %5614 = vmatprep.subr.bf16.mxu0 %v6266_v48  ;;  %v6333_v47 = vld [vmem:[%s8204_s1 + $0x8a0] sm:$0xff]   ;;  %v6334_v48 = vld [vmem:[%s8204_s1 + $0x858] sm:$0xff]  }
  0xda   :  { %5636 = vmatprep.subr.bf16.mxu1 %v6268_v50  ;;  %v6336_v50 = vld [vmem:[%s8204_s1 + $0x8d8] sm:$0xff]  }
  0xdc   :  { %5615 = vmatpush3.bf16.msra.mxu0 %v6267_v49  ;;  %v6335_v49 = vld [vmem:[%s8204_s1 + $0x818] sm:$0xff]  }
  0xdd   :  { %5637 = vmatpush3.bf16.msra.mxu1 %v6269_v51  ;;  %5616 = vmatprep.subr.bf16.mxu0 %v6270_v52  ;;  %v6337_v51 = vld [vmem:[%s8204_s1 + $0x898] sm:$0xff]   ;;  %v6338_v52 = vld [vmem:[%s8204_s1 + $0x850] sm:$0xff]  }
  0xde   :  { %5638 = vmatprep.subr.bf16.mxu1 %v6272_v54  ;;  %v6340_v54 = vld [vmem:[%s8204_s1 + $0x8d0] sm:$0xff]  }
  0xe0   :  { %5617 = vmatpush3.bf16.msra.mxu0 %v6271_v53  ;;  %v6339_v53 = vld [vmem:[%s8204_s1 + $0x810] sm:$0xff]  }
  0xe1   :  { %5639 = vmatpush3.bf16.msra.mxu1 %v6276_v57  ;;  %5646 = vmatprep.subr.bf16.mxu0 %v6277_v58  ;;  %v6343_v57 = vld [vmem:[%s8204_s1 + $0x808] sm:$0xff]  }
  0xe2   :  { %5668 = vmatprep.subr.bf16.mxu1 %v6282_v62  ;;  %v6344_v58 = vld [vmem:[%s8204_s1 + $0x8c8] sm:$0xff]   ;;  %v6348_v62 = vld [vmem:[%s8204_s1 + $0x8c0] sm:$0xff]  }
  0xe3   :  { %3988 = vmatmul.mubr.bf16.vlgmr.msra.gmra.mxu0 %v6273_v55  ;;  %v6341_v55 = vld [vmem:[%s8204_s1 + $0x890] sm:$0xff]  }
  0xe4   :  { %5647 = vmatpush3.bf16.msra.mxu0 %v6281_v61  ;;  %4029 = vmatmul.mubr.bf16.vlgmr.msra.gmra.mxu1 %v6278_v59  ;;  %v6345_v59 = vld [vmem:[%s8204_s1 + $0x888] sm:$0xff]   ;;  %v6347_v61 = vld [vmem:[%s8204_s1 + $0x800] sm:$0xff]  }
  0xe5   :  { %5669 = vmatpush3.bf16.msra.mxu1 %v6283_v63  ;;  %5648 = vmatprep.subr.bf16.mxu0 %v6284_v0  ;;  %v6349_v63 = vld [vmem:[%s8205_s0 + $0x80] ss:$196 sps:$4 sm:$0xff]  }
  0xe6   :  { %5670 = vmatprep.subr.bf16.mxu1 %v6286_v2  ;;  %4069 = vmatprep.mubr.bf16.mxu0 %v6313_v28  ;;  %v6351_v0 = vld [vmem:[%s8205_s0 + $0x84] ss:$196 sps:$4 sm:$0xff]   ;;  %v6353_v2 = vld [vmem:[%s8204_s1 + $0x978] sm:$0xff]  }
  0xe7   :  { %4110 = vmatprep.mubr.bf16.mxu1 %v6318_v32  ;;  %v6380_v28 = vld [vmem:[%s8204_s1 + $0x948] sm:$0xff]   ;;  %v6384_v32 = vld [vmem:[%s8204_s1 + $0x940] sm:$0xff]  }
  0xe8   :  { %5649 = vmatpush3.bf16.msra.mxu0 %v6285_v1  ;;  %v6352_v1 = vld [vmem:[%s8204_s1 + $0x880] sm:$0xff]  }
  0xe9   :  { %5671 = vmatpush3.bf16.msra.mxu1 %v6287_v3  ;;  %5650 = vmatprep.subr.bf16.mxu0 %v6288_v4  ;;  %v6354_v3 = vld [vmem:[%s8205_s0 + $0x88] ss:$196 sps:$4 sm:$0xff]  }
  0xea   :  { %5672 = vmatprep.subr.bf16.mxu1 %v6290_v6  ;;  %v6356_v4 = vld [vmem:[%s8205_s0 + $0x8c] ss:$196 sps:$4 sm:$0xff]   ;;  %v6358_v6 = vld [vmem:[%s8204_s1 + $0x9f8] sm:$0xff]  }
  0xec   :  { %5651 = vmatpush3.bf16.msra.mxu0 %v6289_v5  ;;  %v6357_v5 = vld [vmem:[%s8204_s1 + $0x938] sm:$0xff]  }
  0xed   :  { %5673 = vmatpush3.bf16.msra.mxu1 %v6291_v7  ;;  %5652 = vmatprep.subr.bf16.mxu0 %v6292_v8  ;;  %v6359_v7 = vld [vmem:[%s8204_s1 + $0x9b8] sm:$0xff]   ;;  %v6360_v8 = vld [vmem:[%s8204_s1 + $0x970] sm:$0xff]  }
  0xee   :  { %5674 = vmatprep.subr.bf16.mxu1 %v6294_v10  ;;  %v6362_v10 = vld [vmem:[%s8204_s1 + $0x9f0] sm:$0xff]  }
  0xf0   :  { %5653 = vmatpush3.bf16.msra.mxu0 %v6293_v9  ;;  %v6361_v9 = vld [vmem:[%s8204_s1 + $0x930] sm:$0xff]  }
  0xf1   :  { %5675 = vmatpush3.bf16.msra.mxu1 %v6295_v11  ;;  %5654 = vmatprep.subr.bf16.mxu0 %v6296_v12  ;;  %v6363_v11 = vld [vmem:[%s8204_s1 + $0x9b0] sm:$0xff]   ;;  %v6364_v12 = vld [vmem:[%s8204_s1 + $0x968] sm:$0xff]  }
  0xf2   :  { %5676 = vmatprep.subr.bf16.mxu1 %v6298_v14  ;;  %v6366_v14 = vld [vmem:[%s8204_s1 + $0x9e8] sm:$0xff]  }
  0xf4   :  { %5655 = vmatpush3.bf16.msra.mxu0 %v6297_v13  ;;  %v6365_v13 = vld [vmem:[%s8204_s1 + $0x928] sm:$0xff]  }
  0xf5   :  { %5677 = vmatpush3.bf16.msra.mxu1 %v6299_v15  ;;  %5656 = vmatprep.subr.bf16.mxu0 %v6300_v16  ;;  %v6367_v15 = vld [vmem:[%s8204_s1 + $0x9a8] sm:$0xff]   ;;  %v6368_v16 = vld [vmem:[%s8204_s1 + $0x960] sm:$0xff]  }
  0xf6   :  { %5678 = vmatprep.subr.bf16.mxu1 %v6302_v18  ;;  %v6370_v18 = vld [vmem:[%s8204_s1 + $0x9e0] sm:$0xff]  }
  0xf8   :  { %5657 = vmatpush3.bf16.msra.mxu0 %v6301_v17  ;;  %v6369_v17 = vld [vmem:[%s8204_s1 + $0x920] sm:$0xff]  }
  0xf9   :  { %5679 = vmatpush3.bf16.msra.mxu1 %v6303_v19  ;;  %5658 = vmatprep.subr.bf16.mxu0 %v6304_v20  ;;  %v6371_v19 = vld [vmem:[%s8204_s1 + $0x9a0] sm:$0xff]   ;;  %v6372_v20 = vld [vmem:[%s8204_s1 + $0x958] sm:$0xff]  }
  0xfa   :  { %5680 = vmatprep.subr.bf16.mxu1 %v6306_v22  ;;  %v6374_v22 = vld [vmem:[%s8204_s1 + $0x9d8] sm:$0xff]  }
  0xfc   :  { %5659 = vmatpush3.bf16.msra.mxu0 %v6305_v21  ;;  %v6373_v21 = vld [vmem:[%s8204_s1 + $0x918] sm:$0xff]  }
  0xfd   :  { %5681 = vmatpush3.bf16.msra.mxu1 %v6307_v23  ;;  %5660 = vmatprep.subr.bf16.mxu0 %v6308_v24  ;;  %v6375_v23 = vld [vmem:[%s8204_s1 + $0x998] sm:$0xff]   ;;  %v6376_v24 = vld [vmem:[%s8204_s1 + $0x950] sm:$0xff]  }
  0xfe   :  { %5682 = vmatprep.subr.bf16.mxu1 %v6310_v26  ;;  %v6378_v26 = vld [vmem:[%s8204_s1 + $0x9d0] sm:$0xff]  }
 0x100   :  { %5661 = vmatpush3.bf16.msra.mxu0 %v6309_v25  ;;  %v6377_v25 = vld [vmem:[%s8204_s1 + $0x910] sm:$0xff]  }
 0x101   :  { %5683 = vmatpush3.bf16.msra.mxu1 %v6314_v29  ;;  %5690 = vmatprep.subr.bf16.mxu0 %v6315_v30  ;;  %v6381_v29 = vld [vmem:[%s8204_s1 + $0x908] sm:$0xff]  }
 0x102   :  { %5712 = vmatprep.subr.bf16.mxu1 %v6320_v34  ;;  %v6382_v30 = vld [vmem:[%s8204_s1 + $0x9c8] sm:$0xff]   ;;  %v6386_v34 = vld [vmem:[%s8204_s1 + $0x9c0] sm:$0xff]  }
 0x103   :  { %4070 = vmatmul.mubr.bf16.vlgmr.msra.gmra.mxu0 %v6311_v27  ;;  %v6379_v27 = vld [vmem:[%s8204_s1 + $0x990] sm:$0xff]  }
 0x104   :  { %5691 = vmatpush3.bf16.msra.mxu0 %v6319_v33  ;;  %4111 = vmatmul.mubr.bf16.vlgmr.msra.gmra.mxu1 %v6316_v31  ;;  %v6383_v31 = vld [vmem:[%s8204_s1 + $0x988] sm:$0xff]   ;;  %v6385_v33 = vld [vmem:[%s8204_s1 + $0x900] sm:$0xff]  }
 0x105   :  { %5713 = vmatpush3.bf16.msra.mxu1 %v6321_v35  ;;  %5692 = vmatprep.subr.bf16.mxu0 %v6322_v36  ;;  %v6387_v35 = vld [vmem:[%s8205_s0 + $0x90] ss:$196 sps:$4 sm:$0xff]  }
 0x106   :  { %5714 = vmatprep.subr.bf16.mxu1 %v6324_v38  ;;  %4151 = vmatprep.mubr.bf16.mxu0 %v6351_v0  ;;  %v6389_v36 = vld [vmem:[%s8205_s0 + $0x94] ss:$196 sps:$4 sm:$0xff]   ;;  %v6418_v0 = vld [vmem:[%s8204_s1 + $0xa48] sm:$0xff]  }
 0x107   :  { %4192 = vmatprep.mubr.bf16.mxu1 %v6356_v4  ;;  %v6391_v38 = vld [vmem:[%s8204_s1 + $0xa78] sm:$0xff]   ;;  %v6422_v4 = vld [vmem:[%s8204_s1 + $0xa40] sm:$0xff]  }
 0x108   :  { %5693 = vmatpush3.bf16.msra.mxu0 %v6323_v37  ;;  %v6390_v37 = vld [vmem:[%s8204_s1 + $0x980] sm:$0xff]  }
 0x109   :  { %5715 = vmatpush3.bf16.msra.mxu1 %v6325_v39  ;;  %5694 = vmatprep.subr.bf16.mxu0 %v6326_v40  ;;  %v6392_v39 = vld [vmem:[%s8205_s0 + $0x98] ss:$196 sps:$4 sm:$0xff]  }
 0x10a   :  { %5716 = vmatprep.subr.bf16.mxu1 %v6328_v42  ;;  %v6394_v40 = vld [vmem:[%s8205_s0 + $0x9c] ss:$196 sps:$4 sm:$0xff]  }
 0x10b   :  { %v6396_v42 = vld [vmem:[%s8204_s1 + $0xaf8] sm:$0xff]  }
 0x10c   :  { %5695 = vmatpush3.bf16.msra.mxu0 %v6327_v41  ;;  %v6395_v41 = vld [vmem:[%s8204_s1 + $0xa38] sm:$0xff]  }
 0x10d   :  { %5717 = vmatpush3.bf16.msra.mxu1 %v6329_v43  ;;  %5696 = vmatprep.subr.bf16.mxu0 %v6330_v44  ;;  %v6397_v43 = vld [vmem:[%s8204_s1 + $0xab8] sm:$0xff]   ;;  %v6398_v44 = vld [vmem:[%s8204_s1 + $0xa70] sm:$0xff]  }
 0x10e   :  { %5718 = vmatprep.subr.bf16.mxu1 %v6332_v46  ;;  %v6400_v46 = vld [vmem:[%s8204_s1 + $0xaf0] sm:$0xff]  }
 0x110   :  { %5697 = vmatpush3.bf16.msra.mxu0 %v6331_v45  ;;  %v6399_v45 = vld [vmem:[%s8204_s1 + $0xa30] sm:$0xff]  }
 0x111   :  { %5719 = vmatpush3.bf16.msra.mxu1 %v6333_v47  ;;  %5698 = vmatprep.subr.bf16.mxu0 %v6334_v48  ;;  %v6401_v47 = vld [vmem:[%s8204_s1 + $0xab0] sm:$0xff]   ;;  %v6402_v48 = vld [vmem:[%s8204_s1 + $0xa68] sm:$0xff]  }
 0x112   :  { %5720 = vmatprep.subr.bf16.mxu1 %v6336_v50  ;;  %v6404_v50 = vld [vmem:[%s8204_s1 + $0xae8] sm:$0xff]  }
 0x114   :  { %5699 = vmatpush3.bf16.msra.mxu0 %v6335_v49  ;;  %v6403_v49 = vld [vmem:[%s8204_s1 + $0xa28] sm:$0xff]  }
 0x115   :  { %5721 = vmatpush3.bf16.msra.mxu1 %v6337_v51  ;;  %5700 = vmatprep.subr.bf16.mxu0 %v6338_v52  ;;  %v6405_v51 = vld [vmem:[%s8204_s1 + $0xaa8] sm:$0xff]   ;;  %v6406_v52 = vld [vmem:[%s8204_s1 + $0xa60] sm:$0xff]  }
 0x116   :  { %5722 = vmatprep.subr.bf16.mxu1 %v6340_v54  ;;  %v6408_v54 = vld [vmem:[%s8204_s1 + $0xae0] sm:$0xff]  }
 0x118   :  { %5701 = vmatpush3.bf16.msra.mxu0 %v6339_v53  ;;  %v6407_v53 = vld [vmem:[%s8204_s1 + $0xa20] sm:$0xff]  }
 0x119   :  { %5723 = vmatpush3.bf16.msra.mxu1 %v6341_v55  ;;  %5702 = vmatprep.subr.bf16.mxu0 %v6342_v56  ;;  %v6409_v55 = vld [vmem:[%s8204_s1 + $0xaa0] sm:$0xff]   ;;  %v6410_v56 = vld [vmem:[%s8204_s1 + $0xa58] sm:$0xff]  }
 0x11a   :  { %5724 = vmatprep.subr.bf16.mxu1 %v6344_v58  ;;  %v6412_v58 = vld [vmem:[%s8204_s1 + $0xad8] sm:$0xff]  }
 0x11c   :  { %5703 = vmatpush3.bf16.msra.mxu0 %v6343_v57  ;;  %v6411_v57 = vld [vmem:[%s8204_s1 + $0xa18] sm:$0xff]  }
 0x11d   :  { %5725 = vmatpush3.bf16.msra.mxu1 %v6345_v59  ;;  %5704 = vmatprep.subr.bf16.mxu0 %v6346_v60  ;;  %v6413_v59 = vld [vmem:[%s8204_s1 + $0xa98] sm:$0xff]   ;;  %v6414_v60 = vld [vmem:[%s8204_s1 + $0xa50] sm:$0xff]  }
 0x11e   :  { %5726 = vmatprep.subr.bf16.mxu1 %v6348_v62  ;;  %v6416_v62 = vld [vmem:[%s8204_s1 + $0xad0] sm:$0xff]  }
 0x120   :  { %5705 = vmatpush3.bf16.msra.mxu0 %v6347_v61  ;;  %v6415_v61 = vld [vmem:[%s8204_s1 + $0xa10] sm:$0xff]  }
 0x121   :  { %5727 = vmatpush3.bf16.msra.mxu1 %v6352_v1  ;;  %5734 = vmatprep.subr.bf16.mxu0 %v6353_v2  ;;  %v6419_v1 = vld [vmem:[%s8204_s1 + $0xa08] sm:$0xff]  }
 0x122   :  { %5756 = vmatprep.subr.bf16.mxu1 %v6358_v6  ;;  %v6420_v2 = vld [vmem:[%s8204_s1 + $0xac8] sm:$0xff]   ;;  %v6424_v6 = vld [vmem:[%s8204_s1 + $0xac0] sm:$0xff]  }
 0x123   :  { %4152 = vmatmul.mubr.bf16.vlgmr.msra.gmra.mxu0 %v6349_v63  ;;  %v6417_v63 = vld [vmem:[%s8204_s1 + $0xa90] sm:$0xff]  }
 0x124   :  { %5735 = vmatpush3.bf16.msra.mxu0 %v6357_v5  ;;  %4193 = vmatmul.mubr.bf16.vlgmr.msra.gmra.mxu1 %v6354_v3  ;;  %v6421_v3 = vld [vmem:[%s8204_s1 + $0xa88] sm:$0xff]   ;;  %v6423_v5 = vld [vmem:[%s8204_s1 + $0xa00] sm:$0xff]  }
 0x125   :  { %5757 = vmatpush3.bf16.msra.mxu1 %v6359_v7  ;;  %5736 = vmatprep.subr.bf16.mxu0 %v6360_v8  ;;  %v6425_v7 = vld [vmem:[%s8205_s0 + $0xa0] ss:$196 sps:$4 sm:$0xff]  }
 0x126   :  { %5758 = vmatprep.subr.bf16.mxu1 %v6362_v10  ;;  %4233 = vmatprep.mubr.bf16.mxu0 %v6389_v36  ;;  %v6427_v8 = vld [vmem:[%s8205_s0 + $0xa4] ss:$196 sps:$4 sm:$0xff]   ;;  %v6429_v10 = vld [vmem:[%s8204_s1 + $0xb78] sm:$0xff]  }
 0x127   :  { %4274 = vmatprep.mubr.bf16.mxu1 %v6394_v40  ;;  %v6456_v36 = vld [vmem:[%s8204_s1 + $0xb48] sm:$0xff]   ;;  %v6460_v40 = vld [vmem:[%s8204_s1 + $0xb40] sm:$0xff]  }
 0x128   :  { %5737 = vmatpush3.bf16.msra.mxu0 %v6361_v9  ;;  %v6428_v9 = vld [vmem:[%s8204_s1 + $0xa80] sm:$0xff]  }
 0x129   :  { %5759 = vmatpush3.bf16.msra.mxu1 %v6363_v11  ;;  %5738 = vmatprep.subr.bf16.mxu0 %v6364_v12  ;;  %v6430_v11 = vld [vmem:[%s8205_s0 + $0xa8] ss:$196 sps:$4 sm:$0xff]  }
 0x12a   :  { %5760 = vmatprep.subr.bf16.mxu1 %v6366_v14  ;;  %v6432_v12 = vld [vmem:[%s8205_s0 + $0xac] ss:$196 sps:$4 sm:$0xff]   ;;  %v6434_v14 = vld [vmem:[%s8204_s1 + $0xbf8] sm:$0xff]  }
 0x12c   :  { %5739 = vmatpush3.bf16.msra.mxu0 %v6365_v13  ;;  %v6433_v13 = vld [vmem:[%s8204_s1 + $0xb38] sm:$0xff]  }
 0x12d   :  { %5761 = vmatpush3.bf16.msra.mxu1 %v6367_v15  ;;  %5740 = vmatprep.subr.bf16.mxu0 %v6368_v16  ;;  %v6435_v15 = vld [vmem:[%s8204_s1 + $0xbb8] sm:$0xff]   ;;  %v6436_v16 = vld [vmem:[%s8204_s1 + $0xb70] sm:$0xff]  }
 0x12e   :  { %5762 = vmatprep.subr.bf16.mxu1 %v6370_v18  ;;  %v6438_v18 = vld [vmem:[%s8204_s1 + $0xbf0] sm:$0xff]  }
 0x130   :  { %5741 = vmatpush3.bf16.msra.mxu0 %v6369_v17  ;;  %v6437_v17 = vld [vmem:[%s8204_s1 + $0xb30] sm:$0xff]  }
 0x131   :  { %5763 = vmatpush3.bf16.msra.mxu1 %v6371_v19  ;;  %5742 = vmatprep.subr.bf16.mxu0 %v6372_v20  ;;  %v6439_v19 = vld [vmem:[%s8204_s1 + $0xbb0] sm:$0xff]   ;;  %v6440_v20 = vld [vmem:[%s8204_s1 + $0xb68] sm:$0xff]  }
 0x132   :  { %5764 = vmatprep.subr.bf16.mxu1 %v6374_v22  ;;  %v6442_v22 = vld [vmem:[%s8204_s1 + $0xbe8] sm:$0xff]  }
 0x134   :  { %5743 = vmatpush3.bf16.msra.mxu0 %v6373_v21  ;;  %v6441_v21 = vld [vmem:[%s8204_s1 + $0xb28] sm:$0xff]  }
 0x135   :  { %5765 = vmatpush3.bf16.msra.mxu1 %v6375_v23  ;;  %5744 = vmatprep.subr.bf16.mxu0 %v6376_v24  ;;  %v6443_v23 = vld [vmem:[%s8204_s1 + $0xba8] sm:$0xff]   ;;  %v6444_v24 = vld [vmem:[%s8204_s1 + $0xb60] sm:$0xff]  }
 0x136   :  { %5766 = vmatprep.subr.bf16.mxu1 %v6378_v26  ;;  %v6446_v26 = vld [vmem:[%s8204_s1 + $0xbe0] sm:$0xff]  }
 0x138   :  { %5745 = vmatpush3.bf16.msra.mxu0 %v6377_v25  ;;  %v6445_v25 = vld [vmem:[%s8204_s1 + $0xb20] sm:$0xff]  }
 0x139   :  { %5767 = vmatpush3.bf16.msra.mxu1 %v6379_v27  ;;  %5746 = vmatprep.subr.bf16.mxu0 %v6380_v28  ;;  %v6447_v27 = vld [vmem:[%s8204_s1 + $0xba0] sm:$0xff]   ;;  %v6448_v28 = vld [vmem:[%s8204_s1 + $0xb58] sm:$0xff]  }
 0x13a   :  { %5768 = vmatprep.subr.bf16.mxu1 %v6382_v30  ;;  %v6450_v30 = vld [vmem:[%s8204_s1 + $0xbd8] sm:$0xff]  }
 0x13c   :  { %5747 = vmatpush3.bf16.msra.mxu0 %v6381_v29  ;;  %v6449_v29 = vld [vmem:[%s8204_s1 + $0xb18] sm:$0xff]  }
 0x13d   :  { %5769 = vmatpush3.bf16.msra.mxu1 %v6383_v31  ;;  %5748 = vmatprep.subr.bf16.mxu0 %v6384_v32  ;;  %v6451_v31 = vld [vmem:[%s8204_s1 + $0xb98] sm:$0xff]   ;;  %v6452_v32 = vld [vmem:[%s8204_s1 + $0xb50] sm:$0xff]  }
 0x13e   :  { %5770 = vmatprep.subr.bf16.mxu1 %v6386_v34  ;;  %v6454_v34 = vld [vmem:[%s8204_s1 + $0xbd0] sm:$0xff]  }
 0x140   :  { %5749 = vmatpush3.bf16.msra.mxu0 %v6385_v33  ;;  %v6453_v33 = vld [vmem:[%s8204_s1 + $0xb10] sm:$0xff]  }
 0x141   :  { %5771 = vmatpush3.bf16.msra.mxu1 %v6390_v37  ;;  %5778 = vmatprep.subr.bf16.mxu0 %v6391_v38  ;;  %v6457_v37 = vld [vmem:[%s8204_s1 + $0xb08] sm:$0xff]  }
 0x142   :  { %5800 = vmatprep.subr.bf16.mxu1 %v6396_v42  ;;  %v6458_v38 = vld [vmem:[%s8204_s1 + $0xbc8] sm:$0xff]   ;;  %v6462_v42 = vld [vmem:[%s8204_s1 + $0xbc0] sm:$0xff]  }
 0x143   :  { %4234 = vmatmul.mubr.bf16.vlgmr.msra.gmra.mxu0 %v6387_v35  ;;  %v6455_v35 = vld [vmem:[%s8204_s1 + $0xb90] sm:$0xff]  }
 0x144   :  { %5779 = vmatpush3.bf16.msra.mxu0 %v6395_v41  ;;  %4275 = vmatmul.mubr.bf16.vlgmr.msra.gmra.mxu1 %v6392_v39  ;;  %v6459_v39 = vld [vmem:[%s8204_s1 + $0xb88] sm:$0xff]   ;;  %v6461_v41 = vld [vmem:[%s8204_s1 + $0xb00] sm:$0xff]  }
 0x145   :  { %5801 = vmatpush3.bf16.msra.mxu1 %v6397_v43  ;;  %5780 = vmatprep.subr.bf16.mxu0 %v6398_v44  ;;  %v6463_v43 = vld [vmem:[%s8205_s0 + $0xb0] ss:$196 sps:$4 sm:$0xff]  }
 0x146   :  { %5802 = vmatprep.subr.bf16.mxu1 %v6400_v46  ;;  %4315 = vmatprep.mubr.bf16.mxu0 %v6427_v8  ;;  %v6465_v44 = vld [vmem:[%s8205_s0 + $0xb4] ss:$196 sps:$4 sm:$0xff]   ;;  %v8208_v46 = vmov 0.0  }
 0x147   :  { %4356 = vmatprep.mubr.bf16.mxu1 %v6432_v12  ;;  %v7892_v8 = vld [vmem:[%s8206_s2 + $0x30] sm:$0xff]   ;;  %v7906_v12 = vld [vmem:[%s8206_s2 + $0x28] sm:$0xff]  }
 0x148   :  { %5781 = vmatpush3.bf16.msra.mxu0 %v6399_v45  ;;  %v6466_v45 = vld [vmem:[%s8204_s1 + $0xb80] sm:$0xff]   ;;  %8227 = vst [vmem:[#allocation3_spill] sm:$0xff] %v7892_v8  ;;  %8228 = vst [vmem:[#allocation4_spill] sm:$0xff] %v7906_v12 }
 0x149   :  { %5803 = vmatpush3.bf16.msra.mxu1 %v6401_v47  ;;  %5782 = vmatprep.subr.bf16.mxu0 %v6402_v48  ;;  %v6467_v47 = vld [vmem:[%s8205_s0 + $0xb8] ss:$196 sps:$4 sm:$0xff]  }
 0x14a   :  { %5804 = vmatprep.subr.bf16.mxu1 %v6404_v50  ;;  %v6469_v48 = vld [vmem:[%s8205_s0 + $0xbc] ss:$196 sps:$4 sm:$0xff]   ;;  %v6471_v50 = vld [vmem:[%s8204_s1 + $0xc30] sm:$0xff]  }
 0x14c   :  { %5783 = vmatpush3.bf16.msra.mxu0 %v6403_v49  ;;  %v6470_v49 = vld [vmem:[%s8204_s1 + $0xc38] sm:$0xff]  }
 0x14d   :  { %5805 = vmatpush3.bf16.msra.mxu1 %v6405_v51  ;;  %5784 = vmatprep.subr.bf16.mxu0 %v6406_v52  ;;  %v6472_v51 = vld [vmem:[%s8204_s1 + $0xc28] sm:$0xff]   ;;  %v6473_v52 = vld [vmem:[%s8204_s1 + $0xc20] sm:$0xff]  }
 0x14e   :  { %5806 = vmatprep.subr.bf16.mxu1 %v6408_v54  ;;  %v6475_v54 = vld [vmem:[%s8204_s1 + $0xc10] sm:$0xff]  }
 0x150   :  { %5785 = vmatpush3.bf16.msra.mxu0 %v6407_v53  ;;  %v6474_v53 = vld [vmem:[%s8204_s1 + $0xc18] sm:$0xff]  }
 0x151   :  { %5807 = vmatpush3.bf16.msra.mxu1 %v6409_v55  ;;  %5786 = vmatprep.subr.bf16.mxu0 %v6410_v56  ;;  %v6476_v55 = vld [vmem:[%s8204_s1 + $0xc08] sm:$0xff]   ;;  %v6477_v56 = vld [vmem:[%s8204_s1 + $0xc00] sm:$0xff]  }
 0x152   :  { %5808 = vmatprep.subr.bf16.mxu1 %v6412_v58  ;;  %v7857_v58 = vpop.f32.mrf.mxu0 }
 0x154   :  { %5787 = vmatpush3.bf16.msra.mxu0 %v6411_v57  ;;  %v6478_v57 = vld [vmem:[%s8205_s0 + $0xc0] ss:$196 sps:$4 sm:$0xff]  }
 0x155   :  { %5809 = vmatpush3.bf16.msra.mxu1 %v6413_v59  ;;  %5788 = vmatprep.subr.bf16.mxu0 %v6414_v60  ;;  %v7859_v59 = vpop.f32.mrf.mxu1  ;;  %v7861_v60 = vpop.f32.mrf.mxu0 }
 0x156   :  { %5810 = vmatprep.subr.bf16.mxu1 %v6416_v62 }
 0x157   :  { %v7865_v62 = vpop.f32.mrf.mxu0 }
 0x158   :  { %5789 = vmatpush3.bf16.msra.mxu0 %v6415_v61  ;;  %v7863_v61 = vpop.f32.mrf.mxu1 }
 0x159   :  { %5811 = vmatpush3.bf16.msra.mxu1 %v6417_v63  ;;  %5790 = vmatprep.subr.bf16.mxu0 %v6418_v0  ;;  %v7869_v0 = vpop.f32.mrf.mxu0 }
 0x15a   :  { %5812 = vmatprep.subr.bf16.mxu1 %v6420_v2  ;;  %v7867_v63 = vpop.f32.mrf.mxu1 }
 0x15c   :  { %5791 = vmatpush3.bf16.msra.mxu0 %v6419_v1  ;;  %v7871_v1 = vpop.f32.mrf.mxu0  ;;  %v7873_v2 = vpop.f32.mrf.mxu1 }
 0x15d   :  { %5813 = vmatpush3.bf16.msra.mxu1 %v6421_v3  ;;  %5792 = vmatprep.subr.bf16.mxu0 %v6422_v4 }
 0x15e   :  { %5814 = vmatprep.subr.bf16.mxu1 %v6424_v6  ;;  %v7875_v3 = vpop.f32.mrf.mxu0  ;;  %v7877_v4 = vpop.f32.mrf.mxu1 }
 0x160   :  { %5793 = vmatpush3.bf16.msra.mxu0 %v6423_v5  ;;  %v7879_v5 = vpop.f32.mrf.mxu0  ;;  %v7881_v6 = vpop.f32.mrf.mxu1 }
 0x161   :  { %5815 = vmatpush3.bf16.msra.mxu1 %v6428_v9  ;;  %5822 = vmatprep.subr.bf16.mxu0 %v6429_v10 }
 0x162   :  { %5844 = vmatprep.subr.bf16.mxu1 %v6434_v14  ;;  %v7895_v9 = vpop.f32.mrf.mxu0  ;;  %v7897_v10 = vpop.f32.mrf.mxu1 }
 0x163   :  { %4316 = vmatmul.mubr.bf16.vlgmr.msra.gmra.mxu0 %v6425_v7  ;;  %v7886_v7 = vld [vmem:[%s8206_s2 + $0x38] sm:$0xff]  }
 0x164   :  { %5823 = vmatpush3.bf16.msra.mxu0 %v6433_v13  ;;  %4357 = vmatmul.mubr.bf16.vlgmr.msra.gmra.mxu1 %v6430_v11  ;;  %8226 = vst [vmem:[#allocation2_spill] sm:$0xff] %v7886_v7  ;;  %v7901_v11 = vpop.f32.mrf.mxu0  ;;  %v7910_v13 = vpop.f32.mrf.mxu1 }
 0x165   :  { %5845 = vmatpush3.bf16.msra.mxu1 %v6435_v15  ;;  %5824 = vmatprep.subr.bf16.mxu0 %v6436_v16  ;;  %v7922_v16 = vld [vmem:[%s8206_s2 + $0x20] sm:$0xff]  }
 0x166   :  { %5846 = vmatprep.subr.bf16.mxu1 %v6438_v18  ;;  %4397 = vmatprep.mubr.bf16.mxu0 %v6465_v44  ;;  %v7914_v14 = vpop.f32.mrf.mxu0  ;;  %v7916_v15 = vpop.f32.mrf.mxu1  ;;  %8229 = vst [vmem:[#allocation5_spill] sm:$0xff] %v7922_v16 }
 0x167   :  { %4438 = vmatprep.mubr.bf16.mxu1 %v6469_v48 }
 0x168   :  { %5825 = vmatpush3.bf16.msra.mxu0 %v6437_v17  ;;  %v7927_v17 = vpop.f32.mrf.mxu0  ;;  %v7929_v18 = vpop.f32.mrf.mxu1 }
 0x169   :  { %5847 = vmatpush3.bf16.msra.mxu1 %v6439_v19  ;;  %5826 = vmatprep.subr.bf16.mxu0 %v6440_v20  ;;  %v7935_v19 = vld [vmem:[%s8206_s2 + $0x18] sm:$0xff]  }
 0x16a   :  { %5848 = vmatprep.subr.bf16.mxu1 %v6442_v22  ;;  %8230 = vst [vmem:[#allocation6_spill] sm:$0xff] %v7935_v19  ;;  %v7940_v20 = vpop.f32.mrf.mxu0  ;;  %v7948_v22 = vld [vmem:[%s8206_s2 + $0x10] sm:$0xff]  }
 0x16b   :  { %8231 = vst [vmem:[#allocation7_spill] sm:$0xff] %v7948_v22 }
 0x16c   :  { %5827 = vmatpush3.bf16.msra.mxu0 %v6441_v21  ;;  %v7942_v21 = vpop.f32.mrf.mxu1 }
 0x16d   :  { %5849 = vmatpush3.bf16.msra.mxu1 %v6443_v23  ;;  %5828 = vmatprep.subr.bf16.mxu0 %v6444_v24  ;;  %v7951_v23 = vpop.f32.mrf.mxu0 }
 0x16e   :  { %5850 = vmatprep.subr.bf16.mxu1 %v6446_v26  ;;  %v7955_v24 = vpop.f32.mrf.mxu1 }
 0x170   :  { %5829 = vmatpush3.bf16.msra.mxu0 %v6445_v25  ;;  %v7959_v25 = vpop.f32.mrf.mxu0  ;;  %v7961_v26 = vpop.f32.mrf.mxu1 }
 0x171   :  { %5851 = vmatpush3.bf16.msra.mxu1 %v6447_v27  ;;  %5830 = vmatprep.subr.bf16.mxu0 %v6448_v28  ;;  %v7968_v27 = vld [vmem:[%s8206_s2 + $0x8] sm:$0xff]  }
 0x172   :  { %5852 = vmatprep.subr.bf16.mxu1 %v6450_v30  ;;  %8232 = vst [vmem:[#allocation8_spill] sm:$0xff] %v7968_v27  ;;  %v7972_v28 = vpop.f32.mrf.mxu0  ;;  %v7981_v30 = vld [vmem:[%s8206_s2] sm:$0xff]  }
 0x173   :  { %8233 = vst [vmem:[#allocation9_spill] sm:$0xff] %v7981_v30 }
 0x174   :  { %5831 = vmatpush3.bf16.msra.mxu0 %v6449_v29  ;;  %v7974_v29 = vpop.f32.mrf.mxu1 }
 0x175   :  { %5853 = vmatpush3.bf16.msra.mxu1 %v6451_v31  ;;  %5832 = vmatprep.subr.bf16.mxu0 %v6452_v32  ;;  %v7985_v31 = vpop.f32.mrf.mxu0 }
 0x176   :  { %5854 = vmatprep.subr.bf16.mxu1 %v6454_v34  ;;  %v7987_v32 = vpop.f32.mrf.mxu1 }
 0x178   :  { %5833 = vmatpush3.bf16.msra.mxu0 %v6453_v33  ;;  %v7991_v33 = vpop.f32.mrf.mxu0  ;;  %v7993_v34 = vpop.f32.mrf.mxu1 }
 0x179   :  { %5855 = vmatpush3.bf16.msra.mxu1 %v6455_v35  ;;  %5834 = vmatprep.subr.bf16.mxu0 %v6456_v36 }
 0x17a   :  { %5856 = vmatprep.subr.bf16.mxu1 %v6458_v38  ;;  %v5531_v35 = vpop.f32.mrf.mxu0  ;;  %v7995_v36 = vpop.f32.mrf.mxu1 }
 0x17c   :  { %5835 = vmatpush3.bf16.msra.mxu0 %v6457_v37  ;;  %v7997_v37 = vpop.f32.mrf.mxu0  ;;  %v7999_v38 = vpop.f32.mrf.mxu1 }
 0x17d   :  { %5857 = vmatpush3.bf16.msra.mxu1 %v6459_v39  ;;  %5836 = vmatprep.subr.bf16.mxu0 %v6460_v40 }
 0x17e   :  { %5858 = vmatprep.subr.bf16.mxu1 %v6462_v42  ;;  %v8001_v39 = vpop.f32.mrf.mxu0  ;;  %v8003_v40 = vpop.f32.mrf.mxu1 }
 0x180   :  { %5837 = vmatpush3.bf16.msra.mxu0 %v6461_v41  ;;  %v8007_v42 = vpop.f32.mrf.mxu1 }
 0x181   :  { %5911 = vmatprep.subr.bf16.mxu0 %v8208_v46  ;;  %5859 = vmatpush3.bf16.msra.mxu1 %v6466_v45 }
 0x182   :  { %5931 = vmatprep.subr.bf16.mxu1 %v8208_v46 }
 0x183   :  { %4398 = vmatmul.mubr.bf16.vlgmr.msra.gmra.mxu0 %v6463_v43  ;;  %v8005_v41 = vpop.f32.mrf.mxu0 }
 0x184   :  { %5927 = vmatprep.mubr.msk.bf16.mxu0 %vm6496_vm0, %v8208_v46  ;;  %5912 = vmatpush3.bf16.msra.mxu0 %v6470_v49  ;;  %v8011_v44 = vpop.f32.mrf.mxu1 }
 0x185   :  { %4439 = vmatmul.mubr.bf16.vlgmr.msra.gmra.mxu1 %v6467_v47  ;;  %5913 = vmatprep.subr.bf16.mxu0 %v8208_v46  ;;  %v8009_v43 = vpop.f32.mrf.mxu0 }
 0x186   :  { %5947 = vmatprep.mubr.msk.bf16.mxu1 %vm6496_vm0, %v8208_v46  ;;  %5932 = vmatpush3.bf16.msra.mxu1 %v7886_v7  ;;  %v8015_v47 = vpop.f32.mrf.mxu1 }
 0x187   :  { %5933 = vmatprep.subr.bf16.mxu1 %v8208_v46  ;;  %v8013_v45 = vpop.f32.mrf.mxu0 }
 0x188   :  { %5914 = vmatpush3.bf16.msra.mxu0 %v6471_v50  ;;  %v8019_v49 = vpop.f32.mrf.mxu1 }
 0x189   :  { %5915 = vmatprep.subr.bf16.mxu0 %v8208_v46  ;;  %v8017_v48 = vpop.f32.mrf.mxu0 }
 0x18a   :  { %5934 = vmatpush3.bf16.msra.mxu1 %v7892_v8 }
 0x18b   :  { %5935 = vmatprep.subr.bf16.mxu1 %v8208_v46 }
 0x18c   :  { %5916 = vmatpush3.bf16.msra.mxu0 %v6472_v51  ;;  %v8023_v51 = vpop.f32.mrf.mxu1 }
 0x18d   :  { %5917 = vmatprep.subr.bf16.mxu0 %v8208_v46 }
 0x18e   :  { %5936 = vmatpush3.bf16.msra.mxu1 %v7906_v12 }
 0x18f   :  { %5937 = vmatprep.subr.bf16.mxu1 %v8208_v46 }
 0x190   :  { %5918 = vmatpush3.bf16.msra.mxu0 %v6473_v52 }
 0x191   :  { %5919 = vmatprep.subr.bf16.mxu0 %v8208_v46 }
 0x192   :  { %5938 = vmatpush3.bf16.msra.mxu1 %v7922_v16 }
 0x193   :  { %5939 = vmatprep.subr.bf16.mxu1 %v8208_v46 }
 0x194   :  { %5920 = vmatpush3.bf16.msra.mxu0 %v6474_v53 }
 0x195   :  { %5921 = vmatprep.subr.bf16.mxu0 %v8208_v46 }
 0x196   :  { %5940 = vmatpush3.bf16.msra.mxu1 %v7935_v19 }
 0x197   :  { %5941 = vmatprep.subr.bf16.mxu1 %v8208_v46 }
 0x198   :  { %5922 = vmatpush3.bf16.msra.mxu0 %v6475_v54 }
 0x199   :  { %5923 = vmatprep.subr.bf16.mxu0 %v8208_v46 }
 0x19a   :  { %5942 = vmatpush3.bf16.msra.mxu1 %v7948_v22 }
 0x19b   :  { %5943 = vmatprep.subr.bf16.mxu1 %v8208_v46 }
 0x19c   :  { %5924 = vmatpush3.bf16.msra.mxu0 %v6476_v55 }
 0x19d   :  { %5925 = vmatprep.subr.bf16.mxu0 %v8208_v46 }
 0x19e   :  { %5944 = vmatpush3.bf16.msra.mxu1 %v7968_v27 }
 0x19f   :  { %5945 = vmatprep.subr.bf16.mxu1 %v8208_v46 }
 0x1a0   :  { %5926 = vmatpush3.bf16.msra.mxu0 %v6477_v56 }
 0x1a1   :  { %5951 = vmatprep.subr.bf16.mxu0 %v8208_v46 }
 0x1a2   :  { %5946 = vmatpush3.bf16.msra.mxu1 %v7981_v30 }
 0x1a3   :  { %5928 = vmatmul.mubr.bf16.vlgmr.msra.gmra.mxu0 %v6478_v57  ;;  %5971 = vmatprep.subr.bf16.mxu1 %v8208_v46  ;;  %v8021_v50 = vpop.f32.mrf.mxu0 }
 0x1a4   :  { %5967 = vmatprep.mubr.msk.bf16.mxu0 %vm6496_vm0, %v8208_v46  ;;  %5952 = vmatpush3.bf16.msra.mxu0 %v7886_v7  ;;  %v8027_v53 = vpop.f32.mrf.mxu1 }
 0x1a5   :  { %5953 = vmatprep.subr.bf16.mxu0 %v8208_v46  ;;  %v8025_v52 = vpop.f32.mrf.mxu0 }
 0x1a6   :  { %v8031_v55 = vpop.f32.mrf.mxu1 }
 0x1a7   :  { %v8029_v54 = vpop.f32.mrf.mxu0 }
 0x1a8   :  { %5954 = vmatpush3.bf16.msra.mxu0 %v7892_v8  ;;  %v8035_v57 = vpop.f32.mrf.mxu1 }
 0x1a9   :  { %5955 = vmatprep.subr.bf16.mxu0 %v8208_v46  ;;  %v8033_v56 = vpop.f32.mrf.mxu0  ;;  %8234 = vst [vmem:[#allocation10_spill] sm:$0xff] %v8035_v57 }
 0x1ac   :  { %5956 = vmatpush3.bf16.msra.mxu0 %v7906_v12  ;;  %v5400_v12 = vadd.f32 %v7875_v3, %v7871_v1  ;;  %v5444_v3 = vadd.f32 %v7914_v14, %v7901_v11  ;;  %v5488_v14 = vadd.f32 %v7959_v25, %v7951_v23 }
 0x1ad   :  { %5957 = vmatprep.subr.bf16.mxu0 %v8208_v46 }
 0x1b0   :  { %5958 = vmatpush3.bf16.msra.mxu0 %v7922_v16  ;;  %v5378_v16 = vadd.f32 %v7863_v61, %v7859_v59  ;;  %v5403_v59 = vadd.f32 %v7895_v9, %v7879_v5  ;;  %v5466_v5 = vadd.f32 %v7929_v18, %v7916_v15  ;;  %v5510_v15 = vadd.f32 %v7974_v29, %v7961_v26 }
 0x1b1   :  { %5959 = vmatprep.subr.bf16.mxu0 %v8208_v46  ;;  %v5535_v26 = vadd.f32 %v8001_v39, %v7997_v37 }
 0x1b4   :  { %5960 = vmatpush3.bf16.msra.mxu0 %v7935_v19  ;;  %v5356_v19 = vadd.f32 %v7861_v60, %v7857_v58  ;;  %v5422_v58 = vadd.f32 %v7881_v6, %v7877_v4  ;;  %v5447_v6 = vadd.f32 %v7940_v20, %v7927_v17  ;;  %v5491_v17 = vadd.f32 %v7985_v31, %v7972_v28 }
 0x1b5   :  { %5961 = vmatprep.subr.bf16.mxu0 %v8208_v46  ;;  %v5532_v20 = vadd.f32 %v5531_v35, %v7991_v33  ;;  %v5576_v31 = vadd.f32 %v8009_v43, %v8005_v41  ;;  %v5620_v41 = vadd.f32 %v8025_v52, %v8021_v50 }
 0x1b6   :  { %v3539_v57 = vadd.f32 %v5378_v16, %v5356_v19 }
 0x1b8   :  { %5962 = vmatpush3.bf16.msra.mxu0 %v7948_v22 }
 0x1b9   :  { %5963 = vmatprep.subr.bf16.mxu0 %v8208_v46 }
 0x1bc   :  { %5964 = vmatpush3.bf16.msra.mxu0 %v7968_v27 }
 0x1bd   :  { %5965 = vmatprep.subr.bf16.mxu0 %v8208_v46 }
 0x1c0   :  { %5966 = vmatpush3.bf16.msra.mxu0 %v7981_v30  ;;  %v8039_v30 = vpop.f32.mrf.mxu1 }
 0x1c1   :  { %5991 = vmatprep.subr.bf16.mxu0 %v8208_v46  ;;  %8235 = vst [vmem:[#allocation11_spill] sm:$0xff] %v8039_v30  ;;  %v5359_v30 = vadd.f32 %v7869_v0, %v7865_v62 }
 0x1c3   :  { %v8037_v46 = vpop.f32.mrf.mxu0 }
 0x1c4   :  { %v8043_v22 = vpop.f32.mrf.mxu1 }
 0x1c5   :  { %v8041_v27 = vpop.f32.mrf.mxu0  ;;  %8237 = vst [vmem:[#allocation13_spill] sm:$0xff] %v8043_v22  ;;  %v5381_v22 = vadd.f32 %v7873_v2, %v7867_v63  ;;  %v5425_v63 = vadd.f32 %v7910_v13, %v7897_v10  ;;  %v5469_v10 = vadd.f32 %v7955_v24, %v7942_v21 }
 0x1c6   :  { %8236 = vst [vmem:[#allocation12_spill] sm:$0xff] %v8041_v27  ;;  %v8053_v7 = vpop.f32.mrf.mxu1  ;;  %v3580_v27 = vadd.f32 %v5400_v12, %v3539_v57 }
 0x1c7   :  { %v8051_v8 = vpop.f32.mrf.mxu0  ;;  %v3542_v1 = vadd.f32 %v5381_v22, %v5359_v30 }
 0x1c8   :  { %v8065_v61 = vpop.f32.mrf.mxu1  ;;  %v3621_v62 = vadd.f32 %v5422_v58, %v3580_v27 }
 0x1c9   :  { %v8063_v60 = vpop.f32.mrf.mxu0  ;;  %v3583_v0 = vadd.f32 %v5403_v59, %v3542_v1  ;;  %v5513_v59 = vadd.f32 %v7993_v34, %v7987_v32  ;;  %v5554_v1 = vadd.f32 %v7999_v38, %v7995_v36  ;;  %v5557_v32 = vadd.f32 %v8007_v42, %v8003_v40 }
 0x1ca   :  { %v8073_v2 = vpop.f32.mrf.mxu1  ;;  %v3662_v4 = vadd.f32 %v5444_v3, %v3621_v62  ;;  %v5579_v36 = vadd.f32 %v8017_v48, %v8013_v45  ;;  %v5623_v45 = vadd.f32 %v8033_v56, %v8029_v54  ;;  %v5667_v54 = vadd.f32 %v8063_v60, %v8051_v8 }
 0x1cb   :  { %v3624_v11 = vadd.f32 %v5425_v63, %v3583_v0  ;;  %v5598_v0 = vadd.f32 %v8015_v47, %v8011_v44  ;;  %v5642_v44 = vadd.f32 %v8031_v55, %v8027_v53 }
 0x1cc   :  { %v3703_v19 = vadd.f32 %v5466_v5, %v3662_v4  ;;  %v5601_v4 = vadd.f32 %v8023_v51, %v8019_v49 }
 0x1cd   :  { %v3665_v22 = vadd.f32 %v5447_v6, %v3624_v11  ;;  %v8238_v6 = vld [vmem:[#allocation12_spill] sm:$0xff] }
 0x1ce   :  { %v3744_v30 = vadd.f32 %v5488_v14, %v3703_v19  ;;  %v5664_v11 = vadd.f32 %v8238_v6, %v8037_v46  ;;  %v8239_v19 = vld [vmem:[#allocation10_spill] sm:$0xff] }
 0x1cf   :  { %v3706_v18 = vadd.f32 %v5469_v10, %v3665_v22  ;;  %v8240_v22 = vld [vmem:[#allocation11_spill] sm:$0xff] }
 0x1d0   :  { %v3785_v23 = vadd.f32 %v5510_v15, %v3744_v30  ;;  %v5645_v49 = vadd.f32 %v8240_v22, %v8239_v19  ;;  %v8241_v15 = vld [vmem:[#allocation13_spill] sm:$0xff] }
 0x1d1   :  { %v3747_v25 = vadd.f32 %v5491_v17, %v3706_v18  ;;  %v5686_v53 = vadd.f32 %v8053_v7, %v8241_v15 }
 0x1d2   :  { %v3826_v24 = vadd.f32 %v5532_v20, %v3785_v23  ;;  %v5689_v23 = vadd.f32 %v8073_v2, %v8065_v61 }
 0x1d3   :  { %v3788_v28 = vadd.f32 %v5513_v59, %v3747_v25 }
 0x1d4   :  { %v3867_v3 = vadd.f32 %v5554_v1, %v3826_v24 }
 0x1d5   :  { %v3829_v62 = vadd.f32 %v5535_v26, %v3788_v28 }
 0x1d6   :  { %v3908_v34 = vadd.f32 %v5576_v31, %v3867_v3 }
 0x1d7   :  { %v3870_v39 = vadd.f32 %v5557_v32, %v3829_v62 }
 0x1d8   :  { %v3949_v43 = vadd.f32 %v5598_v0, %v3908_v34 }
 0x1d9   :  { %v3911_v63 = vadd.f32 %v5579_v36, %v3870_v39 }
 0x1da   :  { %v3990_v42 = vadd.f32 %v5620_v41, %v3949_v43 }
 0x1db   :  { %v3952_v48 = vadd.f32 %v5601_v4, %v3911_v63 }
 0x1dc   :  { %v4031_v52 = vadd.f32 %v5642_v44, %v3990_v42 }
 0x1dd   :  { %v3993_v14 = vadd.f32 %v5623_v45, %v3952_v48 }
 0x1de   :  { %v4072_v30 = vadd.f32 %v5664_v11, %v4031_v52 }
 0x1df   :  { %v4034_v55 = vadd.f32 %v5645_v49, %v3993_v14  ;;  %v8242_v49 = vmov 0.0  }
 0x1e0   :  { %v4113_v18 = vadd.f32 %v5686_v53, %v4072_v30 }
 0x1e1   :  { %v4075_v20 = vadd.f32 %v5667_v54, %v4034_v55  ;;  %v6497_v55 = vmov 1.0|1.0  }
 0x1e3   :  { %v8069_v16 = vpop.f32.mrf.mxu0  ;;  %v4116_v7 = vadd.f32 %v5689_v23, %v4075_v20  ;;  %v8244_v23 = vld [vmem:[#allocation3_spill] sm:$0xff] }
 0x1e4   :  { %v8079_v12 = vpop.f32.mrf.mxu1 }
 0x1e5   :  { %v5707_v9 = vpop.f32.mrf.mxu0 }
 0x1e6   :  { %v5729_v27 = vpop.f32.mrf.mxu1  ;;  %v5708_v56 = vadd.f32 %v5707_v9, %v8069_v16 }
 0x1e7   :  { %v5709_v13 = vpop.f32.mrf.mxu0  ;;  %v5730_v59 = vadd.f32 %v5729_v27, %v8079_v12 }
 0x1e8   :  { %v5731_v58 = vpop.f32.mrf.mxu1  ;;  %v4154_v25 = vadd.f32 %v5708_v56, %v4113_v18 }
 0x1e9   :  { %v5710_v57 = vpop.f32.mrf.mxu0 }
 0x1ea   :  { %v5732_v29 = vpop.f32.mrf.mxu1  ;;  %v5711_v24 = vadd.f32 %v5710_v57, %v5709_v13  ;;  %v4195_v8 = vadd.f32 %v5730_v59, %v4154_v25 }
 0x1eb   :  { %v5733_v3 = vadd.f32 %v5732_v29, %v5731_v58 }
 0x1ec   :  { %v4157_v60 = vadd.f32 %v5711_v24, %v4116_v7 }
 0x1ee   :  { %v4198_v36 = vadd.f32 %v5733_v3, %v4157_v60  ;;  %v8246_v60 = vld [vmem:[#allocation5_spill] sm:$0xff] }
 0x203   :  { %v5750_v21 = vpop.f32.mrf.mxu0 }
 0x204   :  { %v5772_v35 = vpop.f32.mrf.mxu1 }
 0x205   :  { %v5751_v33 = vpop.f32.mrf.mxu0 }
 0x206   :  { %v5773_v38 = vpop.f32.mrf.mxu1  ;;  %v5752_v28 = vadd.f32 %v5751_v33, %v5750_v21 }
 0x207   :  { %v5753_v37 = vpop.f32.mrf.mxu0  ;;  %v5774_v62 = vadd.f32 %v5773_v38, %v5772_v35 }
 0x208   :  { %v5775_v40 = vpop.f32.mrf.mxu1  ;;  %v4236_v9 = vadd.f32 %v5752_v28, %v4195_v8 }
 0x209   :  { %v5754_v5 = vpop.f32.mrf.mxu0 }
 0x20a   :  { %v5776_v50 = vpop.f32.mrf.mxu1  ;;  %v5755_v32 = vadd.f32 %v5754_v5, %v5753_v37  ;;  %v4277_v2 = vadd.f32 %v5774_v62, %v4236_v9  ;;  %v8247_v62 = vld [vmem:[#allocation6_spill] sm:$0xff] }
 0x20b   :  { %v5777_v12 = vadd.f32 %v5776_v50, %v5775_v40 }
 0x20c   :  { %v4239_v39 = vadd.f32 %v5755_v32, %v4198_v36 }
 0x20e   :  { %v4280_v33 = vadd.f32 %v5777_v12, %v4239_v39 }
 0x223   :  { %v5794_v47 = vpop.f32.mrf.mxu0 }
 0x224   :  { %v5816_v10 = vpop.f32.mrf.mxu1 }
 0x225   :  { %v5795_v51 = vpop.f32.mrf.mxu0 }
 0x226   :  { %v5817_v46 = vpop.f32.mrf.mxu1  ;;  %v5796_v61 = vadd.f32 %v5795_v51, %v5794_v47 }
 0x227   :  { %v5797_v17 = vpop.f32.mrf.mxu0  ;;  %v5818_v41 = vadd.f32 %v5817_v46, %v5816_v10 }
 0x228   :  { %v5819_v26 = vpop.f32.mrf.mxu1  ;;  %v4318_v57 = vadd.f32 %v5796_v61, %v4277_v2  ;;  %v8249_v2 = vld [vmem:[#allocation8_spill] sm:$0xff] }
 0x229   :  { %v5798_v1 = vpop.f32.mrf.mxu0 }
 0x22a   :  { %v5820_v16 = vpop.f32.mrf.mxu1  ;;  %v5799_v21 = vadd.f32 %v5798_v1, %v5797_v17  ;;  %v4359_v29 = vadd.f32 %v5818_v41, %v4318_v57  ;;  %v8243_v17 = vld [vmem:[#allocation2_spill] sm:$0xff] }
 0x22b   :  { %v5821_v35 = vadd.f32 %v5820_v16, %v5819_v26  ;;  %v8245_v26 = vld [vmem:[#allocation4_spill] sm:$0xff] }
 0x22c   :  { %v4321_v4 = vadd.f32 %v5799_v21, %v4280_v33 }
 0x22e   :  { %v4362_v44 = vadd.f32 %v5821_v35, %v4321_v4 }
 0x243   :  { %v5838_v31 = vpop.f32.mrf.mxu0 }
 0x245   :  { %v5839_v34 = vpop.f32.mrf.mxu0  ;;  %v5860_v0 = vpop.f32.mrf.mxu1 }
 0x246   :  { %v5840_v43 = vadd.f32 %v5839_v34, %v5838_v31  ;;  %v8248_v34 = vld [vmem:[#allocation7_spill] sm:$0xff] }
 0x247   :  { %v5841_v13 = vpop.f32.mrf.mxu0  ;;  %v5861_v27 = vpop.f32.mrf.mxu1 }
 0x248   :  { %v4400_v37 = vadd.f32 %v5840_v43, %v4359_v29  ;;  %v5862_v38 = vadd.f32 %v5861_v27, %v5860_v0 }
 0x249   :  { %v5842_v63 = vpop.f32.mrf.mxu0  ;;  %v5863_v58 = vpop.f32.mrf.mxu1 }
 0x24a   :  { %v5843_v5 = vadd.f32 %v5842_v63, %v5841_v13  ;;  %v4441_v40 = vadd.f32 %v5862_v38, %v4400_v37  ;;  %v8250_v13 = vld [vmem:[#allocation9_spill] sm:$0xff] }
 0x24b   :  { %v5864_v42 = vpop.f32.mrf.mxu1 }
 0x24c   :  { %v4403_v45 = vadd.f32 %v5843_v5, %v4362_v44  ;;  %v5865_v47 = vadd.f32 %v5864_v42, %v5863_v58 }
 0x24e   :  { %v4444_v52 = vadd.f32 %v5865_v47, %v4403_v45 }
 0x263   :  { %v4481_v48 = vpop.f32.mrf.mxu0 }
 0x264   :  { %v4482_v6 = vadd.f32 %v4481_v48, %v4441_v40 }
 0x265   :  { %v5929_v11 = vpop.f32.mrf.mxu0 }
 0x266   :  { %v8124_v50 = vmul.f32 0.5, %v4482_v6 }
 0x267   :  { %v4484_v14 = vpop.f32.mrf.mxu0 }
 0x268   :  { %v4485_v19 = vadd.f32 %v4484_v14, %v4444_v52  ;;  %vm4494_vm1 = vcmp.ge.f32.partialorder %v8124_v50, 1.0 }
 0x269   :  { %v5930_v22 = vpop.f32.mrf.mxu0  ;;  %v5306_v51 = vsel %vm4494_vm1, 1.0, %v8242_v49 }
 0x26a   :  { %v8128_v10 = vmul.f32 0.5, %v4485_v19  ;;  %v4500_v30 = vsub.f32 1.0, %v5306_v51 }
 0x26c   :  { %vm4495_vm2 = vcmp.ge.f32.partialorder %v8128_v10, 1.0  ;;  %v4502_v15 = vmul.f32 %v4500_v30, %v8124_v50 }
 0x26d   :  { %v5307_v53 = vsel %vm4495_vm2, 1.0, %v8242_v49  ;;  %vm5316_vm3 = vmpackc.low %vm4495_vm2, %vm4494_vm1 }
 0x26e   :  { %v4501_v54 = vsub.f32 1.0, %v5307_v53  ;;  %5948 = vmatmul.mubr.msk.bf16.vlgmr.msra.gmra.mxu1 %vm5316_vm3, %v6497_v55  ;;  %v4612_v56 = vmul.f32 0.5, %v4502_v15 }
 0x26f   :  { %5972 = vmatpush3.bf16.msra.mxu1 %v8243_v17  ;;  %5987 = vmatprep.mubr.msk.bf16.mxu1 %vm6496_vm0, %v8242_v49 }
 0x270   :  { %v4503_v46 = vmul.f32 %v4501_v54, %v8128_v10  ;;  %5973 = vmatprep.subr.bf16.mxu1 %v8242_v49  ;;  %v4614_v18 = vadd.f32 %v4612_v56, %v8124_v50 }
 0x272   :  { %v4613_v20 = vmul.f32 0.5, %v4503_v46  ;;  %vm4616_vm4 = vcmp.ge.f32.partialorder %v4614_v18, 1.0 }
 0x273   :  { %5974 = vmatpush3.bf16.msra.mxu1 %v8244_v23  ;;  %v5320_v25 = vsel %vm4616_vm4, 1.0, %v8242_v49 }
 0x274   :  { %5975 = vmatprep.subr.bf16.mxu1 %v8242_v49  ;;  %v4615_v59 = vadd.f32 %v4613_v20, %v8128_v10  ;;  %v4622_v24 = vsub.f32 1.0, %v5320_v25 }
 0x276   :  { %vm4617_vm5 = vcmp.ge.f32.partialorder %v4615_v59, 1.0  ;;  %v4624_v1 = vmul.f32 %v4622_v24, %v4614_v18 }
 0x277   :  { %5976 = vmatpush3.bf16.msra.mxu1 %v8245_v26  ;;  %v5321_v7 = vsel %vm4617_vm5, 1.0, %v8242_v49  ;;  %vm5322_vm6 = vmpackc.low %vm4617_vm5, %vm4616_vm4 }
 0x278   :  { %v4623_v28 = vsub.f32 1.0, %v5321_v7  ;;  %5968 = vmatmul.mubr.msk.bf16.vlgmr.msra.gmra.mxu0 %vm5322_vm6, %v6497_v55  ;;  %v4688_v31 = vmul.f32 0.5, %v4624_v1  ;;  %5977 = vmatprep.subr.bf16.mxu1 %v8242_v49 }
 0x279   :  { %5992 = vmatpush3.bf16.msra.mxu0 %v8243_v17  ;;  %6007 = vmatprep.mubr.msk.bf16.mxu0 %vm6496_vm0, %v8242_v49 }
 0x27a   :  { %v4625_v8 = vmul.f32 %v4623_v28, %v4615_v59  ;;  %5993 = vmatprep.subr.bf16.mxu0 %v8242_v49  ;;  %v4690_v16 = vadd.f32 %v4688_v31, %v8124_v50  ;;  %v4834_v31 = vlaneseq }
 0x27b   :  { %5978 = vmatpush3.bf16.msra.mxu1 %v8246_v60 }
 0x27c   :  { %v4689_v3 = vmul.f32 0.5, %v4625_v8  ;;  %5979 = vmatprep.subr.bf16.mxu1 %v8242_v49  ;;  %vm4692_vm7 = vcmp.ge.f32.partialorder %v4690_v16, 1.0 }
 0x27d   :  { %5994 = vmatpush3.bf16.msra.mxu0 %v8244_v23  ;;  %v5326_v0 = vsel %vm4692_vm7, 1.0, %v8242_v49 }
 0x27e   :  { %5995 = vmatprep.subr.bf16.mxu0 %v8242_v49  ;;  %v4691_v9 = vadd.f32 %v4689_v3, %v8128_v10  ;;  %v4698_v61 = vsub.f32 1.0, %v5326_v0  ;;  %v4835_v0 = vand.u32 127, %v4834_v31 }
 0x27f   :  { %5980 = vmatpush3.bf16.msra.mxu1 %v8247_v62 }
 0x280   :  { %5981 = vmatprep.subr.bf16.mxu1 %v8242_v49  ;;  %vm4693_vm8 = vcmp.ge.f32.partialorder %v4691_v9, 1.0  ;;  %v4700_v12 = vmul.f32 %v4698_v61, %v4690_v16  ;;  %vm4836_vm4 = vcmp.lt.s32.totalorder %v4835_v0, 10 }
 0x281   :  { %5996 = vmatpush3.bf16.msra.mxu0 %v8245_v26  ;;  %v5327_v32 = vsel %vm4693_vm8, 1.0, %v8242_v49  ;;  %vm5328_vm9 = vmpackc.low %vm4693_vm8, %vm4692_vm7 }
 0x282   :  { %5997 = vmatprep.subr.bf16.mxu0 %v8242_v49  ;;  %v4699_v36 = vsub.f32 1.0, %v5327_v32  ;;  %v4764_v57 = vmul.f32 0.5, %v4700_v12 }
 0x283   :  { %5982 = vmatpush3.bf16.msra.mxu1 %v8248_v34 }
 0x284   :  { %5983 = vmatprep.subr.bf16.mxu1 %v8242_v49  ;;  %v4701_v39 = vmul.f32 %v4699_v36, %v4691_v9  ;;  %v4766_v21 = vadd.f32 %v4764_v57, %v8124_v50 }
 0x285   :  { %5998 = vmatpush3.bf16.msra.mxu0 %v8246_v60 }
 0x286   :  { %5999 = vmatprep.subr.bf16.mxu0 %v8242_v49  ;;  %v4765_v27 = vmul.f32 0.5, %v4701_v39  ;;  %vm4768_vm11 = vcmp.ge.f32.partialorder %v4766_v21, 1.0 }
 0x287   :  { %5984 = vmatpush3.bf16.msra.mxu1 %v8249_v2 }
 0x288   :  { %5985 = vmatprep.subr.bf16.mxu1 %v8242_v49  ;;  %v4767_v41 = vadd.f32 %v4765_v27, %v8128_v10 }
 0x289   :  { %6000 = vmatpush3.bf16.msra.mxu0 %v8247_v62 }
 0x28a   :  { %6001 = vmatprep.subr.bf16.mxu0 %v8242_v49  ;;  %vm4769_vm10 = vcmp.ge.f32.partialorder %v4767_v41, 1.0 }
 0x28b   :  { %5986 = vmatpush3.bf16.msra.mxu1 %v8250_v13  ;;  %vm5334_vm12 = vmpackc.low %vm4769_vm10, %vm4768_vm11 }
 0x28d   :  { %6002 = vmatpush3.bf16.msra.mxu0 %v8248_v34 }
 0x28e   :  { %5988 = vmatmul.mubr.msk.bf16.vlgmr.msra.gmra.mxu1 %vm5328_vm9, %v6497_v55  ;;  %6003 = vmatprep.subr.bf16.mxu0 %v8242_v49 }
 0x291   :  { %6004 = vmatpush3.bf16.msra.mxu0 %v8249_v2 }
 0x292   :  { %6005 = vmatprep.subr.bf16.mxu0 %v8242_v49 }
 0x295   :  { %6006 = vmatpush3.bf16.msra.mxu0 %v8250_v13 }
 0x298   :  { %6008 = vmatmul.mubr.msk.bf16.vlgmr.msra.gmra.mxu0 %vm5334_vm12, %v6497_v55 }
 0x32e   :  { %v4587_v33 = vpop.f32.mrf.mxu1 }
 0x32f   :  { %v4594_v43 = vmul.f32 0.5, %v4587_v33 }
 0x330   :  { %v5949_v63 = vpop.f32.mrf.mxu1 }
 0x331   :  { %vm4600_vm13 = vcmp.ge.f32.partialorder %v4594_v43, 1.0 }
 0x332   :  { %v5318_v58 = vsel %vm4600_vm13, 1.0, %v8242_v49  ;;  %v4590_v29 = vpop.f32.mrf.mxu1 }
 0x333   :  { %v4606_v4 = vsub.f32 1.0, %v5318_v58  ;;  %v4595_v35 = vmul.f32 0.5, %v4590_v29 }
 0x334   :  { %v5950_v37 = vpop.f32.mrf.mxu1 }
 0x335   :  { %vm4601_vm14 = vcmp.ge.f32.partialorder %v4595_v35, 1.0  ;;  %v4608_v5 = vmul.f32 %v4606_v4, %v4594_v43 }
 0x336   :  { %v5319_v38 = vsel %vm4601_vm14, 1.0, %v8242_v49 }
 0x337   :  { %v4607_v42 = vsub.f32 1.0, %v5319_v38  ;;  %v4668_v40 = vmul.f32 0.5, %v4608_v5 }
 0x338   :  { %v4661_v44 = vpop.f32.mrf.mxu0 }
 0x339   :  { %v4670_v45 = vmul.f32 0.5, %v4661_v44  ;;  %v4609_v48 = vmul.f32 %v4607_v42, %v4595_v35 }
 0x33a   :  { %v5969_v47 = vpop.f32.mrf.mxu0 }
 0x33b   :  { %v4672_v11 = vadd.f32 %v4670_v45, %v4668_v40  ;;  %v4669_v14 = vmul.f32 0.5, %v4609_v48 }
 0x33c   :  { %v4664_v6 = vpop.f32.mrf.mxu0 }
 0x33d   :  { %v4671_v50 = vmul.f32 0.5, %v4664_v6  ;;  %vm4676_vm15 = vcmp.ge.f32.partialorder %v4672_v11, 1.0 }
 0x33e   :  { %v5970_v52 = vpop.f32.mrf.mxu0  ;;  %v5324_v22 = vsel %vm4676_vm15, 1.0, %v8242_v49 }
 0x33f   :  { %v4673_v19 = vadd.f32 %v4671_v50, %v4669_v14  ;;  %v4682_v51 = vsub.f32 1.0, %v5324_v22  ;;  %v4686_v9 = vadd.f32 %v5324_v22, %v5318_v58 }
 0x341   :  { %vm4677_vm0 = vcmp.ge.f32.partialorder %v4673_v19, 1.0  ;;  %v4684_v30 = vmul.f32 %v4682_v51, %v4672_v11 }
 0x342   :  { %v5325_v10 = vsel %vm4677_vm0, 1.0, %v8242_v49 }
 0x343   :  { %v4683_v15 = vsub.f32 1.0, %v5325_v10  ;;  %v4744_v55 = vmul.f32 0.5, %v4684_v30  ;;  %v4687_v13 = vadd.f32 %v5325_v10, %v5319_v38 }
 0x345   :  { %v4685_v54 = vmul.f32 %v4683_v15, %v4673_v19 }
 0x347   :  { %v4745_v20 = vmul.f32 0.5, %v4685_v54 }
 0x34e   :  { %v4737_v53 = vpop.f32.mrf.mxu1 }
 0x34f   :  { %v4746_v56 = vmul.f32 0.5, %v4737_v53 }
 0x350   :  { %v5989_v17 = vpop.f32.mrf.mxu1 }
 0x351   :  { %v4748_v46 = vadd.f32 %v4746_v56, %v4744_v55 }
 0x352   :  { %v4740_v18 = vpop.f32.mrf.mxu1 }
 0x353   :  { %vm4752_vm1 = vcmp.ge.f32.partialorder %v4748_v46, 1.0  ;;  %v4747_v23 = vmul.f32 0.5, %v4740_v18 }
 0x354   :  { %v5330_v25 = vsel %vm4752_vm1, 1.0, %v8242_v49  ;;  %v5990_v59 = vpop.f32.mrf.mxu1 }
 0x355   :  { %v4758_v24 = vsub.f32 1.0, %v5330_v25  ;;  %v4749_v1 = vadd.f32 %v4747_v23, %v4745_v20  ;;  %v4762_v2 = vadd.f32 %v5330_v25, %v4686_v9 }
 0x357   :  { %v4760_v26 = vmul.f32 %v4758_v24, %v4748_v46  ;;  %vm4753_vm2 = vcmp.ge.f32.partialorder %v4749_v1, 1.0 }
 0x358   :  { %v5331_v7 = vsel %vm4753_vm2, 1.0, %v8242_v49  ;;  %v4809_v28 = vpop.f32.mrf.mxu0 }
 0x359   :  { %v4759_v8 = vsub.f32 1.0, %v5331_v7  ;;  %v4816_v60 = vmul.f32 0.5, %v4760_v26  ;;  %v4818_v3 = vmul.f32 0.5, %v4809_v28  ;;  %v4763_v21 = vadd.f32 %v5331_v7, %v4687_v13 }
 0x35a   :  { %v6009_v16 = vpop.f32.mrf.mxu0 }
 0x35b   :  { %v4761_v62 = vmul.f32 %v4759_v8, %v4749_v1  ;;  %v4820_v32 = vadd.f32 %v4818_v3, %v4816_v60 }
 0x35c   :  { %v4812_v34 = vpop.f32.mrf.mxu0 }
 0x35d   :  { %vm4824_vm3 = vcmp.ge.f32.partialorder %v4820_v32, 1.0  ;;  %v4817_v36 = vmul.f32 0.5, %v4761_v62  ;;  %v4819_v61 = vmul.f32 0.5, %v4812_v34 }
 0x35e   :  { %v6010_v39 = vpop.f32.mrf.mxu0  ;;  %v5336_v12 = vsel %vm4824_vm3, 1.0, %v8242_v49 }
 0x35f   :  { %v4821_v27 = vadd.f32 %v4819_v61, %v4817_v36  ;;  %v4830_v57 = vadd.f32 %v5336_v12, %v4762_v2 }
 0x361   :  { %vm4825_vm5 = vcmp.ge.f32.partialorder %v4821_v27, 1.0  ;;  %v4832_v41 = vmul.f32 0.25, %v4830_v57 }
 0x362   :  { %v5337_v33 = vsel %vm4825_vm5, 1.0, %v8242_v49 }
 0x363   :  { %v4837_v43 = vsel %vm4836_vm4, %v4832_v41, -1e+30  ;;  %v4831_v63 = vadd.f32 %v5337_v33, %v4763_v21 }
 0x364   :  { %4839 = vmax.xlane.f32.xlu0 %v4837_v43 }
 0x365   :  { %v4833_v58 = vmul.f32 0.25, %v4831_v63 }
 0x367   :  { %v4838_v29 = vsel %vm4836_vm4, %v4833_v58, -1e+30 }
 0x368   :  { %4841 = vmax.xlane.f32.xlu0 %v4838_v29 }
 0x3ed   :  { %v4840_v4 = vpop.xlane.xlu0 %4839 }
 0x3ee   :  { %v4843_v35 = vsub.f32 %v4837_v43, %v4840_v4 }
 0x3f0   :  { %v4845_v37 = vmul.f32 1.442695, %v4843_v35 }
 0x3f1   :  { %v4842_v38 = vpop.xlane.xlu0 %4841 }
 0x3f2   :  { %6487 = vpow2.f32 %v4845_v37  ;;  %v4844_v5 = vsub.f32 %v4838_v29, %v4842_v38 }
 0x3f4   :  { %v4847_v42 = vmul.f32 1.442695, %v4844_v5 }
 0x3f6   :  { %6489 = vpow2.f32 %v4847_v42 }
 0x3ff   :  { %v6488_v44 = vpop.eup %6487 }
 0x400   :  { %v4849_v45 = vsel %vm4836_vm4, %v6488_v44, 0.0 }
 0x401   :  { %4851 = vadd.xlane.f32.xlu1 %v4849_v45 }
 0x403   :  { %v6490_v49 = vpop.eup %6489 }
 0x404   :  { %v4850_v47 = vsel %vm4836_vm4, %v6490_v49, 0.0 }
 0x405   :  { %4853 = vadd.xlane.f32.xlu1 %v4850_v47 }
 0x48a   :  { %v4852_v40 = vpop.xlane.xlu1 %4851 }
 0x48b   :  { %6491 = vrcp.f32 %v4852_v40 }
 0x48e   :  { %v4854_v48 = vpop.xlane.xlu1 %4853 }
 0x48f   :  { %6493 = vrcp.f32 %v4854_v48 }
 0x498   :  { %v6492_v6 = vpop.eup %6491 }
 0x499   :  { %v4856_v11 = vmul.f32 %v6492_v6, %v4849_v45 }
 0x49b   :  { %4859 = vst [vmem:[%s8207_s3] sm:$0xff] %v4856_v11 }
 0x49c   :  { %v6494_v50 = vpop.eup %6493 }
 0x49d   :  { %v4858_v52 = vmul.f32 %v6494_v50, %v4850_v47 }
 0x49f   :  { %4860 = vst [vmem:[%s8207_s3 + $0x8] sm:$0xff] %v4858_v52 }

</bundles_post_ra>
